<compile_context>
chip_gen: v7x
topology: tpu7x:2x2x1
jax: 0.10.0
libtpu: 0.0.40
codegen_flags: <defaults>
</compile_context>

<pallas_src>
from functools import partial

import jax
import jax.numpy as jnp
from jax.experimental import pallas as pl
from jax.experimental.pallas import tpu as pltpu


# ----------------------------------------------------------------------------
# Pallas kernel: whole forward pass runs in VMEM in a single invocation.
# ----------------------------------------------------------------------------
def omni_gru_kernel(
    action_ref, aud_ref, objs_ref, frame_ref,
    w_act_ref, b_act_ref, w_aud_ref, b_aud_ref,
    w_objp_ref, b_objp_ref, w_frmp_ref, b_frmp_ref,
    w_ofc_ref, b_ofc_ref,
    wih0c_ref, bih0c_ref, whh0c_ref, bhh0n_ref,
    w1h_ref, w1x_ref, b1x_ref, bhh1n_ref,
    w_fc_ref, b_fc_ref,
    out_ref, h_ref,
    *, B, T, O,
):
    f32 = jnp.float32
    bf16 = jnp.bfloat16
    relu = lambda v: jnp.maximum(v, 0.0)
    dot = lambda a, b: jnp.dot(a, b, preferred_element_type=f32)
    sigmoid = jax.nn.sigmoid

    BT, A = action_ref.shape
    AU = aud_ref.shape[1]
    KI = objs_ref.shape[1]            # ragged img feature dim (517); Mosaic masks
    P = w_act_ref.shape[1]
    H = bhh0n_ref.shape[1]
    G = whh0c_ref.shape[1]            # 3 * 128 fused gate width
    S = G // 3                        # lane stride between gate blocks (128)

    # ---- action / audio branches: bf16 weights, bf16 MXU, f32 accumulation ----
    act = relu(dot(action_ref[...].astype(bf16), w_act_ref[...]) + b_act_ref[...])
    aud = relu(dot(aud_ref[...].astype(bf16), w_aud_ref[...]) + b_aud_ref[...])

    # ---- object / frame attention branch (K=517 kept ragged, f32) ----
    obj_p = relu(dot(objs_ref[...], w_objp_ref[...]) + b_objp_ref[...])   # (BT*O, P)
    frm_p = relu(dot(frame_ref[...], w_frmp_ref[...]) + b_frmp_ref[...])  # (BT, P)

    # Cosine similarities: normalize once, then plain lane reductions.
    # NOTE: rsqrt(max(||x||^2, eps^2)) differs from PyTorch's
    # max(||a||*||b||, eps) only when a norm lies in (0, eps) -- effectively
    # impossible for these ReLU activations at f32 scale (all-zero rows give 0
    # in both formulations).  Do not "fix" this back to the gram-matrix form.
    eps = 1e-8
    on = obj_p * jax.lax.rsqrt(
        jnp.maximum(jnp.sum(obj_p * obj_p, axis=-1, keepdims=True), eps * eps))
    fn = frm_p * jax.lax.rsqrt(
        jnp.maximum(jnp.sum(frm_p * frm_p, axis=-1, keepdims=True), eps * eps))

    on3 = on.reshape(BT, O, P)
    theta = jnp.sum(fn[:, None, :] * on3, axis=-1)                  # (BT, O)
    phi = jnp.sum(on3 * jnp.mean(on3, axis=1)[:, None, :], axis=-1) # (BT, O)

    logits = theta + phi
    logits = logits - jnp.max(logits, axis=-1, keepdims=True)
    e = jnp.exp(logits)
    w = e * pl.reciprocal(jnp.sum(e, axis=-1, keepdims=True), approx=True)

    w3 = w[:, :, None]
    obj_mix = w3 * frm_p[:, None, :] + (1.0 - w3) * obj_p.reshape(BT, O, P)
    obj_in = relu(dot(jnp.mean(obj_mix, axis=1), w_ofc_ref[...]) + b_ofc_ref[...])

    # ---- concat features -> GRU input; layer-0 projection hoisted out of loop ----
    x = jnp.concatenate([act, aud, obj_in], axis=-1)                # (BT, 3P)
    # columns: gate g at lanes [g*128, g*128+H); r/z biases include bhh parts.
    ih0 = (dot(x, wih0c_ref[...]) + bih0c_ref[...]).reshape(B, T, G)

    whh0c = whh0c_ref[...]            # (H, G)
    bhh0n = bhh0n_ref[...]            # (1, H)
    w1h = w1h_ref[...]                # (H, G)  layer-1 h1-dependent part
    w1x = w1x_ref[...]                # (H, G)  layer-1 h0_new-dependent part
    b1x = b1x_ref[...]                # (1, G)
    bhh1n = bhh1n_ref[...]            # (1, H)

    h0 = jnp.zeros((B, H), f32)
    h1 = jnp.zeros((B, H), f32)
    # T is small & static: unrolled Python loop.  Gate blocks sit at lane
    # offsets 0 / 128 / 256, so every slice below starts at a vreg boundary
    # (no lane rotations on the serial chain).
    # TODO(synk): on v6e/v7x the two top-of-step matmuls (hh, gh1) could be one
    # block-diagonal (B,2H)@(2H,2G) 256-lane push; kept separate (both are off
    # the gates0 chain already) to avoid a per-step lane concat of [h0|h1].
    for t in range(T):
        ih_t = ih0[:, t, :]                                         # loop-invariant wrt h
        hh = dot(h0, whh0c)                                         # (B, G)
        gh1 = dot(h1, w1h)                                          # (B, G) independent of layer 0

        r0 = sigmoid(ih_t[:, 0:H] + hh[:, 0:H])
        z0 = sigmoid(ih_t[:, S:S + H] + hh[:, S:S + H])
        n0 = jnp.tanh(ih_t[:, 2 * S:2 * S + H]
                      + r0 * (hh[:, 2 * S:2 * S + H] + bhh0n))
        h0 = (1.0 - z0) * n0 + z0 * h0

        gx = dot(h0, w1x) + b1x                                     # only matmul on the chain
        g = gx + gh1
        r1 = sigmoid(g[:, 0:H])
        z1 = sigmoid(g[:, S:S + H])
        n1 = jnp.tanh(gx[:, 2 * S:2 * S + H]
                      + r1 * (gh1[:, 2 * S:2 * S + H] + bhh1n))
        h1 = (1.0 - z1) * n1 + z1 * h1

    # out = fc(relu(last top-layer output)); fc is lane-padded to 128 columns.
    out_ref[...] = dot(relu(h1), w_fc_ref[...]) + b_fc_ref[...]
    h_ref[0] = h0
    h_ref[1] = h1


# ----------------------------------------------------------------------------
# One-time (model-load) weight fusion / padding / casting.  Kept OUT of the
# jitted per-call forward so none of this HBM traffic recurs per call.
# ----------------------------------------------------------------------------
def prepare_params(p):
    f32 = jnp.float32
    H = p["whh0"].shape[2]
    S = 128                            # vreg-aligned lane stride between gates
    G = 3 * S

    def spread_cols(mats):
        # mats: 3 x (in_dim, H) -> (in_dim, G) with gate g at lanes [g*S, g*S+H)
        out = jnp.zeros((mats[0].shape[0], G), f32)
        for g, m in enumerate(mats):
            out = out.at[:, g * S:g * S + H].set(m)
        return out

    def spread_bias(vecs):
        out = jnp.zeros((1, G), f32)
        for g, v in enumerate(vecs):
            out = out.at[:, g * S:g * S + H].set(v)
        return out

    out_dim = p["w_fc"].shape[1]
    NP = out_dim + (-out_dim) % 128    # lane-dense fc output width

    return {
        # big-K projections: bf16 weights (half the DMA, single-pass MXU)
        "w_act": p["w_act"].astype(jnp.bfloat16), "b_act": p["b_act"],
        "w_aud": p["w_aud"].astype(jnp.bfloat16), "b_aud": p["b_aud"],
        # odd-K (517) projections stay f32 and un-padded (ragged-K masking)
        "w_objp": p["w_objp"], "b_objp": p["b_objp"],
        "w_frmp": p["w_frmp"], "b_frmp": p["b_frmp"],
        "w_ofc": p["w_ofc"], "b_ofc": p["b_ofc"],
        # GRU layer 0: fused gates at lane offsets 0/128/256; r/z biases folded
        "wih0c": spread_cols([p["wih0"][0], p["wih0"][1], p["wih0"][2]]),
        "bih0c": spread_bias([p["bih0"][0] + p["bhh0"][0],
                              p["bih0"][1] + p["bhh0"][1],
                              p["bih0"][2]]),
        "whh0c": spread_cols([p["whh0"][0], p["whh0"][1], p["whh0"][2]]),
        "bhh0n": p["bhh0"][2],
        # GRU layer 1 split into h1-dependent and h0_new-dependent halves
        "w1h": spread_cols([p["whh1"][0], p["whh1"][1], p["whh1"][2]]),
        "w1x": spread_cols([p["wih1"][0], p["wih1"][1], p["wih1"][2]]),
        "b1x": spread_bias([p["bih1"][0] + p["bhh1"][0],
                            p["bih1"][1] + p["bhh1"][1],
                            p["bih1"][2]]),
        "bhh1n": p["bhh1"][2],
        # final fc padded to 128 output lanes (unmasked vst in the kernel)
        "w_fc": jnp.pad(p["w_fc"], ((0, 0), (0, NP - out_dim))),
        "b_fc": jnp.pad(p["b_fc"], ((0, 0), (0, NP - out_dim))),
    }


# ----------------------------------------------------------------------------
# Per-call wrapper: only free reshapes (row-major bitcasts) + the kernel call.
# ----------------------------------------------------------------------------
@partial(jax.jit, static_argnames=("out_dim",))
def omni_gru_forward(action, aud, objs, frame, prepared, *, out_dim):
    f32 = jnp.float32
    B, T, A = action.shape
    O = objs.shape[2]
    KI = objs.shape[3]
    H = prepared["bhh0n"].shape[1]
    NP = prepared["w_fc"].shape[1]

    args = [
        action.reshape(B * T, A),
        aud.reshape(B * T, aud.shape[-1]),
        objs.reshape(B * T * O, KI),
        frame.reshape(B * T, KI),
        prepared["w_act"], prepared["b_act"], prepared["w_aud"], prepared["b_aud"],
        prepared["w_objp"], prepared["b_objp"], prepared["w_frmp"], prepared["b_frmp"],
        prepared["w_ofc"], prepared["b_ofc"],
        prepared["wih0c"], prepared["bih0c"], prepared["whh0c"], prepared["bhh0n"],
        prepared["w1h"], prepared["w1x"], prepared["b1x"], prepared["bhh1n"],
        prepared["w_fc"], prepared["b_fc"],
    ]
    vmem = lambda: pl.BlockSpec(memory_space=pltpu.MemorySpace.VMEM)

    # Working set ~1.5 MiB -> single grid-less call; no vmem_limit needed.
    # TODO(synk): on v5e, if profiling shows exposed input DMA, pipeline the
    #   action/audio projections with a small K-grid (pl.Buffered(2)); skipped
    #   here since v6e/v7x hide it and the grid-step overhead would dominate.
    # TODO(synk): if batch grows beyond toy sizes, add a leading "parallel"
    #   grid axis over B so both TensorCores on v7x are used.
    out_pad, h = pl.pallas_call(
        partial(omni_gru_kernel, B=B, T=T, O=O),
        out_shape=(
            jax.ShapeDtypeStruct((B, NP), f32),
            jax.ShapeDtypeStruct((2, B, H), f32),
        ),
        in_specs=[vmem() for _ in args],
        out_specs=(vmem(), vmem()),
    )(*args)
    return out_pad[:, :out_dim], h


# ----------------------------------------------------------------------------
# Pure-JAX reference (PyTorch-equivalent semantics, for correctness check)
# ----------------------------------------------------------------------------
def reference_forward(action, aud, objs, frame, p):
    dot = lambda a, b: jnp.dot(a, b, precision=jax.lax.Precision.HIGHEST)
    relu = lambda v: jnp.maximum(v, 0.0)
    eps = 1e-8

    act = relu(dot(action, p["w_act"]) + p["b_act"][0])          # (B,T,P)
    au = relu(dot(aud, p["w_aud"]) + p["b_aud"][0])              # (B,T,P)
    obj_p = relu(dot(objs, p["w_objp"]) + p["b_objp"][0])        # (B,T,O,P)
    frm_p = relu(dot(frame, p["w_frmp"]) + p["b_frmp"][0])       # (B,T,1,P)

    def cos(a, b):
        num = jnp.sum(a * b, -1)
        den = jnp.maximum(jnp.linalg.norm(a, axis=-1) * jnp.linalg.norm(b, axis=-1), eps)
        return num / den

    theta = cos(frm_p, obj_p)                                    # (B,T,O)
    phi = jnp.mean(cos(obj_p[:, :, None, :, :], obj_p[:, :, :, None, :]), -1)
    w = jax.nn.softmax(theta + phi, axis=-1)[..., None]
    obj_in = jnp.mean(w * frm_p + (1 - w) * obj_p, axis=-2)
    obj_in = relu(dot(obj_in, p["w_ofc"]) + p["b_ofc"][0])

    x = jnp.concatenate([act, au, obj_in], -1)                   # (B,T,3P)
    B, T, _ = x.shape
    H = p["whh0"].shape[2]

    def cell(xt, h, wih, whh, bih, bhh):
        r = jax.nn.sigmoid(dot(xt, wih[0]) + bih[0] + dot(h, whh[0]) + bhh[0])
        z = jax.nn.sigmoid(dot(xt, wih[1]) + bih[1] + dot(h, whh[1]) + bhh[1])
        n = jnp.tanh(dot(xt, wih[2]) + bih[2] + r * (dot(h, whh[2]) + bhh[2]))
        return (1 - z) * n + z * h

    h0 = jnp.zeros((B, H), jnp.float32)
    h1 = jnp.zeros((B, H), jnp.float32)
    for t in range(T):
        xt = x[:, t]
        h0 = cell(xt, h0, p["wih0"], p["whh0"], p["bih0"], p["bhh0"])
        h1 = cell(h0, h1, p["wih1"], p["whh1"], p["bih1"], p["bhh1"])

    out = dot(relu(h1), p["w_fc"]) + p["b_fc"][0]
    return out, jnp.stack([h0, h1])


# ----------------------------------------------------------------------------
# Deterministic parameter init (shapes from OmniGRU.__init__)
# ----------------------------------------------------------------------------
def make_params(key, action_size, audio_size, img_size, P, H, out_dim):
    ks = iter(jax.random.split(key, 32))

    def xavier(fan_in, fan_out):
        std = (2.0 / (fan_in + fan_out)) ** 0.5
        return std * jax.random.normal(next(ks), (fan_in, fan_out), jnp.float32)

    def gru_u(shape):
        bound = 1.0 / (H ** 0.5)
        return jax.random.uniform(next(ks), shape, jnp.float32, -bound, bound)

    zeros = lambda *s: jnp.zeros(s, jnp.float32)
    return {
        # Linear layers: xavier_normal weights, zero biases (custom_weights)
        "w_act": xavier(action_size, P), "b_act": zeros(1, P),
        "w_aud": xavier(audio_size, P), "b_aud": zeros(1, P),
        "w_objp": xavier(img_size, P), "b_objp": zeros(1, P),
        "w_frmp": xavier(img_size, P), "b_frmp": zeros(1, P),
        "w_ofc": xavier(P, P), "b_ofc": zeros(1, P),
        # GRU layer 0 (input dim = 3*P), gate order [r, z, n]
        "wih0": gru_u((3, 3 * P, H)), "whh0": gru_u((3, H, H)),
        "bih0": gru_u((3, 1, H)), "bhh0": gru_u((3, 1, H)),
        # GRU layer 1 (input dim = H)
        "wih1": gru_u((3, H, H)), "whh1": gru_u((3, H, H)),
        "bih1": gru_u((3, 1, H)), "bhh1": gru_u((3, 1, H)),
        # final fc
        "w_fc": xavier(H, out_dim), "b_fc": zeros(1, out_dim),
    }


if __name__ == "__main__":
    # small shapes consistent with the module
    B, T, O = 2, 8, 4
    ACTION_SIZE, AUDIO_SIZE, IMG_SIZE = 1024, 2304, 517
    P, H = 32, 32                      # PROJECTION_SIZE, HIDDEN_SIZE
    OUTPUT_DIM = 10
    OUT_DIM = (OUTPUT_DIM + 1) + 2     # number_classes + number_position

    root = jax.random.PRNGKey(0)
    k_par, k_a, k_u, k_o, k_f = jax.random.split(root, 5)

    params = make_params(k_par, ACTION_SIZE, AUDIO_SIZE, IMG_SIZE, P, H, OUT_DIM)
    prepared = prepare_params(params)          # one-time model-load cost

    action = jax.random.normal(k_a, (B, T, ACTION_SIZE), jnp.float32)
    aud = jax.random.normal(k_u, (B, T, AUDIO_SIZE), jnp.float32)
    objs = jax.random.normal(k_o, (B, T, O, IMG_SIZE), jnp.float32)
    frame = jax.random.normal(k_f, (B, T, 1, IMG_SIZE), jnp.float32)

    out, h = omni_gru_forward(action, aud, objs, frame, prepared, out_dim=OUT_DIM)
    jax.block_until_ready((out, h))

    out_exp, h_exp = reference_forward(action, aud, objs, frame, params)
    assert out.shape == (B, OUT_DIM) and h.shape == (2, B, H)
    # bf16 action/audio projections + default MXU precision (vs HIGHEST f32
    # reference) leave ~1e-3-scale differences; 2e-2 gives comfortable margin.
    assert jnp.allclose(out, out_exp, rtol=2e-2, atol=2e-2), "out mismatch vs reference"
    assert jnp.allclose(h, h_exp, rtol=2e-2, atol=2e-2), "hidden mismatch vs reference"

    print("KERNEL_OK")
</pallas_src>

<mosaic_0001>
module attributes {stable_mosaic.version = 11 : i64} {
  func.func @omni_gru_kernel(%arg0: memref<16x1024xf32, #tpu.memory_space<vmem>>, %arg1: memref<16x2304xf32, #tpu.memory_space<vmem>>, %arg2: memref<64x517xf32, #tpu.memory_space<vmem>>, %arg3: memref<16x517xf32, #tpu.memory_space<vmem>>, %arg4: memref<1024x32xbf16, #tpu.memory_space<vmem>>, %arg5: memref<1x32xf32, #tpu.memory_space<vmem>>, %arg6: memref<2304x32xbf16, #tpu.memory_space<vmem>>, %arg7: memref<1x32xf32, #tpu.memory_space<vmem>>, %arg8: memref<517x32xf32, #tpu.memory_space<vmem>>, %arg9: memref<1x32xf32, #tpu.memory_space<vmem>>, %arg10: memref<517x32xf32, #tpu.memory_space<vmem>>, %arg11: memref<1x32xf32, #tpu.memory_space<vmem>>, %arg12: memref<32x32xf32, #tpu.memory_space<vmem>>, %arg13: memref<1x32xf32, #tpu.memory_space<vmem>>, %arg14: memref<96x384xf32, #tpu.memory_space<vmem>>, %arg15: memref<1x384xf32, #tpu.memory_space<vmem>>, %arg16: memref<32x384xf32, #tpu.memory_space<vmem>>, %arg17: memref<1x32xf32, #tpu.memory_space<vmem>>, %arg18: memref<32x384xf32, #tpu.memory_space<vmem>>, %arg19: memref<32x384xf32, #tpu.memory_space<vmem>>, %arg20: memref<1x384xf32, #tpu.memory_space<vmem>>, %arg21: memref<1x32xf32, #tpu.memory_space<vmem>>, %arg22: memref<32x128xf32, #tpu.memory_space<vmem>>, %arg23: memref<1x128xf32, #tpu.memory_space<vmem>>, %arg24: memref<2x128xf32, #tpu.memory_space<vmem>>, %arg25: memref<2x2x32xf32, #tpu.memory_space<vmem>>) attributes {dimension_semantics = [], scalar_prefetch = 0 : i64, scratch_operands = 0 : i64, tpu.core_type = #tpu.core_type<tc>} {
    %c0 = arith.constant 0 : index
    %c0_0 = arith.constant 0 : index
    %0 = vector.load %arg0[%c0, %c0_0] : memref<16x1024xf32, #tpu.memory_space<vmem>>, vector<16x1024xf32>
    %1 = arith.truncf %0 : vector<16x1024xf32> to vector<16x1024xbf16>
    %c0_1 = arith.constant 0 : index
    %c0_2 = arith.constant 0 : index
    %2 = vector.load %arg4[%c0_1, %c0_2] : memref<1024x32xbf16, #tpu.memory_space<vmem>>, vector<1024x32xbf16>
    %cst = arith.constant dense<0.000000e+00> : vector<16x32xf32>
    %3 = tpu.matmul %1, %2, %cst {dimension_numbers = #tpu.dot_dimension_numbers<[1], [0], [0], [1], [0, 0, 1, 1], [], []>} : vector<16x1024xbf16>, vector<1024x32xbf16>, vector<16x32xf32> -> vector<16x32xf32>
    %c0_3 = arith.constant 0 : index
    %c0_4 = arith.constant 0 : index
    %4 = vector.load %arg5[%c0_3, %c0_4] : memref<1x32xf32, #tpu.memory_space<vmem>>, vector<1x32xf32>
    %5 = vector.broadcast %4 : vector<1x32xf32> to vector<16x32xf32>
    %6 = arith.addf %3, %5 : vector<16x32xf32>
    %cst_5 = arith.constant 0.000000e+00 : f32
    %7 = vector.broadcast %cst_5 : f32 to vector<16x32xf32>
    %8 = arith.maximumf %6, %7 : vector<16x32xf32>
    %c0_6 = arith.constant 0 : index
    %c0_7 = arith.constant 0 : index
    %9 = vector.load %arg1[%c0_6, %c0_7] : memref<16x2304xf32, #tpu.memory_space<vmem>>, vector<16x2304xf32>
    %10 = arith.truncf %9 : vector<16x2304xf32> to vector<16x2304xbf16>
    %c0_8 = arith.constant 0 : index
    %c0_9 = arith.constant 0 : index
    %11 = vector.load %arg6[%c0_8, %c0_9] : memref<2304x32xbf16, #tpu.memory_space<vmem>>, vector<2304x32xbf16>
    %cst_10 = arith.constant dense<0.000000e+00> : vector<16x32xf32>
    %12 = tpu.matmul %10, %11, %cst_10 {dimension_numbers = #tpu.dot_dimension_numbers<[1], [0], [0], [1], [0, 0, 1, 1], [], []>} : vector<16x2304xbf16>, vector<2304x32xbf16>, vector<16x32xf32> -> vector<16x32xf32>
    %c0_11 = arith.constant 0 : index
    %c0_12 = arith.constant 0 : index
    %13 = vector.load %arg7[%c0_11, %c0_12] : memref<1x32xf32, #tpu.memory_space<vmem>>, vector<1x32xf32>
    %14 = vector.broadcast %13 : vector<1x32xf32> to vector<16x32xf32>
    %15 = arith.addf %12, %14 : vector<16x32xf32>
    %cst_13 = arith.constant 0.000000e+00 : f32
    %16 = vector.broadcast %cst_13 : f32 to vector<16x32xf32>
    %17 = arith.maximumf %15, %16 : vector<16x32xf32>
    %c0_14 = arith.constant 0 : index
    %c0_15 = arith.constant 0 : index
    %18 = vector.load %arg2[%c0_14, %c0_15] : memref<64x517xf32, #tpu.memory_space<vmem>>, vector<64x517xf32>
    %c0_16 = arith.constant 0 : index
    %c0_17 = arith.constant 0 : index
    %19 = vector.load %arg8[%c0_16, %c0_17] : memref<517x32xf32, #tpu.memory_space<vmem>>, vector<517x32xf32>
    %cst_18 = arith.constant dense<0.000000e+00> : vector<64x32xf32>
    %20 = tpu.matmul %18, %19, %cst_18 {dimension_numbers = #tpu.dot_dimension_numbers<[1], [0], [0], [1], [0, 0, 1, 1], [], []>} : vector<64x517xf32>, vector<517x32xf32>, vector<64x32xf32> -> vector<64x32xf32>
    %c0_19 = arith.constant 0 : index
    %c0_20 = arith.constant 0 : index
    %21 = vector.load %arg9[%c0_19, %c0_20] : memref<1x32xf32, #tpu.memory_space<vmem>>, vector<1x32xf32>
    %22 = vector.broadcast %21 : vector<1x32xf32> to vector<64x32xf32>
    %23 = arith.addf %20, %22 : vector<64x32xf32>
    %cst_21 = arith.constant 0.000000e+00 : f32
    %24 = vector.broadcast %cst_21 : f32 to vector<64x32xf32>
    %25 = arith.maximumf %23, %24 : vector<64x32xf32>
    %c0_22 = arith.constant 0 : index
    %c0_23 = arith.constant 0 : index
    %26 = vector.load %arg3[%c0_22, %c0_23] : memref<16x517xf32, #tpu.memory_space<vmem>>, vector<16x517xf32>
    %c0_24 = arith.constant 0 : index
    %c0_25 = arith.constant 0 : index
    %27 = vector.load %arg10[%c0_24, %c0_25] : memref<517x32xf32, #tpu.memory_space<vmem>>, vector<517x32xf32>
    %cst_26 = arith.constant dense<0.000000e+00> : vector<16x32xf32>
    %28 = tpu.matmul %26, %27, %cst_26 {dimension_numbers = #tpu.dot_dimension_numbers<[1], [0], [0], [1], [0, 0, 1, 1], [], []>} : vector<16x517xf32>, vector<517x32xf32>, vector<16x32xf32> -> vector<16x32xf32>
    %c0_27 = arith.constant 0 : index
    %c0_28 = arith.constant 0 : index
    %29 = vector.load %arg11[%c0_27, %c0_28] : memref<1x32xf32, #tpu.memory_space<vmem>>, vector<1x32xf32>
    %30 = vector.broadcast %29 : vector<1x32xf32> to vector<16x32xf32>
    %31 = arith.addf %28, %30 : vector<16x32xf32>
    %cst_29 = arith.constant 0.000000e+00 : f32
    %32 = vector.broadcast %cst_29 : f32 to vector<16x32xf32>
    %33 = arith.maximumf %31, %32 : vector<16x32xf32>
    %34 = arith.mulf %25, %25 : vector<64x32xf32>
    %cst_30 = arith.constant dense<0.000000e+00> : vector<64xf32>
    %35 = vector.multi_reduction <add>, %34, %cst_30 [1] : vector<64x32xf32> to vector<64xf32>
    %36 = vector.shape_cast %35 : vector<64xf32> to vector<64x1xf32>
    %cst_31 = arith.constant 1.000000e-16 : f32
    %37 = vector.broadcast %cst_31 : f32 to vector<64x1xf32>
    %38 = arith.maximumf %36, %37 : vector<64x1xf32>
    %39 = math.rsqrt %38 : vector<64x1xf32>
    %40 = vector.broadcast %39 : vector<64x1xf32> to vector<64x32xf32>
    %41 = arith.mulf %25, %40 : vector<64x32xf32>
    %42 = arith.mulf %33, %33 : vector<16x32xf32>
    %cst_32 = arith.constant dense<0.000000e+00> : vector<16xf32>
    %43 = vector.multi_reduction <add>, %42, %cst_32 [1] : vector<16x32xf32> to vector<16xf32>
    %44 = vector.shape_cast %43 : vector<16xf32> to vector<16x1xf32>
    %cst_33 = arith.constant 1.000000e-16 : f32
    %45 = vector.broadcast %cst_33 : f32 to vector<16x1xf32>
    %46 = arith.maximumf %44, %45 : vector<16x1xf32>
    %47 = math.rsqrt %46 : vector<16x1xf32>
    %48 = vector.broadcast %47 : vector<16x1xf32> to vector<16x32xf32>
    %49 = arith.mulf %33, %48 : vector<16x32xf32>
    %50 = vector.shape_cast %41 : vector<64x32xf32> to vector<16x4x32xf32>
    %51 = vector.shape_cast %49 : vector<16x32xf32> to vector<16x1x32xf32>
    %52 = vector.broadcast %51 : vector<16x1x32xf32> to vector<16x4x32xf32>
    %53 = arith.mulf %52, %50 : vector<16x4x32xf32>
    %cst_34 = arith.constant dense<0.000000e+00> : vector<16x4xf32>
    %54 = vector.multi_reduction <add>, %53, %cst_34 [2] : vector<16x4x32xf32> to vector<16x4xf32>
    %cst_35 = arith.constant dense<0.000000e+00> : vector<16x32xf32>
    %55 = vector.multi_reduction <add>, %50, %cst_35 [1] : vector<16x4x32xf32> to vector<16x32xf32>
    %cst_36 = arith.constant 4.000000e+00 : f32
    %56 = vector.broadcast %cst_36 : f32 to vector<16x32xf32>
    %57 = arith.divf %55, %56 : vector<16x32xf32>
    %58 = vector.shape_cast %57 : vector<16x32xf32> to vector<16x1x32xf32>
    %59 = vector.broadcast %58 : vector<16x1x32xf32> to vector<16x4x32xf32>
    %60 = arith.mulf %50, %59 : vector<16x4x32xf32>
    %cst_37 = arith.constant dense<0.000000e+00> : vector<16x4xf32>
    %61 = vector.multi_reduction <add>, %60, %cst_37 [2] : vector<16x4x32xf32> to vector<16x4xf32>
    %62 = arith.addf %54, %61 : vector<16x4xf32>
    %cst_38 = arith.constant dense<0xFF800000> : vector<16xf32>
    %63 = vector.multi_reduction <maximumf>, %62, %cst_38 [1] : vector<16x4xf32> to vector<16xf32>
    %64 = vector.shape_cast %63 : vector<16xf32> to vector<16x1xf32>
    %65 = vector.broadcast %64 : vector<16x1xf32> to vector<16x4xf32>
    %66 = arith.subf %62, %65 : vector<16x4xf32>
    %67 = math.exp %66 : vector<16x4xf32>
    %cst_39 = arith.constant dense<0.000000e+00> : vector<16xf32>
    %68 = vector.multi_reduction <add>, %67, %cst_39 [1] : vector<16x4xf32> to vector<16xf32>
    %69 = vector.shape_cast %68 : vector<16xf32> to vector<16x1xf32>
    %70 = tpu.reciprocal %69 {approx = true} : vector<16x1xf32> -> vector<16x1xf32>
    %71 = vector.broadcast %70 : vector<16x1xf32> to vector<16x4xf32>
    %72 = arith.mulf %67, %71 : vector<16x4xf32>
    %73 = vector.shape_cast %72 : vector<16x4xf32> to vector<16x4x1xf32>
    %74 = vector.shape_cast %33 : vector<16x32xf32> to vector<16x1x32xf32>
    %75 = vector.broadcast %73 : vector<16x4x1xf32> to vector<16x4x32xf32>
    %76 = vector.broadcast %74 : vector<16x1x32xf32> to vector<16x4x32xf32>
    %77 = arith.mulf %75, %76 : vector<16x4x32xf32>
    %cst_40 = arith.constant 1.000000e+00 : f32
    %78 = vector.broadcast %cst_40 : f32 to vector<16x4x1xf32>
    %79 = arith.subf %78, %73 : vector<16x4x1xf32>
    %80 = vector.shape_cast %25 : vector<64x32xf32> to vector<16x4x32xf32>
    %81 = vector.broadcast %79 : vector<16x4x1xf32> to vector<16x4x32xf32>
    %82 = arith.mulf %81, %80 : vector<16x4x32xf32>
    %83 = arith.addf %77, %82 : vector<16x4x32xf32>
    %cst_41 = arith.constant dense<0.000000e+00> : vector<16x32xf32>
    %84 = vector.multi_reduction <add>, %83, %cst_41 [1] : vector<16x4x32xf32> to vector<16x32xf32>
    %cst_42 = arith.constant 4.000000e+00 : f32
    %85 = vector.broadcast %cst_42 : f32 to vector<16x32xf32>
    %86 = arith.divf %84, %85 : vector<16x32xf32>
    %c0_43 = arith.constant 0 : index
    %c0_44 = arith.constant 0 : index
    %87 = vector.load %arg12[%c0_43, %c0_44] : memref<32x32xf32, #tpu.memory_space<vmem>>, vector<32x32xf32>
    %cst_45 = arith.constant dense<0.000000e+00> : vector<16x32xf32>
    %88 = tpu.matmul %86, %87, %cst_45 {dimension_numbers = #tpu.dot_dimension_numbers<[1], [0], [0], [1], [0, 0, 1, 1], [], []>} : vector<16x32xf32>, vector<32x32xf32>, vector<16x32xf32> -> vector<16x32xf32>
    %c0_46 = arith.constant 0 : index
    %c0_47 = arith.constant 0 : index
    %89 = vector.load %arg13[%c0_46, %c0_47] : memref<1x32xf32, #tpu.memory_space<vmem>>, vector<1x32xf32>
    %90 = vector.broadcast %89 : vector<1x32xf32> to vector<16x32xf32>
    %91 = arith.addf %88, %90 : vector<16x32xf32>
    %cst_48 = arith.constant 0.000000e+00 : f32
    %92 = vector.broadcast %cst_48 : f32 to vector<16x32xf32>
    %93 = arith.maximumf %91, %92 : vector<16x32xf32>
    %94 = tpu.concatenate %8, %17, %93 in 1 : vector<16x32xf32>, vector<16x32xf32>, vector<16x32xf32> -> vector<16x96xf32>
    %c0_49 = arith.constant 0 : index
    %c0_50 = arith.constant 0 : index
    %95 = vector.load %arg14[%c0_49, %c0_50] : memref<96x384xf32, #tpu.memory_space<vmem>>, vector<96x384xf32>
    %cst_51 = arith.constant dense<0.000000e+00> : vector<16x384xf32>
    %96 = tpu.matmul %94, %95, %cst_51 {dimension_numbers = #tpu.dot_dimension_numbers<[1], [0], [0], [1], [0, 0, 1, 1], [], []>} : vector<16x96xf32>, vector<96x384xf32>, vector<16x384xf32> -> vector<16x384xf32>
    %c0_52 = arith.constant 0 : index
    %c0_53 = arith.constant 0 : index
    %97 = vector.load %arg15[%c0_52, %c0_53] : memref<1x384xf32, #tpu.memory_space<vmem>>, vector<1x384xf32>
    %98 = vector.broadcast %97 : vector<1x384xf32> to vector<16x384xf32>
    %99 = arith.addf %96, %98 : vector<16x384xf32>
    %100 = vector.shape_cast %99 : vector<16x384xf32> to vector<2x8x384xf32>
    %c0_54 = arith.constant 0 : index
    %c0_55 = arith.constant 0 : index
    %101 = vector.load %arg16[%c0_54, %c0_55] : memref<32x384xf32, #tpu.memory_space<vmem>>, vector<32x384xf32>
    %c0_56 = arith.constant 0 : index
    %c0_57 = arith.constant 0 : index
    %102 = vector.load %arg17[%c0_56, %c0_57] : memref<1x32xf32, #tpu.memory_space<vmem>>, vector<1x32xf32>
    %c0_58 = arith.constant 0 : index
    %c0_59 = arith.constant 0 : index
    %103 = vector.load %arg18[%c0_58, %c0_59] : memref<32x384xf32, #tpu.memory_space<vmem>>, vector<32x384xf32>
    %c0_60 = arith.constant 0 : index
    %c0_61 = arith.constant 0 : index
    %104 = vector.load %arg19[%c0_60, %c0_61] : memref<32x384xf32, #tpu.memory_space<vmem>>, vector<32x384xf32>
    %c0_62 = arith.constant 0 : index
    %c0_63 = arith.constant 0 : index
    %105 = vector.load %arg20[%c0_62, %c0_63] : memref<1x384xf32, #tpu.memory_space<vmem>>, vector<1x384xf32>
    %c0_64 = arith.constant 0 : index
    %c0_65 = arith.constant 0 : index
    %106 = vector.load %arg21[%c0_64, %c0_65] : memref<1x32xf32, #tpu.memory_space<vmem>>, vector<1x32xf32>
    %cst_66 = arith.constant 0.000000e+00 : f32
    %107 = vector.broadcast %cst_66 : f32 to vector<2x32xf32>
    %cst_67 = arith.constant 0.000000e+00 : f32
    %108 = vector.broadcast %cst_67 : f32 to vector<2x32xf32>
    %109 = vector.extract_strided_slice %100 {offsets = [0, 0, 0], sizes = [2, 1, 384], strides = [1, 1, 1]} : vector<2x8x384xf32> to vector<2x1x384xf32>
    %110 = vector.shape_cast %109 : vector<2x1x384xf32> to vector<2x384xf32>
    %cst_68 = arith.constant dense<0.000000e+00> : vector<2x384xf32>
    %111 = tpu.matmul %107, %101, %cst_68 {dimension_numbers = #tpu.dot_dimension_numbers<[1], [0], [0], [1], [0, 0, 1, 1], [], []>} : vector<2x32xf32>, vector<32x384xf32>, vector<2x384xf32> -> vector<2x384xf32>
    %cst_69 = arith.constant dense<0.000000e+00> : vector<2x384xf32>
    %112 = tpu.matmul %108, %103, %cst_69 {dimension_numbers = #tpu.dot_dimension_numbers<[1], [0], [0], [1], [0, 0, 1, 1], [], []>} : vector<2x32xf32>, vector<32x384xf32>, vector<2x384xf32> -> vector<2x384xf32>
    %113 = vector.extract_strided_slice %110 {offsets = [0, 0], sizes = [2, 32], strides = [1, 1]} : vector<2x384xf32> to vector<2x32xf32>
    %114 = vector.extract_strided_slice %111 {offsets = [0, 0], sizes = [2, 32], strides = [1, 1]} : vector<2x384xf32> to vector<2x32xf32>
    %115 = arith.addf %113, %114 : vector<2x32xf32>
    %116 = arith.negf %115 : vector<2x32xf32>
    %117 = math.exp %116 : vector<2x32xf32>
    %cst_70 = arith.constant 1.000000e+00 : f32
    %118 = vector.broadcast %cst_70 : f32 to vector<2x32xf32>
    %119 = arith.addf %118, %117 : vector<2x32xf32>
    %120 = arith.divf %118, %119 : vector<2x32xf32>
    %121 = vector.extract_strided_slice %110 {offsets = [0, 128], sizes = [2, 32], strides = [1, 1]} : vector<2x384xf32> to vector<2x32xf32>
    %122 = vector.extract_strided_slice %111 {offsets = [0, 128], sizes = [2, 32], strides = [1, 1]} : vector<2x384xf32> to vector<2x32xf32>
    %123 = arith.addf %121, %122 : vector<2x32xf32>
    %124 = arith.negf %123 : vector<2x32xf32>
    %125 = math.exp %124 : vector<2x32xf32>
    %cst_71 = arith.constant 1.000000e+00 : f32
    %126 = vector.broadcast %cst_71 : f32 to vector<2x32xf32>
    %127 = arith.addf %126, %125 : vector<2x32xf32>
    %128 = arith.divf %126, %127 : vector<2x32xf32>
    %129 = vector.extract_strided_slice %110 {offsets = [0, 256], sizes = [2, 32], strides = [1, 1]} : vector<2x384xf32> to vector<2x32xf32>
    %130 = vector.extract_strided_slice %111 {offsets = [0, 256], sizes = [2, 32], strides = [1, 1]} : vector<2x384xf32> to vector<2x32xf32>
    %131 = vector.broadcast %102 : vector<1x32xf32> to vector<2x32xf32>
    %132 = arith.addf %130, %131 : vector<2x32xf32>
    %133 = arith.mulf %120, %132 : vector<2x32xf32>
    %134 = arith.addf %129, %133 : vector<2x32xf32>
    %135 = math.tanh %134 : vector<2x32xf32>
    %cst_72 = arith.constant 1.000000e+00 : f32
    %136 = vector.broadcast %cst_72 : f32 to vector<2x32xf32>
    %137 = arith.subf %136, %128 : vector<2x32xf32>
    %138 = arith.mulf %137, %135 : vector<2x32xf32>
    %139 = arith.mulf %128, %107 : vector<2x32xf32>
    %140 = arith.addf %138, %139 : vector<2x32xf32>
    %cst_73 = arith.constant dense<0.000000e+00> : vector<2x384xf32>
    %141 = tpu.matmul %140, %104, %cst_73 {dimension_numbers = #tpu.dot_dimension_numbers<[1], [0], [0], [1], [0, 0, 1, 1], [], []>} : vector<2x32xf32>, vector<32x384xf32>, vector<2x384xf32> -> vector<2x384xf32>
    %142 = vector.broadcast %105 : vector<1x384xf32> to vector<2x384xf32>
    %143 = arith.addf %141, %142 : vector<2x384xf32>
    %144 = arith.addf %143, %112 : vector<2x384xf32>
    %145 = vector.extract_strided_slice %144 {offsets = [0, 0], sizes = [2, 32], strides = [1, 1]} : vector<2x384xf32> to vector<2x32xf32>
    %146 = arith.negf %145 : vector<2x32xf32>
    %147 = math.exp %146 : vector<2x32xf32>
    %cst_74 = arith.constant 1.000000e+00 : f32
    %148 = vector.broadcast %cst_74 : f32 to vector<2x32xf32>
    %149 = arith.addf %148, %147 : vector<2x32xf32>
    %150 = arith.divf %148, %149 : vector<2x32xf32>
    %151 = vector.extract_strided_slice %144 {offsets = [0, 128], sizes = [2, 32], strides = [1, 1]} : vector<2x384xf32> to vector<2x32xf32>
    %152 = arith.negf %151 : vector<2x32xf32>
    %153 = math.exp %152 : vector<2x32xf32>
    %cst_75 = arith.constant 1.000000e+00 : f32
    %154 = vector.broadcast %cst_75 : f32 to vector<2x32xf32>
    %155 = arith.addf %154, %153 : vector<2x32xf32>
    %156 = arith.divf %154, %155 : vector<2x32xf32>
    %157 = vector.extract_strided_slice %143 {offsets = [0, 256], sizes = [2, 32], strides = [1, 1]} : vector<2x384xf32> to vector<2x32xf32>
    %158 = vector.extract_strided_slice %112 {offsets = [0, 256], sizes = [2, 32], strides = [1, 1]} : vector<2x384xf32> to vector<2x32xf32>
    %159 = vector.broadcast %106 : vector<1x32xf32> to vector<2x32xf32>
    %160 = arith.addf %158, %159 : vector<2x32xf32>
    %161 = arith.mulf %150, %160 : vector<2x32xf32>
    %162 = arith.addf %157, %161 : vector<2x32xf32>
    %163 = math.tanh %162 : vector<2x32xf32>
    %cst_76 = arith.constant 1.000000e+00 : f32
    %164 = vector.broadcast %cst_76 : f32 to vector<2x32xf32>
    %165 = arith.subf %164, %156 : vector<2x32xf32>
    %166 = arith.mulf %165, %163 : vector<2x32xf32>
    %167 = arith.mulf %156, %108 : vector<2x32xf32>
    %168 = arith.addf %166, %167 : vector<2x32xf32>
    %169 = vector.extract_strided_slice %100 {offsets = [0, 1, 0], sizes = [2, 1, 384], strides = [1, 1, 1]} : vector<2x8x384xf32> to vector<2x1x384xf32>
    %170 = vector.shape_cast %169 : vector<2x1x384xf32> to vector<2x384xf32>
    %cst_77 = arith.constant dense<0.000000e+00> : vector<2x384xf32>
    %171 = tpu.matmul %140, %101, %cst_77 {dimension_numbers = #tpu.dot_dimension_numbers<[1], [0], [0], [1], [0, 0, 1, 1], [], []>} : vector<2x32xf32>, vector<32x384xf32>, vector<2x384xf32> -> vector<2x384xf32>
    %cst_78 = arith.constant dense<0.000000e+00> : vector<2x384xf32>
    %172 = tpu.matmul %168, %103, %cst_78 {dimension_numbers = #tpu.dot_dimension_numbers<[1], [0], [0], [1], [0, 0, 1, 1], [], []>} : vector<2x32xf32>, vector<32x384xf32>, vector<2x384xf32> -> vector<2x384xf32>
    %173 = vector.extract_strided_slice %170 {offsets = [0, 0], sizes = [2, 32], strides = [1, 1]} : vector<2x384xf32> to vector<2x32xf32>
    %174 = vector.extract_strided_slice %171 {offsets = [0, 0], sizes = [2, 32], strides = [1, 1]} : vector<2x384xf32> to vector<2x32xf32>
    %175 = arith.addf %173, %174 : vector<2x32xf32>
    %176 = arith.negf %175 : vector<2x32xf32>
    %177 = math.exp %176 : vector<2x32xf32>
    %cst_79 = arith.constant 1.000000e+00 : f32
    %178 = vector.broadcast %cst_79 : f32 to vector<2x32xf32>
    %179 = arith.addf %178, %177 : vector<2x32xf32>
    %180 = arith.divf %178, %179 : vector<2x32xf32>
    %181 = vector.extract_strided_slice %170 {offsets = [0, 128], sizes = [2, 32], strides = [1, 1]} : vector<2x384xf32> to vector<2x32xf32>
    %182 = vector.extract_strided_slice %171 {offsets = [0, 128], sizes = [2, 32], strides = [1, 1]} : vector<2x384xf32> to vector<2x32xf32>
    %183 = arith.addf %181, %182 : vector<2x32xf32>
    %184 = arith.negf %183 : vector<2x32xf32>
    %185 = math.exp %184 : vector<2x32xf32>
    %cst_80 = arith.constant 1.000000e+00 : f32
    %186 = vector.broadcast %cst_80 : f32 to vector<2x32xf32>
    %187 = arith.addf %186, %185 : vector<2x32xf32>
    %188 = arith.divf %186, %187 : vector<2x32xf32>
    %189 = vector.extract_strided_slice %170 {offsets = [0, 256], sizes = [2, 32], strides = [1, 1]} : vector<2x384xf32> to vector<2x32xf32>
    %190 = vector.extract_strided_slice %171 {offsets = [0, 256], sizes = [2, 32], strides = [1, 1]} : vector<2x384xf32> to vector<2x32xf32>
    %191 = vector.broadcast %102 : vector<1x32xf32> to vector<2x32xf32>
    %192 = arith.addf %190, %191 : vector<2x32xf32>
    %193 = arith.mulf %180, %192 : vector<2x32xf32>
    %194 = arith.addf %189, %193 : vector<2x32xf32>
    %195 = math.tanh %194 : vector<2x32xf32>
    %cst_81 = arith.constant 1.000000e+00 : f32
    %196 = vector.broadcast %cst_81 : f32 to vector<2x32xf32>
    %197 = arith.subf %196, %188 : vector<2x32xf32>
    %198 = arith.mulf %197, %195 : vector<2x32xf32>
    %199 = arith.mulf %188, %140 : vector<2x32xf32>
    %200 = arith.addf %198, %199 : vector<2x32xf32>
    %cst_82 = arith.constant dense<0.000000e+00> : vector<2x384xf32>
    %201 = tpu.matmul %200, %104, %cst_82 {dimension_numbers = #tpu.dot_dimension_numbers<[1], [0], [0], [1], [0, 0, 1, 1], [], []>} : vector<2x32xf32>, vector<32x384xf32>, vector<2x384xf32> -> vector<2x384xf32>
    %202 = vector.broadcast %105 : vector<1x384xf32> to vector<2x384xf32>
    %203 = arith.addf %201, %202 : vector<2x384xf32>
    %204 = arith.addf %203, %172 : vector<2x384xf32>
    %205 = vector.extract_strided_slice %204 {offsets = [0, 0], sizes = [2, 32], strides = [1, 1]} : vector<2x384xf32> to vector<2x32xf32>
    %206 = arith.negf %205 : vector<2x32xf32>
    %207 = math.exp %206 : vector<2x32xf32>
    %cst_83 = arith.constant 1.000000e+00 : f32
    %208 = vector.broadcast %cst_83 : f32 to vector<2x32xf32>
    %209 = arith.addf %208, %207 : vector<2x32xf32>
    %210 = arith.divf %208, %209 : vector<2x32xf32>
    %211 = vector.extract_strided_slice %204 {offsets = [0, 128], sizes = [2, 32], strides = [1, 1]} : vector<2x384xf32> to vector<2x32xf32>
    %212 = arith.negf %211 : vector<2x32xf32>
    %213 = math.exp %212 : vector<2x32xf32>
    %cst_84 = arith.constant 1.000000e+00 : f32
    %214 = vector.broadcast %cst_84 : f32 to vector<2x32xf32>
    %215 = arith.addf %214, %213 : vector<2x32xf32>
    %216 = arith.divf %214, %215 : vector<2x32xf32>
    %217 = vector.extract_strided_slice %203 {offsets = [0, 256], sizes = [2, 32], strides = [1, 1]} : vector<2x384xf32> to vector<2x32xf32>
    %218 = vector.extract_strided_slice %172 {offsets = [0, 256], sizes = [2, 32], strides = [1, 1]} : vector<2x384xf32> to vector<2x32xf32>
    %219 = vector.broadcast %106 : vector<1x32xf32> to vector<2x32xf32>
    %220 = arith.addf %218, %219 : vector<2x32xf32>
    %221 = arith.mulf %210, %220 : vector<2x32xf32>
    %222 = arith.addf %217, %221 : vector<2x32xf32>
    %223 = math.tanh %222 : vector<2x32xf32>
    %cst_85 = arith.constant 1.000000e+00 : f32
    %224 = vector.broadcast %cst_85 : f32 to vector<2x32xf32>
    %225 = arith.subf %224, %216 : vector<2x32xf32>
    %226 = arith.mulf %225, %223 : vector<2x32xf32>
    %227 = arith.mulf %216, %168 : vector<2x32xf32>
    %228 = arith.addf %226, %227 : vector<2x32xf32>
    %229 = vector.extract_strided_slice %100 {offsets = [0, 2, 0], sizes = [2, 1, 384], strides = [1, 1, 1]} : vector<2x8x384xf32> to vector<2x1x384xf32>
    %230 = vector.shape_cast %229 : vector<2x1x384xf32> to vector<2x384xf32>
    %cst_86 = arith.constant dense<0.000000e+00> : vector<2x384xf32>
    %231 = tpu.matmul %200, %101, %cst_86 {dimension_numbers = #tpu.dot_dimension_numbers<[1], [0], [0], [1], [0, 0, 1, 1], [], []>} : vector<2x32xf32>, vector<32x384xf32>, vector<2x384xf32> -> vector<2x384xf32>
    %cst_87 = arith.constant dense<0.000000e+00> : vector<2x384xf32>
    %232 = tpu.matmul %228, %103, %cst_87 {dimension_numbers = #tpu.dot_dimension_numbers<[1], [0], [0], [1], [0, 0, 1, 1], [], []>} : vector<2x32xf32>, vector<32x384xf32>, vector<2x384xf32> -> vector<2x384xf32>
    %233 = vector.extract_strided_slice %230 {offsets = [0, 0], sizes = [2, 32], strides = [1, 1]} : vector<2x384xf32> to vector<2x32xf32>
    %234 = vector.extract_strided_slice %231 {offsets = [0, 0], sizes = [2, 32], strides = [1, 1]} : vector<2x384xf32> to vector<2x32xf32>
    %235 = arith.addf %233, %234 : vector<2x32xf32>
    %236 = arith.negf %235 : vector<2x32xf32>
    %237 = math.exp %236 : vector<2x32xf32>
    %cst_88 = arith.constant 1.000000e+00 : f32
    %238 = vector.broadcast %cst_88 : f32 to vector<2x32xf32>
    %239 = arith.addf %238, %237 : vector<2x32xf32>
    %240 = arith.divf %238, %239 : vector<2x32xf32>
    %241 = vector.extract_strided_slice %230 {offsets = [0, 128], sizes = [2, 32], strides = [1, 1]} : vector<2x384xf32> to vector<2x32xf32>
    %242 = vector.extract_strided_slice %231 {offsets = [0, 128], sizes = [2, 32], strides = [1, 1]} : vector<2x384xf32> to vector<2x32xf32>
    %243 = arith.addf %241, %242 : vector<2x32xf32>
    %244 = arith.negf %243 : vector<2x32xf32>
    %245 = math.exp %244 : vector<2x32xf32>
    %cst_89 = arith.constant 1.000000e+00 : f32
    %246 = vector.broadcast %cst_89 : f32 to vector<2x32xf32>
    %247 = arith.addf %246, %245 : vector<2x32xf32>
    %248 = arith.divf %246, %247 : vector<2x32xf32>
    %249 = vector.extract_strided_slice %230 {offsets = [0, 256], sizes = [2, 32], strides = [1, 1]} : vector<2x384xf32> to vector<2x32xf32>
    %250 = vector.extract_strided_slice %231 {offsets = [0, 256], sizes = [2, 32], strides = [1, 1]} : vector<2x384xf32> to vector<2x32xf32>
    %251 = vector.broadcast %102 : vector<1x32xf32> to vector<2x32xf32>
    %252 = arith.addf %250, %251 : vector<2x32xf32>
    %253 = arith.mulf %240, %252 : vector<2x32xf32>
    %254 = arith.addf %249, %253 : vector<2x32xf32>
    %255 = math.tanh %254 : vector<2x32xf32>
    %cst_90 = arith.constant 1.000000e+00 : f32
    %256 = vector.broadcast %cst_90 : f32 to vector<2x32xf32>
    %257 = arith.subf %256, %248 : vector<2x32xf32>
    %258 = arith.mulf %257, %255 : vector<2x32xf32>
    %259 = arith.mulf %248, %200 : vector<2x32xf32>
    %260 = arith.addf %258, %259 : vector<2x32xf32>
    %cst_91 = arith.constant dense<0.000000e+00> : vector<2x384xf32>
    %261 = tpu.matmul %260, %104, %cst_91 {dimension_numbers = #tpu.dot_dimension_numbers<[1], [0], [0], [1], [0, 0, 1, 1], [], []>} : vector<2x32xf32>, vector<32x384xf32>, vector<2x384xf32> -> vector<2x384xf32>
    %262 = vector.broadcast %105 : vector<1x384xf32> to vector<2x384xf32>
    %263 = arith.addf %261, %262 : vector<2x384xf32>
    %264 = arith.addf %263, %232 : vector<2x384xf32>
    %265 = vector.extract_strided_slice %264 {offsets = [0, 0], sizes = [2, 32], strides = [1, 1]} : vector<2x384xf32> to vector<2x32xf32>
    %266 = arith.negf %265 : vector<2x32xf32>
    %267 = math.exp %266 : vector<2x32xf32>
    %cst_92 = arith.constant 1.000000e+00 : f32
    %268 = vector.broadcast %cst_92 : f32 to vector<2x32xf32>
    %269 = arith.addf %268, %267 : vector<2x32xf32>
    %270 = arith.divf %268, %269 : vector<2x32xf32>
    %271 = vector.extract_strided_slice %264 {offsets = [0, 128], sizes = [2, 32], strides = [1, 1]} : vector<2x384xf32> to vector<2x32xf32>
    %272 = arith.negf %271 : vector<2x32xf32>
    %273 = math.exp %272 : vector<2x32xf32>
    %cst_93 = arith.constant 1.000000e+00 : f32
    %274 = vector.broadcast %cst_93 : f32 to vector<2x32xf32>
    %275 = arith.addf %274, %273 : vector<2x32xf32>
    %276 = arith.divf %274, %275 : vector<2x32xf32>
    %277 = vector.extract_strided_slice %263 {offsets = [0, 256], sizes = [2, 32], strides = [1, 1]} : vector<2x384xf32> to vector<2x32xf32>
    %278 = vector.extract_strided_slice %232 {offsets = [0, 256], sizes = [2, 32], strides = [1, 1]} : vector<2x384xf32> to vector<2x32xf32>
    %279 = vector.broadcast %106 : vector<1x32xf32> to vector<2x32xf32>
    %280 = arith.addf %278, %279 : vector<2x32xf32>
    %281 = arith.mulf %270, %280 : vector<2x32xf32>
    %282 = arith.addf %277, %281 : vector<2x32xf32>
    %283 = math.tanh %282 : vector<2x32xf32>
    %cst_94 = arith.constant 1.000000e+00 : f32
    %284 = vector.broadcast %cst_94 : f32 to vector<2x32xf32>
    %285 = arith.subf %284, %276 : vector<2x32xf32>
    %286 = arith.mulf %285, %283 : vector<2x32xf32>
    %287 = arith.mulf %276, %228 : vector<2x32xf32>
    %288 = arith.addf %286, %287 : vector<2x32xf32>
    %289 = vector.extract_strided_slice %100 {offsets = [0, 3, 0], sizes = [2, 1, 384], strides = [1, 1, 1]} : vector<2x8x384xf32> to vector<2x1x384xf32>
    %290 = vector.shape_cast %289 : vector<2x1x384xf32> to vector<2x384xf32>
    %cst_95 = arith.constant dense<0.000000e+00> : vector<2x384xf32>
    %291 = tpu.matmul %260, %101, %cst_95 {dimension_numbers = #tpu.dot_dimension_numbers<[1], [0], [0], [1], [0, 0, 1, 1], [], []>} : vector<2x32xf32>, vector<32x384xf32>, vector<2x384xf32> -> vector<2x384xf32>
    %cst_96 = arith.constant dense<0.000000e+00> : vector<2x384xf32>
    %292 = tpu.matmul %288, %103, %cst_96 {dimension_numbers = #tpu.dot_dimension_numbers<[1], [0], [0], [1], [0, 0, 1, 1], [], []>} : vector<2x32xf32>, vector<32x384xf32>, vector<2x384xf32> -> vector<2x384xf32>
    %293 = vector.extract_strided_slice %290 {offsets = [0, 0], sizes = [2, 32], strides = [1, 1]} : vector<2x384xf32> to vector<2x32xf32>
    %294 = vector.extract_strided_slice %291 {offsets = [0, 0], sizes = [2, 32], strides = [1, 1]} : vector<2x384xf32> to vector<2x32xf32>
    %295 = arith.addf %293, %294 : vector<2x32xf32>
    %296 = arith.negf %295 : vector<2x32xf32>
    %297 = math.exp %296 : vector<2x32xf32>
    %cst_97 = arith.constant 1.000000e+00 : f32
    %298 = vector.broadcast %cst_97 : f32 to vector<2x32xf32>
    %299 = arith.addf %298, %297 : vector<2x32xf32>
    %300 = arith.divf %298, %299 : vector<2x32xf32>
    %301 = vector.extract_strided_slice %290 {offsets = [0, 128], sizes = [2, 32], strides = [1, 1]} : vector<2x384xf32> to vector<2x32xf32>
    %302 = vector.extract_strided_slice %291 {offsets = [0, 128], sizes = [2, 32], strides = [1, 1]} : vector<2x384xf32> to vector<2x32xf32>
    %303 = arith.addf %301, %302 : vector<2x32xf32>
    %304 = arith.negf %303 : vector<2x32xf32>
    %305 = math.exp %304 : vector<2x32xf32>
    %cst_98 = arith.constant 1.000000e+00 : f32
    %306 = vector.broadcast %cst_98 : f32 to vector<2x32xf32>
    %307 = arith.addf %306, %305 : vector<2x32xf32>
    %308 = arith.divf %306, %307 : vector<2x32xf32>
    %309 = vector.extract_strided_slice %290 {offsets = [0, 256], sizes = [2, 32], strides = [1, 1]} : vector<2x384xf32> to vector<2x32xf32>
    %310 = vector.extract_strided_slice %291 {offsets = [0, 256], sizes = [2, 32], strides = [1, 1]} : vector<2x384xf32> to vector<2x32xf32>
    %311 = vector.broadcast %102 : vector<1x32xf32> to vector<2x32xf32>
    %312 = arith.addf %310, %311 : vector<2x32xf32>
    %313 = arith.mulf %300, %312 : vector<2x32xf32>
    %314 = arith.addf %309, %313 : vector<2x32xf32>
    %315 = math.tanh %314 : vector<2x32xf32>
    %cst_99 = arith.constant 1.000000e+00 : f32
    %316 = vector.broadcast %cst_99 : f32 to vector<2x32xf32>
    %317 = arith.subf %316, %308 : vector<2x32xf32>
    %318 = arith.mulf %317, %315 : vector<2x32xf32>
    %319 = arith.mulf %308, %260 : vector<2x32xf32>
    %320 = arith.addf %318, %319 : vector<2x32xf32>
    %cst_100 = arith.constant dense<0.000000e+00> : vector<2x384xf32>
    %321 = tpu.matmul %320, %104, %cst_100 {dimension_numbers = #tpu.dot_dimension_numbers<[1], [0], [0], [1], [0, 0, 1, 1], [], []>} : vector<2x32xf32>, vector<32x384xf32>, vector<2x384xf32> -> vector<2x384xf32>
    %322 = vector.broadcast %105 : vector<1x384xf32> to vector<2x384xf32>
    %323 = arith.addf %321, %322 : vector<2x384xf32>
    %324 = arith.addf %323, %292 : vector<2x384xf32>
    %325 = vector.extract_strided_slice %324 {offsets = [0, 0], sizes = [2, 32], strides = [1, 1]} : vector<2x384xf32> to vector<2x32xf32>
    %326 = arith.negf %325 : vector<2x32xf32>
    %327 = math.exp %326 : vector<2x32xf32>
    %cst_101 = arith.constant 1.000000e+00 : f32
    %328 = vector.broadcast %cst_101 : f32 to vector<2x32xf32>
    %329 = arith.addf %328, %327 : vector<2x32xf32>
    %330 = arith.divf %328, %329 : vector<2x32xf32>
    %331 = vector.extract_strided_slice %324 {offsets = [0, 128], sizes = [2, 32], strides = [1, 1]} : vector<2x384xf32> to vector<2x32xf32>
    %332 = arith.negf %331 : vector<2x32xf32>
    %333 = math.exp %332 : vector<2x32xf32>
    %cst_102 = arith.constant 1.000000e+00 : f32
    %334 = vector.broadcast %cst_102 : f32 to vector<2x32xf32>
    %335 = arith.addf %334, %333 : vector<2x32xf32>
    %336 = arith.divf %334, %335 : vector<2x32xf32>
    %337 = vector.extract_strided_slice %323 {offsets = [0, 256], sizes = [2, 32], strides = [1, 1]} : vector<2x384xf32> to vector<2x32xf32>
    %338 = vector.extract_strided_slice %292 {offsets = [0, 256], sizes = [2, 32], strides = [1, 1]} : vector<2x384xf32> to vector<2x32xf32>
    %339 = vector.broadcast %106 : vector<1x32xf32> to vector<2x32xf32>
    %340 = arith.addf %338, %339 : vector<2x32xf32>
    %341 = arith.mulf %330, %340 : vector<2x32xf32>
    %342 = arith.addf %337, %341 : vector<2x32xf32>
    %343 = math.tanh %342 : vector<2x32xf32>
    %cst_103 = arith.constant 1.000000e+00 : f32
    %344 = vector.broadcast %cst_103 : f32 to vector<2x32xf32>
    %345 = arith.subf %344, %336 : vector<2x32xf32>
    %346 = arith.mulf %345, %343 : vector<2x32xf32>
    %347 = arith.mulf %336, %288 : vector<2x32xf32>
    %348 = arith.addf %346, %347 : vector<2x32xf32>
    %349 = vector.extract_strided_slice %100 {offsets = [0, 4, 0], sizes = [2, 1, 384], strides = [1, 1, 1]} : vector<2x8x384xf32> to vector<2x1x384xf32>
    %350 = vector.shape_cast %349 : vector<2x1x384xf32> to vector<2x384xf32>
    %cst_104 = arith.constant dense<0.000000e+00> : vector<2x384xf32>
    %351 = tpu.matmul %320, %101, %cst_104 {dimension_numbers = #tpu.dot_dimension_numbers<[1], [0], [0], [1], [0, 0, 1, 1], [], []>} : vector<2x32xf32>, vector<32x384xf32>, vector<2x384xf32> -> vector<2x384xf32>
    %cst_105 = arith.constant dense<0.000000e+00> : vector<2x384xf32>
    %352 = tpu.matmul %348, %103, %cst_105 {dimension_numbers = #tpu.dot_dimension_numbers<[1], [0], [0], [1], [0, 0, 1, 1], [], []>} : vector<2x32xf32>, vector<32x384xf32>, vector<2x384xf32> -> vector<2x384xf32>
    %353 = vector.extract_strided_slice %350 {offsets = [0, 0], sizes = [2, 32], strides = [1, 1]} : vector<2x384xf32> to vector<2x32xf32>
    %354 = vector.extract_strided_slice %351 {offsets = [0, 0], sizes = [2, 32], strides = [1, 1]} : vector<2x384xf32> to vector<2x32xf32>
    %355 = arith.addf %353, %354 : vector<2x32xf32>
    %356 = arith.negf %355 : vector<2x32xf32>
    %357 = math.exp %356 : vector<2x32xf32>
    %cst_106 = arith.constant 1.000000e+00 : f32
    %358 = vector.broadcast %cst_106 : f32 to vector<2x32xf32>
    %359 = arith.addf %358, %357 : vector<2x32xf32>
    %360 = arith.divf %358, %359 : vector<2x32xf32>
    %361 = vector.extract_strided_slice %350 {offsets = [0, 128], sizes = [2, 32], strides = [1, 1]} : vector<2x384xf32> to vector<2x32xf32>
    %362 = vector.extract_strided_slice %351 {offsets = [0, 128], sizes = [2, 32], strides = [1, 1]} : vector<2x384xf32> to vector<2x32xf32>
    %363 = arith.addf %361, %362 : vector<2x32xf32>
    %364 = arith.negf %363 : vector<2x32xf32>
    %365 = math.exp %364 : vector<2x32xf32>
    %cst_107 = arith.constant 1.000000e+00 : f32
    %366 = vector.broadcast %cst_107 : f32 to vector<2x32xf32>
    %367 = arith.addf %366, %365 : vector<2x32xf32>
    %368 = arith.divf %366, %367 : vector<2x32xf32>
    %369 = vector.extract_strided_slice %350 {offsets = [0, 256], sizes = [2, 32], strides = [1, 1]} : vector<2x384xf32> to vector<2x32xf32>
    %370 = vector.extract_strided_slice %351 {offsets = [0, 256], sizes = [2, 32], strides = [1, 1]} : vector<2x384xf32> to vector<2x32xf32>
    %371 = vector.broadcast %102 : vector<1x32xf32> to vector<2x32xf32>
    %372 = arith.addf %370, %371 : vector<2x32xf32>
    %373 = arith.mulf %360, %372 : vector<2x32xf32>
    %374 = arith.addf %369, %373 : vector<2x32xf32>
    %375 = math.tanh %374 : vector<2x32xf32>
    %cst_108 = arith.constant 1.000000e+00 : f32
    %376 = vector.broadcast %cst_108 : f32 to vector<2x32xf32>
    %377 = arith.subf %376, %368 : vector<2x32xf32>
    %378 = arith.mulf %377, %375 : vector<2x32xf32>
    %379 = arith.mulf %368, %320 : vector<2x32xf32>
    %380 = arith.addf %378, %379 : vector<2x32xf32>
    %cst_109 = arith.constant dense<0.000000e+00> : vector<2x384xf32>
    %381 = tpu.matmul %380, %104, %cst_109 {dimension_numbers = #tpu.dot_dimension_numbers<[1], [0], [0], [1], [0, 0, 1, 1], [], []>} : vector<2x32xf32>, vector<32x384xf32>, vector<2x384xf32> -> vector<2x384xf32>
    %382 = vector.broadcast %105 : vector<1x384xf32> to vector<2x384xf32>
    %383 = arith.addf %381, %382 : vector<2x384xf32>
    %384 = arith.addf %383, %352 : vector<2x384xf32>
    %385 = vector.extract_strided_slice %384 {offsets = [0, 0], sizes = [2, 32], strides = [1, 1]} : vector<2x384xf32> to vector<2x32xf32>
    %386 = arith.negf %385 : vector<2x32xf32>
    %387 = math.exp %386 : vector<2x32xf32>
    %cst_110 = arith.constant 1.000000e+00 : f32
    %388 = vector.broadcast %cst_110 : f32 to vector<2x32xf32>
    %389 = arith.addf %388, %387 : vector<2x32xf32>
    %390 = arith.divf %388, %389 : vector<2x32xf32>
    %391 = vector.extract_strided_slice %384 {offsets = [0, 128], sizes = [2, 32], strides = [1, 1]} : vector<2x384xf32> to vector<2x32xf32>
    %392 = arith.negf %391 : vector<2x32xf32>
    %393 = math.exp %392 : vector<2x32xf32>
    %cst_111 = arith.constant 1.000000e+00 : f32
    %394 = vector.broadcast %cst_111 : f32 to vector<2x32xf32>
    %395 = arith.addf %394, %393 : vector<2x32xf32>
    %396 = arith.divf %394, %395 : vector<2x32xf32>
    %397 = vector.extract_strided_slice %383 {offsets = [0, 256], sizes = [2, 32], strides = [1, 1]} : vector<2x384xf32> to vector<2x32xf32>
    %398 = vector.extract_strided_slice %352 {offsets = [0, 256], sizes = [2, 32], strides = [1, 1]} : vector<2x384xf32> to vector<2x32xf32>
    %399 = vector.broadcast %106 : vector<1x32xf32> to vector<2x32xf32>
    %400 = arith.addf %398, %399 : vector<2x32xf32>
    %401 = arith.mulf %390, %400 : vector<2x32xf32>
    %402 = arith.addf %397, %401 : vector<2x32xf32>
    %403 = math.tanh %402 : vector<2x32xf32>
    %cst_112 = arith.constant 1.000000e+00 : f32
    %404 = vector.broadcast %cst_112 : f32 to vector<2x32xf32>
    %405 = arith.subf %404, %396 : vector<2x32xf32>
    %406 = arith.mulf %405, %403 : vector<2x32xf32>
    %407 = arith.mulf %396, %348 : vector<2x32xf32>
    %408 = arith.addf %406, %407 : vector<2x32xf32>
    %409 = vector.extract_strided_slice %100 {offsets = [0, 5, 0], sizes = [2, 1, 384], strides = [1, 1, 1]} : vector<2x8x384xf32> to vector<2x1x384xf32>
    %410 = vector.shape_cast %409 : vector<2x1x384xf32> to vector<2x384xf32>
    %cst_113 = arith.constant dense<0.000000e+00> : vector<2x384xf32>
    %411 = tpu.matmul %380, %101, %cst_113 {dimension_numbers = #tpu.dot_dimension_numbers<[1], [0], [0], [1], [0, 0, 1, 1], [], []>} : vector<2x32xf32>, vector<32x384xf32>, vector<2x384xf32> -> vector<2x384xf32>
    %cst_114 = arith.constant dense<0.000000e+00> : vector<2x384xf32>
    %412 = tpu.matmul %408, %103, %cst_114 {dimension_numbers = #tpu.dot_dimension_numbers<[1], [0], [0], [1], [0, 0, 1, 1], [], []>} : vector<2x32xf32>, vector<32x384xf32>, vector<2x384xf32> -> vector<2x384xf32>
    %413 = vector.extract_strided_slice %410 {offsets = [0, 0], sizes = [2, 32], strides = [1, 1]} : vector<2x384xf32> to vector<2x32xf32>
    %414 = vector.extract_strided_slice %411 {offsets = [0, 0], sizes = [2, 32], strides = [1, 1]} : vector<2x384xf32> to vector<2x32xf32>
    %415 = arith.addf %413, %414 : vector<2x32xf32>
    %416 = arith.negf %415 : vector<2x32xf32>
    %417 = math.exp %416 : vector<2x32xf32>
    %cst_115 = arith.constant 1.000000e+00 : f32
    %418 = vector.broadcast %cst_115 : f32 to vector<2x32xf32>
    %419 = arith.addf %418, %417 : vector<2x32xf32>
    %420 = arith.divf %418, %419 : vector<2x32xf32>
    %421 = vector.extract_strided_slice %410 {offsets = [0, 128], sizes = [2, 32], strides = [1, 1]} : vector<2x384xf32> to vector<2x32xf32>
    %422 = vector.extract_strided_slice %411 {offsets = [0, 128], sizes = [2, 32], strides = [1, 1]} : vector<2x384xf32> to vector<2x32xf32>
    %423 = arith.addf %421, %422 : vector<2x32xf32>
    %424 = arith.negf %423 : vector<2x32xf32>
    %425 = math.exp %424 : vector<2x32xf32>
    %cst_116 = arith.constant 1.000000e+00 : f32
    %426 = vector.broadcast %cst_116 : f32 to vector<2x32xf32>
    %427 = arith.addf %426, %425 : vector<2x32xf32>
    %428 = arith.divf %426, %427 : vector<2x32xf32>
    %429 = vector.extract_strided_slice %410 {offsets = [0, 256], sizes = [2, 32], strides = [1, 1]} : vector<2x384xf32> to vector<2x32xf32>
    %430 = vector.extract_strided_slice %411 {offsets = [0, 256], sizes = [2, 32], strides = [1, 1]} : vector<2x384xf32> to vector<2x32xf32>
    %431 = vector.broadcast %102 : vector<1x32xf32> to vector<2x32xf32>
    %432 = arith.addf %430, %431 : vector<2x32xf32>
    %433 = arith.mulf %420, %432 : vector<2x32xf32>
    %434 = arith.addf %429, %433 : vector<2x32xf32>
    %435 = math.tanh %434 : vector<2x32xf32>
    %cst_117 = arith.constant 1.000000e+00 : f32
    %436 = vector.broadcast %cst_117 : f32 to vector<2x32xf32>
    %437 = arith.subf %436, %428 : vector<2x32xf32>
    %438 = arith.mulf %437, %435 : vector<2x32xf32>
    %439 = arith.mulf %428, %380 : vector<2x32xf32>
    %440 = arith.addf %438, %439 : vector<2x32xf32>
    %cst_118 = arith.constant dense<0.000000e+00> : vector<2x384xf32>
    %441 = tpu.matmul %440, %104, %cst_118 {dimension_numbers = #tpu.dot_dimension_numbers<[1], [0], [0], [1], [0, 0, 1, 1], [], []>} : vector<2x32xf32>, vector<32x384xf32>, vector<2x384xf32> -> vector<2x384xf32>
    %442 = vector.broadcast %105 : vector<1x384xf32> to vector<2x384xf32>
    %443 = arith.addf %441, %442 : vector<2x384xf32>
    %444 = arith.addf %443, %412 : vector<2x384xf32>
    %445 = vector.extract_strided_slice %444 {offsets = [0, 0], sizes = [2, 32], strides = [1, 1]} : vector<2x384xf32> to vector<2x32xf32>
    %446 = arith.negf %445 : vector<2x32xf32>
    %447 = math.exp %446 : vector<2x32xf32>
    %cst_119 = arith.constant 1.000000e+00 : f32
    %448 = vector.broadcast %cst_119 : f32 to vector<2x32xf32>
    %449 = arith.addf %448, %447 : vector<2x32xf32>
    %450 = arith.divf %448, %449 : vector<2x32xf32>
    %451 = vector.extract_strided_slice %444 {offsets = [0, 128], sizes = [2, 32], strides = [1, 1]} : vector<2x384xf32> to vector<2x32xf32>
    %452 = arith.negf %451 : vector<2x32xf32>
    %453 = math.exp %452 : vector<2x32xf32>
    %cst_120 = arith.constant 1.000000e+00 : f32
    %454 = vector.broadcast %cst_120 : f32 to vector<2x32xf32>
    %455 = arith.addf %454, %453 : vector<2x32xf32>
    %456 = arith.divf %454, %455 : vector<2x32xf32>
    %457 = vector.extract_strided_slice %443 {offsets = [0, 256], sizes = [2, 32], strides = [1, 1]} : vector<2x384xf32> to vector<2x32xf32>
    %458 = vector.extract_strided_slice %412 {offsets = [0, 256], sizes = [2, 32], strides = [1, 1]} : vector<2x384xf32> to vector<2x32xf32>
    %459 = vector.broadcast %106 : vector<1x32xf32> to vector<2x32xf32>
    %460 = arith.addf %458, %459 : vector<2x32xf32>
    %461 = arith.mulf %450, %460 : vector<2x32xf32>
    %462 = arith.addf %457, %461 : vector<2x32xf32>
    %463 = math.tanh %462 : vector<2x32xf32>
    %cst_121 = arith.constant 1.000000e+00 : f32
    %464 = vector.broadcast %cst_121 : f32 to vector<2x32xf32>
    %465 = arith.subf %464, %456 : vector<2x32xf32>
    %466 = arith.mulf %465, %463 : vector<2x32xf32>
    %467 = arith.mulf %456, %408 : vector<2x32xf32>
    %468 = arith.addf %466, %467 : vector<2x32xf32>
    %469 = vector.extract_strided_slice %100 {offsets = [0, 6, 0], sizes = [2, 1, 384], strides = [1, 1, 1]} : vector<2x8x384xf32> to vector<2x1x384xf32>
    %470 = vector.shape_cast %469 : vector<2x1x384xf32> to vector<2x384xf32>
    %cst_122 = arith.constant dense<0.000000e+00> : vector<2x384xf32>
    %471 = tpu.matmul %440, %101, %cst_122 {dimension_numbers = #tpu.dot_dimension_numbers<[1], [0], [0], [1], [0, 0, 1, 1], [], []>} : vector<2x32xf32>, vector<32x384xf32>, vector<2x384xf32> -> vector<2x384xf32>
    %cst_123 = arith.constant dense<0.000000e+00> : vector<2x384xf32>
    %472 = tpu.matmul %468, %103, %cst_123 {dimension_numbers = #tpu.dot_dimension_numbers<[1], [0], [0], [1], [0, 0, 1, 1], [], []>} : vector<2x32xf32>, vector<32x384xf32>, vector<2x384xf32> -> vector<2x384xf32>
    %473 = vector.extract_strided_slice %470 {offsets = [0, 0], sizes = [2, 32], strides = [1, 1]} : vector<2x384xf32> to vector<2x32xf32>
    %474 = vector.extract_strided_slice %471 {offsets = [0, 0], sizes = [2, 32], strides = [1, 1]} : vector<2x384xf32> to vector<2x32xf32>
    %475 = arith.addf %473, %474 : vector<2x32xf32>
    %476 = arith.negf %475 : vector<2x32xf32>
    %477 = math.exp %476 : vector<2x32xf32>
    %cst_124 = arith.constant 1.000000e+00 : f32
    %478 = vector.broadcast %cst_124 : f32 to vector<2x32xf32>
    %479 = arith.addf %478, %477 : vector<2x32xf32>
    %480 = arith.divf %478, %479 : vector<2x32xf32>
    %481 = vector.extract_strided_slice %470 {offsets = [0, 128], sizes = [2, 32], strides = [1, 1]} : vector<2x384xf32> to vector<2x32xf32>
    %482 = vector.extract_strided_slice %471 {offsets = [0, 128], sizes = [2, 32], strides = [1, 1]} : vector<2x384xf32> to vector<2x32xf32>
    %483 = arith.addf %481, %482 : vector<2x32xf32>
    %484 = arith.negf %483 : vector<2x32xf32>
    %485 = math.exp %484 : vector<2x32xf32>
    %cst_125 = arith.constant 1.000000e+00 : f32
    %486 = vector.broadcast %cst_125 : f32 to vector<2x32xf32>
    %487 = arith.addf %486, %485 : vector<2x32xf32>
    %488 = arith.divf %486, %487 : vector<2x32xf32>
    %489 = vector.extract_strided_slice %470 {offsets = [0, 256], sizes = [2, 32], strides = [1, 1]} : vector<2x384xf32> to vector<2x32xf32>
    %490 = vector.extract_strided_slice %471 {offsets = [0, 256], sizes = [2, 32], strides = [1, 1]} : vector<2x384xf32> to vector<2x32xf32>
    %491 = vector.broadcast %102 : vector<1x32xf32> to vector<2x32xf32>
    %492 = arith.addf %490, %491 : vector<2x32xf32>
    %493 = arith.mulf %480, %492 : vector<2x32xf32>
    %494 = arith.addf %489, %493 : vector<2x32xf32>
    %495 = math.tanh %494 : vector<2x32xf32>
    %cst_126 = arith.constant 1.000000e+00 : f32
    %496 = vector.broadcast %cst_126 : f32 to vector<2x32xf32>
    %497 = arith.subf %496, %488 : vector<2x32xf32>
    %498 = arith.mulf %497, %495 : vector<2x32xf32>
    %499 = arith.mulf %488, %440 : vector<2x32xf32>
    %500 = arith.addf %498, %499 : vector<2x32xf32>
    %cst_127 = arith.constant dense<0.000000e+00> : vector<2x384xf32>
    %501 = tpu.matmul %500, %104, %cst_127 {dimension_numbers = #tpu.dot_dimension_numbers<[1], [0], [0], [1], [0, 0, 1, 1], [], []>} : vector<2x32xf32>, vector<32x384xf32>, vector<2x384xf32> -> vector<2x384xf32>
    %502 = vector.broadcast %105 : vector<1x384xf32> to vector<2x384xf32>
    %503 = arith.addf %501, %502 : vector<2x384xf32>
    %504 = arith.addf %503, %472 : vector<2x384xf32>
    %505 = vector.extract_strided_slice %504 {offsets = [0, 0], sizes = [2, 32], strides = [1, 1]} : vector<2x384xf32> to vector<2x32xf32>
    %506 = arith.negf %505 : vector<2x32xf32>
    %507 = math.exp %506 : vector<2x32xf32>
    %cst_128 = arith.constant 1.000000e+00 : f32
    %508 = vector.broadcast %cst_128 : f32 to vector<2x32xf32>
    %509 = arith.addf %508, %507 : vector<2x32xf32>
    %510 = arith.divf %508, %509 : vector<2x32xf32>
    %511 = vector.extract_strided_slice %504 {offsets = [0, 128], sizes = [2, 32], strides = [1, 1]} : vector<2x384xf32> to vector<2x32xf32>
    %512 = arith.negf %511 : vector<2x32xf32>
    %513 = math.exp %512 : vector<2x32xf32>
    %cst_129 = arith.constant 1.000000e+00 : f32
    %514 = vector.broadcast %cst_129 : f32 to vector<2x32xf32>
    %515 = arith.addf %514, %513 : vector<2x32xf32>
    %516 = arith.divf %514, %515 : vector<2x32xf32>
    %517 = vector.extract_strided_slice %503 {offsets = [0, 256], sizes = [2, 32], strides = [1, 1]} : vector<2x384xf32> to vector<2x32xf32>
    %518 = vector.extract_strided_slice %472 {offsets = [0, 256], sizes = [2, 32], strides = [1, 1]} : vector<2x384xf32> to vector<2x32xf32>
    %519 = vector.broadcast %106 : vector<1x32xf32> to vector<2x32xf32>
    %520 = arith.addf %518, %519 : vector<2x32xf32>
    %521 = arith.mulf %510, %520 : vector<2x32xf32>
    %522 = arith.addf %517, %521 : vector<2x32xf32>
    %523 = math.tanh %522 : vector<2x32xf32>
    %cst_130 = arith.constant 1.000000e+00 : f32
    %524 = vector.broadcast %cst_130 : f32 to vector<2x32xf32>
    %525 = arith.subf %524, %516 : vector<2x32xf32>
    %526 = arith.mulf %525, %523 : vector<2x32xf32>
    %527 = arith.mulf %516, %468 : vector<2x32xf32>
    %528 = arith.addf %526, %527 : vector<2x32xf32>
    %529 = vector.extract_strided_slice %100 {offsets = [0, 7, 0], sizes = [2, 1, 384], strides = [1, 1, 1]} : vector<2x8x384xf32> to vector<2x1x384xf32>
    %530 = vector.shape_cast %529 : vector<2x1x384xf32> to vector<2x384xf32>
    %cst_131 = arith.constant dense<0.000000e+00> : vector<2x384xf32>
    %531 = tpu.matmul %500, %101, %cst_131 {dimension_numbers = #tpu.dot_dimension_numbers<[1], [0], [0], [1], [0, 0, 1, 1], [], []>} : vector<2x32xf32>, vector<32x384xf32>, vector<2x384xf32> -> vector<2x384xf32>
    %cst_132 = arith.constant dense<0.000000e+00> : vector<2x384xf32>
    %532 = tpu.matmul %528, %103, %cst_132 {dimension_numbers = #tpu.dot_dimension_numbers<[1], [0], [0], [1], [0, 0, 1, 1], [], []>} : vector<2x32xf32>, vector<32x384xf32>, vector<2x384xf32> -> vector<2x384xf32>
    %533 = vector.extract_strided_slice %530 {offsets = [0, 0], sizes = [2, 32], strides = [1, 1]} : vector<2x384xf32> to vector<2x32xf32>
    %534 = vector.extract_strided_slice %531 {offsets = [0, 0], sizes = [2, 32], strides = [1, 1]} : vector<2x384xf32> to vector<2x32xf32>
    %535 = arith.addf %533, %534 : vector<2x32xf32>
    %536 = arith.negf %535 : vector<2x32xf32>
    %537 = math.exp %536 : vector<2x32xf32>
    %cst_133 = arith.constant 1.000000e+00 : f32
    %538 = vector.broadcast %cst_133 : f32 to vector<2x32xf32>
    %539 = arith.addf %538, %537 : vector<2x32xf32>
    %540 = arith.divf %538, %539 : vector<2x32xf32>
    %541 = vector.extract_strided_slice %530 {offsets = [0, 128], sizes = [2, 32], strides = [1, 1]} : vector<2x384xf32> to vector<2x32xf32>
    %542 = vector.extract_strided_slice %531 {offsets = [0, 128], sizes = [2, 32], strides = [1, 1]} : vector<2x384xf32> to vector<2x32xf32>
    %543 = arith.addf %541, %542 : vector<2x32xf32>
    %544 = arith.negf %543 : vector<2x32xf32>
    %545 = math.exp %544 : vector<2x32xf32>
    %cst_134 = arith.constant 1.000000e+00 : f32
    %546 = vector.broadcast %cst_134 : f32 to vector<2x32xf32>
    %547 = arith.addf %546, %545 : vector<2x32xf32>
    %548 = arith.divf %546, %547 : vector<2x32xf32>
    %549 = vector.extract_strided_slice %530 {offsets = [0, 256], sizes = [2, 32], strides = [1, 1]} : vector<2x384xf32> to vector<2x32xf32>
    %550 = vector.extract_strided_slice %531 {offsets = [0, 256], sizes = [2, 32], strides = [1, 1]} : vector<2x384xf32> to vector<2x32xf32>
    %551 = vector.broadcast %102 : vector<1x32xf32> to vector<2x32xf32>
    %552 = arith.addf %550, %551 : vector<2x32xf32>
    %553 = arith.mulf %540, %552 : vector<2x32xf32>
    %554 = arith.addf %549, %553 : vector<2x32xf32>
    %555 = math.tanh %554 : vector<2x32xf32>
    %cst_135 = arith.constant 1.000000e+00 : f32
    %556 = vector.broadcast %cst_135 : f32 to vector<2x32xf32>
    %557 = arith.subf %556, %548 : vector<2x32xf32>
    %558 = arith.mulf %557, %555 : vector<2x32xf32>
    %559 = arith.mulf %548, %500 : vector<2x32xf32>
    %560 = arith.addf %558, %559 : vector<2x32xf32>
    %cst_136 = arith.constant dense<0.000000e+00> : vector<2x384xf32>
    %561 = tpu.matmul %560, %104, %cst_136 {dimension_numbers = #tpu.dot_dimension_numbers<[1], [0], [0], [1], [0, 0, 1, 1], [], []>} : vector<2x32xf32>, vector<32x384xf32>, vector<2x384xf32> -> vector<2x384xf32>
    %562 = vector.broadcast %105 : vector<1x384xf32> to vector<2x384xf32>
    %563 = arith.addf %561, %562 : vector<2x384xf32>
    %564 = arith.addf %563, %532 : vector<2x384xf32>
    %565 = vector.extract_strided_slice %564 {offsets = [0, 0], sizes = [2, 32], strides = [1, 1]} : vector<2x384xf32> to vector<2x32xf32>
    %566 = arith.negf %565 : vector<2x32xf32>
    %567 = math.exp %566 : vector<2x32xf32>
    %cst_137 = arith.constant 1.000000e+00 : f32
    %568 = vector.broadcast %cst_137 : f32 to vector<2x32xf32>
    %569 = arith.addf %568, %567 : vector<2x32xf32>
    %570 = arith.divf %568, %569 : vector<2x32xf32>
    %571 = vector.extract_strided_slice %564 {offsets = [0, 128], sizes = [2, 32], strides = [1, 1]} : vector<2x384xf32> to vector<2x32xf32>
    %572 = arith.negf %571 : vector<2x32xf32>
    %573 = math.exp %572 : vector<2x32xf32>
    %cst_138 = arith.constant 1.000000e+00 : f32
    %574 = vector.broadcast %cst_138 : f32 to vector<2x32xf32>
    %575 = arith.addf %574, %573 : vector<2x32xf32>
    %576 = arith.divf %574, %575 : vector<2x32xf32>
    %577 = vector.extract_strided_slice %563 {offsets = [0, 256], sizes = [2, 32], strides = [1, 1]} : vector<2x384xf32> to vector<2x32xf32>
    %578 = vector.extract_strided_slice %532 {offsets = [0, 256], sizes = [2, 32], strides = [1, 1]} : vector<2x384xf32> to vector<2x32xf32>
    %579 = vector.broadcast %106 : vector<1x32xf32> to vector<2x32xf32>
    %580 = arith.addf %578, %579 : vector<2x32xf32>
    %581 = arith.mulf %570, %580 : vector<2x32xf32>
    %582 = arith.addf %577, %581 : vector<2x32xf32>
    %583 = math.tanh %582 : vector<2x32xf32>
    %cst_139 = arith.constant 1.000000e+00 : f32
    %584 = vector.broadcast %cst_139 : f32 to vector<2x32xf32>
    %585 = arith.subf %584, %576 : vector<2x32xf32>
    %586 = arith.mulf %585, %583 : vector<2x32xf32>
    %587 = arith.mulf %576, %528 : vector<2x32xf32>
    %588 = arith.addf %586, %587 : vector<2x32xf32>
    %cst_140 = arith.constant 0.000000e+00 : f32
    %589 = vector.broadcast %cst_140 : f32 to vector<2x32xf32>
    %590 = arith.maximumf %588, %589 : vector<2x32xf32>
    %c0_141 = arith.constant 0 : index
    %c0_142 = arith.constant 0 : index
    %591 = vector.load %arg22[%c0_141, %c0_142] : memref<32x128xf32, #tpu.memory_space<vmem>>, vector<32x128xf32>
    %cst_143 = arith.constant dense<0.000000e+00> : vector<2x128xf32>
    %592 = tpu.matmul %590, %591, %cst_143 {dimension_numbers = #tpu.dot_dimension_numbers<[1], [0], [0], [1], [0, 0, 1, 1], [], []>} : vector<2x32xf32>, vector<32x128xf32>, vector<2x128xf32> -> vector<2x128xf32>
    %c0_144 = arith.constant 0 : index
    %c0_145 = arith.constant 0 : index
    %593 = vector.load %arg23[%c0_144, %c0_145] : memref<1x128xf32, #tpu.memory_space<vmem>>, vector<1x128xf32>
    %594 = vector.broadcast %593 : vector<1x128xf32> to vector<2x128xf32>
    %595 = arith.addf %592, %594 : vector<2x128xf32>
    %c0_146 = arith.constant 0 : index
    %c0_147 = arith.constant 0 : index
    %596 = vector.load %arg24[%c0_146, %c0_147] : memref<2x128xf32, #tpu.memory_space<vmem>>, vector<2x128xf32>
    tpu.vector_store %arg24[%c0_146, %c0_147], %595 {strides = array<i32>} : memref<2x128xf32, #tpu.memory_space<vmem>>, vector<2x128xf32>,
    %c0_148 = arith.constant 0 : index
    %c0_149 = arith.constant 0 : index
    %c0_150 = arith.constant 0 : index
    %597 = vector.load %arg25[%c0_148, %c0_149, %c0_150] : memref<2x2x32xf32, #tpu.memory_space<vmem>>, vector<1x2x32xf32>
    %598 = vector.shape_cast %597 : vector<1x2x32xf32> to vector<2x32xf32>
    %599 = vector.shape_cast %560 : vector<2x32xf32> to vector<1x2x32xf32>
    tpu.vector_store %arg25[%c0_148, %c0_149, %c0_150], %599 {strides = array<i32>} : memref<2x2x32xf32, #tpu.memory_space<vmem>>, vector<1x2x32xf32>,
    %c1 = arith.constant 1 : index
    %c0_151 = arith.constant 0 : index
    %c0_152 = arith.constant 0 : index
    %600 = vector.load %arg25[%c1, %c0_151, %c0_152] : memref<2x2x32xf32, #tpu.memory_space<vmem>>, vector<1x2x32xf32>
    %601 = vector.shape_cast %600 : vector<1x2x32xf32> to vector<2x32xf32>
    %602 = vector.shape_cast %588 : vector<2x32xf32> to vector<1x2x32xf32>
    tpu.vector_store %arg25[%c1, %c0_151, %c0_152], %602 {strides = array<i32>} : memref<2x2x32xf32, #tpu.memory_space<vmem>>, vector<1x2x32xf32>,
    return
  }
}

</mosaic_0001>

<bundles_post_ra>
// kernel: omni_gru_forward.1
= control target key start
LH: loop header
LB: loop body
LE: loop exit
PB: predicated region body
PF: predicated region fallthrough
CT: control target
= control target key end

     0   :  { %s14880_s0 = inlined_call_operand.vmem [shape: f32[16,1024], index: 0, kind: input, shape index: {}]   ;;  %s14881_s1 = inlined_call_operand.vmem [shape: f32[16,2304], index: 1, kind: input, shape index: {}]   ;;  %s14882_s2 = inlined_call_operand.vmem [shape: f32[64,517], index: 2, kind: input, shape index: {}]   ;;  %s14883_s3 = inlined_call_operand.vmem [shape: f32[16,517], index: 3, kind: input, shape index: {}]   ;;  %s14884_s4 = inlined_call_operand.vmem [shape: bf16[1024,32], index: 4, kind: input, shape index: {}]   ;;  %s14885_s5 = inlined_call_operand.vmem [shape: f32[1,32], index: 5, kind: input, shape index: {}]   ;;  %s14886_s6 = inlined_call_operand.vmem [shape: bf16[2304,32], index: 6, kind: input, shape index: {}]   ;;  %s14887_s7 = inlined_call_operand.vmem [shape: f32[1,32], index: 7, kind: input, shape index: {}]   ;;  %s14888_s8 = inlined_call_operand.vmem [shape: f32[517,32], index: 8, kind: input, shape index: {}]   ;;  %s14889_s9 = inlined_call_operand.vmem [shape: f32[1,32], index: 9, kind: input, shape index: {}]   ;;  %s14890_s10 = inlined_call_operand.vmem [shape: f32[517,32], index: 10, kind: input, shape index: {}]   ;;  %s14891_s11 = inlined_call_operand.vmem [shape: f32[1,32], index: 11, kind: input, shape index: {}]   ;;  %s14892_s12 = inlined_call_operand.vmem [shape: f32[32,32], index: 12, kind: input, shape index: {}]   ;;  %s14893_s13 = inlined_call_operand.vmem [shape: f32[1,32], index: 13, kind: input, shape index: {}]   ;;  %s14894_s14 = inlined_call_operand.vmem [shape: f32[96,384], index: 14, kind: input, shape index: {}]   ;;  %s14895_s15 = inlined_call_operand.vmem [shape: f32[1,384], index: 15, kind: input, shape index: {}]   ;;  %s14896_s16 = inlined_call_operand.vmem [shape: f32[32,384], index: 16, kind: input, shape index: {}]   ;;  %s14897_s17 = inlined_call_operand.vmem [shape: f32[1,32], index: 17, kind: input, shape index: {}]   ;;  %s14898_s18 = inlined_call_operand.vmem [shape: f32[32,384], index: 18, kind: input, shape index: {}]   ;;  %s14899_s19 = inlined_call_operand.vmem [shape: f32[32,384], index: 19, kind: input, shape index: {}]   ;;  %s14900_s20 = inlined_call_operand.vmem [shape: f32[1,384], index: 20, kind: input, shape index: {}]   ;;  %s14901_s21 = inlined_call_operand.vmem [shape: f32[1,32], index: 21, kind: input, shape index: {}]   ;;  %s14902_s22 = inlined_call_operand.vmem [shape: f32[32,128], index: 22, kind: input, shape index: {}]   ;;  %s14903_s23 = inlined_call_operand.vmem [shape: f32[1,128], index: 23, kind: input, shape index: {}]   ;;  %s14904_s24 = inlined_call_operand.hbm [shape: f32[2,128], index: 24, kind: output, shape index: {0}]   ;;  %s14905_s25 = inlined_call_operand.hbm [shape: f32[2,2,32], index: 25, kind: output, shape index: {1}]  }
   0x1   :  { %14913 = sst [smem:[#allocation8_spill]] %s14880_s0 }
   0x2   :  { %14914 = sst [smem:[#allocation9_spill]] %s14881_s1 }
   0x3   :  { %14915 = sst [smem:[#allocation10_spill]] %s14882_s2 }
   0x4   :  { %14916 = sst [smem:[#allocation11_spill]] %s14883_s3 }
   0x5   :  { %14917 = sst [smem:[#allocation12_spill]] %s14884_s4 }
   0x6   :  { %14918 = sst [smem:[#allocation13_spill]] %s14885_s5 }
   0x7   :  { %14919 = sst [smem:[#allocation14_spill]] %s14886_s6 }
   0x8   :  { %14920 = sst [smem:[#allocation15_spill]] %s14887_s7 }
   0x9   :  { %14921 = sst [smem:[#allocation16_spill]] %s14888_s8 }
   0xa   :  { %14922 = sst [smem:[#allocation17_spill]] %s14889_s9 }
   0xb   :  { %31 = vsyncpa [#allocation3], 0  ;;  %s14923_s6 = sld [smem:[#allocation12_spill]]  ;;  %s14924_s27 = sld [smem:[#allocation8_spill]]  ;;  %vm2512_vm0 = vcmask 1044480   ;;  %vm2487_vm1 = vcmask 39936  }
   0xc   :  { %s14925_s8 = sld [smem:[#allocation14_spill]]  ;;  %s14926_s28 = sld [smem:[#allocation9_spill]] }
   0xd   :  { %s14928_s4 = sld [smem:[#allocation10_spill]]  ;;  %s14929_s26 = sld [smem:[#allocation13_spill]] }
  0x11   :  { %v11285_v0 = vld [vmem:[%s14923_s6 + $0x40] sm:$0xff]   ;;  %v11289_v4 = vld [vmem:[%s14923_s6 + $0x48] sm:$0xff]   ;;  %v11293_v8 = vld [vmem:[%s14923_s6 + $0x50] sm:$0xff]  }
  0x12   :  { %v11286_v1 = vld [vmem:[%s14923_s6] sm:$0xff]   ;;  %9752 = vmatprep.subr.bf16.mxu0 %v11285_v0  ;;  %v11290_v5 = vld [vmem:[%s14923_s6 + $0x8] sm:$0xff]   ;;  %v11294_v9 = vld [vmem:[%s14923_s6 + $0x10] sm:$0xff]  }
  0x13   :  { %v11287_v2 = vld [vmem:[%s14923_s6 + $0xc0] sm:$0xff]   ;;  %9753 = vmatpush3.bf16.msra.mxu0 %v11286_v1  ;;  %v11291_v6 = vld [vmem:[%s14923_s6 + $0xc8] sm:$0xff]   ;;  %v11295_v10 = vld [vmem:[%s14923_s6 + $0xd0] sm:$0xff]  }
  0x14   :  { %v11288_v3 = vld [vmem:[%s14923_s6 + $0x80] sm:$0xff]   ;;  %9774 = vmatprep.subr.bf16.mxu1 %v11287_v2  ;;  %9754 = vmatprep.subr.bf16.mxu0 %v11289_v4  ;;  %v11292_v7 = vld [vmem:[%s14923_s6 + $0x88] sm:$0xff]   ;;  %v11296_v11 = vld [vmem:[%s14923_s6 + $0x90] sm:$0xff]  }
  0x15   :  { %9775 = vmatpush3.bf16.msra.mxu1 %v11288_v3  ;;  %v11297_v12 = vld [vmem:[%s14923_s6 + $0x58] sm:$0xff]   ;;  %v11301_v16 = vld [vmem:[%s14923_s6 + $0x60] sm:$0xff]   ;;  %v11305_v20 = vld [vmem:[%s14923_s6 + $0x68] sm:$0xff]  }
  0x16   :  { %9776 = vmatprep.subr.bf16.mxu1 %v11291_v6  ;;  %v11298_v13 = vld [vmem:[%s14923_s6 + $0x18] sm:$0xff]   ;;  %v11302_v17 = vld [vmem:[%s14923_s6 + $0x20] sm:$0xff]   ;;  %v11306_v21 = vld [vmem:[%s14923_s6 + $0x28] sm:$0xff]  }
  0x17   :  { %9755 = vmatpush3.bf16.msra.mxu0 %v11290_v5  ;;  %v11299_v14 = vld [vmem:[%s14923_s6 + $0xd8] sm:$0xff]   ;;  %v11303_v18 = vld [vmem:[%s14923_s6 + $0xe0] sm:$0xff]   ;;  %v11307_v22 = vld [vmem:[%s14923_s6 + $0xe8] sm:$0xff]  }
  0x18   :  { %9756 = vmatprep.subr.bf16.mxu0 %v11293_v8  ;;  %v11300_v15 = vld [vmem:[%s14923_s6 + $0x98] sm:$0xff]   ;;  %v11304_v19 = vld [vmem:[%s14923_s6 + $0xa0] sm:$0xff]   ;;  %v11308_v23 = vld [vmem:[%s14923_s6 + $0xa8] sm:$0xff]  }
  0x19   :  { %9777 = vmatpush3.bf16.msra.mxu1 %v11292_v7  ;;  %v11309_v24 = vld [vmem:[%s14923_s6 + $0x70] sm:$0xff]   ;;  %v11313_v28 = vld [vmem:[%s14923_s6 + $0x78] sm:$0xff]   ;;  %v83_v31 = vld [vmem:[%s14924_s27 + $0x8] sm:$0xff] }
  0x1a   :  { %9778 = vmatprep.subr.bf16.mxu1 %v11295_v10  ;;  %v11310_v25 = vld [vmem:[%s14923_s6 + $0x30] sm:$0xff]   ;;  %v11314_v29 = vld [vmem:[%s14923_s6 + $0x38] sm:$0xff]   ;;  %v91_v32 = vld [vmem:[%s14924_s27 + $0x48] sm:$0xff] }
  0x1b   :  { %9757 = vmatpush3.bf16.msra.mxu0 %v11294_v9  ;;  %v11311_v26 = vld [vmem:[%s14923_s6 + $0xf0] sm:$0xff]   ;;  %v11315_v30 = vld [vmem:[%s14923_s6 + $0xf8] sm:$0xff]   ;;  %v99_v33 = vpack.c.bf16 %v91_v32, %v83_v31  ;;  %v82_v35 = vld [vmem:[%s14924_s27] sm:$0xff] }
  0x1c   :  { %9758 = vmatprep.subr.bf16.mxu0 %v11297_v12  ;;  %v11312_v27 = vld [vmem:[%s14923_s6 + $0xb0] sm:$0xff]   ;;  %v11316_v34 = vld [vmem:[%s14923_s6 + $0xb8] sm:$0xff]   ;;  %v90_v36 = vld [vmem:[%s14924_s27 + $0x40] sm:$0xff] }
  0x1d   :  { %9779 = vmatpush3.bf16.msra.mxu1 %v11296_v11  ;;  %657 = vmatprep.mubr.bf16.mxu0 %v99_v33  ;;  %v98_v37 = vpack.c.bf16 %v90_v36, %v82_v35  ;;  %v11317_v38 = vld [vmem:[%s14923_s6 + $0x140] sm:$0xff]   ;;  %v85_v39 = vld [vmem:[%s14924_s27 + $0x18] sm:$0xff]  ;;  %v84_v43 = vld [vmem:[%s14924_s27 + $0x10] sm:$0xff] }
  0x1e   :  { %9780 = vmatprep.subr.bf16.mxu1 %v11299_v14  ;;  %v93_v40 = vld [vmem:[%s14924_s27 + $0x58] sm:$0xff]  ;;  %v11318_v42 = vld [vmem:[%s14923_s6 + $0x100] sm:$0xff]   ;;  %v92_v44 = vld [vmem:[%s14924_s27 + $0x50] sm:$0xff] }
  0x1f   :  { %9759 = vmatpush3.bf16.msra.mxu0 %v11298_v13  ;;  %v101_v41 = vpack.c.bf16 %v93_v40, %v85_v39  ;;  %v100_v45 = vpack.c.bf16 %v92_v44, %v84_v43  ;;  %v11319_v46 = vld [vmem:[%s14923_s6 + $0x1c0] sm:$0xff]   ;;  %v11321_v48 = vld [vmem:[%s14923_s6 + $0x148] sm:$0xff]   ;;  %v11325_v52 = vld [vmem:[%s14923_s6 + $0x150] sm:$0xff]  }
  0x20   :  { %9760 = vmatprep.subr.bf16.mxu0 %v11301_v16  ;;  %v11320_v47 = vld [vmem:[%s14923_s6 + $0x180] sm:$0xff]   ;;  %v11322_v49 = vld [vmem:[%s14923_s6 + $0x108] sm:$0xff]   ;;  %v11326_v53 = vld [vmem:[%s14923_s6 + $0x110] sm:$0xff]  }
  0x21   :  { %9781 = vmatpush3.bf16.msra.mxu1 %v11300_v15  ;;  %698 = vmatprep.mubr.bf16.mxu1 %v101_v41  ;;  %v11323_v50 = vld [vmem:[%s14923_s6 + $0x1c8] sm:$0xff]   ;;  %v11327_v54 = vld [vmem:[%s14923_s6 + $0x1d0] sm:$0xff]   ;;  %v11329_v56 = vld [vmem:[%s14923_s6 + $0x158] sm:$0xff]  }
  0x22   :  { %9782 = vmatprep.subr.bf16.mxu1 %v11303_v18  ;;  %v11324_v51 = vld [vmem:[%s14923_s6 + $0x188] sm:$0xff]   ;;  %v11328_v55 = vld [vmem:[%s14923_s6 + $0x190] sm:$0xff]   ;;  %v11330_v57 = vld [vmem:[%s14923_s6 + $0x118] sm:$0xff]  }
  0x23   :  { %9761 = vmatpush3.bf16.msra.mxu0 %v11302_v17  ;;  %v11331_v58 = vld [vmem:[%s14923_s6 + $0x1d8] sm:$0xff]   ;;  %v11333_v60 = vld [vmem:[%s14923_s6 + $0x160] sm:$0xff]   ;;  %v11337_v0 = vld [vmem:[%s14923_s6 + $0x168] sm:$0xff]  }
  0x24   :  { %9762 = vmatprep.subr.bf16.mxu0 %v11305_v20  ;;  %v11332_v59 = vld [vmem:[%s14923_s6 + $0x198] sm:$0xff]   ;;  %v11334_v61 = vld [vmem:[%s14923_s6 + $0x120] sm:$0xff]   ;;  %v11338_v1 = vld [vmem:[%s14923_s6 + $0x128] sm:$0xff]  }
  0x25   :  { %9783 = vmatpush3.bf16.msra.mxu1 %v11304_v19  ;;  %v11335_v62 = vld [vmem:[%s14923_s6 + $0x1e0] sm:$0xff]   ;;  %v11339_v2 = vld [vmem:[%s14923_s6 + $0x1e8] sm:$0xff]   ;;  %v11341_v4 = vld [vmem:[%s14923_s6 + $0x170] sm:$0xff]  }
  0x26   :  { %9784 = vmatprep.subr.bf16.mxu1 %v11307_v22  ;;  %v11336_v63 = vld [vmem:[%s14923_s6 + $0x1a0] sm:$0xff]   ;;  %v11340_v3 = vld [vmem:[%s14923_s6 + $0x1a8] sm:$0xff]   ;;  %v11342_v5 = vld [vmem:[%s14923_s6 + $0x130] sm:$0xff]  }
  0x27   :  { %9763 = vmatpush3.bf16.msra.mxu0 %v11306_v21  ;;  %v11343_v6 = vld [vmem:[%s14923_s6 + $0x1f0] sm:$0xff]   ;;  %v11345_v8 = vld [vmem:[%s14923_s6 + $0x178] sm:$0xff]   ;;  %v87_v11 = vld [vmem:[%s14924_s27 + $0x28] sm:$0xff] }
  0x28   :  { %9764 = vmatprep.subr.bf16.mxu0 %v11309_v24  ;;  %v11344_v7 = vld [vmem:[%s14923_s6 + $0x1b0] sm:$0xff]   ;;  %v11346_v9 = vld [vmem:[%s14923_s6 + $0x138] sm:$0xff]   ;;  %v95_v12 = vld [vmem:[%s14924_s27 + $0x68] sm:$0xff] }
  0x29   :  { %9785 = vmatpush3.bf16.msra.mxu1 %v11308_v23  ;;  %v11347_v10 = vld [vmem:[%s14923_s6 + $0x1f8] sm:$0xff]   ;;  %v103_v13 = vpack.c.bf16 %v95_v12, %v87_v11  ;;  %v86_v15 = vld [vmem:[%s14924_s27 + $0x20] sm:$0xff]  ;;  %v88_v23 = vld [vmem:[%s14924_s27 + $0x30] sm:$0xff] }
  0x2a   :  { %9786 = vmatprep.subr.bf16.mxu1 %v11311_v26  ;;  %v11348_v14 = vld [vmem:[%s14923_s6 + $0x1b8] sm:$0xff]   ;;  %v94_v16 = vld [vmem:[%s14924_s27 + $0x60] sm:$0xff]  ;;  %v96_v24 = vld [vmem:[%s14924_s27 + $0x70] sm:$0xff] }
  0x2b   :  { %9765 = vmatpush3.bf16.msra.mxu0 %v11310_v25  ;;  %v102_v17 = vpack.c.bf16 %v94_v16, %v86_v15  ;;  %v11349_v18 = vld [vmem:[%s14925_s8 + $0x40] sm:$0xff]   ;;  %v89_v19 = vld [vmem:[%s14924_s27 + $0x38] sm:$0xff]  ;;  %v104_v25 = vpack.c.bf16 %v96_v24, %v88_v23  ;;  %v11356_v31 = vld [vmem:[%s14925_s8 + $0x88] sm:$0xff]  }
  0x2c   :  { %9766 = vmatprep.subr.bf16.mxu0 %v11313_v28  ;;  %v97_v20 = vld [vmem:[%s14924_s27 + $0x78] sm:$0xff]  ;;  %v11350_v22 = vld [vmem:[%s14925_s8] sm:$0xff]   ;;  %v11353_v28 = vld [vmem:[%s14925_s8 + $0x48] sm:$0xff]   ;;  %s14927_s27 = sld [smem:[#allocation16_spill]] }
  0x2d   :  { %9787 = vmatpush3.bf16.msra.mxu1 %v11312_v27  ;;  %v105_v21 = vpack.c.bf16 %v97_v20, %v89_v19  ;;  %v11351_v26 = vld [vmem:[%s14925_s8 + $0xc0] sm:$0xff]   ;;  %v11357_v32 = vld [vmem:[%s14925_s8 + $0x50] sm:$0xff]   ;;  %v11361_v36 = vld [vmem:[%s14925_s8 + $0x58] sm:$0xff]  }
  0x2e   :  { %9788 = vmatprep.subr.bf16.mxu1 %v11315_v30  ;;  %v11352_v27 = vld [vmem:[%s14925_s8 + $0x80] sm:$0xff]   ;;  %v11355_v30 = vld [vmem:[%s14925_s8 + $0xc8] sm:$0xff]   ;;  %v11358_v33 = vld [vmem:[%s14925_s8 + $0x10] sm:$0xff]  }
  0x2f   :  { %9767 = vmatpush3.bf16.msra.mxu0 %v11314_v29  ;;  %v11354_v29 = vld [vmem:[%s14925_s8 + $0x8] sm:$0xff]   ;;  %v11360_v35 = vld [vmem:[%s14925_s8 + $0x90] sm:$0xff]   ;;  %v11364_v39 = vld [vmem:[%s14925_s8 + $0x98] sm:$0xff]  }
  0x30   :  { %9796 = vmatprep.subr.bf16.mxu0 %v11317_v38  ;;  %v11363_v38 = vld [vmem:[%s14925_s8 + $0xd8] sm:$0xff]   ;;  %v11365_v40 = vld [vmem:[%s14925_s8 + $0x60] sm:$0xff]   ;;  %v11369_v44 = vld [vmem:[%s14925_s8 + $0x68] sm:$0xff]  }
  0x31   :  { %9789 = vmatpush3.bf16.msra.mxu1 %v11316_v34  ;;  %v11359_v34 = vld [vmem:[%s14925_s8 + $0xd0] sm:$0xff]   ;;  %v11366_v41 = vld [vmem:[%s14925_s8 + $0x20] sm:$0xff]   ;;  %v11388_v11 = vld [vmem:[%s14925_s8 + $0x188] sm:$0xff]  }
  0x32   :  { %658 = vmatmul.mubr.bf16.vlgmr.msra.gmra.mrb[0].mxu0 %v98_v37  ;;  %9818 = vmatprep.subr.bf16.mxu1 %v11319_v46  ;;  %v11362_v37 = vld [vmem:[%s14925_s8 + $0x18] sm:$0xff]   ;;  %v11368_v43 = vld [vmem:[%s14925_s8 + $0xa0] sm:$0xff]   ;;  %v11371_v46 = vld [vmem:[%s14925_s8 + $0xe8] sm:$0xff]  }
  0x33   :  { %9797 = vmatpush3.bf16.msra.mxu0 %v11318_v42  ;;  %739 = vmatprep.mubr.bf16.mxu0 %v103_v13  ;;  %v11367_v42 = vld [vmem:[%s14925_s8 + $0xe0] sm:$0xff]   ;;  %v11389_v12 = vld [vmem:[%s14925_s8 + $0x150] sm:$0xff]   ;;  %v11393_v16 = vld [vmem:[%s14925_s8 + $0x158] sm:$0xff]  }
  0x34   :  { %699 = vmatmul.mubr.bf16.vlgmr.msra.gmra.mrb[0].mxu1 %v100_v45  ;;  %9798 = vmatprep.subr.bf16.mxu0 %v11321_v48  ;;  %v11370_v45 = vld [vmem:[%s14925_s8 + $0x28] sm:$0xff]   ;;  %v11373_v48 = vld [vmem:[%s14925_s8 + $0x70] sm:$0xff]   ;;  %v11396_v19 = vld [vmem:[%s14925_s8 + $0x198] sm:$0xff]  }
  0x35   :  { %9819 = vmatpush3.bf16.msra.mxu1 %v11320_v47  ;;  %780 = vmatprep.mubr.bf16.mxu1 %v105_v21  ;;  %v11372_v47 = vld [vmem:[%s14925_s8 + $0xa8] sm:$0xff]   ;;  %v11390_v13 = vld [vmem:[%s14925_s8 + $0x110] sm:$0xff]   ;;  %v11397_v20 = vld [vmem:[%s14925_s8 + $0x160] sm:$0xff]  }
  0x36   :  { %9820 = vmatprep.subr.bf16.mxu1 %v11323_v50  ;;  %v11375_v50 = vld [vmem:[%s14925_s8 + $0xf0] sm:$0xff]   ;;  %v11398_v21 = vld [vmem:[%s14925_s8 + $0x120] sm:$0xff]   ;;  %v11401_v24 = vld [vmem:[%s14925_s8 + $0x168] sm:$0xff]  }
  0x37   :  { %9799 = vmatpush3.bf16.msra.mxu0 %v11322_v49  ;;  %v11374_v49 = vld [vmem:[%s14925_s8 + $0x30] sm:$0xff]   ;;  %v11400_v23 = vld [vmem:[%s14925_s8 + $0x1a0] sm:$0xff]  }
  0x38   :  { %9800 = vmatprep.subr.bf16.mxu0 %v11325_v52  ;;  %v11377_v52 = vld [vmem:[%s14925_s8 + $0x78] sm:$0xff]   ;;  %v11392_v15 = vld [vmem:[%s14925_s8 + $0x190] sm:$0xff]  }
  0x39   :  { %9821 = vmatpush3.bf16.msra.mxu1 %v11324_v51  ;;  %v11376_v51 = vld [vmem:[%s14925_s8 + $0xb0] sm:$0xff]  }
  0x3a   :  { %9822 = vmatprep.subr.bf16.mxu1 %v11327_v54  ;;  %v11379_v54 = vld [vmem:[%s14925_s8 + $0xf8] sm:$0xff]  }
  0x3b   :  { %9801 = vmatpush3.bf16.msra.mxu0 %v11326_v53  ;;  %v11378_v53 = vld [vmem:[%s14925_s8 + $0x38] sm:$0xff]  }
  0x3c   :  { %9802 = vmatprep.subr.bf16.mxu0 %v11329_v56  ;;  %v810_v56 = vld [vmem:[%s14926_s28 + $0x98] sm:$0xff] }
  0x3d   :  { %9823 = vmatpush3.bf16.msra.mxu1 %v11328_v55  ;;  %v792_v55 = vld [vmem:[%s14926_s28 + $0x8] sm:$0xff] }
  0x3e   :  { %9824 = vmatprep.subr.bf16.mxu1 %v11331_v58  ;;  %v11380_v58 = vld [vmem:[%s14925_s8 + $0xb8] sm:$0xff]  }
  0x3f   :  { %9803 = vmatpush3.bf16.msra.mxu0 %v11330_v57  ;;  %v828_v57 = vpack.c.bf16 %v810_v56, %v792_v55  ;;  %v11420_v55 = vld [vmem:[%s14925_s8 + $0x288] sm:$0xff]   ;;  %v11421_v56 = vld [vmem:[%s14925_s8 + $0x250] sm:$0xff]  }
  0x40   :  { %9804 = vmatprep.subr.bf16.mxu0 %v11333_v60  ;;  %v809_v60 = vld [vmem:[%s14926_s28 + $0x90] sm:$0xff] }
  0x41   :  { %9825 = vmatpush3.bf16.msra.mxu1 %v11332_v59  ;;  %v791_v59 = vld [vmem:[%s14926_s28] sm:$0xff] }
  0x42   :  { %9826 = vmatprep.subr.bf16.mxu1 %v11335_v62  ;;  %v11381_v62 = vld [vmem:[%s14925_s8 + $0x140] sm:$0xff]  }
  0x43   :  { %9805 = vmatpush3.bf16.msra.mxu0 %v11334_v61  ;;  %v827_v61 = vpack.c.bf16 %v809_v60, %v791_v59  ;;  %v11424_v59 = vld [vmem:[%s14925_s8 + $0x290] sm:$0xff]   ;;  %v11425_v60 = vld [vmem:[%s14925_s8 + $0x258] sm:$0xff]  }
  0x44   :  { %9806 = vmatprep.subr.bf16.mxu0 %v11337_v0  ;;  %v812_v0 = vld [vmem:[%s14926_s28 + $0xa8] sm:$0xff] }
  0x45   :  { %9827 = vmatpush3.bf16.msra.mxu1 %v11336_v63  ;;  %v794_v63 = vld [vmem:[%s14926_s28 + $0x18] sm:$0xff] }
  0x46   :  { %9828 = vmatprep.subr.bf16.mxu1 %v11339_v2  ;;  %v11382_v2 = vld [vmem:[%s14925_s8 + $0x100] sm:$0xff]  }
  0x47   :  { %9807 = vmatpush3.bf16.msra.mxu0 %v11338_v1  ;;  %v830_v1 = vpack.c.bf16 %v812_v0, %v794_v63  ;;  %v11428_v63 = vld [vmem:[%s14925_s8 + $0x298] sm:$0xff]   ;;  %v11429_v0 = vld [vmem:[%s14925_s8 + $0x260] sm:$0xff]  }
  0x48   :  { %9808 = vmatprep.subr.bf16.mxu0 %v11341_v4  ;;  %v811_v4 = vld [vmem:[%s14926_s28 + $0xa0] sm:$0xff] }
  0x49   :  { %9829 = vmatpush3.bf16.msra.mxu1 %v11340_v3  ;;  %v793_v3 = vld [vmem:[%s14926_s28 + $0x10] sm:$0xff] }
  0x4a   :  { %9830 = vmatprep.subr.bf16.mxu1 %v11343_v6  ;;  %v11383_v6 = vld [vmem:[%s14925_s8 + $0x1c0] sm:$0xff]  }
  0x4b   :  { %9809 = vmatpush3.bf16.msra.mxu0 %v11342_v5  ;;  %v829_v5 = vpack.c.bf16 %v811_v4, %v793_v3  ;;  %v11432_v3 = vld [vmem:[%s14925_s8 + $0x2a0] sm:$0xff]   ;;  %v11433_v4 = vld [vmem:[%s14925_s8 + $0x268] sm:$0xff]  }
  0x4c   :  { %9810 = vmatprep.subr.bf16.mxu0 %v11345_v8  ;;  %v11385_v8 = vld [vmem:[%s14925_s8 + $0x148] sm:$0xff]  }
  0x4d   :  { %9831 = vmatpush3.bf16.msra.mxu1 %v11344_v7  ;;  %v11384_v7 = vld [vmem:[%s14925_s8 + $0x180] sm:$0xff]  }
  0x4e   :  { %9832 = vmatprep.subr.bf16.mxu1 %v11347_v10  ;;  %v11387_v10 = vld [vmem:[%s14925_s8 + $0x1c8] sm:$0xff]  }
  0x4f   :  { %9811 = vmatpush3.bf16.msra.mxu0 %v11346_v9  ;;  %v11386_v9 = vld [vmem:[%s14925_s8 + $0x108] sm:$0xff]  }
  0x50   :  { %9840 = vmatprep.subr.bf16.mxu0 %v11349_v18  ;;  %v11395_v18 = vld [vmem:[%s14925_s8 + $0x1d8] sm:$0xff]  }
  0x51   :  { %9833 = vmatpush3.bf16.msra.mxu1 %v11348_v14  ;;  %v11391_v14 = vld [vmem:[%s14925_s8 + $0x1d0] sm:$0xff]  }
  0x52   :  { %740 = vmatmul.mubr.bf16.vlgmr.msra.gmra.mrb[4].mxu0 %v102_v17  ;;  %9862 = vmatprep.subr.bf16.mxu1 %v11351_v26  ;;  %v11394_v17 = vld [vmem:[%s14925_s8 + $0x118] sm:$0xff]   ;;  %v11403_v26 = vld [vmem:[%s14925_s8 + $0x1e8] sm:$0xff]  }
  0x53   :  { %9841 = vmatpush3.bf16.msra.mxu0 %v11350_v22  ;;  %2036 = vmatprep.mubr.bf16.mxu0 %v828_v57  ;;  %v11399_v22 = vld [vmem:[%s14925_s8 + $0x1e0] sm:$0xff]   ;;  %v11422_v57 = vld [vmem:[%s14925_s8 + $0x210] sm:$0xff]  }
  0x54   :  { %781 = vmatmul.mubr.bf16.vlgmr.msra.gmra.mrb[4].mxu1 %v104_v25  ;;  %9842 = vmatprep.subr.bf16.mxu0 %v11353_v28  ;;  %v11402_v25 = vld [vmem:[%s14925_s8 + $0x128] sm:$0xff]   ;;  %v11405_v28 = vld [vmem:[%s14925_s8 + $0x170] sm:$0xff]  }
  0x55   :  { %9863 = vmatpush3.bf16.msra.mxu1 %v11352_v27  ;;  %2077 = vmatprep.mubr.bf16.mxu1 %v830_v1  ;;  %v11404_v27 = vld [vmem:[%s14925_s8 + $0x1a8] sm:$0xff]   ;;  %v11430_v1 = vld [vmem:[%s14925_s8 + $0x220] sm:$0xff]  }
  0x56   :  { %9864 = vmatprep.subr.bf16.mxu1 %v11355_v30  ;;  %v11407_v30 = vld [vmem:[%s14925_s8 + $0x1f0] sm:$0xff]  }
  0x57   :  { %9843 = vmatpush3.bf16.msra.mxu0 %v11354_v29  ;;  %v11406_v29 = vld [vmem:[%s14925_s8 + $0x130] sm:$0xff]  }
  0x58   :  { %9844 = vmatprep.subr.bf16.mxu0 %v11357_v32  ;;  %v11409_v32 = vld [vmem:[%s14925_s8 + $0x178] sm:$0xff]  }
  0x59   :  { %9865 = vmatpush3.bf16.msra.mxu1 %v11356_v31  ;;  %v11408_v31 = vld [vmem:[%s14925_s8 + $0x1b0] sm:$0xff]  }
  0x5a   :  { %9866 = vmatprep.subr.bf16.mxu1 %v11359_v34  ;;  %v11411_v34 = vld [vmem:[%s14925_s8 + $0x1f8] sm:$0xff]  }
  0x5b   :  { %9845 = vmatpush3.bf16.msra.mxu0 %v11358_v33  ;;  %v11410_v33 = vld [vmem:[%s14925_s8 + $0x138] sm:$0xff]  }
  0x5c   :  { %9846 = vmatprep.subr.bf16.mxu0 %v11361_v36  ;;  %v814_v36 = vld [vmem:[%s14926_s28 + $0xb8] sm:$0xff] }
  0x5d   :  { %9867 = vmatpush3.bf16.msra.mxu1 %v11360_v35  ;;  %v796_v35 = vld [vmem:[%s14926_s28 + $0x28] sm:$0xff] }
  0x5e   :  { %9868 = vmatprep.subr.bf16.mxu1 %v11363_v38  ;;  %v11412_v38 = vld [vmem:[%s14925_s8 + $0x1b8] sm:$0xff]  }
  0x5f   :  { %9847 = vmatpush3.bf16.msra.mxu0 %v11362_v37  ;;  %v832_v37 = vpack.c.bf16 %v814_v36, %v796_v35  ;;  %v11452_v35 = vld [vmem:[%s14925_s8 + $0x388] sm:$0xff]   ;;  %v11453_v36 = vld [vmem:[%s14925_s8 + $0x350] sm:$0xff]  }
  0x60   :  { %9848 = vmatprep.subr.bf16.mxu0 %v11365_v40  ;;  %v813_v40 = vld [vmem:[%s14926_s28 + $0xb0] sm:$0xff] }
  0x61   :  { %9869 = vmatpush3.bf16.msra.mxu1 %v11364_v39  ;;  %v795_v39 = vld [vmem:[%s14926_s28 + $0x20] sm:$0xff] }
  0x62   :  { %9870 = vmatprep.subr.bf16.mxu1 %v11367_v42  ;;  %v11413_v42 = vld [vmem:[%s14925_s8 + $0x240] sm:$0xff]  }
  0x63   :  { %9849 = vmatpush3.bf16.msra.mxu0 %v11366_v41  ;;  %v831_v41 = vpack.c.bf16 %v813_v40, %v795_v39  ;;  %v11456_v39 = vld [vmem:[%s14925_s8 + $0x390] sm:$0xff]   ;;  %v11457_v40 = vld [vmem:[%s14925_s8 + $0x358] sm:$0xff]  }
  0x64   :  { %9850 = vmatprep.subr.bf16.mxu0 %v11369_v44  ;;  %v816_v44 = vld [vmem:[%s14926_s28 + $0xc8] sm:$0xff] }
  0x65   :  { %9871 = vmatpush3.bf16.msra.mxu1 %v11368_v43  ;;  %v798_v43 = vld [vmem:[%s14926_s28 + $0x38] sm:$0xff] }
  0x66   :  { %9872 = vmatprep.subr.bf16.mxu1 %v11371_v46  ;;  %v11414_v46 = vld [vmem:[%s14925_s8 + $0x200] sm:$0xff]  }
  0x67   :  { %9851 = vmatpush3.bf16.msra.mxu0 %v11370_v45  ;;  %v834_v45 = vpack.c.bf16 %v816_v44, %v798_v43  ;;  %v11460_v43 = vld [vmem:[%s14925_s8 + $0x398] sm:$0xff]   ;;  %v11461_v44 = vld [vmem:[%s14925_s8 + $0x360] sm:$0xff]  }
  0x68   :  { %9852 = vmatprep.subr.bf16.mxu0 %v11373_v48  ;;  %v815_v48 = vld [vmem:[%s14926_s28 + $0xc0] sm:$0xff] }
  0x69   :  { %9873 = vmatpush3.bf16.msra.mxu1 %v11372_v47  ;;  %v797_v47 = vld [vmem:[%s14926_s28 + $0x30] sm:$0xff] }
  0x6a   :  { %9874 = vmatprep.subr.bf16.mxu1 %v11375_v50  ;;  %v11415_v50 = vld [vmem:[%s14925_s8 + $0x2c0] sm:$0xff]  }
  0x6b   :  { %9853 = vmatpush3.bf16.msra.mxu0 %v11374_v49  ;;  %v833_v49 = vpack.c.bf16 %v815_v48, %v797_v47  ;;  %v11464_v47 = vld [vmem:[%s14925_s8 + $0x3a0] sm:$0xff]   ;;  %v11465_v48 = vld [vmem:[%s14925_s8 + $0x368] sm:$0xff]  }
  0x6c   :  { %9854 = vmatprep.subr.bf16.mxu0 %v11377_v52  ;;  %v11417_v52 = vld [vmem:[%s14925_s8 + $0x248] sm:$0xff]  }
  0x6d   :  { %9875 = vmatpush3.bf16.msra.mxu1 %v11376_v51  ;;  %v11416_v51 = vld [vmem:[%s14925_s8 + $0x280] sm:$0xff]  }
  0x6e   :  { %9876 = vmatprep.subr.bf16.mxu1 %v11379_v54  ;;  %v11419_v54 = vld [vmem:[%s14925_s8 + $0x2c8] sm:$0xff]  }
  0x6f   :  { %9855 = vmatpush3.bf16.msra.mxu0 %v11378_v53  ;;  %v11418_v53 = vld [vmem:[%s14925_s8 + $0x208] sm:$0xff]  }
  0x70   :  { %9884 = vmatprep.subr.bf16.mxu0 %v11381_v62  ;;  %v11427_v62 = vld [vmem:[%s14925_s8 + $0x2d8] sm:$0xff]  }
  0x71   :  { %9877 = vmatpush3.bf16.msra.mxu1 %v11380_v58  ;;  %v11423_v58 = vld [vmem:[%s14925_s8 + $0x2d0] sm:$0xff]  }
  0x72   :  { %2037 = vmatmul.mubr.bf16.vlgmr.msra.gmra.mrb[8].mxu0 %v827_v61  ;;  %9906 = vmatprep.subr.bf16.mxu1 %v11383_v6  ;;  %v11426_v61 = vld [vmem:[%s14925_s8 + $0x218] sm:$0xff]   ;;  %v11435_v6 = vld [vmem:[%s14925_s8 + $0x2e8] sm:$0xff]  }
  0x73   :  { %9885 = vmatpush3.bf16.msra.mxu0 %v11382_v2  ;;  %2118 = vmatprep.mubr.bf16.mxu0 %v832_v37  ;;  %v11431_v2 = vld [vmem:[%s14925_s8 + $0x2e0] sm:$0xff]   ;;  %v11454_v37 = vld [vmem:[%s14925_s8 + $0x310] sm:$0xff]  }
  0x74   :  { %2078 = vmatmul.mubr.bf16.vlgmr.msra.gmra.mrb[8].mxu1 %v829_v5  ;;  %9886 = vmatprep.subr.bf16.mxu0 %v11385_v8  ;;  %v11434_v5 = vld [vmem:[%s14925_s8 + $0x228] sm:$0xff]   ;;  %v11437_v8 = vld [vmem:[%s14925_s8 + $0x270] sm:$0xff]  }
  0x75   :  { %9907 = vmatpush3.bf16.msra.mxu1 %v11384_v7  ;;  %2159 = vmatprep.mubr.bf16.mxu1 %v834_v45  ;;  %v11436_v7 = vld [vmem:[%s14925_s8 + $0x2a8] sm:$0xff]   ;;  %v11462_v45 = vld [vmem:[%s14925_s8 + $0x320] sm:$0xff]  }
  0x76   :  { %9908 = vmatprep.subr.bf16.mxu1 %v11387_v10  ;;  %v11439_v10 = vld [vmem:[%s14925_s8 + $0x2f0] sm:$0xff]  }
  0x77   :  { %9887 = vmatpush3.bf16.msra.mxu0 %v11386_v9  ;;  %v11438_v9 = vld [vmem:[%s14925_s8 + $0x230] sm:$0xff]  }
  0x78   :  { %9888 = vmatprep.subr.bf16.mxu0 %v11389_v12  ;;  %v11441_v12 = vld [vmem:[%s14925_s8 + $0x278] sm:$0xff]  }
  0x79   :  { %9909 = vmatpush3.bf16.msra.mxu1 %v11388_v11  ;;  %v11440_v11 = vld [vmem:[%s14925_s8 + $0x2b0] sm:$0xff]  }
  0x7a   :  { %9910 = vmatprep.subr.bf16.mxu1 %v11391_v14  ;;  %v11443_v14 = vld [vmem:[%s14925_s8 + $0x2f8] sm:$0xff]  }
  0x7b   :  { %9889 = vmatpush3.bf16.msra.mxu0 %v11390_v13  ;;  %v11442_v13 = vld [vmem:[%s14925_s8 + $0x238] sm:$0xff]  }
  0x7c   :  { %9890 = vmatprep.subr.bf16.mxu0 %v11393_v16  ;;  %v818_v16 = vld [vmem:[%s14926_s28 + $0xd8] sm:$0xff] }
  0x7d   :  { %9911 = vmatpush3.bf16.msra.mxu1 %v11392_v15  ;;  %v800_v15 = vld [vmem:[%s14926_s28 + $0x48] sm:$0xff] }
  0x7e   :  { %9912 = vmatprep.subr.bf16.mxu1 %v11395_v18  ;;  %v11444_v18 = vld [vmem:[%s14925_s8 + $0x2b8] sm:$0xff]  }
  0x7f   :  { %9891 = vmatpush3.bf16.msra.mxu0 %v11394_v17  ;;  %v836_v17 = vpack.c.bf16 %v818_v16, %v800_v15  ;;  %v2416_v15 = vld [vmem:[%s14927_s27 + $0x8] sm:$0xff] }
  0x80   :  { %9892 = vmatprep.subr.bf16.mxu0 %v11397_v20  ;;  %v817_v20 = vld [vmem:[%s14926_s28 + $0xd0] sm:$0xff] }
  0x81   :  { %9913 = vmatpush3.bf16.msra.mxu1 %v11396_v19  ;;  %v799_v19 = vld [vmem:[%s14926_s28 + $0x40] sm:$0xff] }
  0x82   :  { %9914 = vmatprep.subr.bf16.mxu1 %v11399_v22  ;;  %v11445_v22 = vld [vmem:[%s14925_s8 + $0x340] sm:$0xff]  }
  0x83   :  { %9893 = vmatpush3.bf16.msra.mxu0 %v11398_v21  ;;  %v835_v21 = vpack.c.bf16 %v817_v20, %v799_v19  ;;  %v2434_v19 = vld [vmem:[%s14927_s27 + $0x98] sm:$0xff] }
  0x84   :  { %9894 = vmatprep.subr.bf16.mxu0 %v11401_v24  ;;  %v820_v24 = vld [vmem:[%s14926_s28 + $0xe8] sm:$0xff] }
  0x85   :  { %9915 = vmatpush3.bf16.msra.mxu1 %v11400_v23  ;;  %v802_v23 = vld [vmem:[%s14926_s28 + $0x58] sm:$0xff] }
  0x86   :  { %9916 = vmatprep.subr.bf16.mxu1 %v11403_v26  ;;  %v11446_v26 = vld [vmem:[%s14925_s8 + $0x300] sm:$0xff]  }
  0x87   :  { %9895 = vmatpush3.bf16.msra.mxu0 %v11402_v25  ;;  %v838_v25 = vpack.c.bf16 %v820_v24, %v802_v23  ;;  %v2418_v23 = vld [vmem:[%s14927_s27 + $0x18] sm:$0xff] }
  0x88   :  { %9896 = vmatprep.subr.bf16.mxu0 %v11405_v28  ;;  %v819_v28 = vld [vmem:[%s14926_s28 + $0xe0] sm:$0xff] }
  0x89   :  { %9917 = vmatpush3.bf16.msra.mxu1 %v11404_v27  ;;  %v801_v27 = vld [vmem:[%s14926_s28 + $0x50] sm:$0xff] }
  0x8a   :  { %9918 = vmatprep.subr.bf16.mxu1 %v11407_v30  ;;  %v11447_v30 = vld [vmem:[%s14925_s8 + $0x3c0] sm:$0xff]  }
  0x8b   :  { %9897 = vmatpush3.bf16.msra.mxu0 %v11406_v29  ;;  %v837_v29 = vpack.c.bf16 %v819_v28, %v801_v27  ;;  %v2436_v27 = vld [vmem:[%s14927_s27 + $0xa8] sm:$0xff] }
  0x8c   :  { %9898 = vmatprep.subr.bf16.mxu0 %v11409_v32  ;;  %v11449_v32 = vld [vmem:[%s14925_s8 + $0x348] sm:$0xff]  }
  0x8d   :  { %9919 = vmatpush3.bf16.msra.mxu1 %v11408_v31  ;;  %v11448_v31 = vld [vmem:[%s14925_s8 + $0x380] sm:$0xff]  }
  0x8e   :  { %9920 = vmatprep.subr.bf16.mxu1 %v11411_v34  ;;  %v11451_v34 = vld [vmem:[%s14925_s8 + $0x3c8] sm:$0xff]  }
  0x8f   :  { %9899 = vmatpush3.bf16.msra.mxu0 %v11410_v33  ;;  %v11450_v33 = vld [vmem:[%s14925_s8 + $0x308] sm:$0xff]  }
  0x90   :  { %9928 = vmatprep.subr.bf16.mxu0 %v11413_v42  ;;  %v11459_v42 = vld [vmem:[%s14925_s8 + $0x3d8] sm:$0xff]  }
  0x91   :  { %9921 = vmatpush3.bf16.msra.mxu1 %v11412_v38  ;;  %v11455_v38 = vld [vmem:[%s14925_s8 + $0x3d0] sm:$0xff]  }
  0x92   :  { %2119 = vmatmul.mubr.bf16.vlgmr.msra.gmra.mrb[12].mxu0 %v831_v41  ;;  %9950 = vmatprep.subr.bf16.mxu1 %v11415_v50  ;;  %v11458_v41 = vld [vmem:[%s14925_s8 + $0x318] sm:$0xff]   ;;  %v11467_v50 = vld [vmem:[%s14925_s8 + $0x3e8] sm:$0xff]  }
  0x93   :  { %9929 = vmatpush3.bf16.msra.mxu0 %v11414_v46  ;;  %2200 = vmatprep.mubr.bf16.mxu0 %v836_v17  ;;  %v11463_v46 = vld [vmem:[%s14925_s8 + $0x3e0] sm:$0xff]   ;;  %v11480_v17 = vld [vmem:[%s14925_s8 + $0x408] sm:$0xff]  }
  0x94   :  { %2160 = vmatmul.mubr.bf16.vlgmr.msra.gmra.mrb[12].mxu1 %v833_v49  ;;  %9930 = vmatprep.subr.bf16.mxu0 %v11417_v52  ;;  %v11466_v49 = vld [vmem:[%s14925_s8 + $0x328] sm:$0xff]   ;;  %v11469_v52 = vld [vmem:[%s14925_s8 + $0x370] sm:$0xff]  }
  0x95   :  { %9951 = vmatpush3.bf16.msra.mxu1 %v11416_v51  ;;  %2241 = vmatprep.mubr.bf16.mxu1 %v838_v25  ;;  %v11468_v51 = vld [vmem:[%s14925_s8 + $0x3a8] sm:$0xff]   ;;  %v11482_v25 = vld [vmem:[%s14925_s8 + $0x410] sm:$0xff]  }
  0x96   :  { %9952 = vmatprep.subr.bf16.mxu1 %v11419_v54  ;;  %v11471_v54 = vld [vmem:[%s14925_s8 + $0x3f0] sm:$0xff]  }
  0x97   :  { %9931 = vmatpush3.bf16.msra.mxu0 %v11418_v53  ;;  %v11470_v53 = vld [vmem:[%s14925_s8 + $0x330] sm:$0xff]  }
  0x98   :  { %9932 = vmatprep.subr.bf16.mxu0 %v11421_v56  ;;  %v11473_v56 = vld [vmem:[%s14925_s8 + $0x378] sm:$0xff]  }
  0x99   :  { %9953 = vmatpush3.bf16.msra.mxu1 %v11420_v55  ;;  %v11472_v55 = vld [vmem:[%s14925_s8 + $0x3b0] sm:$0xff]  }
  0x9a   :  { %9954 = vmatprep.subr.bf16.mxu1 %v11423_v58  ;;  %v11475_v58 = vld [vmem:[%s14925_s8 + $0x3f8] sm:$0xff]  }
  0x9b   :  { %9933 = vmatpush3.bf16.msra.mxu0 %v11422_v57  ;;  %v11474_v57 = vld [vmem:[%s14925_s8 + $0x338] sm:$0xff]  }
  0x9c   :  { %9934 = vmatprep.subr.bf16.mxu0 %v11425_v60  ;;  %v822_v60 = vld [vmem:[%s14926_s28 + $0xf8] sm:$0xff] }
  0x9d   :  { %9955 = vmatpush3.bf16.msra.mxu1 %v11424_v59  ;;  %v804_v59 = vld [vmem:[%s14926_s28 + $0x68] sm:$0xff] }
  0x9e   :  { %9956 = vmatprep.subr.bf16.mxu1 %v11427_v62  ;;  %v11476_v62 = vld [vmem:[%s14925_s8 + $0x3b8] sm:$0xff]  }
  0x9f   :  { %9935 = vmatpush3.bf16.msra.mxu0 %v11426_v61  ;;  %v840_v61 = vpack.c.bf16 %v822_v60, %v804_v59  ;;  %v11491_v60 = vld [vmem:[%s14925_s8 + $0x478] sm:$0xff]  }
  0xa0   :  { %9936 = vmatprep.subr.bf16.mxu0 %v11429_v0  ;;  %v821_v0 = vld [vmem:[%s14926_s28 + $0xf0] sm:$0xff] }
  0xa1   :  { %9957 = vmatpush3.bf16.msra.mxu1 %v11428_v63  ;;  %v803_v63 = vld [vmem:[%s14926_s28 + $0x60] sm:$0xff] }
  0xa2   :  { %9958 = vmatprep.subr.bf16.mxu1 %v11431_v2  ;;  %v11477_v2 = vld [vmem:[%s14925_s8 + $0x440] sm:$0xff]  }
  0xa3   :  { %9937 = vmatpush3.bf16.msra.mxu0 %v11430_v1  ;;  %v839_v1 = vpack.c.bf16 %v821_v0, %v803_v63  ;;  %v2428_v63 = vld [vmem:[%s14927_s27 + $0x68] sm:$0xff]  ;;  %v11492_v0 = vld [vmem:[%s14925_s8 + $0x438] sm:$0xff]  }
  0xa4   :  { %9938 = vmatprep.subr.bf16.mxu0 %v11433_v4  ;;  %v824_v4 = vld [vmem:[%s14926_s28 + $0x108] sm:$0xff] }
  0xa5   :  { %9959 = vmatpush3.bf16.msra.mxu1 %v11432_v3  ;;  %v806_v3 = vld [vmem:[%s14926_s28 + $0x78] sm:$0xff] }
  0xa6   :  { %9960 = vmatprep.subr.bf16.mxu1 %v11435_v6  ;;  %v11478_v6 = vld [vmem:[%s14925_s8 + $0x400] sm:$0xff]  }
  0xa7   :  { %9939 = vmatpush3.bf16.msra.mxu0 %v11434_v5  ;;  %v842_v5 = vpack.c.bf16 %v824_v4, %v806_v3  ;;  %v2445_v4 = vld [vmem:[%s14927_s27 + $0xf0] sm:$0xff] }
  0xa8   :  { %9940 = vmatprep.subr.bf16.mxu0 %v11437_v8  ;;  %v823_v8 = vld [vmem:[%s14926_s28 + $0x100] sm:$0xff] }
  0xa9   :  { %9961 = vmatpush3.bf16.msra.mxu1 %v11436_v7  ;;  %v805_v7 = vld [vmem:[%s14926_s28 + $0x70] sm:$0xff] }
  0xaa   :  { %9962 = vmatprep.subr.bf16.mxu1 %v11439_v10  ;;  %v2431_v10 = vld [vmem:[%s14927_s27 + $0x80] sm:$0xff] }
  0xab   :  { %9941 = vmatpush3.bf16.msra.mxu0 %v11438_v9  ;;  %v841_v9 = vpack.c.bf16 %v823_v8, %v805_v7  ;;  %v825_v8 = vld [vmem:[%s14926_s28 + $0x110] sm:$0xff] }
  0xac   :  { %9942 = vmatprep.subr.bf16.mxu0 %v11441_v12 }
  0xad   :  { %9963 = vmatpush3.bf16.msra.mxu1 %v11440_v11  ;;  %v2432_v11 = vld [vmem:[%s14927_s27 + $0x88] sm:$0xff] }
  0xae   :  { %9964 = vmatprep.subr.bf16.mxu1 %v11443_v14  ;;  %v10715_v12 = vpack.c.bf16 %v2432_v11, %v2431_v10  ;;  %v2415_v14 = vld [vmem:[%s14927_s27] sm:$0xff]  ;;  %v2430_v10 = vld [vmem:[%s14927_s27 + $0x78] sm:$0xff] }
  0xaf   :  { %9943 = vmatpush3.bf16.msra.mxu0 %v11442_v13  ;;  %v11479_v13 = vld [vmem:[%s14925_s8 + $0x448] sm:$0xff]   ;;  %v10717_v16 = vpack.c.bf16 %v2416_v15, %v2415_v14  ;;  %v2447_v14 = vld [vmem:[%s14927_s27 + $0x100] sm:$0xff] }
  0xb0   :  { %9972 = vmatprep.subr.bf16.mxu0 %v11445_v22  ;;  %v2417_v22 = vld [vmem:[%s14927_s27 + $0x10] sm:$0xff] }
  0xb1   :  { %9965 = vmatpush3.bf16.msra.mxu1 %v11444_v18  ;;  %v2433_v18 = vld [vmem:[%s14927_s27 + $0x90] sm:$0xff]  ;;  %v10721_v24 = vpack.c.bf16 %v2418_v23, %v2417_v22 }
  0xb2   :  { %2201 = vmatmul.mubr.bf16.vlgmr.msra.gmra.mrb[16].mxu0 %v835_v21  ;;  %9994 = vmatprep.subr.bf16.mxu1 %v11447_v30  ;;  %v10719_v20 = vpack.c.bf16 %v2434_v19, %v2433_v18  ;;  %v11481_v21 = vld [vmem:[%s14925_s8 + $0x450] sm:$0xff]   ;;  %v2419_v30 = vld [vmem:[%s14927_s27 + $0x20] sm:$0xff] }
  0xb3   :  { %9973 = vmatpush3.bf16.msra.mxu0 %v11446_v26  ;;  %2282 = vmatprep.mubr.bf16.mxu0 %v840_v61  ;;  %v2435_v26 = vld [vmem:[%s14927_s27 + $0xa0] sm:$0xff]  ;;  %v2465_v19 = vld [vmem:[%s14927_s27 + $0x190] sm:$0xff] }
  0xb4   :  { %2242 = vmatmul.mubr.bf16.vlgmr.msra.gmra.mrb[16].mxu1 %v837_v29  ;;  %9974 = vmatprep.subr.bf16.mxu0 %v11449_v32  ;;  %v10723_v28 = vpack.c.bf16 %v2436_v27, %v2435_v26  ;;  %v11483_v29 = vld [vmem:[%s14925_s8 + $0x458] sm:$0xff]   ;;  %v2427_v61 = vld [vmem:[%s14927_s27 + $0x60] sm:$0xff] }
  0xb5   :  { %9995 = vmatpush3.bf16.msra.mxu1 %v11448_v31  ;;  %2323 = vmatprep.mubr.bf16.mxu1 %v842_v5  ;;  %v2420_v31 = vld [vmem:[%s14927_s27 + $0x28] sm:$0xff]  ;;  %v2446_v5 = vld [vmem:[%s14927_s27 + $0xf8] sm:$0xff]  ;;  %v10741_v7 = vpack.c.bf16 %v2428_v63, %v2427_v61  ;;  %v2479_v26 = vld [vmem:[%s14927_s27 + $0x200] sm:$0x1f] }
  0xb6   :  { %9996 = vmatprep.subr.bf16.mxu1 %v11451_v34  ;;  %v10725_v32 = vpack.c.bf16 %v2420_v31, %v2419_v30  ;;  %v2437_v34 = vld [vmem:[%s14927_s27 + $0xb0] sm:$0xff]  ;;  %v10743_v11 = vpack.c.bf16 %v2446_v5, %v2445_v4  ;;  %v2467_v27 = vld [vmem:[%s14927_s27 + $0x1a0] sm:$0xff]  ;;  %v2378_v63 = vld [vmem:[%s14928_s4 + $0x18] sm:$0xff] }
  0xb7   :  { %9975 = vmatpush3.bf16.msra.mxu0 %v11450_v33  ;;  %v11484_v33 = vld [vmem:[%s14925_s8 + $0x418] sm:$0xff]   ;;  %v2381_v31 = vld [vmem:[%s14928_s4 + $0x30] sm:$0xff] }
  0xb8   :  { %9976 = vmatprep.subr.bf16.mxu0 %v11453_v36 }
  0xb9   :  { %9997 = vmatpush3.bf16.msra.mxu1 %v11452_v35  ;;  %v2438_v35 = vld [vmem:[%s14927_s27 + $0xb8] sm:$0xff] }
  0xba   :  { %9998 = vmatprep.subr.bf16.mxu1 %v11455_v38  ;;  %v10727_v36 = vpack.c.bf16 %v2438_v35, %v2437_v34  ;;  %v2421_v38 = vld [vmem:[%s14927_s27 + $0x30] sm:$0xff]  ;;  %v2452_v34 = vld [vmem:[%s14927_s27 + $0x128] sm:$0xff] }
  0xbb   :  { %9977 = vmatpush3.bf16.msra.mxu0 %v11454_v37  ;;  %v11485_v37 = vld [vmem:[%s14925_s8 + $0x460] sm:$0xff]   ;;  %v2469_v35 = vld [vmem:[%s14927_s27 + $0x1b0] sm:$0xff] }
  0xbc   :  { %9978 = vmatprep.subr.bf16.mxu0 %v11457_v40 }
  0xbd   :  { %9999 = vmatpush3.bf16.msra.mxu1 %v11456_v39  ;;  %v2422_v39 = vld [vmem:[%s14927_s27 + $0x38] sm:$0xff] }
  0xbe   :  { %10000 = vmatprep.subr.bf16.mxu1 %v11459_v42  ;;  %v10729_v40 = vpack.c.bf16 %v2422_v39, %v2421_v38  ;;  %v2439_v42 = vld [vmem:[%s14927_s27 + $0xc0] sm:$0xff]  ;;  %v2386_v39 = vld [vmem:[%s14928_s4 + $0x58] sm:$0xff] }
  0xbf   :  { %9979 = vmatpush3.bf16.msra.mxu0 %v11458_v41  ;;  %v11486_v41 = vld [vmem:[%s14925_s8 + $0x420] sm:$0xff]  }
  0xc0   :  { %9980 = vmatprep.subr.bf16.mxu0 %v11461_v44 }
  0xc1   :  { %10001 = vmatpush3.bf16.msra.mxu1 %v11460_v43  ;;  %v2440_v43 = vld [vmem:[%s14927_s27 + $0xc8] sm:$0xff] }
  0xc2   :  { %10002 = vmatprep.subr.bf16.mxu1 %v11463_v46  ;;  %v10731_v44 = vpack.c.bf16 %v2440_v43, %v2439_v42  ;;  %v2423_v46 = vld [vmem:[%s14927_s27 + $0x40] sm:$0xff]  ;;  %v2453_v42 = vld [vmem:[%s14927_s27 + $0x130] sm:$0xff]  ;;  %v2454_v43 = vld [vmem:[%s14927_s27 + $0x138] sm:$0xff] }
  0xc3   :  { %9981 = vmatpush3.bf16.msra.mxu0 %v11462_v45  ;;  %v11487_v45 = vld [vmem:[%s14925_s8 + $0x468] sm:$0xff]  }
  0xc4   :  { %9982 = vmatprep.subr.bf16.mxu0 %v11465_v48  ;;  %v11488_v48 = vld [vmem:[%s14925_s8 + $0x428] sm:$0xff]  }
  0xc5   :  { %10003 = vmatpush3.bf16.msra.mxu1 %v11464_v47  ;;  %v2424_v47 = vld [vmem:[%s14927_s27 + $0x48] sm:$0xff] }
  0xc6   :  { %10004 = vmatprep.subr.bf16.mxu1 %v11467_v50  ;;  %v10733_v50 = vpack.c.bf16 %v2424_v47, %v2423_v46  ;;  %v2471_v46 = vld [vmem:[%s14927_s27 + $0x1c0] sm:$0xff]  ;;  %v2472_v47 = vld [vmem:[%s14927_s27 + $0x1c8] sm:$0xff] }
  0xc7   :  { %9983 = vmatpush3.bf16.msra.mxu0 %v11466_v49  ;;  %v2441_v49 = vld [vmem:[%s14927_s27 + $0xd0] sm:$0xff] }
  0xc8   :  { %9984 = vmatprep.subr.bf16.mxu0 %v11469_v52 }
  0xc9   :  { %10005 = vmatpush3.bf16.msra.mxu1 %v11468_v51  ;;  %v2442_v51 = vld [vmem:[%s14927_s27 + $0xd8] sm:$0xff] }
  0xca   :  { %10006 = vmatprep.subr.bf16.mxu1 %v11471_v54  ;;  %v10735_v52 = vpack.c.bf16 %v2442_v51, %v2441_v49  ;;  %v2425_v54 = vld [vmem:[%s14927_s27 + $0x50] sm:$0xff] }
  0xcb   :  { %9985 = vmatpush3.bf16.msra.mxu0 %v11470_v53  ;;  %v11489_v53 = vld [vmem:[%s14925_s8 + $0x470] sm:$0xff]  }
  0xcc   :  { %9986 = vmatprep.subr.bf16.mxu0 %v11473_v56  ;;  %v11490_v56 = vld [vmem:[%s14925_s8 + $0x430] sm:$0xff]  }
  0xcd   :  { %10007 = vmatpush3.bf16.msra.mxu1 %v11472_v55  ;;  %v2426_v55 = vld [vmem:[%s14927_s27 + $0x58] sm:$0xff] }
  0xce   :  { %10008 = vmatprep.subr.bf16.mxu1 %v11475_v58  ;;  %v2444_v58 = vld [vmem:[%s14927_s27 + $0xe8] sm:$0xff]  ;;  %v10737_v59 = vpack.c.bf16 %v2426_v55, %v2425_v54  ;;  %v2391_v54 = vld [vmem:[%s14928_s4 + $0x80] sm:$0xff] }
  0xcf   :  { %9987 = vmatpush3.bf16.msra.mxu0 %v11474_v57  ;;  %v2443_v57 = vld [vmem:[%s14927_s27 + $0xe0] sm:$0xff] }
  0xd0   :  { %10016 = vmatprep.subr.bf16.mxu0 %v11477_v2  ;;  %v826_v2 = vld [vmem:[%s14926_s28 + $0x118] sm:$0xff] }
  0xd1   :  { %10009 = vmatpush3.bf16.msra.mxu1 %v11476_v62  ;;  %v10739_v62 = vpack.c.bf16 %v2444_v58, %v2443_v57  ;;  %v10763_v58 = vpack.c.bf16 %v2472_v47, %v2471_v46  ;;  %v2881_v46 = vld [vmem:[%s14890_s10 + $0x100] sm:$0xff]  ;;  %v2882_v47 = vld [vmem:[%s14890_s10 + $0x108] sm:$0xff] }
  0xd2   :  { %2283 = vmatmul.mubr.bf16.vlgmr.msra.gmra.mrb[20].mxu0 %v839_v1  ;;  %10716 = vmatprep.subr.bf16.mxu1 %v10715_v12  ;;  %v808_v1 = vld [vmem:[%s14926_s28 + $0x88] sm:$0xff]  ;;  %v2463_v12 = vld [vmem:[%s14927_s27 + $0x180] sm:$0xff] }
  0xd3   :  { %10017 = vmatpush3.bf16.msra.mxu0 %v11478_v6  ;;  %v844_v3 = vpack.c.bf16 %v826_v2, %v808_v1  ;;  %v807_v6 = vld [vmem:[%s14926_s28 + $0x80] sm:$0xff]  ;;  %v2474_v1 = vld [vmem:[%s14927_s27 + $0x1d8] sm:$0xff] }
  0xd4   :  { %2324 = vmatmul.mubr.bf16.vlgmr.msra.gmra.mrb[20].mxu1 %v841_v9  ;;  %10018 = vmatprep.subr.bf16.mxu0 %v11479_v13  ;;  %v2429_v9 = vld [vmem:[%s14927_s27 + $0x70] sm:$0xff]  ;;  %v2464_v13 = vld [vmem:[%s14927_s27 + $0x188] sm:$0xff]  ;;  %v843_v18 = vpack.c.bf16 %v825_v8, %v807_v6  ;;  %v2390_v6 = vld [vmem:[%s14928_s4 + $0x78] sm:$0xff] }
  0xd5   :  { %10718 = vmatpush3.bf16.msra.mxu1 %v10717_v16  ;;  %2364 = vmatprep.mubr.bf16.mxu0 %v844_v3  ;;  %v10747_v15 = vpack.c.bf16 %v2464_v13, %v2463_v12  ;;  %v2448_v16 = vld [vmem:[%s14927_s27 + $0x108] sm:$0xff]  ;;  %v2897_v8 = vld [vmem:[%s14890_s10 + $0x180] sm:$0xff]  ;;  %v2457_v12 = vld [vmem:[%s14927_s27 + $0x150] sm:$0xff] }
  0xd6   :  { %10720 = vmatprep.subr.bf16.mxu1 %v10719_v20  ;;  %v2466_v20 = vld [vmem:[%s14927_s27 + $0x198] sm:$0xff]  ;;  %v10749_v22 = vpack.c.bf16 %v2448_v16, %v2447_v14  ;;  %v2475_v16 = vld [vmem:[%s14927_s27 + $0x1e0] sm:$0xff] }
  0xd7   :  { %10019 = vmatpush3.bf16.msra.mxu0 %v11480_v17  ;;  %v2376_v17 = vld [vmem:[%s14928_s4 + $0x8] sm:$0xff]  ;;  %v10751_v23 = vpack.c.bf16 %v2466_v20, %v2465_v19  ;;  %v2458_v13 = vld [vmem:[%s14927_s27 + $0x158] sm:$0xff]  ;;  %v2401_v20 = vld [vmem:[%s14928_s4 + $0xd0] sm:$0xff] }
  0xd8   :  { %10020 = vmatprep.subr.bf16.mxu0 %v11481_v21  ;;  %2580 = vmatprep.mubr.f32.mxu1 %v2376_v17  ;;  %v10745_v21 = vpack.c.bf16 %v2430_v10, %v2429_v9  ;;  %v2898_v9 = vld [vmem:[%s14890_s10 + $0x188] sm:$0xff]  ;;  %v10769_v19 = vpack.c.bf16 %v2458_v13, %v2457_v12  ;;  %v2393_v12 = vld [vmem:[%s14928_s4 + $0x90] sm:$0xff]  ;;  %v2885_v13 = vld [vmem:[%s14890_s10 + $0x120] sm:$0xff] }
  0xd9   :  { %10722 = vmatpush3.bf16.msra.mxu1 %v10721_v24  ;;  %v2449_v24 = vld [vmem:[%s14927_s27 + $0x110] sm:$0xff]  ;;  %v2396_v10 = vld [vmem:[%s14928_s4 + $0xa8] sm:$0xff] }
  0xda   :  { %10724 = vmatprep.subr.bf16.mxu1 %v10723_v28  ;;  %v2468_v28 = vld [vmem:[%s14927_s27 + $0x1a8] sm:$0xff] }
  0xdb   :  { %10021 = vmatpush3.bf16.msra.mxu0 %v11482_v25  ;;  %v2450_v25 = vld [vmem:[%s14927_s27 + $0x118] sm:$0xff]  ;;  %v2476_v17 = vld [vmem:[%s14927_s27 + $0x1e8] sm:$0xff] }
  0xdc   :  { %10022 = vmatprep.subr.bf16.mxu0 %v11483_v29  ;;  %v2375_v29 = vld [vmem:[%s14928_s4] sm:$0xff]  ;;  %v10753_v30 = vpack.c.bf16 %v2450_v25, %v2449_v24  ;;  %v2477_v24 = vld [vmem:[%s14927_s27 + $0x1f0] sm:$0xff]  ;;  %v2478_v25 = vld [vmem:[%s14927_s27 + $0x1f8] sm:$0xff] }
  0xdd   :  { %10726 = vmatpush3.bf16.msra.mxu1 %v10725_v32  ;;  %v10755_v32 = vpack.c.bf16 %v2468_v28, %v2467_v27  ;;  %v2406_v28 = vld [vmem:[%s14928_s4 + $0xf8] sm:$0xff] }
  0xde   :  { %10728 = vmatprep.subr.bf16.mxu1 %v10727_v36  ;;  %v2470_v36 = vld [vmem:[%s14927_s27 + $0x1b8] sm:$0xff] }
  0xdf   :  { %10023 = vmatpush3.bf16.msra.mxu0 %v11484_v33  ;;  %v2451_v33 = vld [vmem:[%s14927_s27 + $0x120] sm:$0xff] }
  0xe0   :  { %10024 = vmatprep.subr.bf16.mxu0 %v11485_v37  ;;  %v2380_v37 = vld [vmem:[%s14928_s4 + $0x28] sm:$0xff]  ;;  %v10757_v38 = vpack.c.bf16 %v2452_v34, %v2451_v33  ;;  %v2405_v34 = vld [vmem:[%s14928_s4 + $0xf0] sm:$0xff] }
  0xe1   :  { %10730 = vmatpush3.bf16.msra.mxu1 %v10729_v40  ;;  %v2866_v33 = vld [vmem:[%s14890_s10 + $0x88] sm:$0xff] }
  0xe2   :  { %10732 = vmatprep.subr.bf16.mxu1 %v10731_v44  ;;  %v9425_v44 = vld [vmem:[%s14929_s26] ss:$0 sm:$0xff] }
  0xe3   :  { %10025 = vmatpush3.bf16.msra.mxu0 %v11486_v41  ;;  %v10759_v41 = vpack.c.bf16 %v2470_v36, %v2469_v35  ;;  %v2411_v36 = vld [vmem:[%s14928_s4 + $0x120] sm:$0xff] }
  0xe4   :  { %10026 = vmatprep.subr.bf16.mxu0 %v11487_v45 }
  0xe5   :  { %10734 = vmatpush3.bf16.msra.mxu1 %v10733_v50 }
  0xe6   :  { %10736 = vmatprep.subr.bf16.mxu1 %v10735_v52  ;;  %v2385_v52 = vld [vmem:[%s14928_s4 + $0x50] sm:$0xff] }
  0xe7   :  { %10027 = vmatpush3.bf16.msra.mxu0 %v11488_v48 }
  0xe8   :  { %10028 = vmatprep.subr.bf16.mxu0 %v11489_v53  ;;  %v10761_v53 = vpack.c.bf16 %v2454_v43, %v2453_v42  ;;  %v2410_v42 = vld [vmem:[%s14928_s4 + $0x118] sm:$0xff]  ;;  %v2377_v43 = vld [vmem:[%s14928_s4 + $0x10] sm:$0xff] }
  0xe9   :  { %10738 = vmatpush3.bf16.msra.mxu1 %v10737_v59  ;;  %v2455_v59 = vld [vmem:[%s14927_s27 + $0x140] sm:$0xff] }
  0xea   :  { %10740 = vmatprep.subr.bf16.mxu1 %v10739_v62 }
  0xeb   :  { %10029 = vmatpush3.bf16.msra.mxu0 %v11490_v56 }
  0xec   :  { %10030 = vmatprep.subr.bf16.mxu0 %v11491_v60  ;;  %v2456_v60 = vld [vmem:[%s14927_s27 + $0x148] sm:$0xff] }
  0xed   :  { %10742 = vmatpush3.bf16.msra.mxu1 %v10741_v7  ;;  %v10765_v7 = vpack.c.bf16 %v2456_v60, %v2455_v59  ;;  %v2388_v60 = vld [vmem:[%s14928_s4 + $0x68] sm:$0xff] }
  0xee   :  { %10744 = vmatprep.subr.bf16.mxu1 %v10743_v11 }
  0xef   :  { %10031 = vmatpush3.bf16.msra.mxu0 %v11492_v0  ;;  %v2473_v0 = vld [vmem:[%s14927_s27 + $0x1d0] sm:$0xff] }
  0xf0   :  { %10748 = vmatprep.subr.bf16.mxu0 %v10747_v15  ;;  %v10767_v11 = vpack.c.bf16 %v2474_v1, %v2473_v0  ;;  %v10811_v15 = vpack.c.bf16 %v2898_v9, %v2897_v8  ;;  %v2853_v0 = vld [vmem:[%s14890_s10 + $0x20] sm:$0xff]  ;;  %v2854_v1 = vld [vmem:[%s14890_s10 + $0x28] sm:$0xff]  ;;  %v2871_v8 = vld [vmem:[%s14890_s10 + $0xb0] sm:$0xff] }
  0xf1   :  { %10746 = vmatpush3.bf16.msra.mxu1 %v10745_v21  ;;  %v10771_v21 = vpack.c.bf16 %v2476_v17, %v2475_v16  ;;  %v2872_v9 = vld [vmem:[%s14890_s10 + $0xb8] sm:$0xff]  ;;  %v2886_v17 = vld [vmem:[%s14890_s10 + $0x128] sm:$0xff] }
  0xf2   :  { %2365 = vmatmul.mubr.bf16.vlgmr.msra.gmra.mrb[24].mxu0 %v843_v18  ;;  %10383 = vmatprep.subr.msk.mxu1 %vm2512_vm0, %v2479_v26  ;;  %v2395_v18 = vld [vmem:[%s14928_s4 + $0xa0] sm:$0xff] }
  0xf3   :  { %10750 = vmatpush3.bf16.msra.mxu0 %v10749_v22  ;;  %2685 = vmatprep.mubr.f32.mxu0 %v2378_v63  ;;  %v2459_v22 = vld [vmem:[%s14927_s27 + $0x160] sm:$0xff]  ;;  %v2884_v63 = vld [vmem:[%s14890_s10 + $0x118] sm:$0xff] }
  0xf4   :  { %10752 = vmatprep.subr.bf16.mxu0 %v10751_v23  ;;  %2581 = vmatmul.mubr.f32.vlgmr.msra.gmra.mrb[24].mxu1 %v2375_v29  ;;  %v2460_v23 = vld [vmem:[%s14927_s27 + $0x168] sm:$0xff]  ;;  %v10775_v29 = vpack.c.bf16 %v2478_v25, %v2477_v24  ;;  %v2873_v25 = vld [vmem:[%s14890_s10 + $0xc0] sm:$0xff] }
  0xf5   :  { %2585 = vmatprep.mubr.f32.mxu1 %v2381_v31  ;;  %10384 = vmatpush3.msk.msra.mxu1 %vm2512_vm0, %v2479_v26  ;;  %v2400_v26 = vld [vmem:[%s14928_s4 + $0xc8] sm:$0xff]  ;;  %v10773_v27 = vpack.c.bf16 %v2460_v23, %v2459_v22  ;;  %v2462_v31 = vld [vmem:[%s14927_s27 + $0x178] sm:$0xff]  ;;  %v2903_v22 = vld [vmem:[%s14890_s10 + $0x1b0] sm:$0xff] }
  0xf6   :  { %10812 = vmatprep.subr.bf16.mxu1 %v10811_v15  ;;  %v2394_v15 = vld [vmem:[%s14928_s4 + $0x98] sm:$0xff] }
  0xf7   :  { %10754 = vmatpush3.bf16.msra.mxu0 %v10753_v30  ;;  %v2461_v30 = vld [vmem:[%s14927_s27 + $0x170] sm:$0xff]  ;;  %v2904_v23 = vld [vmem:[%s14890_s10 + $0x1b8] sm:$0xff] }
  0xf8   :  { %10756 = vmatprep.subr.bf16.mxu0 %v10755_v32  ;;  %2586 = vmatmul.mubr.f32.gmra.mrb[26].mxu1 %v2380_v37  ;;  %v2865_v32 = vld [vmem:[%s14890_s10 + $0x80] sm:$0xff]  ;;  %v10777_v35 = vpack.c.bf16 %v2462_v31, %v2461_v30  ;;  %v2887_v31 = vld [vmem:[%s14890_s10 + $0x130] sm:$0xff] }
  0xf9   :  { %2590 = vmatprep.mubr.f32.mxu1 %v2386_v39  ;;  %v10779_v37 = vpack.c.bf16 %v2866_v33, %v2865_v32  ;;  %v2850_v39 = vld [vmem:[%s14890_s10 + $0x8] sm:$0xff]  ;;  %v2888_v32 = vld [vmem:[%s14890_s10 + $0x138] sm:$0xff] }
  0xfa   :  { %v2404_v33 = vld [vmem:[%s14928_s4 + $0xe8] sm:$0xff] }
  0xfb   :  { %10758 = vmatpush3.bf16.msra.mxu0 %v10757_v38  ;;  %v2849_v38 = vld [vmem:[%s14890_s10] sm:$0xff] }
  0xfc   :  { %10760 = vmatprep.subr.bf16.mxu0 %v10759_v41  ;;  %2591 = vmatmul.mubr.f32.gmra.mrb[28].mxu1 %v2385_v52  ;;  %v2868_v41 = vld [vmem:[%s14890_s10 + $0x98] sm:$0xff]  ;;  %v2899_v52 = vld [vmem:[%s14890_s10 + $0x190] sm:$0xff] }
  0xfd   :  { %2595 = vmatprep.mubr.f32.mxu1 %v2391_v54  ;;  %v2384_v54 = vld [vmem:[%s14928_s4 + $0x48] sm:$0xff] }
  0xff   :  { %10762 = vmatpush3.bf16.msra.mxu0 %v10761_v53  ;;  %v2900_v53 = vld [vmem:[%s14890_s10 + $0x198] sm:$0xff] }
 0x100   :  { %10764 = vmatprep.subr.bf16.mxu0 %v10763_v58  ;;  %2596 = vmatmul.mubr.f32.gmra.mrb[30].mxu1 %v2390_v6  ;;  %v2382_v58 = vld [vmem:[%s14928_s4 + $0x38] sm:$0xff]  ;;  %v2902_v6 = vld [vmem:[%s14890_s10 + $0x1a8] sm:$0xff] }
 0x101   :  { %2600 = vmatprep.mubr.f32.mxu1 %v2396_v10 }
 0x103   :  { %10766 = vmatpush3.bf16.msra.mxu0 %v10765_v7  ;;  %v2389_v7 = vld [vmem:[%s14928_s4 + $0x70] sm:$0xff] }
 0x104   :  { %10768 = vmatprep.subr.bf16.mxu0 %v10767_v11  ;;  %2601 = vmatmul.mubr.f32.gmra.mrb[32].mxu1 %v2395_v18  ;;  %v10789_v11 = vpack.c.bf16 %v2854_v1, %v2853_v0  ;;  %v2855_v18 = vld [vmem:[%s14890_s10 + $0x30] sm:$0xff] }
 0x105   :  { %v9768_v40 = vpop.f32.mrb[0].mxu0  ;;  %2605 = vmatprep.mubr.f32.mxu1 %v2401_v20  ;;  %v2392_v20 = vld [vmem:[%s14928_s4 + $0x88] sm:$0xff] }
 0x106   :  { %v9769_v45 = vpop.f32.mrb[1].mxu0 }
 0x107   :  { %v9770_v48 = vadd.f32 %v9769_v45, %v9768_v40  ;;  %v9771_v49 = vpop.f32.mrb[2].mxu0  ;;  %v9790_v50 = vpop.f32.mrb[0].mxu1  ;;  %10770 = vmatpush3.bf16.msra.mxu0 %v10769_v19  ;;  %v2867_v40 = vld [vmem:[%s14890_s10 + $0x90] sm:$0xff]  ;;  %v2379_v45 = vld [vmem:[%s14928_s4 + $0x20] sm:$0xff]  ;;  %v2856_v19 = vld [vmem:[%s14890_s10 + $0x38] sm:$0xff] }
 0x108   :  { %v9772_v51 = vpop.f32.mrb[3].mxu0  ;;  %v9791_v57 = vpop.f32.mrb[1].mxu1  ;;  %10772 = vmatprep.subr.bf16.mxu0 %v10771_v21  ;;  %2606 = vmatmul.mubr.f32.gmra.mrb[34].mxu1 %v2400_v26  ;;  %v10791_v21 = vpack.c.bf16 %v2872_v9, %v2871_v8  ;;  %v2874_v26 = vld [vmem:[%s14890_s10 + $0xc8] sm:$0xff]  ;;  %v10793_v30 = vpack.c.bf16 %v2856_v19, %v2855_v18 }
 0x109   :  { %v660_v55 = vadd.f32 %v9770_v48, %v9425_v44  ;;  %v9773_v56 = vadd.f32 %v9772_v51, %v9771_v49  ;;  %v9792_v61 = vadd.f32 %v9791_v57, %v9790_v50  ;;  %v9793_v62 = vpop.f32.mrb[2].mxu1  ;;  %2610 = vmatprep.mubr.f32.mxu1 %v2406_v28  ;;  %v10783_v48 = vpack.c.bf16 %v2868_v41, %v2867_v40  ;;  %v2851_v49 = vld [vmem:[%s14890_s10 + $0x10] sm:$0xff]  ;;  %v2852_v50 = vld [vmem:[%s14890_s10 + $0x18] sm:$0xff]  ;;  %v2383_v51 = vld [vmem:[%s14928_s4 + $0x40] sm:$0xff] }
 0x10a   :  { %v9794_v3 = vpop.f32.mrb[3].mxu1  ;;  %v10813_v57 = vpack.c.bf16 %v2882_v47, %v2881_v46  ;;  %v10785_v59 = vpack.c.bf16 %v2852_v50, %v2851_v49  ;;  %v10795_v41 = vpack.c.bf16 %v2874_v26, %v2873_v25  ;;  %v2876_v49 = vld [vmem:[%s14890_s10 + $0xd8] sm:$0xff] }
 0x10b   :  { %v663_v2 = vadd.f32 %v9773_v56, %v9425_v44  ;;  %v12953_v4 = vadd.f32 %v9792_v61, %v660_v55  ;;  %v9795_v5 = vadd.f32 %v9794_v3, %v9793_v62  ;;  %10774 = vmatpush3.bf16.msra.mxu0 %v10773_v27  ;;  %v10781_v44 = vpack.c.bf16 %v2850_v39, %v2849_v38  ;;  %v2869_v55 = vld [vmem:[%s14890_s10 + $0xa0] sm:$0xff]  ;;  %v2870_v56 = vld [vmem:[%s14890_s10 + $0xa8] sm:$0xff]  ;;  %v2883_v61 = vld [vmem:[%s14890_s10 + $0x110] sm:$0xff] }
 0x10c   :  { %10776 = vmatprep.subr.bf16.mxu0 %v10775_v29  ;;  %2611 = vmatmul.mubr.f32.gmra.mrb[36].mxu1 %v2405_v34  ;;  %v10815_v62 = vpack.c.bf16 %v2900_v53, %v2899_v52  ;;  %v10787_v3 = vpack.c.bf16 %v2870_v56, %v2869_v55  ;;  %v10817_v10 = vpack.c.bf16 %v2884_v63, %v2883_v61  ;;  %v2399_v27 = vld [vmem:[%s14928_s4 + $0xc0] sm:$0xff]  ;;  %v2858_v39 = vld [vmem:[%s14890_s10 + $0x48] sm:$0xff] }
 0x10d   :  { %v12973_v14 = vadd.f32 %v9795_v5, %v663_v2  ;;  %2615 = vmatprep.mubr.f32.mxu1 %v2411_v36  ;;  %v2387_v2 = vld [vmem:[%s14928_s4 + $0x60] sm:$0xff]  ;;  %v10821_v29 = vpack.c.bf16 %v2886_v17, %v2885_v13  ;;  %v10823_v36 = vpack.c.bf16 %v2904_v23, %v2903_v22 }
 0x10e   :  { %v2901_v5 = vld [vmem:[%s14890_s10 + $0x1a0] sm:$0xff] }
 0x10f   :  { %10778 = vmatpush3.bf16.msra.mxu0 %v10777_v35  ;;  %v10819_v16 = vpack.c.bf16 %v2902_v6, %v2901_v5  ;;  %v2857_v38 = vld [vmem:[%s14890_s10 + $0x40] sm:$0xff] }
 0x110   :  { %10780 = vmatprep.subr.bf16.mxu0 %v10779_v37  ;;  %2616 = vmatmul.mubr.f32.gmra.mrb[38].mxu1 %v2410_v42  ;;  %v2398_v37 = vld [vmem:[%s14928_s4 + $0xb8] sm:$0xff]  ;;  %v2905_v42 = vld [vmem:[%s14890_s10 + $0x1c0] sm:$0xff] }
 0x111   :  { %10385 = vmatprep.mubr.msk.f32.mxu1 %vm2487_vm1, %v2379_v45  ;;  %v2875_v45 = vld [vmem:[%s14890_s10 + $0xd0] sm:$0xff] }
 0x112   :  { %2686 = vmatmul.mubr.f32.vlgmr.msra.gmra.mrb[28].mxu0 %v2377_v43  ;;  %v2906_v43 = vld [vmem:[%s14890_s10 + $0x1c8] sm:$0xff] }
 0x113   :  { %10782 = vmatpush3.bf16.msra.mxu0 %v10781_v44  ;;  %2690 = vmatprep.mubr.f32.mxu0 %v2383_v51  ;;  %v2409_v51 = vld [vmem:[%s14928_s4 + $0x110] sm:$0xff] }
 0x114   :  { %10784 = vmatprep.subr.bf16.mxu0 %v10783_v48  ;;  %10386 = vmatmul.mubr.msk.f32.vlgmr.msra.gmra.mrb[40].mxu1 %vm2487_vm1, %v2384_v54  ;;  %v10825_v48 = vpack.c.bf16 %v2888_v32, %v2887_v31 }
 0x115   :  { %10814 = vmatpush3.bf16.msra.mxu1 %v10813_v57  ;;  %10388 = vmatprep.mubr.msk.f32.mxu1 %vm2487_vm1, %v2389_v7 }
 0x116   :  { %2691 = vmatmul.mubr.f32.gmra.mrb[30].mxu0 %v2382_v58  ;;  %10816 = vmatprep.subr.bf16.mxu1 %v10815_v62 }
 0x117   :  { %10786 = vmatpush3.bf16.msra.mxu0 %v10785_v59  ;;  %2695 = vmatprep.mubr.f32.mxu0 %v2388_v60 }
 0x118   :  { %10788 = vmatprep.subr.bf16.mxu0 %v10787_v3  ;;  %10389 = vmatmul.mubr.msk.f32.gmra.mrb[42].mxu1 %vm2487_vm1, %v2394_v15 }
 0x119   :  { %10818 = vmatpush3.bf16.msra.mxu1 %v10817_v10  ;;  %10391 = vmatprep.mubr.msk.f32.mxu1 %vm2487_vm1, %v2399_v27 }
 0x11a   :  { %2696 = vmatmul.mubr.f32.gmra.mrb[32].mxu0 %v2387_v2  ;;  %10820 = vmatprep.subr.bf16.mxu1 %v10819_v16 }
 0x11b   :  { %10790 = vmatpush3.bf16.msra.mxu0 %v10789_v11  ;;  %2700 = vmatprep.mubr.f32.mxu0 %v2393_v12 }
 0x11c   :  { %10792 = vmatprep.subr.bf16.mxu0 %v10791_v21  ;;  %10392 = vmatmul.mubr.msk.f32.gmra.mrb[44].mxu1 %vm2487_vm1, %v2404_v33 }
 0x11e   :  { %2701 = vmatmul.mubr.f32.gmra.mrb[34].mxu0 %v2392_v20 }
 0x125   :  { %v9812_v24 = vpop.f32.mrb[4].mxu0 }
 0x126   :  { %v9813_v28 = vpop.f32.mrb[5].mxu0 }
 0x127   :  { %v9814_v34 = vadd.f32 %v9813_v28, %v9812_v24  ;;  %v9815_v35 = vpop.f32.mrb[6].mxu0  ;;  %v9834_v46 = vpop.f32.mrb[4].mxu1 }
 0x128   :  { %v9816_v40 = vpop.f32.mrb[7].mxu0  ;;  %v9835_v50 = vpop.f32.mrb[5].mxu1 }
 0x129   :  { %v742_v44 = vadd.f32 %v9814_v34, %v12953_v4  ;;  %v9817_v47 = vadd.f32 %v9816_v40, %v9815_v35 }
 0x12a   :  { %32 = vsyncpa [#allocation5], 0  ;;  %10822 = vmatpush3.bf16.msra.mxu1 %v10821_v29  ;;  %10794 = vmatpush3.bf16.msra.mxu0 %v10793_v30  ;;  %v2397_v4 = vld [vmem:[%s14928_s4 + $0xb0] sm:$0xff]  ;;  %v10797_v52 = vpack.c.bf16 %v2858_v39, %v2857_v38  ;;  %v2889_v53 = vld [vmem:[%s14890_s10 + $0x140] sm:$0xff]  ;;  %v9836_v55 = vadd.f32 %v9835_v50, %v9834_v46  ;;  %v9837_v56 = vpop.f32.mrb[6].mxu1  ;;  %v10827_v58 = vpack.c.bf16 %v2906_v43, %v2905_v42  ;;  %s14930_s3 = sld [smem:[#allocation11_spill]] }
 0x12b   :  { %v745_v54 = vadd.f32 %v9817_v47, %v12973_v14  ;;  %v2414_v57 = vld [vmem:[%s14928_s4 + $0x138] sm:$0xff]  ;;  %10824 = vmatprep.subr.bf16.mxu1 %v10823_v36  ;;  %2705 = vmatprep.mubr.f32.mxu0 %v2398_v37  ;;  %v2890_v59 = vld [vmem:[%s14890_s10 + $0x148] sm:$0xff]  ;;  %v2859_v60 = vld [vmem:[%s14890_s10 + $0x50] sm:$0xff]  ;;  %v9838_v61 = vpop.f32.mrb[7].mxu1  ;;  %v10799_v63 = vpack.c.bf16 %v2876_v49, %v2875_v45  ;;  %s14931_s30 = sld [smem:[#allocation15_spill]]  ;;  %s14932_s27 = sld [smem:[#allocation17_spill]] }
 0x12c   :  { %v2860_v14 = vld [vmem:[%s14890_s10 + $0x58] sm:$0xff]  ;;  %10796 = vmatprep.subr.bf16.mxu0 %v10795_v41  ;;  %v2403_v62 = vld [vmem:[%s14928_s4 + $0xe0] sm:$0xff]  ;;  %v13208_v0 = vadd.f32 %v9836_v55, %v742_v44  ;;  %v2907_v1 = vld [vmem:[%s14890_s10 + $0x1d0] sm:$0xff]  ;;  %v9839_v3 = vadd.f32 %v9838_v61, %v9837_v56  ;;  %10394 = vmatprep.mubr.msk.f32.mxu1 %vm2487_vm1, %v2409_v51  ;;  %v10829_v8 = vpack.c.bf16 %v2890_v59, %v2889_v53  ;;  %vm3165_vm2 = vcmask 261120   ;;  %s11844_s8 = smov 64  }
 0x12d   :  { %v2908_v2 = vld [vmem:[%s14890_s10 + $0x1d8] sm:$0xff]  ;;  %2706 = vmatmul.mubr.f32.gmra.mrb[36].mxu0 %v2397_v4  ;;  %v2877_v5 = vld [vmem:[%s14890_s10 + $0xe0] sm:$0xff]  ;;  %v2878_v6 = vld [vmem:[%s14890_s10 + $0xe8] sm:$0xff]  ;;  %10395 = vmatmul.mubr.msk.f32.gmra.mrb[46].mxu1 %vm2487_vm1, %v2414_v57  ;;  %v10801_v10 = vpack.c.bf16 %v2860_v14, %v2859_v60  ;;  %vm3448_vm3 = vcmask 257024   ;;  %vm3788_vm4 = vcmask 1041409   ;;  %vm3790_vm5 = vcmask 1042434  }
 0x12e   :  { %10826 = vmatpush3.bf16.msra.mxu1 %v10825_v48  ;;  %10798 = vmatpush3.bf16.msra.mxu0 %v10797_v52  ;;  %v2402_v9 = vld [vmem:[%s14928_s4 + $0xd8] sm:$0xff]  ;;  %v2891_v11 = vld [vmem:[%s14890_s10 + $0x150] sm:$0xff]  ;;  %v13233_v12 = vadd.f32 %v9839_v3, %v745_v54  ;;  %v10831_v13 = vpack.c.bf16 %v2908_v2, %v2907_v1  ;;  %v2861_v16 = vld [vmem:[%s14890_s10 + $0x60] sm:$0xff]  ;;  %v10803_v19 = vpack.c.bf16 %v2878_v6, %v2877_v5  ;;  %vm3792_vm6 = vcmask 1043459  }
 0x12f   :  { %10828 = vmatprep.subr.bf16.mxu1 %v10827_v58  ;;  %2710 = vmatprep.mubr.f32.mxu0 %v2403_v62  ;;  %v2892_v15 = vld [vmem:[%s14890_s10 + $0x158] sm:$0xff]  ;;  %v2862_v17 = vld [vmem:[%s14890_s10 + $0x68] sm:$0xff]  ;;  %v2909_v20 = vld [vmem:[%s14890_s10 + $0x1e0] sm:$0xff]  ;;  %vm3794_vm7 = vcmask 1044484   ;;  %vm3796_vm8 = vcmask 1045509   ;;  %vm3798_vm9 = vcmask 1046534  }
 0x130   :  { %v2842_v7 = vld [vmem:[%s14930_s3 + $0x18] sm:$0xff]  ;;  %10800 = vmatprep.subr.bf16.mxu0 %v10799_v63  ;;  %v2408_v18 = vld [vmem:[%s14928_s4 + $0x108] sm:$0xff]  ;;  %v2879_v22 = vld [vmem:[%s14890_s10 + $0xf0] sm:$0xff]  ;;  %v10833_v24 = vpack.c.bf16 %v2892_v15, %v2891_v11  ;;  %v10805_v26 = vpack.c.bf16 %v2862_v17, %v2861_v16  ;;  %vm3800_vm10 = vcmask 1047559   ;;  %vm3811_vm11 = vcmask 31744  }
 0x131   :  { %v2910_v21 = vld [vmem:[%s14890_s10 + $0x1e8] sm:$0xff]  ;;  %3069 = vmatprep.mubr.f32.mxu1 %v2842_v7  ;;  %2711 = vmatmul.mubr.f32.gmra.mrb[38].mxu0 %v2402_v9  ;;  %v2880_v23 = vld [vmem:[%s14890_s10 + $0xf8] sm:$0xff]  ;;  %v2407_v25 = vld [vmem:[%s14928_s4 + $0x100] sm:$0xff]  ;;  %vm4894_vm12 = vcmask 523264   ;;  %vm4950_vm13 = vcmask 785408   ;;  %vm11845_vm14 = vmmov 0  }
 0x132   :  { %10830 = vmatpush3.bf16.msra.mxu1 %v10829_v8  ;;  %10802 = vmatpush3.bf16.msra.mxu0 %v10801_v10  ;;  %v2893_v27 = vld [vmem:[%s14890_s10 + $0x160] sm:$0xff]  ;;  %v10835_v28 = vpack.c.bf16 %v2910_v21, %v2909_v20  ;;  %v2894_v29 = vld [vmem:[%s14890_s10 + $0x168] sm:$0xff]  ;;  %v2863_v30 = vld [vmem:[%s14890_s10 + $0x70] sm:$0xff]  ;;  %v10807_v33 = vpack.c.bf16 %v2880_v23, %v2879_v22  ;;  %vm9388_vm15 = vcmask 261127  }
 0x133   :  { %10832 = vmatprep.subr.bf16.mxu1 %v10831_v13  ;;  %2715 = vmatprep.mubr.f32.mxu0 %v2408_v18  ;;  %v2864_v31 = vld [vmem:[%s14890_s10 + $0x78] sm:$0xff]  ;;  %v2413_v32 = vld [vmem:[%s14928_s4 + $0x130] sm:$0xff]  ;;  %v10837_v36 = vpack.c.bf16 %v2894_v29, %v2893_v27  ;;  %v2412_v37 = vld [vmem:[%s14928_s4 + $0x128] sm:$0xff] }
 0x134   :  { %10804 = vmatprep.subr.bf16.mxu0 %v10803_v19  ;;  %v2911_v34 = vld [vmem:[%s14890_s10 + $0x1f0] sm:$0xff]  ;;  %v2912_v35 = vld [vmem:[%s14890_s10 + $0x1f8] sm:$0xff]  ;;  %v10809_v38 = vpack.c.bf16 %v2864_v31, %v2863_v30  ;;  %v2840_v42 = vld [vmem:[%s14930_s3 + $0x8] sm:$0xff] }
 0x135   :  { %2716 = vmatmul.mubr.f32.gmra.mrb[40].mxu0 %v2407_v25  ;;  %v10839_v39 = vpack.c.bf16 %v2912_v35, %v2911_v34  ;;  %v2895_v40 = vld [vmem:[%s14890_s10 + $0x170] sm:$0xff]  ;;  %v2896_v41 = vld [vmem:[%s14890_s10 + $0x178] sm:$0xff]  ;;  %v2913_v43 = vld [vmem:[%s14890_s10 + $0x200] sm:$0x1f] }
 0x136   :  { %10834 = vmatpush3.bf16.msra.mxu1 %v10833_v24  ;;  %10806 = vmatpush3.bf16.msra.mxu0 %v10805_v26  ;;  %v10841_v44 = vpack.c.bf16 %v2896_v41, %v2895_v40  ;;  %v2839_v45 = vld [vmem:[%s14930_s3] sm:$0xff]  ;;  %v2845_v46 = vld [vmem:[%s14930_s3 + $0x30] sm:$0xff]  ;;  %v2844_v48 = vld [vmem:[%s14930_s3 + $0x28] sm:$0xff] }
 0x137   :  { %10836 = vmatprep.subr.bf16.mxu1 %v10835_v28  ;;  %2720 = vmatprep.mubr.f32.mxu0 %v2413_v32  ;;  %v2841_v47 = vld [vmem:[%s14930_s3 + $0x10] sm:$0xff]  ;;  %v2847_v49 = vld [vmem:[%s14930_s3 + $0x40] sm:$0xff]  ;;  %v2846_v51 = vld [vmem:[%s14930_s3 + $0x38] sm:$0xff] }
 0x138   :  { %10808 = vmatprep.subr.bf16.mxu0 %v10807_v33  ;;  %v2843_v50 = vld [vmem:[%s14930_s3 + $0x20] sm:$0xff]  ;;  %v2848_v4 = vld [vmem:[%s14930_s3 + $0x48] sm:$0xff] }
 0x139   :  { %2721 = vmatmul.mubr.f32.gmra.mrb[42].mxu0 %v2412_v37  ;;  %v9490_v53 = vld [vmem:[%s14931_s30] ss:$0 sm:$0xff] }
 0x13a   :  { %10838 = vmatpush3.bf16.msra.mxu1 %v10837_v36  ;;  %10810 = vmatpush3.bf16.msra.mxu0 %v10809_v38 }
 0x13b   :  { %10840 = vmatprep.subr.bf16.mxu1 %v10839_v39  ;;  %2994 = vmatprep.mubr.f32.mxu0 %v2840_v42 }
 0x13c   :  { %10397 = vmatprep.subr.msk.mxu0 %vm2512_vm0, %v2913_v43 }
 0x13d   :  { %2995 = vmatmul.mubr.f32.vlgmr.msra.gmra.mrb[44].mxu0 %v2839_v45 }
 0x13e   :  { %10842 = vmatpush3.bf16.msra.mxu1 %v10841_v44  ;;  %2999 = vmatprep.mubr.f32.mxu0 %v2845_v46 }
 0x13f   :  { %10398 = vmatpush3.msk.msra.mxu0 %vm2512_vm0, %v2913_v43  ;;  %vm9390_vm0 = vcmask 253952  }
 0x141   :  { %3070 = vmatmul.mubr.f32.vlgmr.msra.gmra.mrb[48].mxu1 %v2841_v47  ;;  %3000 = vmatmul.mubr.f32.gmra.mrb[46].mxu0 %v2844_v48 }
 0x142   :  { %3074 = vmatprep.mubr.f32.mxu1 %v2847_v49  ;;  %10399 = vmatprep.mubr.msk.f32.mxu0 %vm2487_vm1, %v2843_v50 }
 0x145   :  { %3075 = vmatmul.mubr.f32.gmra.mrb[50].mxu1 %v2846_v51  ;;  %10400 = vmatmul.mubr.msk.f32.vlgmr.msra.gmra.mrb[48].mxu0 %vm2487_vm1, %v2848_v4  ;;  %v9856_v52 = vpop.f32.mrb[8].mxu0  ;;  %vm9393_vm1 = vcmask 254976  }
 0x146   :  { %v9857_v54 = vpop.f32.mrb[9].mxu0 }
 0x147   :  { %v9858_v55 = vadd.f32 %v9857_v54, %v9856_v52  ;;  %v9859_v56 = vpop.f32.mrb[10].mxu0  ;;  %v9878_v57 = vpop.f32.mrb[8].mxu1 }
 0x148   :  { %v9860_v58 = vpop.f32.mrb[11].mxu0  ;;  %v9879_v14 = vpop.f32.mrb[9].mxu1 }
 0x149   :  { %v2039_v59 = vadd.f32 %v9858_v55, %v9490_v53  ;;  %v9861_v60 = vadd.f32 %v9860_v58, %v9859_v56  ;;  %v9880_v61 = vadd.f32 %v9879_v14, %v9878_v57  ;;  %v9881_v62 = vpop.f32.mrb[10].mxu1 }
 0x14a   :  { %v9882_v1 = vpop.f32.mrb[11].mxu1 }
 0x14b   :  { %v2042_v63 = vadd.f32 %v9861_v60, %v9490_v53  ;;  %v2080_v2 = vadd.f32 %v9880_v61, %v2039_v59  ;;  %v9883_v3 = vadd.f32 %v9882_v1, %v9881_v62 }
 0x14d   :  { %v2083_v5 = vadd.f32 %v9883_v3, %v2042_v63 }
 0x165   :  { %v9900_v6 = vpop.f32.mrb[12].mxu0 }
 0x166   :  { %v9901_v7 = vpop.f32.mrb[13].mxu0 }
 0x167   :  { %v9902_v8 = vadd.f32 %v9901_v7, %v9900_v6  ;;  %v9903_v9 = vpop.f32.mrb[14].mxu0  ;;  %v9922_v10 = vpop.f32.mrb[12].mxu1 }
 0x168   :  { %v9904_v11 = vpop.f32.mrb[15].mxu0  ;;  %v9923_v16 = vpop.f32.mrb[13].mxu1 }
 0x169   :  { %v2121_v13 = vadd.f32 %v9902_v8, %v2080_v2  ;;  %v9905_v15 = vadd.f32 %v9904_v11, %v9903_v9  ;;  %v9924_v17 = vadd.f32 %v9923_v16, %v9922_v10  ;;  %v9925_v18 = vpop.f32.mrb[14].mxu1 }
 0x16a   :  { %v9926_v20 = vpop.f32.mrb[15].mxu1 }
 0x16b   :  { %v2124_v19 = vadd.f32 %v9905_v15, %v2083_v5  ;;  %v2162_v21 = vadd.f32 %v9924_v17, %v2121_v13  ;;  %v9927_v22 = vadd.f32 %v9926_v20, %v9925_v18 }
 0x16d   :  { %v2165_v23 = vadd.f32 %v9927_v22, %v2124_v19 }
 0x185   :  { %v9944_v24 = vpop.f32.mrb[16].mxu0 }
 0x186   :  { %v9945_v25 = vpop.f32.mrb[17].mxu0 }
 0x187   :  { %v9946_v26 = vadd.f32 %v9945_v25, %v9944_v24  ;;  %v9947_v27 = vpop.f32.mrb[18].mxu0  ;;  %v9966_v30 = vpop.f32.mrb[16].mxu1 }
 0x188   :  { %v9948_v28 = vpop.f32.mrb[19].mxu0  ;;  %v9967_v32 = vpop.f32.mrb[17].mxu1 }
 0x189   :  { %v2203_v29 = vadd.f32 %v9946_v26, %v2162_v21  ;;  %v9949_v31 = vadd.f32 %v9948_v28, %v9947_v27  ;;  %v9968_v34 = vadd.f32 %v9967_v32, %v9966_v30  ;;  %v9969_v35 = vpop.f32.mrb[18].mxu1 }
 0x18a   :  { %v9970_v36 = vpop.f32.mrb[19].mxu1 }
 0x18b   :  { %v2206_v33 = vadd.f32 %v9949_v31, %v2165_v23  ;;  %v2244_v37 = vadd.f32 %v9968_v34, %v2203_v29  ;;  %v9971_v38 = vadd.f32 %v9970_v36, %v9969_v35  ;;  %v13338_v23 = vld [vmem:[%s14932_s27] ss:$0 sm:$0xff] }
 0x18d   :  { %v2247_v39 = vadd.f32 %v9971_v38, %v2206_v33 }
 0x1a5   :  { %v9988_v40 = vpop.f32.mrb[20].mxu0 }
 0x1a6   :  { %v9989_v41 = vpop.f32.mrb[21].mxu0 }
 0x1a7   :  { %v9990_v42 = vadd.f32 %v9989_v41, %v9988_v40  ;;  %v9991_v43 = vpop.f32.mrb[22].mxu0  ;;  %v10010_v44 = vpop.f32.mrb[20].mxu1 }
 0x1a8   :  { %v9992_v45 = vpop.f32.mrb[23].mxu0  ;;  %v10011_v48 = vpop.f32.mrb[21].mxu1 }
 0x1a9   :  { %v2285_v46 = vadd.f32 %v9990_v42, %v2244_v37  ;;  %v9993_v47 = vadd.f32 %v9992_v45, %v9991_v43  ;;  %v10012_v49 = vadd.f32 %v10011_v48, %v10010_v44  ;;  %v10013_v50 = vpop.f32.mrb[22].mxu1 }
 0x1aa   :  { %v10014_v4 = vpop.f32.mrb[23].mxu1 }
 0x1ab   :  { %v2288_v51 = vadd.f32 %v9993_v47, %v2247_v39  ;;  %v2326_v52 = vadd.f32 %v10012_v49, %v2285_v46  ;;  %v10015_v53 = vadd.f32 %v10014_v4, %v10013_v50 }
 0x1ad   :  { %v2329_v54 = vadd.f32 %v10015_v53, %v2288_v51 }
 0x1c5   :  { %v10032_v55 = vpop.f32.mrb[24].mxu0 }
 0x1c6   :  { %v10033_v56 = vpop.f32.mrb[25].mxu0 }
 0x1c7   :  { %v10034_v57 = vadd.f32 %v10033_v56, %v10032_v55  ;;  %v10035_v58 = vpop.f32.mrb[26].mxu0  ;;  %v10070_v61 = vpop.f32.mrb[24].mxu1 }
 0x1c8   :  { %v10036_v59 = vpop.f32.mrb[27].mxu0  ;;  %v10071_v62 = vpop.f32.mrb[25].mxu1 }
 0x1c9   :  { %v13329_v60 = vadd.f32 %v10034_v57, %v2326_v52  ;;  %v10037_v14 = vadd.f32 %v10036_v59, %v10035_v58  ;;  %v10072_v1 = vadd.f32 %v10071_v62, %v10070_v61 }
 0x1cb   :  { %v13331_v63 = vadd.f32 %v10037_v14, %v2329_v54  ;;  %v10073_v2 = vpop.f32.mrb[26].mxu1  ;;  %v2583_v28 = vadd.f32 %v10072_v1, %v13338_v23 }
 0x1cc   :  { %v10074_v3 = vpop.f32.mrb[27].mxu1 }
 0x1cd   :  { %v10075_v5 = vadd.f32 %v10074_v3, %v10073_v2 }
 0x1cf   :  { %v10076_v6 = vpop.f32.mrb[28].mxu1  ;;  %v2588_v36 = vadd.f32 %v10075_v5, %v13338_v23 }
 0x1d0   :  { %v10077_v7 = vpop.f32.mrb[29].mxu1 }
 0x1d1   :  { %v10078_v8 = vadd.f32 %v10077_v7, %v10076_v6 }
 0x1d3   :  { %v10079_v9 = vpop.f32.mrb[30].mxu1  ;;  %v2593_v45 = vadd.f32 %v10078_v8, %v13338_v23 }
 0x1d4   :  { %v10080_v10 = vpop.f32.mrb[31].mxu1 }
 0x1d5   :  { %v10081_v11 = vadd.f32 %v10080_v10, %v10079_v9 }
 0x1d7   :  { %v10082_v13 = vpop.f32.mrb[32].mxu1  ;;  %v2598_v55 = vadd.f32 %v10081_v11, %v13338_v23 }
 0x1d8   :  { %v10083_v15 = vpop.f32.mrb[33].mxu1 }
 0x1d9   :  { %v10084_v16 = vadd.f32 %v10083_v15, %v10082_v13 }
 0x1db   :  { %v10085_v17 = vpop.f32.mrb[34].mxu1  ;;  %v2603_v5 = vadd.f32 %v10084_v16, %v13338_v23 }
 0x1dc   :  { %v10086_v18 = vpop.f32.mrb[35].mxu1 }
 0x1dd   :  { %v10087_v19 = vadd.f32 %v10086_v18, %v10085_v17 }
 0x1df   :  { %v10088_v20 = vpop.f32.mrb[36].mxu1  ;;  %v2608_v15 = vadd.f32 %v10087_v19, %v13338_v23 }
 0x1e0   :  { %v10089_v21 = vpop.f32.mrb[37].mxu1 }
 0x1e1   :  { %v13333_v22 = vadd.f32 %v10089_v21, %v10088_v20 }
 0x1e3   :  { %v10091_v25 = vpop.f32.mrb[38].mxu1 }
 0x1e4   :  { %v10092_v27 = vpop.f32.mrb[39].mxu1 }
 0x1e5   :  { %v10126_v24 = vpop.f32.mrb[28].mxu0  ;;  %v13341_v30 = vadd.f32 %v10092_v27, %v10091_v25 }
 0x1e6   :  { %v10127_v26 = vpop.f32.mrb[29].mxu0 }
 0x1e7   :  { %v10128_v29 = vadd.f32 %v10127_v26, %v10126_v24  ;;  %v10387_v32 = vpop.f32.mrb[40].mxu1  ;;  %v2613_v26 = vadd.f32 %v13333_v22, %v13338_v23 }
 0x1e8   :  { %v2792_v35 = vpop.f32.mrb[41].mxu1 }
 0x1e9   :  { %v10129_v31 = vpop.f32.mrb[30].mxu0  ;;  %v2688_v33 = vadd.f32 %v10128_v29, %v2583_v28 }
 0x1ea   :  { %v10130_v34 = vpop.f32.mrb[31].mxu0 }
 0x1eb   :  { %v10131_v37 = vadd.f32 %v10130_v34, %v10129_v31  ;;  %v2793_v38 = vadd.f32 %v2792_v35, %v2688_v33  ;;  %v10390_v42 = vpop.f32.mrb[42].mxu1 }
 0x1ec   :  { %v2802_v44 = vpop.f32.mrb[43].mxu1 }
 0x1ed   :  { %v2693_v39 = vadd.f32 %v10131_v37, %v2588_v36  ;;  %v13344_v40 = vmax.f32 %v2793_v38, 0.0  ;;  %v10132_v41 = vpop.f32.mrb[32].mxu0  ;;  %v2618_v36 = vadd.f32 %v13341_v30, %v13338_v23 }
 0x1ee   :  { %v10133_v43 = vpop.f32.mrb[33].mxu0 }
 0x1ef   :  { %v2798_v46 = vadd.f32 %v10387_v32, %v2693_v39  ;;  %v10134_v47 = vadd.f32 %v10133_v43, %v10132_v41  ;;  %v3157_v48 = vmul.f32 %v13344_v40, %v13344_v40  ;;  %v10393_v52 = vpop.f32.mrb[44].mxu1 }
 0x1f0   :  { %v2812_v54 = vpop.f32.mrb[45].mxu1 }
 0x1f1   :  { %v13349_v49 = vmax.f32 %v2798_v46, 0.0  ;;  %v10135_v50 = vpop.f32.mrb[34].mxu0  ;;  %v2698_v51 = vadd.f32 %v10134_v47, %v2593_v45  ;;  %v3166_v4 = vsel %vm3165_vm2, %v3157_v48, 0.0  ;;  %v9645_v45 = vld [vmem:[%s14891_s11] ss:$0 sm:$0xff]  ;;  %s11841_s11 = smov 32  }
 0x1f2   :  { %v10136_v53 = vpop.f32.mrb[35].mxu0  ;;  %3167 = vadd.xlane.f32.xlu0 %v3166_v4 }
 0x1f3   :  { %v10137_v56 = vadd.f32 %v10136_v53, %v10135_v50  ;;  %v2803_v57 = vadd.f32 %v2802_v44, %v2698_v51  ;;  %v3158_v58 = vmul.f32 %v13349_v49, %v13349_v49 }
 0x1f5   :  { %v2703_v59 = vadd.f32 %v10137_v56, %v2598_v55  ;;  %v13355_v14 = vmax.f32 %v2803_v57, 0.0  ;;  %v3169_v62 = vsel %vm3165_vm2, %v3158_v58, 0.0 }
 0x1f6   :  { %3170 = vadd.xlane.f32.xlu1 %v3169_v62 }
 0x1f7   :  { %v2808_v6 = vadd.f32 %v10390_v42, %v2703_v59  ;;  %v3159_v8 = vmul.f32 %v13355_v14, %v13355_v14 }
 0x1f9   :  { %v3172_v11 = vsel %vm3165_vm2, %v3159_v8, 0.0  ;;  %v13363_v20 = vmax.f32 %v2808_v6, 0.0 }
 0x1fa   :  { %3173 = vadd.xlane.f32.xlu0 %v3172_v11 }
 0x1fb   :  { %v3160_v34 = vmul.f32 %v13363_v20, %v13363_v20 }
 0x1fd   :  { %v3175_v43 = vsel %vm3165_vm2, %v3160_v34, 0.0  ;;  %v11839_v34 = vmov 1966171168  }
 0x200   :  { %v10138_v61 = vpop.f32.mrb[36].mxu0  ;;  %v10396_v1 = vpop.f32.mrb[46].mxu1 }
 0x201   :  { %v10139_v2 = vpop.f32.mrb[37].mxu0  ;;  %v2822_v3 = vpop.f32.mrb[47].mxu1 }
 0x202   :  { %v10140_v7 = vadd.f32 %v10139_v2, %v10138_v61 }
 0x204   :  { %v10141_v9 = vpop.f32.mrb[38].mxu0  ;;  %v2708_v10 = vadd.f32 %v10140_v7, %v2603_v5 }
 0x205   :  { %v10142_v13 = vpop.f32.mrb[39].mxu0 }
 0x206   :  { %v2813_v17 = vadd.f32 %v2812_v54, %v2708_v10  ;;  %v10143_v18 = vadd.f32 %v10142_v13, %v10141_v9 }
 0x208   :  { %v13365_v21 = vmax.f32 %v2813_v17, 0.0  ;;  %v2713_v16 = vadd.f32 %v10143_v18, %v2608_v15  ;;  %v10144_v24 = vpop.f32.mrb[40].mxu0 }
 0x209   :  { %v10145_v25 = vpop.f32.mrb[41].mxu0 }
 0x20a   :  { %v2818_v27 = vadd.f32 %v10393_v52, %v2713_v16  ;;  %v10146_v28 = vadd.f32 %v10145_v25, %v10144_v24  ;;  %v3161_v29 = vmul.f32 %v13365_v21, %v13365_v21 }
 0x20c   :  { %v13371_v31 = vmax.f32 %v2818_v27, 0.0  ;;  %v10147_v19 = vpop.f32.mrb[42].mxu0  ;;  %v2718_v32 = vadd.f32 %v10146_v28, %v2613_v26  ;;  %v3178_v33 = vsel %vm3165_vm2, %v3161_v29, 0.0 }
 0x20d   :  { %v10148_v35 = vpop.f32.mrb[43].mxu0  ;;  %3179 = vadd.xlane.f32.xlu0 %v3178_v33 }
 0x20e   :  { %v10149_v22 = vadd.f32 %v10148_v35, %v10147_v19  ;;  %v2823_v37 = vadd.f32 %v2822_v3, %v2718_v32  ;;  %v3162_v38 = vmul.f32 %v13371_v31, %v13371_v31  ;;  %v3256_v35 = vunpack.c.l.s4 %v11839_v34 }
 0x210   :  { %v2723_v39 = vadd.f32 %v10149_v22, %v2618_v36  ;;  %v13380_v41 = vmax.f32 %v2823_v37, 0.0  ;;  %v3181_v42 = vsel %vm3165_vm2, %v3162_v38, 0.0  ;;  %v10191_v44 = vpop.f32.mrb[44].mxu0 }
 0x211   :  { %3182 = vadd.xlane.f32.xlu1 %v3181_v42  ;;  %3176 = vadd.xlane.f32.xlu0 %v3175_v43  ;;  %v10192_v23 = vpop.f32.mrb[45].mxu0  ;;  %v3258_v42 = vlaneseq }
 0x212   :  { %v2828_v30 = vadd.f32 %v10396_v1, %v2723_v39  ;;  %v10193_v46 = vadd.f32 %v10192_v23, %v10191_v44  ;;  %v3163_v47 = vmul.f32 %v13380_v41, %v13380_v41 }
 0x214   :  { %v13389_v48 = vmax.f32 %v2828_v30, 0.0  ;;  %v2997_v50 = vadd.f32 %v10193_v46, %v9645_v45  ;;  %v10194_v51 = vpop.f32.mrb[46].mxu0  ;;  %v10229_v4 = vpop.f32.mrb[48].mxu1  ;;  %v3184_v52 = vsel %vm3165_vm2, %v3163_v47, 0.0  ;;  %v3257_v47 = vunpack.c.0.s8 %v3256_v35 }
 0x215   :  { %v10195_v53 = vpop.f32.mrb[47].mxu0  ;;  %v10230_v54 = vpop.f32.mrb[49].mxu1  ;;  %3185 = vadd.xlane.f32.xlu1 %v3184_v52 }
 0x216   :  { %v10196_v55 = vadd.f32 %v10195_v53, %v10194_v51  ;;  %v10231_v56 = vadd.f32 %v10230_v54, %v10229_v4  ;;  %v3164_v57 = vmul.f32 %v13389_v48, %v13389_v48 }
 0x218   :  { %v3002_v58 = vadd.f32 %v10196_v55, %v9645_v45  ;;  %v10232_v59 = vpop.f32.mrb[50].mxu1  ;;  %v10401_v61 = vpop.f32.mrb[48].mxu0  ;;  %v3072_v62 = vadd.f32 %v10231_v56, %v2997_v50  ;;  %v3187_v1 = vsel %vm3165_vm2, %v3164_v57, 0.0  ;;  %v13431_v57 = vshrl.u32 %v3258_v42, 7 }
 0x219   :  { %v10233_v2 = vpop.f32.mrb[51].mxu1  ;;  %v3146_v3 = vpop.f32.mrb[49].mxu0  ;;  %3188 = vadd.xlane.f32.xlu1 %v3187_v1 }
 0x21a   :  { %v10234_v5 = vadd.f32 %v10233_v2, %v10232_v59  ;;  %v3147_v6 = vadd.f32 %v3146_v3, %v3072_v62 }
 0x21c   :  { %v3077_v7 = vadd.f32 %v10234_v5, %v3002_v58  ;;  %v13395_v8 = vmax.f32 %v3147_v6, 0.0 }
 0x21e   :  { %v3152_v9 = vadd.f32 %v10401_v61, %v3077_v7  ;;  %v3214_v10 = vmul.f32 %v13395_v8, %v13395_v8 }
 0x220   :  { %v13399_v11 = vmax.f32 %v3152_v9, 0.0  ;;  %v3216_v13 = vsel %vm3165_vm2, %v3214_v10, 0.0 }
 0x221   :  { %3217 = vadd.xlane.f32.xlu0 %v3216_v13 }
 0x222   :  { %v3215_v15 = vmul.f32 %v13399_v11, %v13399_v11 }
 0x224   :  { %v3219_v17 = vsel %vm3165_vm2, %v3215_v15, 0.0 }
 0x225   :  { %3220 = vadd.xlane.f32.xlu1 %v3219_v17 }
 0x27f   :  { %v3168_v18 = vpop.xlane.xlu0 %3167 }
 0x280   :  { %v3190_v16 = vmax.f32 %v3168_v18, 1e-16 }
 0x282   :  { %11493 = vrsqrt.f32 %v3190_v16 }
 0x283   :  { %v3171_v24 = vpop.xlane.xlu1 %3170 }
 0x284   :  { %v3191_v25 = vmax.f32 %v3171_v24, 1e-16  ;;  %v13442_v24 = vsub.s32 %v3257_v47, %v13431_v57 }
 0x286   :  { %11495 = vrsqrt.f32 %v3191_v25 }
 0x287   :  { %v3174_v26 = vpop.xlane.xlu0 %3173 }
 0x288   :  { %v3192_v27 = vmax.f32 %v3174_v26, 1e-16 }
 0x28a   :  { %11497 = vrsqrt.f32 %v3192_v27 }
 0x28c   :  { %v11494_v28 = vpop.eup %11493 }
 0x28d   :  { %v13406_v29 = vmul.f32 %v11494_v28, %v13344_v40 }
 0x28f   :  { %v3497_v32 = vsel %vm3448_vm3, %v13406_v29, 0.0  ;;  %v13412_v33 = vcombine.high %v13406_v29, %v13406_v29 }
 0x290   :  { %v11496_v36 = vpop.eup %11495  ;;  %v3498_v37 = vrot.slane %v3497_v32, 4 }
 0x291   :  { %v13415_v38 = vmul.f32 %v11496_v36, %v13349_v49  ;;  %v3504_v39 = vsel %vm3448_vm3, %v13412_v33, 0.0 }
 0x292   :  { %v3499_v43 = vadd.f32 %v3498_v37, %v3497_v32  ;;  %v3505_v44 = vrot.slane %v3504_v39, 4 }
 0x293   :  { %v13421_v30 = vcombine.high %v13415_v38, %v13415_v38  ;;  %v3511_v46 = vsel %vm3448_vm3, %v13415_v38, 0.0 }
 0x294   :  { %v11498_v50 = vpop.eup %11497  ;;  %v3500_v52 = vrot.slane %v3499_v43, 2  ;;  %v3506_v53 = vadd.f32 %v3505_v44, %v3504_v39  ;;  %v3512_v55 = vrot.slane %v3511_v46, 4 }
 0x295   :  { %v3518_v54 = vsel %vm3448_vm3, %v13421_v30, 0.0  ;;  %v13428_v56 = vmul.f32 %v11498_v50, %v13355_v14 }
 0x296   :  { %v3501_v58 = vadd.f32 %v3500_v52, %v3499_v43  ;;  %v3507_v59 = vrot.slane %v3506_v53, 2  ;;  %v3519_v61 = vrot.slane %v3518_v54, 4  ;;  %v3513_v1 = vadd.f32 %v3512_v55, %v3511_v46 }
 0x297   :  { %v3525_v2 = vsel %vm3448_vm3, %v13428_v56, 0.0  ;;  %v13437_v3 = vcombine.high %v13428_v56, %v13428_v56 }
 0x298   :  { %v3502_v6 = vrot.slane %v3501_v58, 1  ;;  %v3508_v7 = vadd.f32 %v3507_v59, %v3506_v53  ;;  %v3520_v9 = vadd.f32 %v3519_v61, %v3518_v54  ;;  %v3514_v10 = vrot.slane %v3513_v1, 2 }
 0x299   :  { %v3526_v13 = vrot.slane %v3525_v2, 4  ;;  %v3532_v15 = vsel %vm3448_vm3, %v13437_v3, 0.0 }
 0x29a   :  { %v3180_v19 = vpop.xlane.xlu0 %3179  ;;  %v3503_v17 = vadd.f32 %v3502_v6, %v3501_v58  ;;  %v3509_v18 = vrot.slane %v3508_v7, 1  ;;  %v3521_v16 = vrot.slane %v3520_v9, 2  ;;  %v3515_v26 = vadd.f32 %v3514_v10, %v3513_v1 }
 0x29b   :  { %v3194_v22 = vmax.f32 %v3180_v19, 1e-16  ;;  %v3527_v27 = vadd.f32 %v3526_v13, %v3525_v2  ;;  %v3533_v28 = vrot.slane %v3532_v15, 4 }
 0x29c   :  { %v3610_v34 = vmul.f32 0.25, %v3503_v17  ;;  %v3510_v35 = vadd.f32 %v3509_v18, %v3508_v7  ;;  %v3522_v36 = vadd.f32 %v3521_v16, %v3520_v9  ;;  %v3516_v37 = vrot.slane %v3515_v26, 1 }
 0x29d   :  { %11499 = vrsqrt.f32 %v3194_v22  ;;  %v3528_v39 = vrot.slane %v3527_v27, 2  ;;  %v3534_v43 = vadd.f32 %v3533_v28, %v3532_v15 }
 0x29e   :  { %v3183_v45 = vpop.xlane.xlu1 %3182  ;;  %v3177_v23 = vpop.xlane.xlu0 %3176  ;;  %v3626_v44 = vmul.f32 %v3610_v34, %v13406_v29  ;;  %v3517_v46 = vadd.f32 %v3516_v37, %v3515_v26 }
 0x29f   :  { %v3195_v51 = vmax.f32 %v3183_v45, 1e-16  ;;  %v3193_v4 = vmax.f32 %v3177_v23, 1e-16  ;;  %v3611_v45 = vmul.f32 0.25, %v3510_v35  ;;  %v3523_v23 = vrot.slane %v3522_v36, 1 }
 0x2a0   :  { %v3529_v47 = vadd.f32 %v3528_v39, %v3527_v27  ;;  %v3535_v50 = vrot.slane %v3534_v43, 2  ;;  %v3642_v52 = vsel %vm3448_vm3, %v3626_v44, 0.0  ;;  %v3612_v59 = vmul.f32 0.25, %v3517_v46 }
 0x2a1   :  { %11501 = vrsqrt.f32 %v3195_v51  ;;  %v3627_v53 = vmul.f32 %v3611_v45, %v13412_v33  ;;  %v3524_v54 = vadd.f32 %v3523_v23, %v3522_v36  ;;  %3643 = vadd.xlane.f32.xlu0 %v3642_v52 }
 0x2a2   :  { %11503 = vrsqrt.f32 %v3193_v4  ;;  %v3186_v62 = vpop.xlane.xlu1 %3185  ;;  %v3530_v61 = vrot.slane %v3529_v47, 1  ;;  %v3628_v10 = vmul.f32 %v3612_v59, %v13415_v38 }
 0x2a3   :  { %v3196_v5 = vmax.f32 %v3186_v62, 1e-16  ;;  %v3536_v62 = vadd.f32 %v3535_v50, %v3534_v43  ;;  %v3645_v2 = vsel %vm3448_vm3, %v3627_v53, 0.0 }
 0x2a4   :  { %3646 = vadd.xlane.f32.xlu1 %v3645_v2  ;;  %v3531_v13 = vadd.f32 %v3530_v61, %v3529_v47  ;;  %v3648_v28 = vsel %vm3448_vm3, %v3628_v10, 0.0 }
 0x2a5   :  { %11505 = vrsqrt.f32 %v3196_v5  ;;  %v3613_v5 = vmul.f32 0.25, %v3524_v54  ;;  %v3537_v15 = vrot.slane %v3536_v62, 1 }
 0x2a6   :  { %v3189_v25 = vpop.xlane.xlu1 %3188 }
 0x2a7   :  { %v11500_v19 = vpop.eup %11499  ;;  %v3197_v32 = vmax.f32 %v3189_v25, 1e-16  ;;  %v3629_v16 = vmul.f32 %v3613_v5, %v13421_v30 }
 0x2a8   :  { %v13445_v22 = vmul.f32 %v11500_v19, %v13365_v21  ;;  %v3614_v19 = vmul.f32 0.25, %v3531_v13  ;;  %3649 = vadd.xlane.f32.xlu1 %v3648_v28 }
 0x2a9   :  { %11507 = vrsqrt.f32 %v3197_v32  ;;  %v3538_v32 = vadd.f32 %v3537_v15, %v3536_v62  ;;  %v3651_v35 = vsel %vm3448_vm3, %v3629_v16, 0.0 }
 0x2aa   :  { %v13450_v51 = vcombine.high %v13445_v22, %v13445_v22  ;;  %v13456_v55 = vsel %vm3448_vm3, %v13445_v22, 0.0  ;;  %3652 = vadd.xlane.f32.xlu0 %v3651_v35  ;;  %v3630_v43 = vmul.f32 %v3614_v19, %v13428_v56 }
 0x2ab   :  { %v11502_v4 = vpop.eup %11501  ;;  %v3615_v44 = vmul.f32 0.25, %v3538_v32  ;;  %v3554_v15 = vrot.slane %v13456_v55, 4 }
 0x2ac   :  { %v11504_v58 = vpop.eup %11503  ;;  %v3560_v1 = vsel %vm3448_vm3, %v13450_v51, 0.0  ;;  %v13466_v17 = vmul.f32 %v11502_v4, %v13371_v31  ;;  %v3654_v53 = vsel %vm3448_vm3, %v3630_v43, 0.0 }
 0x2ad   :  { %v3561_v6 = vrot.slane %v3560_v1, 4  ;;  %v13462_v7 = vmul.f32 %v11504_v58, %v13363_v20  ;;  %v3631_v54 = vmul.f32 %v3615_v44, %v13437_v3 }
 0x2ae   :  { %v3218_v9 = vpop.xlane.xlu0 %3217  ;;  %v3567_v37 = vsel %vm3448_vm3, %v13466_v17, 0.0  ;;  %v13482_v52 = vcombine.high %v13466_v17, %v13466_v17  ;;  %3655 = vadd.xlane.f32.xlu0 %v3654_v53 }
 0x2af   :  { %v3222_v18 = vmax.f32 %v3218_v9, 1e-16  ;;  %v3562_v25 = vadd.f32 %v3561_v6, %v3560_v1  ;;  %v3539_v26 = vsel %vm3448_vm3, %v13462_v7, 0.0  ;;  %v11506_v27 = vpop.eup %11505  ;;  %v3568_v23 = vrot.slane %v3567_v37, 4 }
 0x2b0   :  { %v3540_v34 = vrot.slane %v3539_v26, 4  ;;  %v13478_v4 = vcombine.high %v13462_v7, %v13462_v7  ;;  %v3574_v1 = vsel %vm3448_vm3, %v13482_v52, 0.0  ;;  %v3657_v2 = vsel %vm3448_vm3, %v3631_v54, 0.0 }
 0x2b1   :  { %11509 = vrsqrt.f32 %v3222_v18  ;;  %v3563_v36 = vrot.slane %v3562_v25, 2  ;;  %v3569_v59 = vadd.f32 %v3568_v23, %v3567_v37  ;;  %v3575_v13 = vrot.slane %v3574_v1, 4 }
 0x2b2   :  { %v3221_v39 = vpop.xlane.xlu1 %3220  ;;  %v3541_v45 = vadd.f32 %v3540_v34, %v3539_v26  ;;  %v3546_v62 = vsel %vm3448_vm3, %v13478_v4, 0.0  ;;  %v13493_v18 = vmul.f32 %v11506_v27, %v13380_v41  ;;  %v3555_v34 = vadd.f32 %v3554_v15, %v13456_v55  ;;  %3658 = vadd.xlane.f32.xlu0 %v3657_v2 }
 0x2b3   :  { %v11508_v46 = vpop.eup %11507  ;;  %v3223_v47 = vmax.f32 %v3221_v39, 1e-16  ;;  %v3564_v50 = vadd.f32 %v3563_v36, %v3562_v25  ;;  %v3570_v6 = vrot.slane %v3569_v59, 2  ;;  %v3547_v9 = vrot.slane %v3546_v62, 4 }
 0x2b4   :  { %v3542_v58 = vrot.slane %v3541_v45, 2  ;;  %v13496_v28 = vmul.f32 %v11508_v46, %v13389_v48  ;;  %v3576_v32 = vadd.f32 %v3575_v13, %v3574_v1  ;;  %v3581_v35 = vsel %vm3448_vm3, %v13493_v18, 0.0 }
 0x2b5   :  { %11511 = vrsqrt.f32 %v3223_v47  ;;  %v3565_v61 = vrot.slane %v3564_v50, 1  ;;  %v3571_v25 = vadd.f32 %v3570_v6, %v3569_v59  ;;  %v3548_v26 = vadd.f32 %v3547_v9, %v3546_v62 }
 0x2b6   :  { %v3543_v5 = vadd.f32 %v3542_v58, %v3541_v45  ;;  %v3582_v43 = vrot.slane %v3581_v35, 4  ;;  %v3577_v45 = vrot.slane %v3576_v32, 2  ;;  %v3556_v23 = vrot.slane %v3555_v34, 2 }
 0x2b7   :  { %v3566_v10 = vadd.f32 %v3565_v61, %v3564_v50  ;;  %v3572_v37 = vrot.slane %v3571_v25, 1  ;;  %v3549_v39 = vrot.slane %v3548_v26, 2  ;;  %v13504_v46 = vcombine.high %v13493_v18, %v13493_v18 }
 0x2b8   :  { %v3544_v16 = vrot.slane %v3543_v5, 1  ;;  %v3583_v53 = vadd.f32 %v3582_v43, %v3581_v35  ;;  %v3578_v58 = vadd.f32 %v3577_v45, %v3576_v32  ;;  %v3557_v59 = vadd.f32 %v3556_v23, %v3555_v34 }
 0x2b9   :  { %v3619_v19 = vmul.f32 0.25, %v3566_v10  ;;  %v3573_v50 = vadd.f32 %v3572_v37, %v3571_v25  ;;  %v3550_v55 = vadd.f32 %v3549_v39, %v3548_v26  ;;  %v3588_v15 = vsel %vm3448_vm3, %v13504_v46, 0.0 }
 0x2ba   :  { %v3545_v36 = vadd.f32 %v3544_v16, %v3543_v5  ;;  %v3584_v5 = vrot.slane %v3583_v53, 2  ;;  %v3579_v9 = vrot.slane %v3578_v58, 1  ;;  %v3558_v10 = vrot.slane %v3557_v59, 1 }
 0x2bb   :  { %v11510_v27 = vpop.eup %11509  ;;  %v3635_v44 = vmul.f32 %v3619_v19, %v13450_v51  ;;  %v3620_v1 = vmul.f32 0.25, %v3573_v50  ;;  %v3551_v2 = vrot.slane %v3550_v55, 1  ;;  %v13515_v19 = vsub.s32 0, %v13431_v57 }
 0x2bc   :  { %v3616_v47 = vmul.f32 0.25, %v3545_v36  ;;  %v3226_v61 = vmul.f32 %v11510_v27, %v13395_v8  ;;  %v3580_v32 = vadd.f32 %v3579_v9, %v3578_v58  ;;  %v3559_v34 = vadd.f32 %v3558_v10, %v3557_v59 }
 0x2bd   :  { %v3669_v54 = vsel %vm3448_vm3, %v3635_v44, 0.0  ;;  %v3636_v25 = vmul.f32 %v3620_v1, %v13466_v17  ;;  %v3552_v26 = vadd.f32 %v3551_v2, %v3550_v55  ;;  %v3585_v35 = vadd.f32 %v3584_v5, %v3583_v53 }
 0x2be   :  { %3670 = vadd.xlane.f32.xlu1 %v3669_v54  ;;  %v3632_v62 = vmul.f32 %v3616_v47, %v13462_v7  ;;  %v3261_v13 = vrot.slane %v3226_v61, %v13442_v24  ;;  %v3589_v43 = vrot.slane %v3588_v15, 4  ;;  %v3595_v27 = vsel %vm3448_vm3, %v13496_v28, 0.0 }
 0x2bf   :  { %v11512_v6 = vpop.eup %11511  ;;  %v3672_v37 = vsel %vm3448_vm3, %v3636_v25, 0.0  ;;  %v3617_v39 = vmul.f32 0.25, %v3552_v26  ;;  %v3621_v44 = vmul.f32 0.25, %v3580_v32  ;;  %v3618_v45 = vmul.f32 0.25, %v3559_v34 }
 0x2c0   :  { %v3660_v16 = vsel %vm3448_vm3, %v3632_v62, 0.0  ;;  %v3277_v36 = vrot.slane %v3261_v13, %v13442_v24  ;;  %v3586_v23 = vrot.slane %v3585_v35, 1  ;;  %v3590_v55 = vadd.f32 %v3589_v43, %v3588_v15 }
 0x2c1   :  { %3661 = vadd.xlane.f32.xlu0 %v3660_v16  ;;  %v3633_v47 = vmul.f32 %v3617_v39, %v13478_v4  ;;  %v3596_v54 = vrot.slane %v3595_v27, 4  ;;  %v3227_v53 = vmul.f32 %v11512_v6, %v13399_v11  ;;  %v3637_v58 = vmul.f32 %v3621_v44, %v13482_v52 }
 0x2c2   :  { %3673 = vadd.xlane.f32.xlu1 %v3672_v37  ;;  %v3355_v50 = vrot.slane %v3277_v36, %v13515_v19  ;;  %v3587_v59 = vadd.f32 %v3586_v23, %v3585_v35  ;;  %v3299_v62 = vcombine.high %v3277_v36, %v3277_v36  ;;  %v3634_v2 = vmul.f32 %v3618_v45, %v13445_v22 }
 0x2c3   :  { %v3663_v1 = vsel %vm3448_vm3, %v3633_v47, 0.0  ;;  %v3591_v5 = vrot.slane %v3590_v55, 2  ;;  %v3597_v9 = vadd.f32 %v3596_v54, %v3595_v27  ;;  %v3675_v10 = vsel %vm3448_vm3, %v3637_v58, 0.0 }
 0x2c4   :  { %v3622_v16 = vmul.f32 0.25, %v3587_v59  ;;  %v3432_v15 = vmul.f32 %v3355_v50, %v13406_v29  ;;  %v3254_v6 = vcombine.high %v3226_v61, %v3226_v61  ;;  %v3363_v34 = vrot.slane %v3299_v62, %v13515_v19 }
 0x2c5   :  { %3664 = vadd.xlane.f32.xlu0 %v3663_v1  ;;  %v3592_v25 = vadd.f32 %v3591_v5, %v3590_v55  ;;  %v3598_v26 = vrot.slane %v3597_v9, 2  ;;  %v3269_v35 = vcombine.high %v3261_v13, %v3261_v13  ;;  %v3310_v36 = vrot.slane %v3227_v53, %v13442_v24 }
 0x2c6   :  { %3676 = vadd.xlane.f32.xlu1 %v3675_v10  ;;  %v3638_v32 = vmul.f32 %v3622_v16, %v13493_v18  ;;  %v3666_v37 = vsel %vm3448_vm3, %v3634_v2, 0.0  ;;  %v3268_v27 = vrot.slane %v3254_v6, %v13442_v24  ;;  %v3449_v47 = vsel %vm3448_vm3, %v3432_v15, 0.0 }
 0x2c7   :  { %v3593_v39 = vrot.slane %v3592_v25, 1  ;;  %v3599_v43 = vadd.f32 %v3598_v26, %v3597_v9  ;;  %v3318_v29 = vcombine.high %v3310_v36, %v3310_v36  ;;  %v3291_v13 = vrot.slane %v3269_v35, %v13442_v24 }
 0x2c8   :  { %v3678_v44 = vsel %vm3448_vm3, %v3638_v32, 0.0  ;;  %v3284_v23 = vrot.slane %v3268_v27, %v13442_v24  ;;  %v3434_v54 = vmul.f32 %v3363_v34, %v13415_v38  ;;  %v3326_v2 = vrot.slane %v3310_v36, %v13442_v24 }
 0x2c9   :  { %3667 = vadd.xlane.f32.xlu0 %v3666_v37  ;;  %v3594_v45 = vadd.f32 %v3593_v39, %v3592_v25  ;;  %v3600_v61 = vrot.slane %v3599_v43, 1  ;;  %v3340_v50 = vrot.slane %v3318_v29, %v13442_v24  ;;  %v3303_v5 = vcombine.high %v3227_v53, %v3227_v53 }
 0x2ca   :  { %3679 = vadd.xlane.f32.xlu1 %v3678_v44  ;;  %v3371_v59 = vrot.slane %v3284_v23, %v13515_v19  ;;  %v3359_v10 = vrot.slane %v3291_v13, %v13515_v19  ;;  %v3301_v15 = vcombine.high %v3291_v13, %v3291_v13  ;;  %v3455_v38 = vsel %vm3448_vm3, %v3434_v54, 0.0 }
 0x2cb   :  { %v3623_v55 = vmul.f32 0.25, %v3594_v45  ;;  %v3601_v58 = vadd.f32 %v3600_v61, %v3599_v43  ;;  %v3391_v16 = vrot.slane %v3340_v50, %v13515_v19  ;;  %v3270_v6 = vcombine.high %v3268_v27, %v3268_v27 }
 0x2cc   :  { %v3436_v9 = vmul.f32 %v3371_v59, %v13428_v56  ;;  %v3387_v32 = vrot.slane %v3326_v2, %v13515_v19  ;;  %v3348_v34 = vcombine.high %v3326_v2, %v3326_v2  ;;  %v3433_v56 = vmul.f32 %v3359_v10, %v13412_v33 }
 0x2cd   :  { %3450 = vadd.xlane.f32.xlu0 %v3449_v47  ;;  %v3639_v62 = vmul.f32 %v3623_v55, %v13504_v46  ;;  %v3624_v1 = vmul.f32 0.25, %v3601_v58  ;;  %v3441_v35 = vmul.f32 %v3391_v16, %v13450_v51  ;;  %v3367_v36 = vrot.slane %v3301_v15, %v13515_v19 }
 0x2ce   :  { %v3461_v53 = vsel %vm3448_vm3, %v3436_v9, 0.0  ;;  %v3298_v39 = vrot.slane %v3270_v6, %v13442_v24  ;;  %v3317_v43 = vrot.slane %v3303_v5, %v13442_v24  ;;  %v13559_v27 = vcombine.high %v13496_v28, %v13496_v28 }
 0x2cf   :  { %v3681_v25 = vsel %vm3448_vm3, %v3639_v62, 0.0  ;;  %v3640_v26 = vmul.f32 %v3624_v1, %v13496_v28  ;;  %v3440_v44 = vmul.f32 %v3387_v32, %v13445_v22  ;;  %v3395_v33 = vrot.slane %v3348_v34, %v13515_v19 }
 0x2d0   :  { %3682 = vadd.xlane.f32.xlu1 %v3681_v25  ;;  %v3452_v51 = vsel %vm3448_vm3, %v3433_v56, 0.0  ;;  %v3435_v29 = vmul.f32 %v3367_v36, %v13421_v30  ;;  %v3300_v45 = vcombine.high %v3284_v23, %v3284_v23  ;;  %v3602_v61 = vsel %vm3448_vm3, %v13559_v27, 0.0 }
 0x2d1   :  { %3456 = vadd.xlane.f32.xlu0 %v3455_v38  ;;  %v3684_v37 = vsel %vm3448_vm3, %v3640_v26, 0.0  ;;  %v3476_v47 = vsel %vm3448_vm3, %v3441_v35, 0.0  ;;  %v3375_v13 = vrot.slane %v3298_v39, %v13515_v19  ;;  %v3333_v55 = vrot.slane %v3317_v43, %v13442_v24 }
 0x2d2   :  { %v3319_v54 = vcombine.high %v3317_v43, %v3317_v43  ;;  %v3603_v22 = vrot.slane %v3602_v61, 4  ;;  %v3473_v58 = vsel %vm3448_vm3, %v3440_v44, 0.0  ;;  %v3442_v59 = vmul.f32 %v3395_v33, %v13466_v17 }
 0x2d3   :  { %v3379_v30 = vrot.slane %v3300_v45, %v13515_v19  ;;  %v3350_v23 = vcombine.high %v3340_v50, %v3340_v50  ;;  %v3302_v62 = vcombine.high %v3298_v39, %v3298_v39  ;;  %v3458_v2 = vsel %vm3448_vm3, %v3435_v29, 0.0 }
 0x2d4   :  { %3685 = vadd.xlane.f32.xlu1 %v3684_v37  ;;  %v3604_v1 = vadd.f32 %v3603_v22, %v3602_v61  ;;  %v3437_v5 = vmul.f32 %v3375_v13, %v13437_v3  ;;  %v3403_v9 = vrot.slane %v3333_v55, %v13515_v19  ;;  %v3347_v10 = vrot.slane %v3319_v54, %v13442_v24 }
 0x2d5   :  { %3462 = vadd.xlane.f32.xlu0 %v3461_v53  ;;  %v3479_v15 = vsel %vm3448_vm3, %v3442_v59, 0.0  ;;  %v3438_v17 = vmul.f32 %v3379_v30, %v13462_v7  ;;  %v3399_v25 = vrot.slane %v3350_v23, %v13515_v19  ;;  %v3383_v50 = vrot.slane %v3302_v62, %v13515_v19 }
 0x2d6   :  { %v3605_v16 = vrot.slane %v3604_v1, 2  ;;  %v3464_v38 = vsel %vm3448_vm3, %v3437_v5, 0.0  ;;  %v3444_v26 = vmul.f32 %v3403_v9, %v13493_v18  ;;  %v3351_v3 = vcombine.high %v3347_v10, %v3347_v10 }
 0x2d7   :  { %v3467_v32 = vsel %vm3448_vm3, %v3438_v17, 0.0  ;;  %v3443_v34 = vmul.f32 %v3399_v25, %v13482_v52  ;;  %v3439_v53 = vmul.f32 %v3383_v50, %v13478_v4  ;;  %v3349_v56 = vcombine.high %v3333_v55, %v3333_v55 }
 0x2d8   :  { %3453 = vadd.xlane.f32.xlu1 %v3452_v51  ;;  %v3606_v6 = vadd.f32 %v3605_v16, %v3604_v1  ;;  %v3485_v7 = vsel %vm3448_vm3, %v3444_v26, 0.0  ;;  %v3407_v35 = vrot.slane %v3347_v10, %v13515_v19  ;;  %v3415_v36 = vrot.slane %v3351_v3, %v13515_v19 }
 0x2d9   :  { %3477 = vadd.xlane.f32.xlu0 %v3476_v47  ;;  %v3482_v18 = vsel %vm3448_vm3, %v3443_v34, 0.0  ;;  %v3470_v39 = vsel %vm3448_vm3, %v3439_v53, 0.0  ;;  %v3411_v4 = vrot.slane %v3349_v56, %v13515_v19  ;;  %v3723_v50 = vand.u32 127, %v3258_v42 }
 0x2da   :  { %v3607_v37 = vrot.slane %v3606_v6, 1  ;;  %v3445_v43 = vmul.f32 %v3407_v35, %v13504_v46  ;;  %v3447_v52 = vmul.f32 %v3415_v36, %v13559_v27 }
 0x2db   :  { %v3446_v29 = vmul.f32 %v3411_v4, %v13496_v28 }
 0x2dc   :  { %3474 = vadd.xlane.f32.xlu1 %v3473_v58  ;;  %v3608_v44 = vadd.f32 %v3607_v37, %v3606_v6  ;;  %v3488_v33 = vsel %vm3448_vm3, %v3445_v43, 0.0  ;;  %v3494_v51 = vsel %vm3448_vm3, %v3447_v52, 0.0  ;;  %v13604_v6 = vsub.s32 %v3723_v50, %v13431_v57 }
 0x2dd   :  { %3459 = vadd.xlane.f32.xlu0 %v3458_v2  ;;  %v3491_v61 = vsel %vm3448_vm3, %v3446_v29, 0.0 }
 0x2de   :  { %v3625_v45 = vmul.f32 0.25, %v3608_v44 }
 0x2e0   :  { %3480 = vadd.xlane.f32.xlu1 %v3479_v15  ;;  %v3641_v46 = vmul.f32 %v3625_v45, %v13559_v27 }
 0x2e1   :  { %3465 = vadd.xlane.f32.xlu0 %v3464_v38 }
 0x2e2   :  { %v3687_v47 = vsel %vm3448_vm3, %v3641_v46, 0.0 }
 0x2e4   :  { %3486 = vadd.xlane.f32.xlu1 %v3485_v7 }
 0x2e5   :  { %3468 = vadd.xlane.f32.xlu0 %v3467_v32 }
 0x2e8   :  { %3483 = vadd.xlane.f32.xlu1 %v3482_v18 }
 0x2e9   :  { %3471 = vadd.xlane.f32.xlu0 %v3470_v39 }
 0x2ec   :  { %3489 = vadd.xlane.f32.xlu1 %v3488_v33 }
 0x2ed   :  { %3495 = vadd.xlane.f32.xlu0 %v3494_v51 }
 0x2f0   :  { %3492 = vadd.xlane.f32.xlu1 %v3491_v61 }
 0x2f4   :  { %3688 = vadd.xlane.f32.xlu1 %v3687_v47 }
 0x32e   :  { %v3644_v13 = vpop.xlane.xlu0 %3643 }
 0x331   :  { %v3647_v54 = vpop.xlane.xlu1 %3646 }
 0x335   :  { %v3650_v58 = vpop.xlane.xlu1 %3649 }
 0x337   :  { %v3653_v55 = vpop.xlane.xlu0 %3652 }
 0x33b   :  { %v3656_v22 = vpop.xlane.xlu0 %3655 }
 0x33f   :  { %v3659_v59 = vpop.xlane.xlu0 %3658 }
 0x34b   :  { %v3671_v30 = vpop.xlane.xlu1 %3670 }
 0x34e   :  { %v3662_v23 = vpop.xlane.xlu0 %3661 }
 0x34f   :  { %v3674_v28 = vpop.xlane.xlu1 %3673 }
 0x352   :  { %v3665_v62 = vpop.xlane.xlu0 %3664 }
 0x353   :  { %v3677_v1 = vpop.xlane.xlu1 %3676 }
 0x356   :  { %v3668_v2 = vpop.xlane.xlu0 %3667 }
 0x357   :  { %v3680_v5 = vpop.xlane.xlu1 %3679 }
 0x35a   :  { %v3451_v9 = vpop.xlane.xlu0 %3450 }
 0x35b   :  { %v13606_v32 = vadd.f32 %v3644_v13, %v3451_v9 }
 0x35d   :  { %v3683_v10 = vpop.xlane.xlu1 %3682  ;;  %v3727_v42 = vrot.slane %v13606_v32, %v13604_v6 }
 0x35e   :  { %v3457_v27 = vpop.xlane.xlu0 %3456 }
 0x35f   :  { %v13612_v56 = vadd.f32 %v3650_v58, %v3457_v27 }
 0x361   :  { %v3686_v16 = vpop.xlane.xlu1 %3685  ;;  %v3735_v39 = vrot.slane %v13612_v56, %v13604_v6 }
 0x362   :  { %v3463_v15 = vpop.xlane.xlu0 %3462 }
 0x363   :  { %v13623_v43 = vadd.f32 %v3656_v22, %v3463_v15 }
 0x365   :  { %v3454_v17 = vpop.xlane.xlu1 %3453  ;;  %v3743_v45 = vrot.slane %v13623_v43, %v13604_v6 }
 0x366   :  { %v3478_v25 = vpop.xlane.xlu0 %3477  ;;  %v13601_v38 = vadd.f32 %v3647_v54, %v3454_v17 }
 0x367   :  { %v13642_v58 = vadd.f32 %v3671_v30, %v3478_v25 }
 0x368   :  { %v3731_v34 = vrot.slane %v13601_v38, %v13604_v6 }
 0x369   :  { %v3475_v26 = vpop.xlane.xlu1 %3474 }
 0x36a   :  { %v3460_v3 = vpop.xlane.xlu0 %3459  ;;  %v3789_v36 = vsel %vm3788_vm4, %v3731_v34, %v3727_v42  ;;  %v13635_v13 = vadd.f32 %v3668_v2, %v3475_v26 }
 0x36b   :  { %v13610_v53 = vadd.f32 %v3653_v55, %v3460_v3  ;;  %v3791_v33 = vsel %vm3790_vm5, %v3735_v39, %v3789_v36 }
 0x36d   :  { %v3481_v7 = vpop.xlane.xlu1 %3480  ;;  %v3739_v37 = vrot.slane %v13610_v53, %v13604_v6 }
 0x36e   :  { %v3466_v35 = vpop.xlane.xlu0 %3465  ;;  %v13639_v54 = vadd.f32 %v3674_v28, %v3481_v7  ;;  %v3759_v28 = vrot.slane %v13635_v13, %v13604_v6 }
 0x36f   :  { %v13619_v18 = vadd.f32 %v3659_v59, %v3466_v35  ;;  %v3793_v51 = vsel %vm3792_vm6, %v3739_v37, %v3791_v33 }
 0x370   :  { %v3795_v22 = vsel %vm3794_vm7, %v3743_v45, %v3793_v51  ;;  %v3767_v15 = vrot.slane %v13639_v54, %v13604_v6  ;;  %v11840_v45 = vmov 0  }
 0x371   :  { %v3487_v52 = vpop.xlane.xlu1 %3486  ;;  %v3747_v29 = vrot.slane %v13619_v18, %v13604_v6  ;;  %11284 = vset.pattern.permute.xlu1 %v11840_v45  ;;  %11283 = vset.pattern.permute.xlu0 %v11840_v45 }
 0x372   :  { %v3469_v4 = vpop.xlane.xlu0 %3468  ;;  %v13662_v50 = vadd.f32 %v3680_v5, %v3487_v52 }
 0x373   :  { %v13625_v44 = vadd.f32 %v3662_v23, %v3469_v4  ;;  %v3797_v9 = vsel %vm3796_vm8, %v3747_v29, %v3795_v22  ;;  %v13691_v22 = vsub.s32 3, %v13431_v57 }
 0x374   :  { %v3775_v36 = vrot.slane %v13662_v50, %v13604_v6 }
 0x375   :  { %v3751_v61 = vrot.slane %v13625_v44, %v13604_v6  ;;  %v3484_v46 = vpop.xlane.xlu1 %3483 }
 0x376   :  { %v3472_v47 = vpop.xlane.xlu0 %3471  ;;  %v13644_v59 = vadd.f32 %v3677_v1, %v3484_v46  ;;  %v3763_v1 = vrot.slane %v13642_v58, %v13604_v6  ;;  %v13685_v46 = vsub.s32 2, %v13431_v57 }
 0x377   :  { %v13637_v55 = vadd.f32 %v3665_v62, %v3472_v47  ;;  %v3799_v62 = vsel %vm3798_vm9, %v3751_v61, %v3797_v9  ;;  %v13682_v61 = vsub.s32 1, %v13431_v57  ;;  %v13688_v47 = vsub.s32 5, %v13431_v57 }
 0x378   :  { %v3771_v17 = vrot.slane %v13644_v59, %v13604_v6  ;;  %v3802_v3 = vsel %vm3788_vm4, %v3763_v1, %v3759_v28 }
 0x379   :  { %v3755_v23 = vrot.slane %v13637_v55, %v13604_v6  ;;  %v3490_v2 = vpop.xlane.xlu1 %3489  ;;  %v3803_v7 = vsel %vm3790_vm5, %v3767_v15, %v3802_v3  ;;  %v13708_v3 = vsub.s32 7, %v13431_v57 }
 0x37a   :  { %v13660_v25 = vadd.f32 %v3683_v10, %v3490_v2  ;;  %v3804_v35 = vsel %vm3792_vm6, %v3771_v17, %v3803_v7  ;;  %v3496_v10 = vpop.xlane.xlu0 %3495 }
 0x37b   :  { %v3801_v27 = vsel %vm3800_vm10, %v3755_v23, %v3799_v62  ;;  %v3805_v52 = vsel %vm3794_vm7, %v3775_v36, %v3804_v35  ;;  %v13694_v23 = vsub.s32 6, %v13431_v57 }
 0x37c   :  { %v3812_v30 = vsel %vm3811_vm11, %v3801_v27, -inf  ;;  %v3779_v42 = vrot.slane %v13660_v25, %v13604_v6  ;;  %v13700_v27 = vsub.s32 4, %v13431_v57 }
 0x37d   :  { %3813 = vmax.xlane.f32.xlu0 %v3812_v30  ;;  %v3493_v26 = vpop.xlane.xlu1 %3492 }
 0x37e   :  { %v13665_v34 = vadd.f32 %v3686_v16, %v3493_v26  ;;  %v3806_v4 = vsel %vm3796_vm8, %v3779_v42, %v3805_v52 }
 0x380   :  { %v3783_v5 = vrot.slane %v13665_v34, %v13604_v6 }
 0x381   :  { %v3689_v37 = vpop.xlane.xlu1 %3688 }
 0x382   :  { %v3705_v39 = vadd.f32 %v3689_v37, %v3496_v10  ;;  %v3807_v33 = vsel %vm3798_vm9, %v3783_v5, %v3806_v4 }
 0x384   :  { %v3787_v16 = vrot.slane %v3705_v39, %v13604_v6 }
 0x386   :  { %v3808_v51 = vsel %vm3800_vm10, %v3787_v16, %v3807_v33 }
 0x387   :  { %v3815_v29 = vsel %vm3811_vm11, %v3808_v51, -inf }
 0x388   :  { %3816 = vmax.xlane.f32.xlu1 %v3815_v29 }
 0x40a   :  { %v3814_v9 = vpop.xlane.xlu0 %3813 }
 0x40b   :  { %v3823_v2 = vrot.slane %v3814_v9, %v13515_v19  ;;  %v3827_v62 = vrot.slane %v3814_v9, %v13682_v61  ;;  %v3831_v28 = vrot.slane %v3814_v9, %v13685_v46  ;;  %v3843_v15 = vrot.slane %v3814_v9, %v13688_v47 }
 0x40c   :  { %v3835_v30 = vrot.slane %v3814_v9, %v13691_v22  ;;  %v3847_v7 = vrot.slane %v3814_v9, %v13694_v23  ;;  %v3839_v10 = vrot.slane %v3814_v9, %v13700_v27 }
 0x40d   :  { %v3900_v1 = vsub.f32 %v13606_v32, %v3823_v2  ;;  %v3901_v17 = vsub.f32 %v13601_v38, %v3827_v62  ;;  %v3902_v26 = vsub.f32 %v13612_v56, %v3831_v28  ;;  %v3905_v35 = vsub.f32 %v13619_v18, %v3843_v15 }
 0x40e   :  { %v3903_v5 = vsub.f32 %v13610_v53, %v3835_v30  ;;  %v3851_v32 = vrot.slane %v3814_v9, %v13708_v3  ;;  %v3906_v38 = vsub.f32 %v13625_v44, %v3847_v7  ;;  %v3904_v57 = vsub.f32 %v13623_v43, %v3839_v10 }
 0x40f   :  { %v3916_v42 = vmul.f32 1.442695, %v3900_v1  ;;  %v3918_v36 = vmul.f32 1.442695, %v3901_v17  ;;  %v3920_v37 = vmul.f32 1.442695, %v3902_v26 }
 0x410   :  { %v3926_v56 = vmul.f32 1.442695, %v3905_v35  ;;  %v3922_v52 = vmul.f32 1.442695, %v3903_v5  ;;  %v3907_v18 = vsub.f32 %v13637_v55, %v3851_v32  ;;  %v3928_v16 = vmul.f32 1.442695, %v3906_v38 }
 0x411   :  { %11513 = vpow2.f32 %v3916_v42  ;;  %v3924_v53 = vmul.f32 1.442695, %v3904_v57 }
 0x412   :  { %11515 = vpow2.f32 %v3918_v36  ;;  %v3930_v29 = vmul.f32 1.442695, %v3907_v18 }
 0x413   :  { %11517 = vpow2.f32 %v3920_v37 }
 0x414   :  { %11519 = vpow2.f32 %v3926_v56 }
 0x415   :  { %v3817_v4 = vpop.xlane.xlu1 %3816  ;;  %11521 = vpow2.f32 %v3922_v52 }
 0x416   :  { %v3855_v33 = vrot.slane %v3817_v4, %v13515_v19  ;;  %v3883_v51 = vrot.slane %v3817_v4, %v13708_v3  ;;  %11523 = vpow2.f32 %v3928_v16  ;;  %v3859_v44 = vrot.slane %v3817_v4, %v13682_v61 }
 0x417   :  { %11525 = vpow2.f32 %v3924_v53  ;;  %v3863_v2 = vrot.slane %v3817_v4, %v13685_v46  ;;  %v3875_v10 = vrot.slane %v3817_v4, %v13688_v47  ;;  %v3879_v38 = vrot.slane %v3817_v4, %v13694_v23 }
 0x418   :  { %v3908_v45 = vsub.f32 %v13635_v13, %v3855_v33  ;;  %v3915_v55 = vsub.f32 %v3705_v39, %v3883_v51  ;;  %11527 = vpow2.f32 %v3930_v29  ;;  %v3909_v62 = vsub.f32 %v13642_v58, %v3859_v44 }
 0x419   :  { %v3867_v39 = vrot.slane %v3817_v4, %v13691_v22  ;;  %v3910_v1 = vsub.f32 %v13639_v54, %v3863_v2  ;;  %v3871_v58 = vrot.slane %v3817_v4, %v13700_v27  ;;  %v3913_v56 = vsub.f32 %v13660_v25, %v3875_v10 }
 0x41a   :  { %v3932_v28 = vmul.f32 1.442695, %v3908_v45  ;;  %v3946_v13 = vmul.f32 1.442695, %v3915_v55  ;;  %v3934_v17 = vmul.f32 1.442695, %v3909_v62 }
 0x41b   :  { %v13722_v43 = vpop.eup %11513  ;;  %v3911_v35 = vsub.f32 %v13644_v59, %v3867_v39  ;;  %v3936_v42 = vmul.f32 1.442695, %v3910_v1  ;;  %v3912_v5 = vsub.f32 %v13662_v50, %v3871_v58  ;;  %v3914_v50 = vsub.f32 %v13665_v34, %v3879_v38 }
 0x41c   :  { %v13724_v9 = vpop.eup %11515  ;;  %3965 = vperm.xlu0 %11283, %v13722_v43   ;;  %11529 = vpow2.f32 %v3932_v28  ;;  %v3942_v18 = vmul.f32 1.442695, %v3913_v56 }
 0x41d   :  { %3968 = vperm.xlu1 %11284, %v13724_v9   ;;  %v13730_v15 = vpop.eup %11517  ;;  %11531 = vpow2.f32 %v3946_v13  ;;  %v3938_v37 = vmul.f32 1.442695, %v3911_v35  ;;  %v3940_v57 = vmul.f32 1.442695, %v3912_v5  ;;  %v3944_v4 = vmul.f32 1.442695, %v3914_v50 }
 0x41e   :  { %v13732_v30 = vpop.eup %11519  ;;  %11533 = vpow2.f32 %v3934_v17 }
 0x41f   :  { %v13738_v26 = vpop.eup %11521  ;;  %11535 = vpow2.f32 %v3936_v42 }
 0x420   :  { %3980 = vperm.xlu0 %11283, %v13732_v30   ;;  %v13740_v7 = vpop.eup %11523  ;;  %11537 = vpow2.f32 %v3938_v37 }
 0x421   :  { %3971 = vperm.xlu1 %11284, %v13730_v15   ;;  %v13746_v36 = vpop.eup %11525  ;;  %11539 = vpow2.f32 %v3940_v57 }
 0x422   :  { %v13748_v54 = vpop.eup %11527  ;;  %11541 = vpow2.f32 %v3942_v18 }
 0x423   :  { %11543 = vpow2.f32 %v3944_v4 }
 0x424   :  { %3983 = vperm.xlu0 %11283, %v13740_v7  }
 0x425   :  { %3974 = vperm.xlu1 %11284, %v13738_v26  }
 0x426   :  { %v13754_v32 = vpop.eup %11529 }
 0x427   :  { %v13757_v59 = vpop.eup %11531 }
 0x428   :  { %3986 = vperm.xlu0 %11283, %v13748_v54   ;;  %v13762_v52 = vpop.eup %11533 }
 0x429   :  { %3977 = vperm.xlu1 %11284, %v13746_v36   ;;  %v13766_v16 = vpop.eup %11535 }
 0x42a   :  { %v13769_v33 = vpop.eup %11537 }
 0x42b   :  { %v13772_v25 = vpop.eup %11539 }
 0x42c   :  { %4010 = vperm.xlu0 %11283, %v13757_v59   ;;  %v13775_v53 = vpop.eup %11541 }
 0x42d   :  { %3989 = vperm.xlu1 %11284, %v13754_v32   ;;  %v13778_v34 = vpop.eup %11543 }
 0x431   :  { %3992 = vperm.xlu1 %11284, %v13762_v52  }
 0x435   :  { %3995 = vperm.xlu1 %11284, %v13766_v16  }
 0x439   :  { %3998 = vperm.xlu1 %11284, %v13769_v33  }
 0x43d   :  { %4001 = vperm.xlu1 %11284, %v13772_v25  }
 0x441   :  { %4004 = vperm.xlu1 %11284, %v13775_v53  }
 0x445   :  { %4007 = vperm.xlu1 %11284, %v13778_v34  }
 0x49b   :  { %v3966_v51 = vpop.permute.xlu0 %3965 }
 0x49c   :  { %v3969_v29 = vpop.permute.xlu1 %3968  ;;  %v4015_v2 = vrot.slane %v3966_v51, %v13604_v6 }
 0x49d   :  { %v4019_v55 = vrot.slane %v3969_v29, %v13604_v6 }
 0x49f   :  { %v3981_v45 = vpop.permute.xlu0 %3980  ;;  %v4076_v1 = vsel %vm3788_vm4, %v4019_v55, %v4015_v2 }
 0x4a0   :  { %v3972_v44 = vpop.permute.xlu1 %3971  ;;  %v4035_v10 = vrot.slane %v3981_v45, %v13604_v6 }
 0x4a1   :  { %v4023_v13 = vrot.slane %v3972_v44, %v13604_v6 }
 0x4a3   :  { %v3984_v28 = vpop.permute.xlu0 %3983  ;;  %v4077_v58 = vsel %vm3790_vm5, %v4023_v13, %v4076_v1 }
 0x4a4   :  { %v3975_v62 = vpop.permute.xlu1 %3974  ;;  %v4039_v37 = vrot.slane %v3984_v28, %v13604_v6 }
 0x4a5   :  { %v4027_v39 = vrot.slane %v3975_v62, %v13604_v6 }
 0x4a7   :  { %v3987_v42 = vpop.permute.xlu0 %3986  ;;  %v4078_v5 = vsel %vm3792_vm6, %v4027_v39, %v4077_v58 }
 0x4a8   :  { %v3978_v17 = vpop.permute.xlu1 %3977  ;;  %v4043_v56 = vrot.slane %v3987_v42, %v13604_v6 }
 0x4a9   :  { %v4031_v35 = vrot.slane %v3978_v17, %v13604_v6 }
 0x4ab   :  { %v4079_v38 = vsel %vm3794_vm7, %v4031_v35, %v4078_v5  ;;  %v4011_v35 = vpop.permute.xlu0 %4010 }
 0x4ac   :  { %v3990_v57 = vpop.permute.xlu1 %3989  ;;  %v4080_v50 = vsel %vm3796_vm8, %v4035_v10, %v4079_v38 }
 0x4ad   :  { %v4081_v18 = vsel %vm3798_vm9, %v4039_v37, %v4080_v50  ;;  %v4047_v28 = vrot.slane %v3990_v57, %v13604_v6 }
 0x4ae   :  { %v4082_v4 = vsel %vm3800_vm10, %v4043_v56, %v4081_v18  ;;  %v4075_v56 = vrot.slane %v4011_v35, %v13604_v6 }
 0x4af   :  { %v4092_v51 = vsel %vm3811_vm11, %v4082_v4, 0.0 }
 0x4b0   :  { %v3993_v29 = vpop.permute.xlu1 %3992  ;;  %4093 = vadd.xlane.f32.xlu1 %v4092_v51 }
 0x4b1   :  { %v4051_v2 = vrot.slane %v3993_v29, %v13604_v6 }
 0x4b3   :  { %v4083_v17 = vsel %vm3788_vm4, %v4051_v2, %v4047_v28 }
 0x4b4   :  { %v3996_v44 = vpop.permute.xlu1 %3995 }
 0x4b5   :  { %v4055_v62 = vrot.slane %v3996_v44, %v13604_v6 }
 0x4b7   :  { %v4084_v42 = vsel %vm3790_vm5, %v4055_v62, %v4083_v17 }
 0x4b8   :  { %v3999_v45 = vpop.permute.xlu1 %3998 }
 0x4b9   :  { %v4059_v13 = vrot.slane %v3999_v45, %v13604_v6 }
 0x4bb   :  { %v4085_v10 = vsel %vm3792_vm6, %v4059_v13, %v4084_v42 }
 0x4bc   :  { %v4002_v55 = vpop.permute.xlu1 %4001 }
 0x4bd   :  { %v4063_v1 = vrot.slane %v4002_v55, %v13604_v6 }
 0x4bf   :  { %v4086_v37 = vsel %vm3794_vm7, %v4063_v1, %v4085_v10 }
 0x4c0   :  { %v4005_v39 = vpop.permute.xlu1 %4004 }
 0x4c1   :  { %v4067_v58 = vrot.slane %v4005_v39, %v13604_v6 }
 0x4c3   :  { %v4087_v57 = vsel %vm3796_vm8, %v4067_v58, %v4086_v37 }
 0x4c4   :  { %v4008_v5 = vpop.permute.xlu1 %4007 }
 0x4c5   :  { %v4071_v38 = vrot.slane %v4008_v5, %v13604_v6 }
 0x4c7   :  { %v4088_v50 = vsel %vm3798_vm9, %v4071_v38, %v4087_v57 }
 0x4c8   :  { %v4089_v18 = vsel %vm3800_vm10, %v4075_v56, %v4088_v50 }
 0x4c9   :  { %v4095_v4 = vsel %vm3811_vm11, %v4089_v18, 0.0 }
 0x4ca   :  { %4096 = vadd.xlane.f32.xlu0 %v4095_v4 }
 0x53d   :  { %v4094_v51 = vpop.xlane.xlu1 %4093 }
 0x53e   :  { %11545 = vrcp.f32 %v4094_v51 }
 0x548   :  { %v11546_v29 = vpop.eup %11545 }
 0x549   :  { %v4109_v44 = vrot.slane %v11546_v29, %v13682_v61  ;;  %v4105_v45 = vrot.slane %v11546_v29, %v13515_v19  ;;  %v4113_v2 = vrot.slane %v11546_v29, %v13685_v46  ;;  %v4117_v13 = vrot.slane %v11546_v29, %v13691_v22 }
 0x54a   :  { %v4121_v1 = vrot.slane %v11546_v29, %v13700_v27  ;;  %v4133_v42 = vrot.slane %v11546_v29, %v13708_v3 }
 0x54b   :  { %v4183_v55 = vmul.f32 %v13724_v9, %v4109_v44  ;;  %v4182_v6 = vmul.f32 %v13722_v43, %v4105_v45  ;;  %v4184_v62 = vmul.f32 %v13730_v15, %v4113_v2  ;;  %v4185_v39 = vmul.f32 %v13738_v26, %v4117_v13 }
 0x54c   :  { %v4186_v9 = vmul.f32 %v13746_v36, %v4121_v1  ;;  %v4125_v43 = vrot.slane %v11546_v29, %v13688_v47  ;;  %v4129_v15 = vrot.slane %v11546_v29, %v13694_v23  ;;  %v4189_v10 = vmul.f32 %v13748_v54, %v4133_v42 }
 0x54d   :  { %4305 = vperm.xlu1 %11284, %v4183_v55   ;;  %4300 = vperm.xlu0 %11283, %v4182_v6   ;;  %v4475_v28 = vsub.f32 1.0, %v4183_v55  ;;  %v4474_v37 = vsub.f32 1.0, %v4182_v6  ;;  %v4476_v38 = vsub.f32 1.0, %v4184_v62  ;;  %v4477_v50 = vsub.f32 1.0, %v4185_v39 }
 0x54e   :  { %v4187_v58 = vmul.f32 %v13732_v30, %v4125_v43  ;;  %v4188_v35 = vmul.f32 %v13740_v7, %v4129_v15  ;;  %v4478_v4 = vsub.f32 1.0, %v4186_v9  ;;  %v2373_v6 = vmax.f32 %v13329_v60, 0.0  ;;  %v4754_v60 = vld [vmem:[%s14892_s12] sm:$0xff] }
 0x54f   :  { %v2374_v2 = vmax.f32 %v13331_v63, 0.0  ;;  %v4756_v63 = vld [vmem:[%s14892_s12 + $0x10] sm:$0xff]  ;;  %v4207_v42 = vrot.slane %v13395_v8, %v13442_v24 }
 0x550   :  { %v4480_v44 = vsub.f32 1.0, %v4188_v35 }
 0x551   :  { %4310 = vperm.xlu1 %11284, %v4184_v62   ;;  %4521 = vperm.xlu0 %11283, %v4475_v28  }
 0x555   :  { %4315 = vperm.xlu1 %11284, %v4185_v39   ;;  %v4757_v39 = vld [vmem:[%s14892_s12 + $0x18] sm:$0xff] }
 0x556   :  { %v10847_v1 = vpack.c.bf16 %v4757_v39, %v4756_v63 }
 0x557   :  { %v4097_v17 = vpop.xlane.xlu0 %4096 }
 0x558   :  { %11547 = vrcp.f32 %v4097_v17 }
 0x559   :  { %4320 = vperm.xlu1 %11284, %v4186_v9  }
 0x55d   :  { %4325 = vperm.xlu1 %11284, %v4187_v58  }
 0x561   :  { %4330 = vperm.xlu1 %11284, %v4188_v35  }
 0x562   :  { %v11548_v26 = vpop.eup %11547 }
 0x563   :  { %v4137_v5 = vrot.slane %v11548_v26, %v13515_v19  ;;  %v4141_v30 = vrot.slane %v11548_v26, %v13682_v61  ;;  %v4145_v56 = vrot.slane %v11548_v26, %v13685_v46  ;;  %v4149_v54 = vrot.slane %v11548_v26, %v13691_v22 }
 0x564   :  { %v4153_v18 = vrot.slane %v11548_v26, %v13700_v27  ;;  %v4157_v29 = vrot.slane %v11548_v26, %v13688_v47  ;;  %v4161_v22 = vrot.slane %v11548_v26, %v13694_v23  ;;  %v4165_v47 = vrot.slane %v11548_v26, %v13708_v3 }
 0x565   :  { %4335 = vperm.xlu1 %11284, %v4189_v10   ;;  %v4190_v36 = vmul.f32 %v13754_v32, %v4137_v5  ;;  %v4191_v7 = vmul.f32 %v13762_v52, %v4141_v30  ;;  %v4192_v57 = vmul.f32 %v13766_v16, %v4145_v56  ;;  %v4193_v32 = vmul.f32 %v13769_v33, %v4149_v54 }
 0x566   :  { %v4194_v51 = vmul.f32 %v13772_v25, %v4153_v18  ;;  %v4479_v52 = vsub.f32 1.0, %v4187_v58  ;;  %v4195_v16 = vmul.f32 %v13775_v53, %v4157_v29  ;;  %v4196_v33 = vmul.f32 %v13778_v34, %v4161_v22 }
 0x567   :  { %4340 = vperm.xlu0 %11283, %v4190_v36   ;;  %v4482_v27 = vsub.f32 1.0, %v4190_v36  ;;  %v4483_v45 = vsub.f32 1.0, %v4191_v7  ;;  %v4481_v25 = vsub.f32 1.0, %v4189_v10  ;;  %v4484_v55 = vsub.f32 1.0, %v4192_v57 }
 0x568   :  { %v4197_v53 = vmul.f32 %v13757_v59, %v4165_v47  ;;  %v4485_v23 = vsub.f32 1.0, %v4193_v32  ;;  %v4486_v34 = vsub.f32 1.0, %v4194_v51  ;;  %v4487_v3 = vsub.f32 1.0, %v4195_v16  ;;  %v4755_v59 = vld [vmem:[%s14892_s12 + $0x8] sm:$0xff] }
 0x569   :  { %4516 = vperm.xlu1 %11284, %v4474_v37   ;;  %v4488_v62 = vsub.f32 1.0, %v4196_v33  ;;  %v10843_v13 = vpack.c.bf16 %v4755_v59, %v4754_v60  ;;  %v4215_v10 = vcombine.high %v4207_v42, %v4207_v42  ;;  %v4223_v5 = vrot.slane %v4207_v42, %v13442_v24 }
 0x56a   :  { %v4489_v28 = vsub.f32 1.0, %v4197_v53  ;;  %v4200_v56 = vcombine.high %v13395_v8, %v13395_v8  ;;  %v4498_v54 = vcombine.high %v13344_v40, %v13344_v40 }
 0x56b   :  { %4526 = vperm.xlu0 %11283, %v4476_v38   ;;  %10844 = vmatprep.subr.bf16.mxu1 %v10843_v13  ;;  %v4237_v30 = vrot.slane %v4215_v10, %v13442_v24  ;;  %v4245_v38 = vcombine.high %v4223_v5, %v4223_v5 }
 0x56c   :  { %10846 = vmatpush3.bf16.msra.mxu1 %v10843_v13 }
 0x56d   :  { %4345 = vperm.xlu1 %11284, %v4191_v7   ;;  %10848 = vmatprep.subr.bf16.mxu1 %v10847_v1  ;;  %v4389_v29 = vrot.slane %v4245_v38, %v13515_v19  ;;  %v4247_v22 = vcombine.high %v4237_v30, %v4237_v30 }
 0x56f   :  { %4350 = vperm.xlu0 %11283, %v4192_v57   ;;  %v4381_v57 = vrot.slane %v4223_v5, %v13515_v19  ;;  %v4502_v5 = vcombine.high %v13365_v21, %v13365_v21 }
 0x570   :  { %10850 = vmatpush3.bf16.msra.mxu1 %v10847_v1  ;;  %v4500_v1 = vcombine.high %v13355_v14, %v13355_v14 }
 0x571   :  { %4531 = vperm.xlu1 %11284, %v4477_v50  }
 0x573   :  { %4355 = vperm.xlu0 %11283, %v4193_v32   ;;  %v4385_v32 = vrot.slane %v4237_v30, %v13515_v19 }
 0x575   :  { %4536 = vperm.xlu1 %11284, %v4478_v4  }
 0x577   :  { %4360 = vperm.xlu0 %11283, %v4194_v51  }
 0x579   :  { %4541 = vperm.xlu1 %11284, %v4479_v52   ;;  %v4214_v52 = vrot.slane %v4200_v56, %v13442_v24  ;;  %v4503_v56 = vcombine.high %v13371_v31, %v13371_v31 }
 0x57b   :  { %4365 = vperm.xlu0 %11283, %v4195_v16   ;;  %v4216_v47 = vcombine.high %v4214_v52, %v4214_v52 }
 0x57d   :  { %4546 = vperm.xlu1 %11284, %v4480_v44   ;;  %v4244_v13 = vrot.slane %v4216_v47, %v13442_v24 }
 0x57f   :  { %4370 = vperm.xlu0 %11283, %v4196_v33  }
 0x581   :  { %4556 = vperm.xlu1 %11284, %v4482_v27  }
 0x583   :  { %4561 = vperm.xlu0 %11283, %v4483_v45  }
 0x585   :  { %4551 = vperm.xlu1 %11284, %v4481_v25  }
 0x587   :  { %4566 = vperm.xlu0 %11283, %v4484_v55  }
 0x589   :  { %4375 = vperm.xlu1 %11284, %v4197_v53  }
 0x58b   :  { %4571 = vperm.xlu0 %11283, %v4485_v23   ;;  %v4230_v23 = vrot.slane %v4214_v52, %v13442_v24 }
 0x58d   :  { %4878 = vrot.lane.b32.xlu1 %v2373_v6, %s11841_s11 }
 0x58f   :  { %4576 = vperm.xlu0 %11283, %v4486_v34   ;;  %v4499_v34 = vcombine.high %v13349_v49, %v13349_v49 }
 0x591   :  { %4880 = vrot.lane.b32.xlu1 %v2374_v2, %s11841_s11  ;;  %v4256_v2 = vrot.slane %v13399_v11, %v13442_v24 }
 0x593   :  { %4581 = vperm.xlu0 %11283, %v4487_v3   ;;  %v4264_v42 = vcombine.high %v4256_v2, %v4256_v2 }
 0x597   :  { %4586 = vperm.xlu0 %11283, %v4488_v62   ;;  %v4249_v62 = vcombine.high %v13399_v11, %v13399_v11  ;;  %v4501_v11 = vcombine.high %v13363_v20, %v13363_v20 }
 0x599   :  { %v4263_v10 = vrot.slane %v4249_v62, %v13442_v24 }
 0x59b   :  { %4591 = vperm.xlu0 %11283, %v4489_v28  }
 0x5cc   :  { %v4306_v17 = vpop.permute.xlu1 %4305  ;;  %v4301_v15 = vpop.permute.xlu0 %4300 }
 0x5cd   :  { %v4458_v18 = vmul.f32 %v4381_v57, %v4301_v15  ;;  %v4459_v8 = vmul.f32 %v4385_v32, %v4306_v17  ;;  %v4401_v57 = vrot.slane %v4244_v13, %v13515_v19 }
 0x5d0   :  { %v4311_v9 = vpop.permute.xlu1 %4310  ;;  %v4522_v36 = vpop.permute.xlu0 %4521 }
 0x5d1   :  { %v4595_v4 = vmul.f32 %v4522_v36, %v4498_v54  ;;  %v4460_v45 = vmul.f32 %v4389_v29, %v4311_v9  ;;  %v4246_v54 = vcombine.high %v4230_v23, %v4230_v23 }
 0x5d3   :  { %v4611_v25 = vadd.f32 %v4595_v4, %v4459_v8  ;;  %v4272_v4 = vrot.slane %v4256_v2, %v13442_v24  ;;  %v4405_v47 = vrot.slane %v4246_v54, %v13515_v19 }
 0x5d4   :  { %v4316_v43 = vpop.permute.xlu1 %4315 }
 0x5d5   :  { %v4633_v28 = vsel %vm3448_vm3, %v4611_v25, 0.0  ;;  %v4294_v2 = vcombine.high %v4272_v4, %v4272_v4 }
 0x5d6   :  { %v4634_v15 = vrot.slane %v4633_v28, 4 }
 0x5d8   :  { %v4321_v58 = vpop.permute.xlu1 %4320  ;;  %v4635_v29 = vadd.f32 %v4634_v15, %v4633_v28 }
 0x5da   :  { %v4636_v62 = vrot.slane %v4635_v29, 2 }
 0x5dc   :  { %v13861_v35 = vpop.permute.xlu1 %4325 }
 0x5dd   :  { %v4463_v52 = vmul.f32 %v4401_v57, %v13861_v35  ;;  %v13929_v35 = vrot.slane %v4263_v10, %v13442_v24 }
 0x5df   :  { %v4429_v54 = vrot.slane %v13929_v35, %v13515_v19 }
 0x5e0   :  { %v13865_v26 = vpop.permute.xlu1 %4330 }
 0x5e1   :  { %v4464_v28 = vmul.f32 %v4405_v47, %v13865_v26 }
 0x5e4   :  { %v13868_v37 = vpop.permute.xlu1 %4335 }
 0x5e6   :  { %v13873_v7 = vpop.permute.xlu0 %4340 }
 0x5e8   :  { %v4517_v50 = vpop.permute.xlu1 %4516 }
 0x5e9   :  { %v4594_v51 = vmul.f32 %v4517_v50, %v13344_v40  ;;  %v4393_v40 = vrot.slane %v4247_v22, %v13515_v19  ;;  %v4265_v22 = vcombine.high %v4263_v10, %v4263_v10 }
 0x5ea   :  { %v4527_v16 = vpop.permute.xlu0 %4526 }
 0x5eb   :  { %v4610_v44 = vadd.f32 %v4594_v51, %v4458_v18  ;;  %v4596_v33 = vmul.f32 %v4527_v16, %v13349_v49  ;;  %v4461_v60 = vmul.f32 %v4393_v40, %v4316_v43  ;;  %v4397_v49 = vrot.slane %v4230_v23, %v13515_v19 }
 0x5ec   :  { %v13883_v27 = vpop.permute.xlu1 %4345  ;;  %v4286_v16 = vrot.slane %v4264_v42, %v13442_v24 }
 0x5ed   :  { %v4626_v55 = vsel %vm3448_vm3, %v4610_v44, 0.0  ;;  %v4612_v6 = vadd.f32 %v4596_v33, %v4460_v45  ;;  %v4462_v36 = vmul.f32 %v4397_v49, %v4321_v58  ;;  %v4504_v58 = vcombine.high %v13380_v41, %v13380_v41 }
 0x5ee   :  { %v13886_v53 = vpop.permute.xlu0 %4350  ;;  %v4627_v59 = vrot.slane %v4626_v55, 4  ;;  %v4417_v26 = vrot.slane %v4286_v16, %v13515_v19 }
 0x5ef   :  { %v4640_v17 = vsel %vm3448_vm3, %v4612_v6, 0.0 }
 0x5f0   :  { %v4532_v3 = vpop.permute.xlu1 %4531  ;;  %v4628_v30 = vadd.f32 %v4627_v59, %v4626_v55  ;;  %v4641_v50 = vrot.slane %v4640_v17, 4  ;;  %v4248_v55 = vcombine.high %v4244_v13, %v4244_v13  ;;  %v13933_v59 = vrot.slane %v4265_v22, %v13442_v24 }
 0x5f1   :  { %v4597_v63 = vmul.f32 %v4532_v3, %v4499_v34  ;;  %v4413_v34 = vrot.slane %v4272_v4, %v13515_v19 }
 0x5f2   :  { %v13898_v39 = vpop.permute.xlu0 %4355  ;;  %v4629_v44 = vrot.slane %v4628_v30, 2  ;;  %v4642_v40 = vadd.f32 %v4641_v50, %v4640_v17 }
 0x5f3   :  { %v4613_v9 = vadd.f32 %v4597_v63, %v4461_v60  ;;  %v4296_v60 = vcombine.high %v4286_v16, %v4286_v16 }
 0x5f4   :  { %v4537_v43 = vpop.permute.xlu1 %4536  ;;  %v4630_v13 = vadd.f32 %v4629_v44, %v4628_v30  ;;  %v4643_v15 = vrot.slane %v4642_v40, 2  ;;  %v4295_v30 = vcombine.high %v13929_v35, %v13929_v35 }
 0x5f5   :  { %v4598_v38 = vmul.f32 %v4537_v43, %v13355_v14  ;;  %v4647_v32 = vsel %vm3448_vm3, %v4613_v9, 0.0  ;;  %v4505_v14 = vcombine.high %v13389_v48, %v13389_v48  ;;  %v4409_v9 = vrot.slane %v4248_v55, %v13515_v19 }
 0x5f6   :  { %v13914_v18 = vpop.permute.xlu0 %4360  ;;  %v4648_v33 = vrot.slane %v4647_v32, 4  ;;  %v4425_v57 = vrot.slane %v4296_v60, %v13515_v19  ;;  %v4631_v4 = vrot.slane %v4630_v13, 1  ;;  %v13953_v47 = vrot.slane %v4295_v30, %v13515_v19 }
 0x5f7   :  { %v4614_v51 = vadd.f32 %v4598_v38, %v4462_v36  ;;  %v4421_v36 = vrot.slane %v4294_v2, %v13515_v19  ;;  %v4637_v38 = vadd.f32 %v4636_v62, %v4635_v29  ;;  %v4465_v2 = vmul.f32 %v4409_v9, %v13868_v37 }
 0x5f8   :  { %v4542_v8 = vpop.permute.xlu1 %4541  ;;  %v4632_v62 = vadd.f32 %v4631_v4, %v4630_v13  ;;  %v4469_v13 = vmul.f32 %v4425_v57, %v13898_v39  ;;  %v4297_v9 = vcombine.high %v13933_v59, %v13933_v59 }
 0x5f9   :  { %v4654_v45 = vsel %vm3448_vm3, %v4614_v51, 0.0  ;;  %v4599_v25 = vmul.f32 %v4542_v8, %v4500_v1  ;;  %v4649_v1 = vadd.f32 %v4648_v33, %v4647_v32  ;;  %v4644_v8 = vadd.f32 %v4643_v15, %v4642_v40 }
 0x5fa   :  { %v4655_v23 = vrot.slane %v4654_v45, 4  ;;  %v13925_v6 = vpop.permute.xlu0 %4365  ;;  %v4466_v40 = vmul.f32 %v4413_v34, %v13873_v7 }
 0x5fb   :  { %v4615_v3 = vadd.f32 %v4599_v25, %v4463_v52  ;;  %v4650_v51 = vrot.slane %v4649_v1, 2  ;;  %v4433_v52 = vrot.slane %v13933_v59, %v13515_v19 }
 0x5fc   :  { %v4547_v63 = vpop.permute.xlu1 %4546  ;;  %v4656_v42 = vadd.f32 %v4655_v23, %v4654_v45  ;;  %v4467_v45 = vmul.f32 %v4417_v26, %v13883_v27  ;;  %v4638_v23 = vrot.slane %v4637_v38, 1 }
 0x5fd   :  { %v4661_v49 = vsel %vm3448_vm3, %v4615_v3, 0.0  ;;  %v4600_v17 = vmul.f32 %v4547_v63, %v13363_v20  ;;  %v4645_v63 = vrot.slane %v4644_v8, 1 }
 0x5fe   :  { %v4662_v43 = vrot.slane %v4661_v49, 4  ;;  %v13938_v10 = vpop.permute.xlu0 %4370  ;;  %v4657_v22 = vrot.slane %v4656_v42, 2  ;;  %v4639_v34 = vadd.f32 %v4638_v23, %v4637_v38 }
 0x5ff   :  { %v4616_v24 = vadd.f32 %v4600_v17, %v4464_v28  ;;  %v4651_v28 = vadd.f32 %v4650_v51, %v4649_v1  ;;  %v4646_v30 = vadd.f32 %v4645_v63, %v4644_v8  ;;  %v4470_v51 = vmul.f32 %v4429_v54, %v13914_v18 }
 0x600   :  { %v4663_v50 = vadd.f32 %v4662_v43, %v4661_v49  ;;  %v4557_v32 = vpop.permute.xlu1 %4556  ;;  %v4658_v49 = vadd.f32 %v4657_v22, %v4656_v42  ;;  %v4739_v4 = vmul.f32 0.25, %v4639_v34  ;;  %v4471_v18 = vmul.f32 %v4433_v52, %v13925_v6 }
 0x601   :  { %v4668_v16 = vsel %vm3448_vm3, %v4616_v24, 0.0  ;;  %v4602_v33 = vmul.f32 %v4557_v32, %v13365_v21  ;;  %v4652_v20 = vrot.slane %v4651_v28, 1  ;;  %v4738_v24 = vmul.f32 0.25, %v4632_v62 }
 0x602   :  { %v4669_v44 = vrot.slane %v4668_v16, 4  ;;  %v4562_v29 = vpop.permute.xlu0 %4561  ;;  %v4664_v25 = vrot.slane %v4663_v50, 2  ;;  %v4472_v34 = vmul.f32 %v13953_v47, %v13938_v10 }
 0x603   :  { %v4603_v55 = vmul.f32 %v4562_v29, %v4502_v5  ;;  %v4618_v15 = vadd.f32 %v4602_v33, %v4466_v40  ;;  %v4468_v5 = vmul.f32 %v4421_v36, %v13886_v53  ;;  %v4659_v53 = vrot.slane %v4658_v49, 1 }
 0x604   :  { %v4670_v35 = vadd.f32 %v4669_v44, %v4668_v16  ;;  %v4552_v3 = vpop.permute.xlu1 %4551  ;;  %v4665_v43 = vadd.f32 %v4664_v25, %v4663_v50  ;;  %v4653_v44 = vadd.f32 %v4652_v20, %v4651_v28  ;;  %v4740_v25 = vmul.f32 0.25, %v4646_v30 }
 0x605   :  { %v4619_v60 = vadd.f32 %v4603_v55, %v4467_v45  ;;  %v4601_v27 = vmul.f32 %v4552_v3, %v4501_v11  ;;  %v4682_v36 = vsel %vm3448_vm3, %v4618_v15, 0.0  ;;  %v4781_v45 = vsel %vm3788_vm4, %v4739_v4, %v4738_v24 }
 0x606   :  { %v4671_v17 = vrot.slane %v4670_v35, 2  ;;  %v4567_v21 = vpop.permute.xlu0 %4566  ;;  %v4666_v32 = vrot.slane %v4665_v43, 1  ;;  %v4660_v55 = vadd.f32 %v4659_v53, %v4658_v49  ;;  %v4683_v23 = vrot.slane %v4682_v36, 4 }
 0x607   :  { %v4617_v37 = vadd.f32 %v4601_v27, %v4465_v2  ;;  %v4604_v7 = vmul.f32 %v4567_v21, %v13371_v31  ;;  %v4689_v11 = vsel %vm3448_vm3, %v4619_v60, 0.0  ;;  %v4741_v28 = vmul.f32 0.25, %v4653_v44 }
 0x608   :  { %v4672_v1 = vadd.f32 %v4671_v17, %v4670_v35  ;;  %v4690_v22 = vrot.slane %v4689_v11, 4  ;;  %v4667_v40 = vadd.f32 %v4666_v32, %v4665_v43  ;;  %v4782_v49 = vsel %vm3790_vm5, %v4740_v25, %v4781_v45 }
 0x609   :  { %v4675_v42 = vsel %vm3448_vm3, %v4617_v37, 0.0  ;;  %v4620_v26 = vadd.f32 %v4604_v7, %v4468_v5  ;;  %v4742_v17 = vmul.f32 0.25, %v4660_v55  ;;  %v4684_v15 = vadd.f32 %v4683_v23, %v4682_v36 }
 0x60a   :  { %v4572_v50 = vpop.permute.xlu0 %4571  ;;  %v4676_v38 = vrot.slane %v4675_v42, 4  ;;  %v4673_v16 = vrot.slane %v4672_v1, 1  ;;  %v4691_v3 = vadd.f32 %v4690_v22, %v4689_v11  ;;  %v4743_v43 = vmul.f32 0.25, %v4667_v40 }
 0x60b   :  { %v4696_v39 = vsel %vm3448_vm3, %v4620_v26, 0.0  ;;  %v4605_v57 = vmul.f32 %v4572_v50, %v4503_v56  ;;  %v4783_v26 = vsel %vm3792_vm6, %v4741_v28, %v4782_v49  ;;  %v4685_v24 = vrot.slane %v4684_v15, 2 }
 0x60c   :  { %v4677_v33 = vadd.f32 %v4676_v38, %v4675_v42  ;;  %v4697_v8 = vrot.slane %v4696_v39, 4  ;;  %v4674_v54 = vadd.f32 %v4673_v16, %v4672_v1  ;;  %v4784_v50 = vsel %vm3794_vm7, %v4742_v17, %v4783_v26  ;;  %v4376_v38 = vpop.permute.xlu1 %4375 }
 0x60d   :  { %v4621_v29 = vadd.f32 %v4605_v57, %v4469_v13  ;;  %v4692_v13 = vrot.slane %v4691_v3, 2  ;;  %v4785_v10 = vsel %vm3796_vm8, %v4743_v43, %v4784_v50  ;;  %v4441_v16 = vrot.slane %v4297_v9, %v13515_v19 }
 0x60e   :  { %v4577_v2 = vpop.permute.xlu0 %4576  ;;  %v4678_v35 = vrot.slane %v4677_v33, 2  ;;  %v4698_v27 = vadd.f32 %v4697_v8, %v4696_v39  ;;  %v4744_v52 = vmul.f32 0.25, %v4674_v54 }
 0x60f   :  { %v4703_v31 = vsel %vm3448_vm3, %v4621_v29, 0.0  ;;  %v4606_v56 = vmul.f32 %v4577_v2, %v13380_v41  ;;  %v4693_v47 = vadd.f32 %v4692_v13, %v4691_v3  ;;  %v4473_v25 = vmul.f32 %v4441_v16, %v4376_v38  ;;  %v4898_v38 = vld [vmem:[%s14894_s14 + $0x8] sm:$0xff]  ;;  %v4904_v16 = vld [vmem:[%s14894_s14 + $0x38] sm:$0xff] }
 0x610   :  { %v4704_v62 = vrot.slane %v4703_v31, 4  ;;  %v4679_v60 = vadd.f32 %v4678_v35, %v4677_v33  ;;  %v4699_v20 = vrot.slane %v4698_v27, 2  ;;  %v4786_v4 = vsel %vm3798_vm9, %v4744_v52, %v4785_v10 }
 0x611   :  { %v4622_v63 = vadd.f32 %v4606_v56, %v4470_v51  ;;  %v4686_v33 = vadd.f32 %v4685_v24, %v4684_v15  ;;  %v4694_v40 = vrot.slane %v4693_v47, 1 }
 0x612   :  { %v4705_v21 = vadd.f32 %v4704_v62, %v4703_v31  ;;  %v4582_v5 = vpop.permute.xlu0 %4581  ;;  %v4680_v37 = vrot.slane %v4679_v60, 1  ;;  %v4700_v51 = vadd.f32 %v4699_v20, %v4698_v27 }
 0x613   :  { %v4710_v7 = vsel %vm3448_vm3, %v4622_v63, 0.0  ;;  %v4607_v6 = vmul.f32 %v4582_v5, %v4504_v58  ;;  %v4687_v56 = vrot.slane %v4686_v33, 1 }
 0x614   :  { %v4711_v1 = vrot.slane %v4710_v7, 4  ;;  %v4681_v42 = vadd.f32 %v4680_v37, %v4679_v60  ;;  %v4706_v30 = vrot.slane %v4705_v21, 2  ;;  %v4701_v35 = vrot.slane %v4700_v51, 1 }
 0x615   :  { %v4623_v11 = vadd.f32 %v4607_v6, %v4471_v18  ;;  %v4695_v60 = vadd.f32 %v4694_v40, %v4693_v47  ;;  %v4688_v15 = vadd.f32 %v4687_v56, %v4686_v33  ;;  %v4908_v56 = vld [vmem:[%s14894_s14 + $0x58] sm:$0xff] }
 0x616   :  { %v4712_v53 = vadd.f32 %v4711_v1, %v4710_v7  ;;  %v4587_v36 = vpop.permute.xlu0 %4586  ;;  %v4745_v32 = vmul.f32 0.25, %v4681_v42  ;;  %v4707_v8 = vadd.f32 %v4706_v30, %v4705_v21  ;;  %v4702_v17 = vadd.f32 %v4701_v35, %v4700_v51  ;;  %v4900_v51 = vld [vmem:[%s14894_s14 + $0x18] sm:$0xff]  ;;  %v4909_v35 = vld [vmem:[%s14894_s14 + $0x60] sm:$0xff] }
 0x617   :  { %v4717_v41 = vsel %vm3448_vm3, %v4623_v11, 0.0  ;;  %v4608_v58 = vmul.f32 %v4587_v36, %v13389_v48  ;;  %v4747_v43 = vmul.f32 0.25, %v4695_v60 }
 0x618   :  { %v4713_v39 = vrot.slane %v4712_v53, 2  ;;  %v4718_v57 = vrot.slane %v4717_v41, 4  ;;  %v4787_v44 = vsel %vm3800_vm10, %v4745_v32, %v4786_v4  ;;  %v4708_v18 = vrot.slane %v4707_v8, 1 }
 0x619   :  { %v4624_v22 = vadd.f32 %v4608_v58, %v4472_v34  ;;  %10410 = vmatprep.mubr.msk.f32.mxu1 %vm3165_vm2, %v4787_v44  ;;  %v4748_v52 = vmul.f32 0.25, %v4702_v17  ;;  %v4746_v34 = vmul.f32 0.25, %v4688_v15  ;;  %v4918_v17 = vld [vmem:[%s14894_s14 + $0xa8] sm:$0xff]  ;;  %v4917_v15 = vld [vmem:[%s14894_s14 + $0xa0] sm:$0xff] }
 0x61a   :  { %v4719_v29 = vadd.f32 %v4718_v57, %v4717_v41  ;;  %v4592_v45 = vpop.permute.xlu0 %4591  ;;  %v4714_v55 = vadd.f32 %v4713_v39, %v4712_v53  ;;  %v4709_v48 = vadd.f32 %v4708_v18, %v4707_v8  ;;  %v4901_v39 = vld [vmem:[%s14894_s14 + $0x20] sm:$0xff]  ;;  %v4903_v8 = vld [vmem:[%s14894_s14 + $0x30] sm:$0xff] }
 0x61b   :  { %v4724_v23 = vsel %vm3448_vm3, %v4624_v22, 0.0  ;;  %v4609_v2 = vmul.f32 %v4592_v45, %v4505_v14  ;;  %v4788_v42 = vsel %vm3788_vm4, %v4747_v43, %v4746_v34  ;;  %v4897_v57 = vld [vmem:[%s14894_s14] sm:$0xff]  ;;  %v10851_v4 = vpack.c.bf16 %v4901_v39, %v4898_v38  ;;  %v4907_v22 = vld [vmem:[%s14894_s14 + $0x50] sm:$0xff]  ;;  %v4926_v34 = vld [vmem:[%s14894_s14 + $0xe8] sm:$0xff] }
 0x61c   :  { %v4720_v59 = vrot.slane %v4719_v29, 2  ;;  %v4725_v9 = vrot.slane %v4724_v23, 4  ;;  %v4715_v62 = vrot.slane %v4714_v55, 1  ;;  %v4749_v13 = vmul.f32 0.25, %v4709_v48  ;;  %v4899_v45 = vld [vmem:[%s14894_s14 + $0x10] sm:$0xff]  ;;  %v4920_v48 = vld [vmem:[%s14894_s14 + $0xb8] sm:$0xff] }
 0x61d   :  { %v4625_v31 = vadd.f32 %v4609_v2, %v4473_v25  ;;  %v4789_v30 = vsel %vm3790_vm5, %v4748_v52, %v4788_v42  ;;  %v10853_v44 = vpack.c.bf16 %v4900_v51, %v4897_v57  ;;  %v10855_v33 = vpack.c.bf16 %v4907_v22, %v4904_v16  ;;  %10852 = vmatprep.subr.bf16.mxu0 %v10851_v4  ;;  %v4902_v25 = vld [vmem:[%s14894_s14 + $0x28] sm:$0xff]  ;;  %v4921_v43 = vld [vmem:[%s14894_s14 + $0xc0] sm:$0xff]  ;;  %v4923_v52 = vld [vmem:[%s14894_s14 + $0xd0] sm:$0xff] }
 0x61e   :  { %v4721_v54 = vadd.f32 %v4720_v59, %v4719_v29  ;;  %v4726_v3 = vadd.f32 %v4725_v9, %v4724_v23  ;;  %v4716_v5 = vadd.f32 %v4715_v62, %v4714_v55  ;;  %v4790_v36 = vsel %vm3792_vm6, %v4749_v13, %v4789_v30  ;;  %v4906_v29 = vld [vmem:[%s14894_s14 + $0x48] sm:$0xff]  ;;  %v4913_v23 = vld [vmem:[%s14894_s14 + $0x80] sm:$0xff]  ;;  %v4911_v62 = vld [vmem:[%s14894_s14 + $0x70] sm:$0xff] }
 0x61f   :  { %v4731_v28 = vsel %vm3448_vm3, %v4625_v31, 0.0  ;;  %v4910_v55 = vld [vmem:[%s14894_s14 + $0x68] sm:$0xff]  ;;  %10854 = vmatpush1.bf16.msra.mxu0 %v10853_v44  ;;  %v10857_v2 = vpack.c.bf16 %v4906_v29, %v4903_v8  ;;  %v10875_v40 = vpack.c.bf16 %v4902_v25, %v4899_v45  ;;  %v4905_v59 = vld [vmem:[%s14894_s14 + $0x40] sm:$0xff]  ;;  %v4912_v31 = vld [vmem:[%s14894_s14 + $0x78] sm:$0xff]  ;;  %v11843_v4 = vmov 0.0|0.0   ;;  %v4879_v44 = vpop.permute.xlu1 %4878 }
 0x620   :  { %v4722_v27 = vrot.slane %v4721_v54, 1  ;;  %v4727_v63 = vrot.slane %v4726_v3, 2  ;;  %v4732_v49 = vrot.slane %v4731_v28, 4  ;;  %v4750_v11 = vmul.f32 0.25, %v4716_v5  ;;  %10856 = vmatprep.subr.bf16.mxu0 %v10855_v33  ;;  %v4928_v13 = vld [vmem:[%s14894_s14 + $0xf8] sm:$0xff]  ;;  %v5109_v33 = vld [vmem:[%s14896_s16] sm:$0xff] }
 0x621   :  { %v10859_v9 = vpack.c.bf16 %v4913_v23, %v4910_v55  ;;  %10876 = vmatprep.subr.bf16.mxu1 %v10875_v40  ;;  %v10879_v18 = vpack.c.bf16 %v4908_v56, %v4905_v59  ;;  %v10861_v60 = vpack.c.bf16 %v4912_v31, %v4909_v35  ;;  %v5112_v8 = vld [vmem:[%s14896_s16 + $0x18] sm:$0xff]  ;;  %v5119_v45 = vld [vmem:[%s14896_s16 + $0x50] sm:$0xff]  ;;  %v789_v25 = vmax.f32 %v13208_v0, 0.0  ;;  %v5114_v56 = vld [vmem:[%s14896_s16 + $0x28] sm:$0xff] }
 0x622   :  { %v4728_v14 = vadd.f32 %v4727_v63, %v4726_v3  ;;  %v4733_v21 = vadd.f32 %v4732_v49, %v4731_v28  ;;  %v4723_v37 = vadd.f32 %v4722_v27, %v4721_v54  ;;  %v4791_v41 = vsel %vm3794_vm7, %v4750_v11, %v4790_v36  ;;  %v4916_v54 = vld [vmem:[%s14894_s14 + $0x98] sm:$0xff]  ;;  %v4919_v3 = vld [vmem:[%s14894_s14 + $0xb0] sm:$0xff]  ;;  %v4914_v28 = vld [vmem:[%s14894_s14 + $0x88] sm:$0xff] }
 0x623   :  { %10858 = vmatpush1.bf16.msra.mxu0 %v10857_v2  ;;  %v4915_v27 = vld [vmem:[%s14894_s14 + $0x90] sm:$0xff]  ;;  %v10883_v63 = vpack.c.bf16 %v4914_v28, %v4911_v62  ;;  %v10863_v49 = vpack.c.bf16 %v4919_v3, %v4916_v54  ;;  %v10891_v11 = vpack.c.bf16 %v4926_v34, %v4923_v52  ;;  %v5113_v36 = vld [vmem:[%s14896_s16 + $0x20] sm:$0xff]  ;;  %v5116_v29 = vld [vmem:[%s14896_s16 + $0x38] sm:$0xff]  ;;  %v14150_v55 = vpack.c.bf16 %v5112_v8, %v5109_v33  ;;  %v4881_v35 = vpop.permute.xlu1 %4880 }
 0x624   :  { %v4729_v7 = vrot.slane %v4728_v14, 1  ;;  %v4734_v6 = vrot.slane %v4733_v21, 2  ;;  %v4751_v26 = vmul.f32 0.25, %v4723_v37  ;;  %10860 = vmatprep.subr.bf16.mxu0 %v10859_v9  ;;  %v10865_v5 = vpack.c.bf16 %v4918_v17, %v4915_v27  ;;  %v5115_v59 = vld [vmem:[%s14896_s16 + $0x30] sm:$0xff]  ;;  %v5118_v9 = vld [vmem:[%s14896_s16 + $0x48] sm:$0xff]  ;;  %v5120_v27 = vld [vmem:[%s14896_s16 + $0x58] sm:$0xff] }
 0x625   :  { %v10887_v37 = vpack.c.bf16 %v4920_v48, %v4917_v15  ;;  %v4892_v23 = vsel %vm3165_vm2, %v789_v25, %v4879_v44  ;;  %v5111_v31 = vld [vmem:[%s14896_s16 + $0x10] sm:$0xff]  ;;  %v14173_v54 = vpack.c.bf16 %v5118_v9, %v5115_v59  ;;  %v5126_v17 = vld [vmem:[%s14898_s18 + $0x20] sm:$0xff]  ;;  %v5145_v44 = vld [vmem:[%s14899_s19 + $0x58] sm:$0xff] }
 0x626   :  { %v4730_v1 = vadd.f32 %v4729_v7, %v4728_v14  ;;  %v4735_v20 = vadd.f32 %v4734_v6, %v4733_v21  ;;  %v4792_v32 = vsel %vm3796_vm8, %v4751_v26, %v4791_v41  ;;  %v4922_v14 = vld [vmem:[%s14894_s14 + $0xc8] sm:$0xff]  ;;  %v4925_v21 = vld [vmem:[%s14894_s14 + $0xe0] sm:$0xff]  ;;  %v4924_v6 = vld [vmem:[%s14894_s14 + $0xd8] sm:$0xff]  ;;  %v14177_v28 = vpack.c.bf16 %v5114_v56, %v5111_v31 }
 0x627   :  { %10862 = vmatpush1.bf16.msra.mxu0 %v10861_v60  ;;  %v10867_v7 = vpack.c.bf16 %v4925_v21, %v4922_v14  ;;  %v4927_v26 = vld [vmem:[%s14894_s14 + $0xf0] sm:$0xff]  ;;  %v5122_v15 = vld [vmem:[%s14898_s18] sm:$0xff]  ;;  %v5125_v14 = vld [vmem:[%s14898_s18 + $0x18] sm:$0xff] }
 0x628   :  { %v4736_v24 = vrot.slane %v4735_v20, 1  ;;  %v4752_v53 = vmul.f32 0.25, %v4730_v1  ;;  %10864 = vmatprep.subr.bf16.mxu0 %v10863_v49  ;;  %v4931_v1 = vld [vmem:[%s14894_s14 + $0x110] sm:$0xff]  ;;  %v5123_v49 = vld [vmem:[%s14898_s18 + $0x8] sm:$0xff] }
 0x629   :  { %v10871_v42 = vpack.c.bf16 %v4931_v1, %v4928_v13  ;;  %v14212_v48 = vpack.c.bf16 %v5126_v17, %v5123_v49  ;;  %v5124_v21 = vld [vmem:[%s14898_s18 + $0x10] sm:$0xff]  ;;  %v5131_v13 = vld [vmem:[%s14898_s18 + $0x48] sm:$0xff]  ;;  %v5130_v1 = vld [vmem:[%s14898_s18 + $0x40] sm:$0xff] }
 0x62a   :  { %v4737_v50 = vadd.f32 %v4736_v24, %v4735_v20  ;;  %v4793_v10 = vsel %vm3798_vm9, %v4752_v53, %v4792_v32  ;;  %v10869_v20 = vpack.c.bf16 %v4924_v6, %v4921_v43  ;;  %v4930_v24 = vld [vmem:[%s14894_s14 + $0x108] sm:$0xff]  ;;  %v4932_v32 = vld [vmem:[%s14894_s14 + $0x118] sm:$0xff]  ;;  %v14223_v43 = vpack.c.bf16 %v5125_v14, %v5122_v15  ;;  %v5132_v6 = vld [vmem:[%s14898_s18 + $0x50] sm:$0xff] }
 0x62b   :  { %10866 = vmatpush1.bf16.msra.mxu0 %v10865_v5  ;;  %v10873_v30 = vpack.c.bf16 %v4930_v24, %v4927_v26  ;;  %v5110_v53 = vld [vmem:[%s14896_s16 + $0x8] sm:$0xff]  ;;  %v5128_v52 = vld [vmem:[%s14898_s18 + $0x30] sm:$0xff]  ;;  %v5138_v24 = vld [vmem:[%s14899_s19 + $0x20] sm:$0xff] }
 0x62c   :  { %v4753_v58 = vmul.f32 0.25, %v4737_v50  ;;  %10868 = vmatprep.subr.bf16.mxu0 %v10867_v7  ;;  %v11842_v50 = vmov 0.0   ;;  %v14124_v41 = vpack.c.bf16 %v5113_v36, %v5110_v53  ;;  %v5127_v5 = vld [vmem:[%s14898_s18 + $0x28] sm:$0xff]  ;;  %v5129_v7 = vld [vmem:[%s14898_s18 + $0x38] sm:$0xff] }
 0x62d   :  { %5021 = vmatprep.mubr.f32.mxu0 %v11842_v50  ;;  %v14237_v34 = vpack.c.bf16 %v5132_v6, %v5129_v7  ;;  %v5135_v26 = vld [vmem:[%s14899_s19 + $0x8] sm:$0xff]  ;;  %v5137_v36 = vld [vmem:[%s14899_s19 + $0x18] sm:$0xff] }
 0x62e   :  { %v4794_v47 = vsel %vm3800_vm10, %v4753_v58, %v4793_v10  ;;  %v4929_v58 = vld [vmem:[%s14894_s14 + $0x100] sm:$0xff]  ;;  %v14265_v53 = vpack.c.bf16 %v5138_v24, %v5135_v26 }
 0x62f   :  { %10411 = vmatmul.mubr.msk.f32.vlgmr.msra.gmra.mrb[52].mxu1 %vm3165_vm2, %v4794_v47  ;;  %10870 = vmatpush1.bf16.msra.mxu0 %v10869_v20  ;;  %v10895_v10 = vpack.c.bf16 %v4932_v32, %v4929_v58  ;;  %v9649_v47 = vld [vmem:[%s14893_s13] ss:$0 sm:$0xff]  ;;  %v5133_v20 = vld [vmem:[%s14898_s18 + $0x58] sm:$0xff]  ;;  %v5136_v58 = vld [vmem:[%s14899_s19 + $0x10] sm:$0xff] }
 0x630   :  { %10878 = vmatpush3.bf16.msra.mxu1 %v10875_v40  ;;  %10872 = vmatprep.subr.bf16.mxu0 %v10871_v42  ;;  %v14153_v40 = vpack.c.bf16 %v5119_v45, %v5116_v29  ;;  %v14252_v42 = vpack.c.bf16 %v5133_v20, %v5130_v1  ;;  %v5139_v32 = vld [vmem:[%s14899_s19 + $0x28] sm:$0xff]  ;;  %v4933_v29 = vld [vmem:[%s14895_s15] sm:$0x7] }
 0x631   :  { %10880 = vmatprep.subr.bf16.mxu1 %v10879_v18 }
 0x633   :  { %10874 = vmatpush1.bf16.msra.mxu0 %v10873_v30  ;;  %v5134_v30 = vld [vmem:[%s14899_s19] sm:$0xff] }
 0x634   :  { %10882 = vmatpush3.bf16.msra.mxu1 %v10879_v18  ;;  %10900 = vmatprep.subr.bf16.mxu0 %v14124_v41  ;;  %v790_v18 = vmax.f32 %v13233_v12, 0.0  ;;  %v5117_v12 = vld [vmem:[%s14896_s16 + $0x40] sm:$0xff] }
 0x635   :  { %10884 = vmatprep.subr.bf16.mxu1 %v10883_v63 }
 0x636   :  { %v4893_v3 = vsel %vm3165_vm2, %v790_v18, %v4881_v35 }
 0x638   :  { %10886 = vmatpush3.bf16.msra.mxu1 %v10883_v63  ;;  %v14191_v63 = vpack.c.bf16 %v5120_v27, %v5117_v12 }
 0x639   :  { %10888 = vmatprep.subr.bf16.mxu1 %v10887_v37 }
 0x63c   :  { %10890 = vmatpush3.bf16.msra.mxu1 %v10887_v37  ;;  %v14225_v37 = vpack.c.bf16 %v5127_v5, %v5124_v21 }
 0x63d   :  { %10892 = vmatprep.subr.bf16.mxu1 %v10891_v11 }
 0x640   :  { %10894 = vmatpush3.bf16.msra.mxu1 %v10891_v11  ;;  %v14250_v11 = vpack.c.bf16 %v5131_v13, %v5128_v52 }
 0x641   :  { %10896 = vmatprep.subr.bf16.mxu1 %v10895_v10 }
 0x644   :  { %10898 = vmatpush3.bf16.msra.mxu1 %v10895_v10  ;;  %v5141_v10 = vld [vmem:[%s14899_s19 + $0x38] sm:$0xff] }
 0x645   :  { %10907 = vmatprep.subr.bf16.mxu1 %v11843_v4 }
 0x702   :  { %v10412_v38 = vpop.f32.mrb[52].mxu1 }
 0x703   :  { %v4865_v39 = vpop.f32.mrb[53].mxu1  ;;  %v4871_v51 = vadd.f32 %v10412_v38, %v9649_v47  ;;  %v14284_v38 = vpack.c.bf16 %v5137_v36, %v5134_v30  ;;  %v14341_v30 = vld [vmem:[%s14897_s17] ss:$0 sm:$0xff] }
 0x704   :  { %v4866_v57 = vadd.f32 %v9649_v47, %v4865_v39  ;;  %v5144_v47 = vld [vmem:[%s14899_s19 + $0x50] sm:$0xff]  ;;  %v14286_v39 = vpack.c.bf16 %v5139_v32, %v5136_v58 }
 0x705   :  { %v4875_v22 = vmax.f32 %v4871_v51, 0.0  ;;  %v14293_v51 = vpack.c.bf16 %v5144_v47, %v5141_v10  ;;  %v4946_v10 = vrot.slane %v4933_v29, %v13685_v46 }
 0x706   :  { %v4874_v16 = vmax.f32 %v4866_v57, 0.0  ;;  %v5140_v57 = vld [vmem:[%s14899_s19 + $0x30] sm:$0xff] }
 0x708   :  { %4886 = vrot.lane.b32.xlu0 %v4874_v16, %s11844_s8  ;;  %v5143_v16 = vld [vmem:[%s14899_s19 + $0x48] sm:$0xff] }
 0x709   :  { %v14308_v33 = vpack.c.bf16 %v5143_v16, %v5140_v57 }
 0x70c   :  { %4888 = vrot.lane.b32.xlu0 %v4875_v22, %s11844_s8  ;;  %v5142_v22 = vld [vmem:[%s14899_s19 + $0x40] sm:$0xff] }
 0x70d   :  { %v14310_v8 = vpack.c.bf16 %v5145_v44, %v5142_v22 }
 0x77a   :  { %v4887_v2 = vpop.permute.xlu0 %4886 }
 0x77b   :  { %v4895_v0 = vsel %vm4894_vm12, %v4892_v23, %v4887_v2  ;;  %v4938_v23 = vrot.slane %v4933_v29, %v13515_v19 }
 0x77c   :  { %9652 = vmatmul.mubr.msk.f32.vlgmr.msra.gmra.mrb[50].mxu0 %vm4950_vm13, %v4895_v0  ;;  %10437 = vmatprep.mubr.msk.f32.mxu1 %vm4950_vm13, %v4895_v0  ;;  %v4942_v0 = vrot.slane %v4933_v29, %v13682_v61 }
 0x77d   :  { %10902 = vmatpush1.bf16.msra.mxu0 %v14150_v55  ;;  %5027 = vmatprep.mubr.f32.mxu0 %v11842_v50 }
 0x77e   :  { %v4889_v62 = vpop.permute.xlu0 %4888  ;;  %10904 = vmatprep.subr.bf16.mxu0 %v14153_v40 }
 0x77f   :  { %v4896_v60 = vsel %vm4894_vm12, %v4893_v3, %v4889_v62 }
 0x780   :  { %9653 = vmatmul.mubr.msk.f32.gmra.mrb[52].mxu0 %vm4950_vm13, %v4896_v60  ;;  %10438 = vmatmul.mubr.msk.f32.vlgmr.msra.gmra.mrb[54].mxu1 %vm4950_vm13, %v4896_v60 }
 0x781   :  { %10906 = vmatpush1.bf16.msra.mxu0 %v14173_v54  ;;  %5215 = vmatprep.mubr.f32.mxu0 %v11842_v50 }
 0x782   :  { %10909 = vmatpush3.bf16.msra.mxu1 %v14177_v28  ;;  %10448 = vmatprep.mubr.msk.f32.mxu1 %vm11845_vm14, %v11842_v50 }
 0x783   :  { %10910 = vmatprep.subr.bf16.mxu1 %v11843_v4  ;;  %10914 = vmatprep.subr.bf16.mxu0 %v14212_v48 }
 0x784   :  { %5216 = vmatmul.mubr.f32.vlgmr.msra.gmra.mrb[54].mxu0 %v11842_v50 }
 0x785   :  { %5356 = vmatprep.mubr.f32.mxu0 %v11842_v50  ;;  %10916 = vmatpush1.bf16.msra.mxu0 %v14223_v43 }
 0x786   :  { %10912 = vmatpush3.bf16.msra.mxu1 %v14191_v63  ;;  %10918 = vmatprep.subr.bf16.mxu0 %v14237_v34 }
 0x787   :  { %10921 = vmatprep.subr.bf16.mxu1 %v11843_v4 }
 0x789   :  { %10449 = vmatmul.mubr.f32.vlgmr.msra.gmra.mrb[56].mxu1 %v11842_v50  ;;  %10920 = vmatpush1.bf16.msra.mxu0 %v14250_v11 }
 0x78a   :  { %10459 = vmatprep.mubr.msk.f32.mxu1 %vm11845_vm14, %v11842_v50  ;;  %10923 = vmatpush3.bf16.msra.mxu1 %v14225_v37 }
 0x78b   :  { %10924 = vmatprep.subr.bf16.mxu1 %v11843_v4  ;;  %10928 = vmatprep.subr.bf16.mxu0 %v14265_v53 }
 0x78c   :  { %5357 = vmatmul.mubr.f32.vlgmr.msra.gmra.mrb[56].mxu0 %v11842_v50 }
 0x78d   :  { %10930 = vmatpush1.bf16.msra.mxu0 %v14284_v38  ;;  %5580 = vmatprep.mubr.f32.mxu0 %v11842_v50 }
 0x78e   :  { %10926 = vmatpush3.bf16.msra.mxu1 %v14252_v42  ;;  %10932 = vmatprep.subr.bf16.mxu0 %v14293_v51 }
 0x78f   :  { %10935 = vmatprep.subr.bf16.mxu1 %v11843_v4 }
 0x791   :  { %10460 = vmatmul.mubr.f32.vlgmr.msra.gmra.mrb[58].mxu1 %v11842_v50  ;;  %10934 = vmatpush1.bf16.msra.mxu0 %v14308_v33 }
 0x792   :  { %10937 = vmatpush3.bf16.msra.mxu1 %v14286_v39  ;;  %10470 = vmatprep.mubr.msk.f32.mxu1 %vm11845_vm14, %v11842_v50 }
 0x793   :  { %10938 = vmatprep.subr.bf16.mxu1 %v11843_v4  ;;  %10942 = vmatprep.subr.bf16.mxu0 %v14124_v41 }
 0x796   :  { %10940 = vmatpush3.bf16.msra.mxu1 %v14310_v8 }
 0x797   :  { %10949 = vmatprep.subr.bf16.mxu1 %v11843_v4 }
 0x84f   :  { %v5023_v45 = vpop.f32.mrb[50].mxu0 }
 0x850   :  { %v5025_v25 = vpop.f32.mrb[51].mxu0  ;;  %v14326_v31 = vadd.f32 %v5023_v45, %v4938_v23 }
 0x851   :  { %v14331_v12 = vadd.f32 %v5025_v25, %v4942_v0 }
 0x853   :  { %v5029_v2 = vpop.f32.mrb[52].mxu0  ;;  %v10439_v59 = vpop.f32.mrb[54].mxu1 }
 0x854   :  { %v5031_v9 = vpop.f32.mrb[53].mxu0  ;;  %v5100_v35 = vpop.f32.mrb[55].mxu1  ;;  %v14328_v18 = vadd.f32 %v5029_v2, %v4938_v23  ;;  %v14347_v23 = vadd.f32 %v10439_v59, %v4946_v10 }
 0x855   :  { %v14334_v15 = vadd.f32 %v5031_v9, %v4942_v0  ;;  %v14345_v44 = vadd.f32 %v5100_v35, %v4946_v10 }
 0x857   :  { %v5217_v56 = vpop.f32.mrb[54].mxu0 }
 0x858   :  { %v5434_v3 = vrot.slane %v5217_v56, 1  ;;  %v5437_v62 = vadd.f32 %v5217_v56, %v14326_v31  ;;  %v5219_v60 = vpop.f32.mrb[55].mxu0 }
 0x859   :  { %v5452_v27 = vrot.slane %v5219_v60, 1  ;;  %v5455_v14 = vadd.f32 %v5219_v60, %v14331_v12 }
 0x85a   :  { %v5438_v49 = vadd.f32 %v5434_v3, %v14328_v18  ;;  %v9656_v17 = vmul.f32 -1.442695, %v5437_v62 }
 0x85b   :  { %v5456_v7 = vadd.f32 %v5452_v27, %v14334_v15  ;;  %v9658_v52 = vmul.f32 -1.442695, %v5455_v14 }
 0x85c   :  { %11549 = vpow2.f32 %v9656_v17  ;;  %v9657_v21 = vmul.f32 -1.442695, %v5438_v49  ;;  %v5288_v5 = vpop.f32.mrb[56].mxu1 }
 0x85d   :  { %v10450_v6 = vpop.f32.mrb[57].mxu1  ;;  %v9659_v13 = vmul.f32 -1.442695, %v5456_v7  ;;  %v5475_v58 = vadd.f32 %v14341_v30, %v5288_v5 }
 0x85e   :  { %11551 = vpow2.f32 %v9657_v21 }
 0x85f   :  { %11553 = vpow2.f32 %v9658_v52  ;;  %v5477_v16 = vrot.slane %v5475_v58, 1 }
 0x860   :  { %11555 = vpow2.f32 %v9659_v13  ;;  %v5146_v13 = vld [vmem:[%s14900_s20] sm:$0x7] }
 0x864   :  { %v5429_v6 = vpop.f32.mrb[58].mxu1 }
 0x865   :  { %v10461_v52 = vpop.f32.mrb[59].mxu1 }
 0x866   :  { %v11550_v1 = vpop.eup %11549 }
 0x867   :  { %v5445_v20 = vadd.f32 1.0, %v11550_v1  ;;  %v14390_v1 = vrot.slane %v5146_v13, %v13515_v19 }
 0x868   :  { %v11552_v26 = vpop.eup %11551 }
 0x869   :  { %v5446_v24 = vadd.f32 1.0, %v11552_v26  ;;  %11557 = vrcp.f32 %v5445_v20  ;;  %v11554_v36 = vpop.eup %11553  ;;  %v14393_v20 = vrot.slane %v5146_v13, %v13682_v61 }
 0x86a   :  { %v11556_v32 = vpop.eup %11555  ;;  %v5463_v47 = vadd.f32 1.0, %v11554_v36 }
 0x86b   :  { %11559 = vrcp.f32 %v5446_v24  ;;  %v5464_v57 = vadd.f32 1.0, %v11556_v32 }
 0x86c   :  { %11561 = vrcp.f32 %v5463_v47 }
 0x86d   :  { %11563 = vrcp.f32 %v5464_v57 }
 0x873   :  { %v11558_v22 = vpop.eup %11557 }
 0x874   :  { %v5480_v45 = vmul.f32 %v11558_v22, %v5475_v58 }
 0x875   :  { %v11560_v25 = vpop.eup %11559 }
 0x876   :  { %v5481_v2 = vmul.f32 %v11560_v25, %v5477_v16  ;;  %v5482_v9 = vadd.f32 %v5480_v45, %v14345_v44  ;;  %v11562_v29 = vpop.eup %11561 }
 0x877   :  { %v11564_v56 = vpop.eup %11563  ;;  %v5486_v3 = vsub.f32 1.0, %v11562_v29  ;;  %v5490_v27 = vmul.f32 0.0, %v11562_v29 }
 0x878   :  { %v5483_v0 = vadd.f32 %v5481_v2, %v14347_v23  ;;  %11565 = vtanh.f32 %v5482_v9  ;;  %v5487_v60 = vsub.f32 1.0, %v11564_v56  ;;  %v5491_v14 = vmul.f32 0.0, %v11564_v56 }
 0x87a   :  { %11567 = vtanh.f32 %v5483_v0 }
 0x882   :  { %v11566_v62 = vpop.eup %11565 }
 0x883   :  { %v5488_v35 = vmul.f32 %v11566_v62, %v5486_v3 }
 0x884   :  { %v11568_v49 = vpop.eup %11567 }
 0x885   :  { %v5489_v17 = vmul.f32 %v11568_v49, %v5487_v60  ;;  %v14351_v59 = vadd.f32 %v5490_v27, %v5488_v35 }
 0x887   :  { %v14353_v21 = vadd.f32 %v5491_v14, %v5489_v17 }
 0x889   :  { %v5512_v5 = vrot.slane %v14353_v21, 7 }
 0x88b   :  { %v5513_v7 = vsel %vm3788_vm4, %v5512_v5, %v14351_v59 }
 0x88c   :  { %9661 = vmatmul.mubr.msk.f32.vlgmr.msra.gmra.mrb[56].mxu0 %vm3165_vm2, %v5513_v7  ;;  %10471 = vmatmul.mubr.msk.f32.vlgmr.msra.gmra.mrb[60].mxu1 %vm3165_vm2, %v5513_v7 }
 0x88d   :  { %10944 = vmatpush1.bf16.msra.mxu0 %v14150_v55  ;;  %10951 = vmatpush3.bf16.msra.mxu1 %v14177_v28 }
 0x88e   :  { %10946 = vmatprep.subr.bf16.mxu0 %v14153_v40  ;;  %10952 = vmatprep.subr.bf16.mxu1 %v11843_v4 }
 0x88f   :  { %5749 = vmatprep.mubr.f32.mxu0 %v11842_v50  ;;  %10481 = vmatprep.mubr.msk.f32.mxu1 %vm11845_vm14, %v11842_v50 }
 0x891   :  { %10948 = vmatpush1.bf16.msra.mxu0 %v14173_v54  ;;  %10954 = vmatpush3.bf16.msra.mxu1 %v14191_v63 }
 0x892   :  { %10956 = vmatprep.subr.bf16.mxu0 %v14212_v48  ;;  %10963 = vmatprep.subr.bf16.mxu1 %v11843_v4 }
 0x894   :  { %9666 = vmatmul.mubr.msk.f32.vlgmr.msra.gmra.mrb[58].mxu0 %vm3165_vm2, %v5513_v7  ;;  %10482 = vmatmul.mubr.msk.f32.vlgmr.msra.gmra.mrb[62].mxu1 %vm3165_vm2, %v5513_v7  ;;  %v14404_v7 = vld [vmem:[%s14901_s21] ss:$0 sm:$0xff] }
 0x895   :  { %10958 = vmatpush1.bf16.msra.mxu0 %v14223_v43  ;;  %10965 = vmatpush3.bf16.msra.mxu1 %v14225_v37 }
 0x896   :  { %10960 = vmatprep.subr.bf16.mxu0 %v14237_v34  ;;  %10966 = vmatprep.subr.bf16.mxu1 %v11843_v4 }
 0x897   :  { %5893 = vmatprep.mubr.f32.mxu0 %v11842_v50  ;;  %10492 = vmatprep.mubr.msk.f32.mxu1 %vm11845_vm14, %v11842_v50 }
 0x899   :  { %10962 = vmatpush1.bf16.msra.mxu0 %v14250_v11  ;;  %10968 = vmatpush3.bf16.msra.mxu1 %v14252_v42 }
 0x89a   :  { %10970 = vmatprep.subr.bf16.mxu0 %v14265_v53  ;;  %10977 = vmatprep.subr.bf16.mxu1 %v11843_v4 }
 0x95f   :  { %v5582_v26 = vpop.f32.mrb[56].mxu0  ;;  %v5653_v24 = vpop.f32.mrb[60].mxu1 }
 0x960   :  { %v5583_v36 = vadd.f32 %v5582_v26, %v14390_v1  ;;  %v5584_v58 = vpop.f32.mrb[57].mxu0  ;;  %v10472_v32 = vpop.f32.mrb[61].mxu1 }
 0x961   :  { %v5585_v10 = vadd.f32 %v5584_v58, %v14393_v20 }
 0x962   :  { %v9663_v47 = vmul.f32 -1.442695, %v5583_v36  ;;  %v14407_v36 = vrot.slane %v5146_v13, %v13685_v46 }
 0x963   :  { %v9664_v57 = vmul.f32 -1.442695, %v5585_v10  ;;  %v5677_v10 = vadd.f32 %v14404_v7, %v5429_v6 }
 0x964   :  { %11569 = vpow2.f32 %v9663_v47 }
 0x965   :  { %11571 = vpow2.f32 %v9664_v57 }
 0x967   :  { %v5751_v16 = vpop.f32.mrb[58].mxu0  ;;  %v5822_v22 = vpop.f32.mrb[62].mxu1 }
 0x968   :  { %v5971_v45 = vrot.slane %v5751_v16, 7  ;;  %v5975_v19 = vadd.f32 %v5751_v16, %v14328_v18  ;;  %v5753_v25 = vpop.f32.mrb[59].mxu0  ;;  %v10483_v2 = vpop.f32.mrb[63].mxu1  ;;  %v5654_v16 = vadd.f32 %v5653_v24, %v14407_v36 }
 0x969   :  { %v5989_v61 = vrot.slane %v5753_v25, 7  ;;  %v5993_v56 = vadd.f32 %v5753_v25, %v14334_v15  ;;  %v6006_v2 = vadd.f32 %v14341_v30, %v5822_v22 }
 0x96a   :  { %v5974_v9 = vadd.f32 %v5971_v45, %v14326_v31  ;;  %v9671_v0 = vmul.f32 -1.442695, %v5975_v19 }
 0x96b   :  { %v5992_v29 = vadd.f32 %v5989_v61, %v14331_v12  ;;  %v9673_v27 = vmul.f32 -1.442695, %v5993_v56 }
 0x96c   :  { %v9670_v3 = vmul.f32 -1.442695, %v5974_v9  ;;  %11573 = vpow2.f32 %v9671_v0  ;;  %v6008_v9 = vrot.slane %v6006_v2, 7 }
 0x96d   :  { %v9672_v62 = vmul.f32 -1.442695, %v5992_v29  ;;  %v6021_v29 = vrot.slane %v14351_v59, 7 }
 0x96e   :  { %v11570_v60 = vpop.eup %11569  ;;  %11575 = vpow2.f32 %v9670_v3 }
 0x96f   :  { %v5662_v35 = vadd.f32 1.0, %v11570_v60  ;;  %11577 = vpow2.f32 %v9672_v62  ;;  %v11572_v49 = vpop.eup %11571 }
 0x970   :  { %v5668_v14 = vadd.f32 1.0, %v11572_v49 }
 0x971   :  { %11579 = vrcp.f32 %v5662_v35 }
 0x972   :  { %11581 = vpow2.f32 %v9673_v27 }
 0x976   :  { %v11574_v17 = vpop.eup %11573 }
 0x977   :  { %v5983_v52 = vadd.f32 1.0, %v11574_v17 }
 0x978   :  { %v11576_v26 = vpop.eup %11575 }
 0x979   :  { %v11578_v58 = vpop.eup %11577  ;;  %v5982_v32 = vadd.f32 1.0, %v11576_v26  ;;  %11583 = vrcp.f32 %v5983_v52 }
 0x97a   :  { %11585 = vrcp.f32 %v5668_v14  ;;  %v6000_v47 = vadd.f32 1.0, %v11578_v58 }
 0x97b   :  { %v11580_v57 = vpop.eup %11579  ;;  %11587 = vrcp.f32 %v5982_v32 }
 0x97c   :  { %v5678_v45 = vmul.f32 %v11580_v57, %v5677_v10  ;;  %11589 = vrcp.f32 %v6000_v47  ;;  %v11582_v19 = vpop.eup %11581 }
 0x97d   :  { %v6001_v46 = vadd.f32 1.0, %v11582_v19 }
 0x97e   :  { %v5679_v25 = vadd.f32 %v5678_v45, %v5654_v16 }
 0x980   :  { %11591 = vtanh.f32 %v5679_v25 }
 0x981   :  { %11593 = vrcp.f32 %v6001_v46 }
 0x983   :  { %v11584_v13 = vpop.eup %11583 }
 0x984   :  { %v11586_v61 = vpop.eup %11585  ;;  %v6012_v0 = vmul.f32 %v11584_v13, %v6006_v2 }
 0x985   :  { %v11588_v6 = vpop.eup %11587  ;;  %v5681_v35 = vsub.f32 1.0, %v11586_v61  ;;  %v5683_v49 = vmul.f32 0.0, %v11586_v61 }
 0x986   :  { %v11590_v56 = vpop.eup %11589  ;;  %v6011_v3 = vmul.f32 %v11588_v6, %v6008_v9  ;;  %v6014_v24 = vadd.f32 %v6012_v0, %v14347_v23 }
 0x987   :  { %v6024_v62 = vmul.f32 %v11590_v56, %v6021_v29  ;;  %v6017_v26 = vsub.f32 1.0, %v11590_v56 }
 0x988   :  { %v6013_v60 = vadd.f32 %v6011_v3, %v14345_v44  ;;  %11595 = vtanh.f32 %v6014_v24 }
 0x98a   :  { %v11592_v27 = vpop.eup %11591  ;;  %11597 = vtanh.f32 %v6013_v60 }
 0x98b   :  { %v5682_v22 = vmul.f32 %v11592_v27, %v5681_v35  ;;  %v11594_v14 = vpop.eup %11593 }
 0x98c   :  { %v6018_v59 = vsub.f32 1.0, %v11594_v14  ;;  %v6025_v32 = vmul.f32 %v11594_v14, %v5512_v5 }
 0x98d   :  { %v14415_v17 = vadd.f32 %v5683_v49, %v5682_v22 }
 0x98f   :  { %9668 = vmatmul.mubr.msk.f32.vlgmr.msra.gmra.mrb[60].mxu0 %vm3165_vm2, %v14415_v17  ;;  %10493 = vmatmul.mubr.msk.f32.vlgmr.msra.gmra.mrb[64].mxu1 %vm3165_vm2, %v14415_v17 }
 0x990   :  { %10972 = vmatpush1.bf16.msra.mxu0 %v14284_v38  ;;  %10979 = vmatpush3.bf16.msra.mxu1 %v14286_v39 }
 0x991   :  { %10974 = vmatprep.subr.bf16.mxu0 %v14293_v51  ;;  %10980 = vmatprep.subr.bf16.mxu1 %v11843_v4 }
 0x992   :  { %v11596_v52 = vpop.eup %11595  ;;  %6098 = vmatprep.mubr.f32.mxu0 %v11842_v50  ;;  %10503 = vmatprep.mubr.msk.f32.mxu1 %vm11845_vm14, %v11842_v50 }
 0x993   :  { %v6020_v58 = vmul.f32 %v11596_v52, %v6018_v59 }
 0x994   :  { %v11598_v10 = vpop.eup %11597  ;;  %10976 = vmatpush1.bf16.msra.mxu0 %v14308_v33  ;;  %10982 = vmatpush3.bf16.msra.mxu1 %v14310_v8 }
 0x995   :  { %10984 = vmatprep.subr.bf16.mxu0 %v14124_v41  ;;  %10991 = vmatprep.subr.bf16.mxu1 %v11843_v4  ;;  %v6019_v47 = vmul.f32 %v11598_v10, %v6017_v26  ;;  %v14434_v57 = vadd.f32 %v6025_v32, %v6020_v58 }
 0x997   :  { %v14436_v16 = vadd.f32 %v6024_v62, %v6019_v47 }
 0x999   :  { %v6030_v45 = vrot.slane %v14436_v16, 1 }
 0x99b   :  { %v6031_v21 = vsel %vm3788_vm4, %v14434_v57, %v6030_v45 }
 0x99c   :  { %9674 = vmatmul.mubr.msk.f32.vlgmr.msra.gmra.mrb[60].mxu0 %vm3165_vm2, %v6031_v21  ;;  %10504 = vmatmul.mubr.msk.f32.vlgmr.msra.gmra.mrb[66].mxu1 %vm3165_vm2, %v6031_v21 }
 0x99d   :  { %10986 = vmatpush1.bf16.msra.mxu0 %v14150_v55  ;;  %10993 = vmatpush3.bf16.msra.mxu1 %v14177_v28 }
 0x99e   :  { %10988 = vmatprep.subr.bf16.mxu0 %v14153_v40  ;;  %10994 = vmatprep.subr.bf16.mxu1 %v11843_v4 }
 0x99f   :  { %6261 = vmatprep.mubr.f32.mxu0 %v11842_v50  ;;  %10514 = vmatprep.mubr.msk.f32.mxu1 %vm11845_vm14, %v11842_v50 }
 0x9a1   :  { %10990 = vmatpush1.bf16.msra.mxu0 %v14173_v54  ;;  %10996 = vmatpush3.bf16.msra.mxu1 %v14191_v63 }
 0x9a2   :  { %10998 = vmatprep.subr.bf16.mxu0 %v14212_v48  ;;  %11005 = vmatprep.subr.bf16.mxu1 %v11843_v4 }
 0x9a4   :  { %9678 = vmatmul.mubr.msk.f32.vlgmr.msra.gmra.mrb[62].mxu0 %vm3165_vm2, %v6031_v21  ;;  %10515 = vmatmul.mubr.msk.f32.vlgmr.msra.gmra.mrb[68].mxu1 %vm3165_vm2, %v6031_v21 }
 0x9a5   :  { %11000 = vmatpush1.bf16.msra.mxu0 %v14223_v43  ;;  %11007 = vmatpush3.bf16.msra.mxu1 %v14225_v37 }
 0x9a6   :  { %11002 = vmatprep.subr.bf16.mxu0 %v14237_v34  ;;  %11008 = vmatprep.subr.bf16.mxu1 %v11843_v4 }
 0x9a7   :  { %6405 = vmatprep.mubr.f32.mxu0 %v11842_v50  ;;  %10525 = vmatprep.mubr.msk.f32.mxu1 %vm11845_vm14, %v11842_v50 }
 0x9a9   :  { %11004 = vmatpush1.bf16.msra.mxu0 %v14250_v11  ;;  %11010 = vmatpush3.bf16.msra.mxu1 %v14252_v42 }
 0x9aa   :  { %11012 = vmatprep.subr.bf16.mxu0 %v14265_v53  ;;  %11019 = vmatprep.subr.bf16.mxu1 %v11843_v4 }
 0xa62   :  { %v5966_v5 = vpop.f32.mrb[64].mxu1 }
 0xa63   :  { %v10494_v19 = vpop.f32.mrb[65].mxu1 }
 0xa6f   :  { %v6100_v25 = vpop.f32.mrb[60].mxu0  ;;  %v6171_v2 = vpop.f32.mrb[66].mxu1 }
 0xa70   :  { %v6101_v46 = vadd.f32 %v6100_v25, %v14390_v1  ;;  %v6102_v13 = vpop.f32.mrb[61].mxu0  ;;  %v10505_v61 = vpop.f32.mrb[67].mxu1 }
 0xa71   :  { %v6103_v9 = vadd.f32 %v6102_v13, %v14393_v20  ;;  %v6189_v61 = vadd.f32 %v14404_v7, %v5966_v5 }
 0xa72   :  { %v9676_v0 = vmul.f32 -1.442695, %v6101_v46 }
 0xa73   :  { %v9677_v6 = vmul.f32 -1.442695, %v6103_v9 }
 0xa74   :  { %11599 = vpow2.f32 %v9676_v0 }
 0xa75   :  { %11601 = vpow2.f32 %v9677_v6 }
 0xa77   :  { %v6263_v29 = vpop.f32.mrb[62].mxu0  ;;  %v6334_v56 = vpop.f32.mrb[68].mxu1 }
 0xa78   :  { %v6483_v3 = vrot.slane %v6263_v29, 6  ;;  %v6484_v24 = vrot.slane %v6263_v29, 7  ;;  %v6265_v62 = vpop.f32.mrb[63].mxu0  ;;  %v10516_v60 = vpop.f32.mrb[69].mxu1  ;;  %v6172_v29 = vadd.f32 %v6171_v2, %v14407_v36 }
 0xa79   :  { %v6502_v35 = vrot.slane %v6265_v62, 6  ;;  %v6503_v27 = vrot.slane %v6265_v62, 7 }
 0xa7a   :  { %v6487_v22 = vadd.f32 %v6483_v3, %v14326_v31  ;;  %v6488_v49 = vadd.f32 %v6484_v24, %v14328_v18 }
 0xa7b   :  { %v6506_v14 = vadd.f32 %v6502_v35, %v14331_v12  ;;  %v6507_v59 = vadd.f32 %v6503_v27, %v14334_v15  ;;  %v6520_v35 = vadd.f32 %v14341_v30, %v6334_v56  ;;  %v6537_v56 = vrot.slane %v14434_v57, 7 }
 0xa7c   :  { %v9682_v52 = vmul.f32 -1.442695, %v6487_v22  ;;  %v9683_v26 = vmul.f32 -1.442695, %v6488_v49 }
 0xa7d   :  { %v9684_v58 = vmul.f32 -1.442695, %v6506_v14  ;;  %v9685_v47 = vmul.f32 -1.442695, %v6507_v59  ;;  %v6522_v22 = vrot.slane %v6520_v35, 6  ;;  %v6523_v49 = vrot.slane %v6520_v35, 7 }
 0xa7e   :  { %v11600_v32 = vpop.eup %11599  ;;  %11603 = vpow2.f32 %v9682_v52  ;;  %v6536_v59 = vrot.slane %v14436_v16, 7 }
 0xa7f   :  { %v6180_v10 = vadd.f32 1.0, %v11600_v32  ;;  %11605 = vpow2.f32 %v9683_v26  ;;  %v11602_v45 = vpop.eup %11601 }
 0xa80   :  { %11607 = vpow2.f32 %v9684_v58  ;;  %v6186_v21 = vadd.f32 1.0, %v11602_v45 }
 0xa81   :  { %11609 = vrcp.f32 %v6180_v10 }
 0xa82   :  { %11611 = vpow2.f32 %v9685_v47 }
 0xa83   :  { %11613 = vrcp.f32 %v6186_v21 }
 0xa88   :  { %v11604_v19 = vpop.eup %11603 }
 0xa89   :  { %v11606_v25 = vpop.eup %11605  ;;  %v6495_v46 = vadd.f32 1.0, %v11604_v19 }
 0xa8a   :  { %v11608_v13 = vpop.eup %11607  ;;  %v6496_v9 = vadd.f32 1.0, %v11606_v25 }
 0xa8b   :  { %v11610_v0 = vpop.eup %11609  ;;  %11615 = vrcp.f32 %v6495_v46  ;;  %v6514_v6 = vadd.f32 1.0, %v11608_v13 }
 0xa8c   :  { %v6190_v3 = vmul.f32 %v11610_v0, %v6189_v61  ;;  %11617 = vrcp.f32 %v6496_v9  ;;  %v11612_v24 = vpop.eup %11611 }
 0xa8d   :  { %11619 = vrcp.f32 %v6514_v6  ;;  %v6515_v60 = vadd.f32 1.0, %v11612_v24  ;;  %v11614_v27 = vpop.eup %11613 }
 0xa8e   :  { %v6191_v62 = vadd.f32 %v6190_v3, %v6172_v29  ;;  %v6193_v10 = vsub.f32 1.0, %v11614_v27  ;;  %v6195_v25 = vmul.f32 %v11614_v27, %v14415_v17 }
 0xa90   :  { %11621 = vtanh.f32 %v6191_v62 }
 0xa91   :  { %11623 = vrcp.f32 %v6515_v60 }
 0xa95   :  { %v11616_v5 = vpop.eup %11615 }
 0xa96   :  { %v11618_v14 = vpop.eup %11617  ;;  %v6526_v52 = vmul.f32 %v11616_v5, %v6522_v22 }
 0xa97   :  { %v11620_v26 = vpop.eup %11619  ;;  %v6527_v2 = vmul.f32 %v11618_v14, %v6523_v49 }
 0xa98   :  { %v6528_v58 = vadd.f32 %v6526_v52, %v14345_v44  ;;  %v6540_v32 = vmul.f32 %v11620_v26, %v6536_v59  ;;  %v6532_v17 = vsub.f32 1.0, %v11620_v26 }
 0xa99   :  { %v6529_v47 = vadd.f32 %v6527_v2, %v14347_v23 }
 0xa9a   :  { %v11622_v45 = vpop.eup %11621  ;;  %11625 = vtanh.f32 %v6528_v58 }
 0xa9b   :  { %v11624_v21 = vpop.eup %11623  ;;  %11627 = vtanh.f32 %v6529_v47  ;;  %v6194_v19 = vmul.f32 %v11622_v45, %v6193_v10 }
 0xa9c   :  { %v6541_v46 = vmul.f32 %v11624_v21, %v6537_v56  ;;  %v6533_v13 = vsub.f32 1.0, %v11624_v21 }
 0xa9d   :  { %v14481_v16 = vadd.f32 %v6195_v25, %v6194_v19 }
 0xa9f   :  { %9680 = vmatmul.mubr.msk.f32.vlgmr.msra.gmra.mrb[64].mxu0 %vm3165_vm2, %v14481_v16  ;;  %10526 = vmatmul.mubr.msk.f32.vlgmr.msra.gmra.mrb[70].mxu1 %vm3165_vm2, %v14481_v16 }
 0xaa0   :  { %11014 = vmatpush1.bf16.msra.mxu0 %v14284_v38  ;;  %11021 = vmatpush3.bf16.msra.mxu1 %v14286_v39 }
 0xaa1   :  { %11016 = vmatprep.subr.bf16.mxu0 %v14293_v51  ;;  %11022 = vmatprep.subr.bf16.mxu1 %v11843_v4 }
 0xaa2   :  { %6615 = vmatprep.mubr.f32.mxu0 %v11842_v50  ;;  %10536 = vmatprep.mubr.msk.f32.mxu1 %vm11845_vm14, %v11842_v50 }
 0xaa4   :  { %v11626_v57 = vpop.eup %11625  ;;  %11018 = vmatpush1.bf16.msra.mxu0 %v14308_v33  ;;  %11024 = vmatpush3.bf16.msra.mxu1 %v14310_v8 }
 0xaa5   :  { %v11628_v61 = vpop.eup %11627  ;;  %11026 = vmatprep.subr.bf16.mxu0 %v14124_v41  ;;  %11033 = vmatprep.subr.bf16.mxu1 %v11843_v4  ;;  %v6534_v9 = vmul.f32 %v11626_v57, %v6532_v17 }
 0xaa6   :  { %v6535_v0 = vmul.f32 %v11628_v61, %v6533_v13 }
 0xaa7   :  { %v14498_v6 = vadd.f32 %v6540_v32, %v6534_v9 }
 0xaa8   :  { %v14500_v29 = vadd.f32 %v6541_v46, %v6535_v0 }
 0xaa9   :  { %v6546_v3 = vrot.slane %v14498_v6, 2 }
 0xaaa   :  { %v6547_v24 = vrot.slane %v14500_v29, 1 }
 0xaac   :  { %v6548_v62 = vsel %vm3788_vm4, %v6547_v24, %v6546_v3 }
 0xaad   :  { %9686 = vmatmul.mubr.msk.f32.vlgmr.msra.gmra.mrb[64].mxu0 %vm3165_vm2, %v6548_v62  ;;  %10537 = vmatmul.mubr.msk.f32.vlgmr.msra.gmra.mrb[72].mxu1 %vm3165_vm2, %v6548_v62 }
 0xaae   :  { %11028 = vmatpush1.bf16.msra.mxu0 %v14150_v55  ;;  %11035 = vmatpush3.bf16.msra.mxu1 %v14177_v28 }
 0xaaf   :  { %11030 = vmatprep.subr.bf16.mxu0 %v14153_v40  ;;  %11036 = vmatprep.subr.bf16.mxu1 %v11843_v4 }
 0xab0   :  { %6778 = vmatprep.mubr.f32.mxu0 %v11842_v50  ;;  %10547 = vmatprep.mubr.msk.f32.mxu1 %vm11845_vm14, %v11842_v50 }
 0xab2   :  { %11032 = vmatpush1.bf16.msra.mxu0 %v14173_v54  ;;  %11038 = vmatpush3.bf16.msra.mxu1 %v14191_v63 }
 0xab3   :  { %11040 = vmatprep.subr.bf16.mxu0 %v14212_v48  ;;  %11047 = vmatprep.subr.bf16.mxu1 %v11843_v4 }
 0xab5   :  { %9690 = vmatmul.mubr.msk.f32.vlgmr.msra.gmra.mrb[66].mxu0 %vm3165_vm2, %v6548_v62  ;;  %10548 = vmatmul.mubr.msk.f32.vlgmr.msra.gmra.mrb[74].mxu1 %vm3165_vm2, %v6548_v62 }
 0xab6   :  { %11042 = vmatpush1.bf16.msra.mxu0 %v14223_v43  ;;  %11049 = vmatpush3.bf16.msra.mxu1 %v14225_v37 }
 0xab7   :  { %11044 = vmatprep.subr.bf16.mxu0 %v14237_v34  ;;  %11050 = vmatprep.subr.bf16.mxu1 %v11843_v4 }
 0xab8   :  { %6922 = vmatprep.mubr.f32.mxu0 %v11842_v50  ;;  %10558 = vmatprep.mubr.msk.f32.mxu1 %vm11845_vm14, %v11842_v50 }
 0xaba   :  { %11046 = vmatpush1.bf16.msra.mxu0 %v14250_v11  ;;  %11052 = vmatpush3.bf16.msra.mxu1 %v14252_v42 }
 0xabb   :  { %11054 = vmatprep.subr.bf16.mxu0 %v14265_v53  ;;  %11061 = vmatprep.subr.bf16.mxu1 %v11843_v4 }
 0xb72   :  { %v6478_v60 = vpop.f32.mrb[70].mxu1 }
 0xb73   :  { %v10527_v35 = vpop.f32.mrb[71].mxu1 }
 0xb80   :  { %v6617_v27 = vpop.f32.mrb[64].mxu0  ;;  %v6688_v22 = vpop.f32.mrb[72].mxu1 }
 0xb81   :  { %v6618_v5 = vadd.f32 %v6617_v27, %v14390_v1  ;;  %v6619_v49 = vpop.f32.mrb[65].mxu0  ;;  %v10538_v14 = vpop.f32.mrb[73].mxu1 }
 0xb82   :  { %v6620_v59 = vadd.f32 %v6619_v49, %v14393_v20  ;;  %v6706_v14 = vadd.f32 %v14404_v7, %v6478_v60 }
 0xb83   :  { %v9688_v52 = vmul.f32 -1.442695, %v6618_v5 }
 0xb84   :  { %v9689_v26 = vmul.f32 -1.442695, %v6620_v59 }
 0xb85   :  { %11629 = vpow2.f32 %v9688_v52 }
 0xb86   :  { %11631 = vpow2.f32 %v9689_v26 }
 0xb88   :  { %v6780_v2 = vpop.f32.mrb[66].mxu0  ;;  %v6851_v58 = vpop.f32.mrb[74].mxu1 }
 0xb89   :  { %v7000_v32 = vrot.slane %v6780_v2, 5  ;;  %v7001_v10 = vrot.slane %v6780_v2, 6  ;;  %v6782_v47 = vpop.f32.mrb[67].mxu0  ;;  %v10549_v45 = vpop.f32.mrb[75].mxu1  ;;  %v6689_v2 = vadd.f32 %v6688_v22, %v14407_v36 }
 0xb8a   :  { %v7019_v56 = vrot.slane %v6782_v47, 5  ;;  %v7020_v21 = vrot.slane %v6782_v47, 6 }
 0xb8b   :  { %v7004_v19 = vadd.f32 %v7000_v32, %v14326_v31  ;;  %v7005_v25 = vadd.f32 %v7001_v10, %v14328_v18 }
 0xb8c   :  { %v7023_v46 = vadd.f32 %v7019_v56, %v14331_v12  ;;  %v7024_v17 = vadd.f32 %v7020_v21, %v14334_v15  ;;  %v7037_v56 = vadd.f32 %v14341_v30, %v6851_v58  ;;  %v7054_v58 = vrot.slane %v14500_v29, 7 }
 0xb8d   :  { %v9694_v57 = vmul.f32 -1.442695, %v7004_v19  ;;  %v9695_v13 = vmul.f32 -1.442695, %v7005_v25 }
 0xb8e   :  { %v9696_v61 = vmul.f32 -1.442695, %v7023_v46  ;;  %v9697_v3 = vmul.f32 -1.442695, %v7024_v17  ;;  %v7039_v19 = vrot.slane %v7037_v56, 5  ;;  %v7040_v25 = vrot.slane %v7037_v56, 6 }
 0xb8f   :  { %v11630_v9 = vpop.eup %11629  ;;  %11633 = vpow2.f32 %v9694_v57  ;;  %v7053_v17 = vrot.slane %v14498_v6, 7 }
 0xb90   :  { %v6697_v0 = vadd.f32 1.0, %v11630_v9  ;;  %11635 = vpow2.f32 %v9695_v13  ;;  %v11632_v24 = vpop.eup %11631 }
 0xb91   :  { %11637 = vpow2.f32 %v9696_v61  ;;  %v6703_v62 = vadd.f32 1.0, %v11632_v24 }
 0xb92   :  { %11639 = vrcp.f32 %v6697_v0 }
 0xb93   :  { %11641 = vpow2.f32 %v9697_v3 }
 0xb94   :  { %11643 = vrcp.f32 %v6703_v62 }
 0xb99   :  { %v11634_v35 = vpop.eup %11633 }
 0xb9a   :  { %v11636_v27 = vpop.eup %11635  ;;  %v7012_v5 = vadd.f32 1.0, %v11634_v35 }
 0xb9b   :  { %v11638_v49 = vpop.eup %11637  ;;  %v7013_v59 = vadd.f32 1.0, %v11636_v27 }
 0xb9c   :  { %v11640_v52 = vpop.eup %11639  ;;  %11645 = vrcp.f32 %v7012_v5  ;;  %v7031_v26 = vadd.f32 1.0, %v11638_v49 }
 0xb9d   :  { %v6707_v32 = vmul.f32 %v11640_v52, %v6706_v14  ;;  %11647 = vrcp.f32 %v7013_v59  ;;  %v11642_v10 = vpop.eup %11641 }
 0xb9e   :  { %11649 = vrcp.f32 %v7031_v26  ;;  %v7032_v45 = vadd.f32 1.0, %v11642_v10  ;;  %v11644_v21 = vpop.eup %11643 }
 0xb9f   :  { %v6708_v47 = vadd.f32 %v6707_v32, %v6689_v2  ;;  %v6710_v0 = vsub.f32 1.0, %v11644_v21  ;;  %v6712_v27 = vmul.f32 %v11644_v21, %v14481_v16 }
 0xba1   :  { %11651 = vtanh.f32 %v6708_v47 }
 0xba2   :  { %11653 = vrcp.f32 %v7032_v45 }
 0xba6   :  { %v11646_v60 = vpop.eup %11645 }
 0xba7   :  { %v11648_v46 = vpop.eup %11647  ;;  %v7043_v57 = vmul.f32 %v11646_v60, %v7039_v19 }
 0xba8   :  { %v11650_v13 = vpop.eup %11649  ;;  %v7044_v22 = vmul.f32 %v11648_v46, %v7040_v25 }
 0xba9   :  { %v7045_v61 = vadd.f32 %v7043_v57, %v14345_v44  ;;  %v7057_v9 = vmul.f32 %v11650_v13, %v7053_v17  ;;  %v7049_v16 = vsub.f32 1.0, %v11650_v13 }
 0xbaa   :  { %v7046_v3 = vadd.f32 %v7044_v22, %v14347_v23 }
 0xbab   :  { %v11652_v24 = vpop.eup %11651  ;;  %11655 = vtanh.f32 %v7045_v61 }
 0xbac   :  { %v11654_v62 = vpop.eup %11653  ;;  %11657 = vtanh.f32 %v7046_v3  ;;  %v6711_v35 = vmul.f32 %v11652_v24, %v6710_v0 }
 0xbad   :  { %v7058_v5 = vmul.f32 %v11654_v62, %v7054_v58  ;;  %v7050_v49 = vsub.f32 1.0, %v11654_v62 }
 0xbae   :  { %v14545_v6 = vadd.f32 %v6712_v27, %v6711_v35 }
 0xbb0   :  { %9692 = vmatmul.mubr.msk.f32.vlgmr.msra.gmra.mrb[68].mxu0 %vm3165_vm2, %v14545_v6  ;;  %10559 = vmatmul.mubr.msk.f32.vlgmr.msra.gmra.mrb[76].mxu1 %vm3165_vm2, %v14545_v6 }
 0xbb1   :  { %11056 = vmatpush1.bf16.msra.mxu0 %v14284_v38  ;;  %11063 = vmatpush3.bf16.msra.mxu1 %v14286_v39 }
 0xbb2   :  { %11058 = vmatprep.subr.bf16.mxu0 %v14293_v51  ;;  %11064 = vmatprep.subr.bf16.mxu1 %v11843_v4 }
 0xbb3   :  { %7132 = vmatprep.mubr.f32.mxu0 %v11842_v50  ;;  %10569 = vmatprep.mubr.msk.f32.mxu1 %vm11845_vm14, %v11842_v50 }
 0xbb5   :  { %v11656_v29 = vpop.eup %11655  ;;  %11060 = vmatpush1.bf16.msra.mxu0 %v14308_v33  ;;  %11066 = vmatpush3.bf16.msra.mxu1 %v14310_v8 }
 0xbb6   :  { %v11658_v14 = vpop.eup %11657  ;;  %11068 = vmatprep.subr.bf16.mxu0 %v14124_v41  ;;  %11075 = vmatprep.subr.bf16.mxu1 %v11843_v4  ;;  %v7051_v59 = vmul.f32 %v11656_v29, %v7049_v16 }
 0xbb7   :  { %v7052_v52 = vmul.f32 %v11658_v14, %v7050_v49 }
 0xbb8   :  { %v14562_v26 = vadd.f32 %v7057_v9, %v7051_v59 }
 0xbb9   :  { %v14564_v2 = vadd.f32 %v7058_v5, %v7052_v52 }
 0xbba   :  { %v7063_v32 = vrot.slane %v14562_v26, 3 }
 0xbbb   :  { %v7064_v10 = vrot.slane %v14564_v2, 2 }
 0xbbd   :  { %v7065_v47 = vsel %vm3788_vm4, %v7064_v10, %v7063_v32 }
 0xbbe   :  { %9698 = vmatmul.mubr.msk.f32.vlgmr.msra.gmra.mrb[68].mxu0 %vm3165_vm2, %v7065_v47  ;;  %10570 = vmatmul.mubr.msk.f32.vlgmr.msra.gmra.mrb[78].mxu1 %vm3165_vm2, %v7065_v47 }
 0xbbf   :  { %11070 = vmatpush1.bf16.msra.mxu0 %v14150_v55  ;;  %11077 = vmatpush3.bf16.msra.mxu1 %v14177_v28 }
 0xbc0   :  { %11072 = vmatprep.subr.bf16.mxu0 %v14153_v40  ;;  %11078 = vmatprep.subr.bf16.mxu1 %v11843_v4 }
 0xbc1   :  { %7295 = vmatprep.mubr.f32.mxu0 %v11842_v50  ;;  %10580 = vmatprep.mubr.msk.f32.mxu1 %vm11845_vm14, %v11842_v50 }
 0xbc3   :  { %11074 = vmatpush1.bf16.msra.mxu0 %v14173_v54  ;;  %11080 = vmatpush3.bf16.msra.mxu1 %v14191_v63 }
 0xbc4   :  { %11082 = vmatprep.subr.bf16.mxu0 %v14212_v48  ;;  %11089 = vmatprep.subr.bf16.mxu1 %v11843_v4 }
 0xbc6   :  { %9702 = vmatmul.mubr.msk.f32.vlgmr.msra.gmra.mrb[70].mxu0 %vm3165_vm2, %v7065_v47  ;;  %10581 = vmatmul.mubr.msk.f32.vlgmr.msra.gmra.mrb[80].mxu1 %vm3165_vm2, %v7065_v47 }
 0xbc7   :  { %11084 = vmatpush1.bf16.msra.mxu0 %v14223_v43  ;;  %11091 = vmatpush3.bf16.msra.mxu1 %v14225_v37 }
 0xbc8   :  { %11086 = vmatprep.subr.bf16.mxu0 %v14237_v34  ;;  %11092 = vmatprep.subr.bf16.mxu1 %v11843_v4 }
 0xbc9   :  { %7439 = vmatprep.mubr.f32.mxu0 %v11842_v50  ;;  %10591 = vmatprep.mubr.msk.f32.mxu1 %vm11845_vm14, %v11842_v50 }
 0xbcb   :  { %11088 = vmatpush1.bf16.msra.mxu0 %v14250_v11  ;;  %11094 = vmatpush3.bf16.msra.mxu1 %v14252_v42 }
 0xbcc   :  { %11096 = vmatprep.subr.bf16.mxu0 %v14265_v53  ;;  %11103 = vmatprep.subr.bf16.mxu1 %v11843_v4 }
 0xc83   :  { %v6995_v45 = vpop.f32.mrb[76].mxu1 }
 0xc84   :  { %v10560_v56 = vpop.f32.mrb[77].mxu1 }
 0xc91   :  { %v7134_v21 = vpop.f32.mrb[68].mxu0  ;;  %v7205_v19 = vpop.f32.mrb[78].mxu1 }
 0xc92   :  { %v7135_v60 = vadd.f32 %v7134_v21, %v14390_v1  ;;  %v7136_v25 = vpop.f32.mrb[69].mxu0  ;;  %v10571_v46 = vpop.f32.mrb[79].mxu1 }
 0xc93   :  { %v7137_v17 = vadd.f32 %v7136_v25, %v14393_v20  ;;  %v7223_v46 = vadd.f32 %v14404_v7, %v6995_v45 }
 0xc94   :  { %v9700_v57 = vmul.f32 -1.442695, %v7135_v60 }
 0xc95   :  { %v9701_v13 = vmul.f32 -1.442695, %v7137_v17 }
 0xc96   :  { %11659 = vpow2.f32 %v9700_v57 }
 0xc97   :  { %11661 = vpow2.f32 %v9701_v13 }
 0xc99   :  { %v7297_v22 = vpop.f32.mrb[70].mxu0  ;;  %v7368_v61 = vpop.f32.mrb[80].mxu1 }
 0xc9a   :  { %v7517_v9 = vrot.slane %v7297_v22, 4  ;;  %v7518_v0 = vrot.slane %v7297_v22, 5  ;;  %v7299_v3 = vpop.f32.mrb[71].mxu0  ;;  %v10582_v24 = vpop.f32.mrb[81].mxu1  ;;  %v7206_v22 = vadd.f32 %v7205_v19, %v14407_v36 }
 0xc9b   :  { %v7536_v58 = vrot.slane %v7299_v3, 4  ;;  %v7537_v62 = vrot.slane %v7299_v3, 5 }
 0xc9c   :  { %v7521_v35 = vadd.f32 %v7517_v9, %v14326_v31  ;;  %v7522_v27 = vadd.f32 %v7518_v0, %v14328_v18 }
 0xc9d   :  { %v7540_v5 = vadd.f32 %v7536_v58, %v14331_v12  ;;  %v7541_v16 = vadd.f32 %v7537_v62, %v14334_v15  ;;  %v7554_v58 = vadd.f32 %v14341_v30, %v7368_v61  ;;  %v7571_v30 = vrot.slane %v14564_v2, 7 }
 0xc9e   :  { %v9706_v29 = vmul.f32 -1.442695, %v7521_v35  ;;  %v9707_v49 = vmul.f32 -1.442695, %v7522_v27 }
 0xc9f   :  { %v9708_v14 = vmul.f32 -1.442695, %v7540_v5  ;;  %v9709_v32 = vmul.f32 -1.442695, %v7541_v16  ;;  %v7556_v35 = vrot.slane %v7554_v58, 4  ;;  %v7557_v27 = vrot.slane %v7554_v58, 5 }
 0xca0   :  { %v11660_v59 = vpop.eup %11659  ;;  %11663 = vpow2.f32 %v9706_v29  ;;  %v7570_v16 = vrot.slane %v14562_v26, 7 }
 0xca1   :  { %v7214_v52 = vadd.f32 1.0, %v11660_v59  ;;  %11665 = vpow2.f32 %v9707_v49  ;;  %v11662_v10 = vpop.eup %11661 }
 0xca2   :  { %11667 = vpow2.f32 %v9708_v14  ;;  %v7220_v47 = vadd.f32 1.0, %v11662_v10 }
 0xca3   :  { %11669 = vrcp.f32 %v7214_v52 }
 0xca4   :  { %11671 = vpow2.f32 %v9709_v32 }
 0xca5   :  { %11673 = vrcp.f32 %v7220_v47 }
 0xcaa   :  { %v11664_v56 = vpop.eup %11663 }
 0xcab   :  { %v11666_v21 = vpop.eup %11665  ;;  %v7529_v60 = vadd.f32 1.0, %v11664_v56 }
 0xcac   :  { %v11668_v25 = vpop.eup %11667  ;;  %v7530_v17 = vadd.f32 1.0, %v11666_v21 }
 0xcad   :  { %v11670_v57 = vpop.eup %11669  ;;  %11675 = vrcp.f32 %v7529_v60  ;;  %v7548_v13 = vadd.f32 1.0, %v11668_v25 }
 0xcae   :  { %v7224_v9 = vmul.f32 %v11670_v57, %v7223_v46  ;;  %11677 = vrcp.f32 %v7530_v17  ;;  %v11672_v0 = vpop.eup %11671 }
 0xcaf   :  { %11679 = vrcp.f32 %v7548_v13  ;;  %v7549_v24 = vadd.f32 1.0, %v11672_v0  ;;  %v11674_v62 = vpop.eup %11673 }
 0xcb0   :  { %v7225_v3 = vadd.f32 %v7224_v9, %v7206_v22  ;;  %v7227_v52 = vsub.f32 1.0, %v11674_v62  ;;  %v7229_v56 = vmul.f32 %v11674_v62, %v14545_v6 }
 0xcb2   :  { %11681 = vtanh.f32 %v7225_v3 }
 0xcb3   :  { %11683 = vrcp.f32 %v7549_v24 }
 0xcb7   :  { %v11676_v45 = vpop.eup %11675 }
 0xcb8   :  { %v11678_v5 = vpop.eup %11677  ;;  %v7560_v29 = vmul.f32 %v11676_v45, %v7556_v35 }
 0xcb9   :  { %v11680_v49 = vpop.eup %11679  ;;  %v7561_v19 = vmul.f32 %v11678_v5, %v7557_v27 }
 0xcba   :  { %v7562_v14 = vadd.f32 %v7560_v29, %v14345_v44  ;;  %v7574_v59 = vmul.f32 %v11680_v49, %v7570_v16  ;;  %v7566_v6 = vsub.f32 1.0, %v11680_v49 }
 0xcbb   :  { %v7563_v32 = vadd.f32 %v7561_v19, %v14347_v23 }
 0xcbc   :  { %v11682_v10 = vpop.eup %11681  ;;  %11685 = vtanh.f32 %v7562_v14 }
 0xcbd   :  { %v11684_v61 = vpop.eup %11683  ;;  %11687 = vtanh.f32 %v7563_v32  ;;  %v7228_v47 = vmul.f32 %v11682_v10, %v7227_v52 }
 0xcbe   :  { %v7575_v21 = vmul.f32 %v11684_v61, %v7571_v30  ;;  %v7567_v60 = vsub.f32 1.0, %v11684_v61 }
 0xcbf   :  { %v14609_v26 = vadd.f32 %v7229_v56, %v7228_v47 }
 0xcc1   :  { %9704 = vmatmul.mubr.msk.f32.vlgmr.msra.gmra.mrb[72].mxu0 %vm3165_vm2, %v14609_v26  ;;  %10592 = vmatmul.mubr.msk.f32.vlgmr.msra.gmra.mrb[82].mxu1 %vm3165_vm2, %v14609_v26 }
 0xcc2   :  { %11098 = vmatpush1.bf16.msra.mxu0 %v14284_v38  ;;  %11105 = vmatpush3.bf16.msra.mxu1 %v14286_v39 }
 0xcc3   :  { %11100 = vmatprep.subr.bf16.mxu0 %v14293_v51  ;;  %11106 = vmatprep.subr.bf16.mxu1 %v11843_v4 }
 0xcc4   :  { %7649 = vmatprep.mubr.f32.mxu0 %v11842_v50  ;;  %10602 = vmatprep.mubr.msk.f32.mxu1 %vm11845_vm14, %v11842_v50 }
 0xcc6   :  { %v11686_v2 = vpop.eup %11685  ;;  %11102 = vmatpush1.bf16.msra.mxu0 %v14308_v33  ;;  %11108 = vmatpush3.bf16.msra.mxu1 %v14310_v8 }
 0xcc7   :  { %v11688_v25 = vpop.eup %11687  ;;  %11110 = vmatprep.subr.bf16.mxu0 %v14124_v41  ;;  %11117 = vmatprep.subr.bf16.mxu1 %v11843_v4  ;;  %v7568_v46 = vmul.f32 %v11686_v2, %v7566_v6 }
 0xcc8   :  { %v7569_v17 = vmul.f32 %v11688_v25, %v7567_v60 }
 0xcc9   :  { %v14626_v57 = vadd.f32 %v7574_v59, %v7568_v46 }
 0xcca   :  { %v14628_v13 = vadd.f32 %v7575_v21, %v7569_v17 }
 0xccb   :  { %v7580_v22 = vrot.slane %v14626_v57, 4 }
 0xccc   :  { %v7581_v9 = vrot.slane %v14628_v13, 3 }
 0xcce   :  { %v7582_v0 = vsel %vm3788_vm4, %v7581_v9, %v7580_v22 }
 0xccf   :  { %9710 = vmatmul.mubr.msk.f32.vlgmr.msra.gmra.mrb[72].mxu0 %vm3165_vm2, %v7582_v0  ;;  %10603 = vmatmul.mubr.msk.f32.vlgmr.msra.gmra.mrb[84].mxu1 %vm3165_vm2, %v7582_v0 }
 0xcd0   :  { %11112 = vmatpush1.bf16.msra.mxu0 %v14150_v55  ;;  %11119 = vmatpush3.bf16.msra.mxu1 %v14177_v28 }
 0xcd1   :  { %11114 = vmatprep.subr.bf16.mxu0 %v14153_v40  ;;  %11120 = vmatprep.subr.bf16.mxu1 %v11843_v4 }
 0xcd2   :  { %7812 = vmatprep.mubr.f32.mxu0 %v11842_v50  ;;  %10613 = vmatprep.mubr.msk.f32.mxu1 %vm11845_vm14, %v11842_v50 }
 0xcd4   :  { %11116 = vmatpush1.bf16.msra.mxu0 %v14173_v54  ;;  %11122 = vmatpush3.bf16.msra.mxu1 %v14191_v63 }
 0xcd5   :  { %11124 = vmatprep.subr.bf16.mxu0 %v14212_v48  ;;  %11131 = vmatprep.subr.bf16.mxu1 %v11843_v4 }
 0xcd7   :  { %9714 = vmatmul.mubr.msk.f32.vlgmr.msra.gmra.mrb[74].mxu0 %vm3165_vm2, %v7582_v0  ;;  %10614 = vmatmul.mubr.msk.f32.vlgmr.msra.gmra.mrb[86].mxu1 %vm3165_vm2, %v7582_v0 }
 0xcd8   :  { %11126 = vmatpush1.bf16.msra.mxu0 %v14223_v43  ;;  %11133 = vmatpush3.bf16.msra.mxu1 %v14225_v37 }
 0xcd9   :  { %11128 = vmatprep.subr.bf16.mxu0 %v14237_v34  ;;  %11134 = vmatprep.subr.bf16.mxu1 %v11843_v4 }
 0xcda   :  { %7956 = vmatprep.mubr.f32.mxu0 %v11842_v50  ;;  %10624 = vmatprep.mubr.msk.f32.mxu1 %vm11845_vm14, %v11842_v50 }
 0xcdc   :  { %11130 = vmatpush1.bf16.msra.mxu0 %v14250_v11  ;;  %11136 = vmatpush3.bf16.msra.mxu1 %v14252_v42 }
 0xcdd   :  { %11138 = vmatprep.subr.bf16.mxu0 %v14265_v53  ;;  %11145 = vmatprep.subr.bf16.mxu1 %v11843_v4 }
 0xd94   :  { %v7512_v3 = vpop.f32.mrb[82].mxu1 }
 0xd95   :  { %v10593_v24 = vpop.f32.mrb[83].mxu1 }
 0xda2   :  { %v7651_v58 = vpop.f32.mrb[72].mxu0  ;;  %v7722_v62 = vpop.f32.mrb[84].mxu1 }
 0xda3   :  { %v7652_v35 = vadd.f32 %v7651_v58, %v14390_v1  ;;  %v7653_v45 = vpop.f32.mrb[73].mxu0  ;;  %v10604_v27 = vpop.f32.mrb[85].mxu1 }
 0xda4   :  { %v7654_v5 = vadd.f32 %v7653_v45, %v14393_v20  ;;  %v7740_v45 = vadd.f32 %v14404_v7, %v7512_v3 }
 0xda5   :  { %v9712_v16 = vmul.f32 -1.442695, %v7652_v35 }
 0xda6   :  { %v9713_v29 = vmul.f32 -1.442695, %v7654_v5 }
 0xda7   :  { %11689 = vpow2.f32 %v9712_v16 }
 0xda8   :  { %11691 = vpow2.f32 %v9713_v29  ;;  %v7723_v29 = vadd.f32 %v7722_v62, %v14407_v36 }
 0xdaa   :  { %v7814_v49 = vpop.f32.mrb[74].mxu0  ;;  %v7885_v19 = vpop.f32.mrb[86].mxu1 }
 0xdab   :  { %v8034_v14 = vrot.slane %v7814_v49, 3  ;;  %v8035_v59 = vrot.slane %v7814_v49, 4  ;;  %v7816_v52 = vpop.f32.mrb[75].mxu0  ;;  %v10615_v32 = vpop.f32.mrb[87].mxu1 }
 0xdac   :  { %v8053_v10 = vrot.slane %v7816_v52, 3  ;;  %v8054_v30 = vrot.slane %v7816_v52, 4  ;;  %v14670_v32 = vld [vmem:[%s14897_s17] ss:$0 sm:$0xff] }
 0xdad   :  { %v8038_v61 = vadd.f32 %v8034_v14, %v14326_v31  ;;  %v8039_v47 = vadd.f32 %v8035_v59, %v14328_v18  ;;  %v8071_v7 = vadd.f32 %v14670_v32, %v7885_v19  ;;  %v8088_v19 = vrot.slane %v14628_v13, 7 }
 0xdae   :  { %v8057_v56 = vadd.f32 %v8053_v10, %v14331_v12  ;;  %v8058_v21 = vadd.f32 %v8054_v30, %v14334_v15 }
 0xdaf   :  { %v9718_v6 = vmul.f32 -1.442695, %v8038_v61  ;;  %v9719_v2 = vmul.f32 -1.442695, %v8039_v47  ;;  %v8073_v10 = vrot.slane %v8071_v7, 3  ;;  %v8074_v61 = vrot.slane %v8071_v7, 4 }
 0xdb0   :  { %v9720_v60 = vmul.f32 -1.442695, %v8057_v56  ;;  %v9721_v17 = vmul.f32 -1.442695, %v8058_v21  ;;  %v8087_v47 = vrot.slane %v14626_v57, 7 }
 0xdb1   :  { %v11690_v25 = vpop.eup %11689  ;;  %11693 = vpow2.f32 %v9718_v6 }
 0xdb2   :  { %v7731_v46 = vadd.f32 1.0, %v11690_v25  ;;  %11695 = vpow2.f32 %v9719_v2  ;;  %v11692_v22 = vpop.eup %11691 }
 0xdb3   :  { %11697 = vpow2.f32 %v9720_v60  ;;  %v7737_v9 = vadd.f32 1.0, %v11692_v22 }
 0xdb4   :  { %11699 = vrcp.f32 %v7731_v46 }
 0xdb5   :  { %11701 = vpow2.f32 %v9721_v17 }
 0xdb6   :  { %11703 = vrcp.f32 %v7737_v9 }
 0xdbb   :  { %v11694_v0 = vpop.eup %11693 }
 0xdbc   :  { %v11696_v24 = vpop.eup %11695  ;;  %v8046_v58 = vadd.f32 1.0, %v11694_v0 }
 0xdbd   :  { %v11698_v35 = vpop.eup %11697  ;;  %v8047_v27 = vadd.f32 1.0, %v11696_v24 }
 0xdbe   :  { %v11700_v5 = vpop.eup %11699  ;;  %11705 = vrcp.f32 %v8046_v58  ;;  %v8065_v16 = vadd.f32 1.0, %v11698_v35 }
 0xdbf   :  { %v7741_v49 = vmul.f32 %v11700_v5, %v7740_v45  ;;  %11707 = vrcp.f32 %v8047_v27  ;;  %v11702_v14 = vpop.eup %11701 }
 0xdc0   :  { %11709 = vrcp.f32 %v8065_v16  ;;  %v8066_v52 = vadd.f32 1.0, %v11702_v14  ;;  %v11704_v3 = vpop.eup %11703 }
 0xdc1   :  { %v7742_v59 = vadd.f32 %v7741_v49, %v7723_v29  ;;  %v7744_v25 = vsub.f32 1.0, %v11704_v3  ;;  %v7746_v0 = vmul.f32 %v11704_v3, %v14609_v26 }
 0xdc3   :  { %11711 = vtanh.f32 %v7742_v59 }
 0xdc4   :  { %11713 = vrcp.f32 %v8066_v52 }
 0xdc8   :  { %v11706_v30 = vpop.eup %11705 }
 0xdc9   :  { %v11708_v62 = vpop.eup %11707  ;;  %v8077_v56 = vmul.f32 %v11706_v30, %v8073_v10 }
 0xdca   :  { %v11710_v21 = vpop.eup %11709  ;;  %v8078_v6 = vmul.f32 %v11708_v62, %v8074_v61 }
 0xdcb   :  { %v8079_v2 = vadd.f32 %v8077_v56, %v14345_v44  ;;  %v8091_v60 = vmul.f32 %v11710_v21, %v8087_v47  ;;  %v8083_v26 = vsub.f32 1.0, %v11710_v21 }
 0xdcc   :  { %v8080_v46 = vadd.f32 %v8078_v6, %v14347_v23 }
 0xdcd   :  { %v11712_v17 = vpop.eup %11711  ;;  %11715 = vtanh.f32 %v8079_v2 }
 0xdce   :  { %v11714_v22 = vpop.eup %11713  ;;  %11717 = vtanh.f32 %v8080_v46  ;;  %v7745_v9 = vmul.f32 %v11712_v17, %v7744_v25 }
 0xdcf   :  { %v8092_v24 = vmul.f32 %v11714_v22, %v8088_v19  ;;  %v8084_v58 = vsub.f32 1.0, %v11714_v22 }
 0xdd0   :  { %v14678_v57 = vadd.f32 %v7746_v0, %v7745_v9 }
 0xdd2   :  { %9716 = vmatmul.mubr.msk.f32.vlgmr.msra.gmra.mrb[76].mxu0 %vm3165_vm2, %v14678_v57  ;;  %10625 = vmatmul.mubr.msk.f32.vlgmr.msra.gmra.mrb[88].mxu1 %vm3165_vm2, %v14678_v57 }
 0xdd3   :  { %11140 = vmatpush1.bf16.msra.mxu0 %v14284_v38  ;;  %11147 = vmatpush3.bf16.msra.mxu1 %v14286_v39 }
 0xdd4   :  { %11142 = vmatprep.subr.bf16.mxu0 %v14293_v51  ;;  %11148 = vmatprep.subr.bf16.mxu1 %v11843_v4 }
 0xdd5   :  { %8166 = vmatprep.mubr.f32.mxu0 %v11842_v50  ;;  %10635 = vmatprep.mubr.msk.f32.mxu1 %vm11845_vm14, %v11842_v50 }
 0xdd7   :  { %v11716_v13 = vpop.eup %11715  ;;  %11144 = vmatpush1.bf16.msra.mxu0 %v14308_v33  ;;  %11150 = vmatpush3.bf16.msra.mxu1 %v14310_v8 }
 0xdd8   :  { %v11718_v35 = vpop.eup %11717  ;;  %11152 = vmatprep.subr.bf16.mxu0 %v14124_v41  ;;  %11159 = vmatprep.subr.bf16.mxu1 %v11843_v4  ;;  %v8085_v45 = vmul.f32 %v11716_v13, %v8083_v26 }
 0xdd9   :  { %v8086_v27 = vmul.f32 %v11718_v35, %v8084_v58 }
 0xdda   :  { %v14695_v5 = vadd.f32 %v8091_v60, %v8085_v45 }
 0xddb   :  { %v14697_v16 = vadd.f32 %v8092_v24, %v8086_v27 }
 0xddc   :  { %v8097_v29 = vrot.slane %v14695_v5, 5 }
 0xddd   :  { %v8098_v49 = vrot.slane %v14697_v16, 4 }
 0xddf   :  { %v8099_v14 = vsel %vm3788_vm4, %v8098_v49, %v8097_v29 }
 0xde0   :  { %9722 = vmatmul.mubr.msk.f32.vlgmr.msra.gmra.mrb[76].mxu0 %vm3165_vm2, %v8099_v14  ;;  %10636 = vmatmul.mubr.msk.f32.vlgmr.msra.gmra.mrb[90].mxu1 %vm3165_vm2, %v8099_v14 }
 0xde1   :  { %11154 = vmatpush1.bf16.msra.mxu0 %v14150_v55  ;;  %11161 = vmatpush3.bf16.msra.mxu1 %v14177_v28 }
 0xde2   :  { %11156 = vmatprep.subr.bf16.mxu0 %v14153_v40  ;;  %11162 = vmatprep.subr.bf16.mxu1 %v11843_v4 }
 0xde3   :  { %8329 = vmatprep.mubr.f32.mxu0 %v11842_v50  ;;  %10646 = vmatprep.mubr.msk.f32.mxu1 %vm11845_vm14, %v11842_v50 }
 0xde5   :  { %11158 = vmatpush1.bf16.msra.mxu0 %v14173_v54  ;;  %11164 = vmatpush3.bf16.msra.mxu1 %v14191_v63 }
 0xde6   :  { %11166 = vmatprep.subr.bf16.mxu0 %v14212_v48  ;;  %11173 = vmatprep.subr.bf16.mxu1 %v11843_v4 }
 0xde8   :  { %9726 = vmatmul.mubr.msk.f32.vlgmr.msra.gmra.mrb[78].mxu0 %vm3165_vm2, %v8099_v14  ;;  %10647 = vmatmul.mubr.msk.f32.vlgmr.msra.gmra.mrb[92].mxu1 %vm3165_vm2, %v8099_v14 }
 0xde9   :  { %11168 = vmatpush1.bf16.msra.mxu0 %v14223_v43  ;;  %11175 = vmatpush3.bf16.msra.mxu1 %v14225_v37 }
 0xdea   :  { %11170 = vmatprep.subr.bf16.mxu0 %v14237_v34  ;;  %11176 = vmatprep.subr.bf16.mxu1 %v11843_v4 }
 0xdeb   :  { %8473 = vmatprep.mubr.f32.mxu0 %v11842_v50  ;;  %10657 = vmatprep.mubr.msk.f32.mxu1 %vm11845_vm14, %v11842_v50 }
 0xded   :  { %11172 = vmatpush1.bf16.msra.mxu0 %v14250_v11  ;;  %11178 = vmatpush3.bf16.msra.mxu1 %v14252_v42 }
 0xdee   :  { %11180 = vmatprep.subr.bf16.mxu0 %v14265_v53  ;;  %11187 = vmatprep.subr.bf16.mxu1 %v11843_v4 }
 0xea5   :  { %v8029_v59 = vpop.f32.mrb[88].mxu1 }
 0xea6   :  { %v10626_v52 = vpop.f32.mrb[89].mxu1 }
 0xeb3   :  { %v8168_v7 = vpop.f32.mrb[76].mxu0  ;;  %v8239_v3 = vpop.f32.mrb[90].mxu1 }
 0xeb4   :  { %v8169_v10 = vadd.f32 %v8168_v7, %v14390_v1  ;;  %v8170_v30 = vpop.f32.mrb[77].mxu0  ;;  %v10637_v61 = vpop.f32.mrb[91].mxu1 }
 0xeb5   :  { %v8171_v62 = vadd.f32 %v8170_v30, %v14393_v20  ;;  %v14737_v30 = vld [vmem:[%s14901_s21] ss:$0 sm:$0xff] }
 0xeb6   :  { %v9724_v47 = vmul.f32 -1.442695, %v8169_v10  ;;  %v8257_v61 = vadd.f32 %v14737_v30, %v8029_v59 }
 0xeb7   :  { %v9725_v56 = vmul.f32 -1.442695, %v8171_v62 }
 0xeb8   :  { %11719 = vpow2.f32 %v9724_v47 }
 0xeb9   :  { %11721 = vpow2.f32 %v9725_v56 }
 0xebb   :  { %v8331_v21 = vpop.f32.mrb[78].mxu0  ;;  %v8402_v6 = vpop.f32.mrb[92].mxu1 }
 0xebc   :  { %v8551_v2 = vrot.slane %v8331_v21, 2  ;;  %v8552_v60 = vrot.slane %v8331_v21, 3  ;;  %v8333_v25 = vpop.f32.mrb[79].mxu0  ;;  %v10648_v46 = vpop.f32.mrb[93].mxu1  ;;  %v8240_v21 = vadd.f32 %v8239_v3, %v14407_v36 }
 0xebd   :  { %v8570_v17 = vrot.slane %v8333_v25, 2  ;;  %v8571_v19 = vrot.slane %v8333_v25, 3 }
 0xebe   :  { %v8555_v22 = vadd.f32 %v8551_v2, %v14326_v31  ;;  %v8556_v9 = vadd.f32 %v8552_v60, %v14328_v18 }
 0xebf   :  { %v8574_v0 = vadd.f32 %v8570_v17, %v14331_v12  ;;  %v8575_v24 = vadd.f32 %v8571_v19, %v14334_v15  ;;  %v8588_v17 = vadd.f32 %v14670_v32, %v8402_v6  ;;  %v8605_v6 = vrot.slane %v14697_v16, 7 }
 0xec0   :  { %v9730_v26 = vmul.f32 -1.442695, %v8555_v22  ;;  %v9731_v13 = vmul.f32 -1.442695, %v8556_v9 }
 0xec1   :  { %v9732_v58 = vmul.f32 -1.442695, %v8574_v0  ;;  %v9733_v27 = vmul.f32 -1.442695, %v8575_v24  ;;  %v8590_v22 = vrot.slane %v8588_v17, 2  ;;  %v8591_v9 = vrot.slane %v8588_v17, 3 }
 0xec2   :  { %v11720_v35 = vpop.eup %11719  ;;  %11723 = vpow2.f32 %v9730_v26  ;;  %v8604_v24 = vrot.slane %v14695_v5, 7 }
 0xec3   :  { %v8248_v45 = vadd.f32 1.0, %v11720_v35  ;;  %11725 = vpow2.f32 %v9731_v13  ;;  %v11722_v29 = vpop.eup %11721 }
 0xec4   :  { %11727 = vpow2.f32 %v9732_v58  ;;  %v8254_v49 = vadd.f32 1.0, %v11722_v29 }
 0xec5   :  { %11729 = vrcp.f32 %v8248_v45 }
 0xec6   :  { %11731 = vpow2.f32 %v9733_v27 }
 0xec7   :  { %11733 = vrcp.f32 %v8254_v49 }
 0xecc   :  { %v11724_v14 = vpop.eup %11723 }
 0xecd   :  { %v11726_v52 = vpop.eup %11725  ;;  %v8563_v7 = vadd.f32 1.0, %v11724_v14 }
 0xece   :  { %v11728_v10 = vpop.eup %11727  ;;  %v8564_v62 = vadd.f32 1.0, %v11726_v52 }
 0xecf   :  { %v11730_v47 = vpop.eup %11729  ;;  %11735 = vrcp.f32 %v8563_v7  ;;  %v8582_v56 = vadd.f32 1.0, %v11728_v10 }
 0xed0   :  { %v8258_v2 = vmul.f32 %v11730_v47, %v8257_v61  ;;  %11737 = vrcp.f32 %v8564_v62  ;;  %v11732_v60 = vpop.eup %11731 }
 0xed1   :  { %11739 = vrcp.f32 %v8582_v56  ;;  %v8583_v46 = vadd.f32 1.0, %v11732_v60  ;;  %v11734_v19 = vpop.eup %11733 }
 0xed2   :  { %v8259_v25 = vadd.f32 %v8258_v2, %v8240_v21  ;;  %v8261_v45 = vsub.f32 1.0, %v11734_v19  ;;  %v8263_v52 = vmul.f32 %v11734_v19, %v14678_v57 }
 0xed4   :  { %11741 = vtanh.f32 %v8259_v25 }
 0xed5   :  { %11743 = vrcp.f32 %v8583_v46 }
 0xed9   :  { %v11736_v59 = vpop.eup %11735 }
 0xeda   :  { %v11738_v0 = vpop.eup %11737  ;;  %v8594_v26 = vmul.f32 %v11736_v59, %v8590_v22 }
 0xedb   :  { %v11740_v13 = vpop.eup %11739  ;;  %v8595_v3 = vmul.f32 %v11738_v0, %v8591_v9 }
 0xedc   :  { %v8596_v58 = vadd.f32 %v8594_v26, %v14345_v44  ;;  %v8608_v35 = vmul.f32 %v11740_v13, %v8604_v24  ;;  %v8600_v57 = vsub.f32 1.0, %v11740_v13 }
 0xedd   :  { %v8597_v27 = vadd.f32 %v8595_v3, %v14347_v23 }
 0xede   :  { %v11742_v29 = vpop.eup %11741  ;;  %11745 = vtanh.f32 %v8596_v58 }
 0xedf   :  { %v11744_v49 = vpop.eup %11743  ;;  %11747 = vtanh.f32 %v8597_v27  ;;  %v8262_v14 = vmul.f32 %v11742_v29, %v8261_v45 }
 0xee0   :  { %v8609_v7 = vmul.f32 %v11744_v49, %v8605_v6  ;;  %v8601_v10 = vsub.f32 1.0, %v11744_v49 }
 0xee1   :  { %v14747_v5 = vadd.f32 %v8263_v52, %v8262_v14 }
 0xee3   :  { %9728 = vmatmul.mubr.msk.f32.vlgmr.msra.gmra.mrb[80].mxu0 %vm3165_vm2, %v14747_v5  ;;  %10658 = vmatmul.mubr.msk.f32.vlgmr.msra.gmra.mrb[94].mxu1 %vm3165_vm2, %v14747_v5 }
 0xee4   :  { %11182 = vmatpush1.bf16.msra.mxu0 %v14284_v38  ;;  %11189 = vmatpush3.bf16.msra.mxu1 %v14286_v39 }
 0xee5   :  { %11184 = vmatprep.subr.bf16.mxu0 %v14293_v51  ;;  %11190 = vmatprep.subr.bf16.mxu1 %v11843_v4 }
 0xee6   :  { %8683 = vmatprep.mubr.f32.mxu0 %v11842_v50  ;;  %10668 = vmatprep.mubr.msk.f32.mxu1 %vm11845_vm14, %v11842_v50 }
 0xee8   :  { %v11746_v16 = vpop.eup %11745  ;;  %11186 = vmatpush1.bf16.msra.mxu0 %v14308_v33  ;;  %11192 = vmatpush3.bf16.msra.mxu1 %v14310_v8 }
 0xee9   :  { %v11748_v61 = vpop.eup %11747  ;;  %11194 = vmatprep.subr.bf16.mxu0 %v14124_v41  ;;  %11201 = vmatprep.subr.bf16.mxu1 %v11843_v4  ;;  %v8602_v62 = vmul.f32 %v11746_v16, %v8600_v57 }
 0xeea   :  { %v8603_v47 = vmul.f32 %v11748_v61, %v8601_v10 }
 0xeeb   :  { %v14764_v56 = vadd.f32 %v8608_v35, %v8602_v62 }
 0xeec   :  { %v14766_v21 = vadd.f32 %v8609_v7, %v8603_v47 }
 0xeed   :  { %v8614_v2 = vrot.slane %v14764_v56, 6 }
 0xeee   :  { %v8615_v60 = vrot.slane %v14766_v21, 5 }
 0xef0   :  { %v8616_v25 = vsel %vm3788_vm4, %v8615_v60, %v8614_v2 }
 0xef1   :  { %9734 = vmatmul.mubr.msk.f32.vlgmr.msra.gmra.mrb[80].mxu0 %vm3165_vm2, %v8616_v25  ;;  %10669 = vmatmul.mubr.msk.f32.vlgmr.msra.gmra.mrb[96].mxu1 %vm3165_vm2, %v8616_v25 }
 0xef2   :  { %11196 = vmatpush1.bf16.msra.mxu0 %v14150_v55  ;;  %11203 = vmatpush3.bf16.msra.mxu1 %v14177_v28 }
 0xef3   :  { %11198 = vmatprep.subr.bf16.mxu0 %v14153_v40  ;;  %11204 = vmatprep.subr.bf16.mxu1 %v11843_v4 }
 0xef4   :  { %8846 = vmatprep.mubr.f32.mxu0 %v11842_v50  ;;  %10679 = vmatprep.mubr.msk.f32.mxu1 %vm11845_vm14, %v11842_v50 }
 0xef6   :  { %11200 = vmatpush1.bf16.msra.mxu0 %v14173_v54  ;;  %11206 = vmatpush3.bf16.msra.mxu1 %v14191_v63 }
 0xef7   :  { %11208 = vmatprep.subr.bf16.mxu0 %v14212_v48  ;;  %11215 = vmatprep.subr.bf16.mxu1 %v11843_v4 }
 0xef9   :  { %9738 = vmatmul.mubr.msk.f32.vlgmr.msra.gmra.mrb[82].mxu0 %vm3165_vm2, %v8616_v25  ;;  %10680 = vmatmul.mubr.msk.f32.vlgmr.msra.gmra.mrb[98].mxu1 %vm3165_vm2, %v8616_v25 }
 0xefa   :  { %11210 = vmatpush1.bf16.msra.mxu0 %v14223_v43  ;;  %11217 = vmatpush3.bf16.msra.mxu1 %v14225_v37 }
 0xefb   :  { %11212 = vmatprep.subr.bf16.mxu0 %v14237_v34  ;;  %11218 = vmatprep.subr.bf16.mxu1 %v11843_v4 }
 0xefc   :  { %8990 = vmatprep.mubr.f32.mxu0 %v11842_v50  ;;  %10690 = vmatprep.mubr.msk.f32.mxu1 %vm11845_vm14, %v11842_v50 }
 0xefe   :  { %11214 = vmatpush1.bf16.msra.mxu0 %v14250_v11  ;;  %11220 = vmatpush3.bf16.msra.mxu1 %v14252_v42 }
 0xeff   :  { %11222 = vmatprep.subr.bf16.mxu0 %v14265_v53  ;;  %11229 = vmatprep.subr.bf16.mxu1 %v11843_v4 }
 0xfb6   :  { %v8546_v41 = vpop.f32.mrb[94].mxu1 }
 0xfb7   :  { %v10659_v55 = vpop.f32.mrb[95].mxu1 }
 0xfc4   :  { %v8685_v40 = vpop.f32.mrb[80].mxu0  ;;  %v8756_v54 = vpop.f32.mrb[96].mxu1 }
 0xfc5   :  { %v8686_v28 = vadd.f32 %v8685_v40, %v14390_v1  ;;  %v8687_v63 = vpop.f32.mrb[81].mxu0  ;;  %v10670_v48 = vpop.f32.mrb[97].mxu1  ;;  %v8757_v57 = vadd.f32 %v8756_v54, %v14407_v36  ;;  %v9121_v40 = vrot.slane %v14764_v56, 7 }
 0xfc6   :  { %v8688_v43 = vadd.f32 %v8687_v63, %v14393_v20 }
 0xfc7   :  { %v9736_v37 = vmul.f32 -1.442695, %v8686_v28 }
 0xfc8   :  { %v9737_v34 = vmul.f32 -1.442695, %v8688_v43 }
 0xfc9   :  { %11749 = vpow2.f32 %v9736_v37 }
 0xfca   :  { %11751 = vpow2.f32 %v9737_v34 }
 0xfcc   :  { %v8848_v11 = vpop.f32.mrb[82].mxu0  ;;  %v8919_v46 = vpop.f32.mrb[98].mxu1 }
 0xfcd   :  { %v9068_v42 = vrot.slane %v8848_v11, 1  ;;  %v9069_v17 = vrot.slane %v8848_v11, 2  ;;  %v8850_v53 = vpop.f32.mrb[83].mxu0  ;;  %v10681_v19 = vpop.f32.mrb[99].mxu1  ;;  %v9105_v47 = vadd.f32 %v14670_v32, %v8919_v46  ;;  %v9122_v32 = vrot.slane %v14766_v21, 7 }
 0xfce   :  { %v9087_v22 = vrot.slane %v8850_v53, 1  ;;  %v9088_v59 = vrot.slane %v8850_v53, 2 }
 0xfcf   :  { %v9072_v9 = vadd.f32 %v9068_v42, %v14326_v31  ;;  %v9073_v0 = vadd.f32 %v9069_v17, %v14328_v18  ;;  %v9107_v60 = vrot.slane %v9105_v47, 1 }
 0xfd0   :  { %v9091_v24 = vadd.f32 %v9087_v22, %v14331_v12  ;;  %v9092_v26 = vadd.f32 %v9088_v59, %v14334_v15  ;;  %v8774_v12 = vadd.f32 %v14737_v30, %v8546_v41  ;;  %v9108_v41 = vrot.slane %v9105_v47, 2 }
 0xfd1   :  { %v9742_v13 = vmul.f32 -1.442695, %v9072_v9  ;;  %v9743_v3 = vmul.f32 -1.442695, %v9073_v0 }
 0xfd2   :  { %v9744_v58 = vmul.f32 -1.442695, %v9091_v24  ;;  %v9745_v27 = vmul.f32 -1.442695, %v9092_v26  ;;  %v9302_v24 = vld [vmem:[%s14902_s22 + $0x10] sm:$0xff] }
 0xfd3   :  { %v11750_v35 = vpop.eup %11749  ;;  %11753 = vpow2.f32 %v9742_v13  ;;  %v9303_v13 = vld [vmem:[%s14902_s22 + $0x18] sm:$0xff] }
 0xfd4   :  { %v8765_v45 = vadd.f32 1.0, %v11750_v35  ;;  %11755 = vpow2.f32 %v9743_v3  ;;  %v11752_v29 = vpop.eup %11751  ;;  %v11239_v3 = vpack.c.bf16 %v9303_v13, %v9302_v24 }
 0xfd5   :  { %11757 = vpow2.f32 %v9744_v58  ;;  %v8771_v6 = vadd.f32 1.0, %v11752_v29 }
 0xfd6   :  { %11759 = vrcp.f32 %v8765_v45 }
 0xfd7   :  { %11761 = vpow2.f32 %v9745_v27 }
 0xfd8   :  { %11763 = vrcp.f32 %v8771_v6 }
 0xfdd   :  { %v11754_v31 = vpop.eup %11753 }
 0xfde   :  { %v11756_v49 = vpop.eup %11755  ;;  %v9080_v18 = vadd.f32 1.0, %v11754_v31 }
 0xfdf   :  { %v11758_v14 = vpop.eup %11757  ;;  %v9081_v15 = vadd.f32 1.0, %v11756_v49 }
 0xfe0   :  { %v11760_v52 = vpop.eup %11759  ;;  %11765 = vrcp.f32 %v9080_v18  ;;  %v9099_v7 = vadd.f32 1.0, %v11758_v14 }
 0xfe1   :  { %v8775_v16 = vmul.f32 %v11760_v52, %v8774_v12  ;;  %11767 = vrcp.f32 %v9081_v15  ;;  %v11762_v10 = vpop.eup %11761 }
 0xfe2   :  { %11769 = vrcp.f32 %v9099_v7  ;;  %v9100_v62 = vadd.f32 1.0, %v11762_v10  ;;  %v11764_v2 = vpop.eup %11763 }
 0xfe3   :  { %v8776_v61 = vadd.f32 %v8775_v16, %v8757_v57  ;;  %v8778_v37 = vsub.f32 1.0, %v11764_v2  ;;  %v8780_v17 = vmul.f32 %v11764_v2, %v14747_v5 }
 0xfe5   :  { %11771 = vtanh.f32 %v8776_v61 }
 0xfe6   :  { %11773 = vrcp.f32 %v9100_v62 }
 0xfea   :  { %v11766_v25 = vpop.eup %11765 }
 0xfeb   :  { %v11768_v55 = vpop.eup %11767  ;;  %v9111_v28 = vmul.f32 %v11766_v25, %v9107_v60 }
 0xfec   :  { %v11770_v63 = vpop.eup %11769  ;;  %v9112_v54 = vmul.f32 %v11768_v55, %v9108_v41 }
 0xfed   :  { %v9113_v48 = vadd.f32 %v9111_v28, %v14345_v44  ;;  %v9125_v43 = vmul.f32 %v11770_v63, %v9121_v40  ;;  %v9117_v44 = vsub.f32 1.0, %v11770_v63 }
 0xfee   :  { %v9114_v34 = vadd.f32 %v9112_v54, %v14347_v23 }
 0xfef   :  { %v11772_v11 = vpop.eup %11771  ;;  %11775 = vtanh.f32 %v9113_v48 }
 0xff0   :  { %v11774_v46 = vpop.eup %11773  ;;  %11777 = vtanh.f32 %v9114_v34  ;;  %v8779_v42 = vmul.f32 %v11772_v11, %v8778_v37 }
 0xff1   :  { %v9126_v53 = vmul.f32 %v11774_v46, %v9122_v32  ;;  %v9118_v5 = vsub.f32 1.0, %v11774_v46 }
 0xff2   :  { %v14811_v56 = vadd.f32 %v8780_v17, %v8779_v42 }
 0xff4   :  { %9740 = vmatmul.mubr.msk.f32.vlgmr.msra.gmra.mrb[84].mxu0 %vm3165_vm2, %v14811_v56  ;;  %10691 = vmatmul.mubr.msk.f32.vlgmr.msra.gmra.mrb[100].mxu1 %vm3165_vm2, %v14811_v56 }
 0xff5   :  { %11224 = vmatpush1.bf16.msra.mxu0 %v14284_v38  ;;  %11231 = vmatpush3.bf16.msra.mxu1 %v14286_v39 }
 0xff6   :  { %11226 = vmatprep.subr.bf16.mxu0 %v14293_v51  ;;  %11232 = vmatprep.subr.bf16.mxu1 %v11843_v4 }
 0xff7   :  { %9200 = vmatprep.mubr.f32.mxu0 %v11842_v50  ;;  %10701 = vmatprep.mubr.msk.f32.mxu1 %vm11845_vm14, %v11842_v50 }
 0xff9   :  { %v11776_v23 = vpop.eup %11775  ;;  %11228 = vmatpush1.bf16.msra.mxu0 %v14308_v33  ;;  %11234 = vmatpush3.bf16.msra.mxu1 %v14310_v8  ;;  %v9300_v33 = vld [vmem:[%s14902_s22] sm:$0xff]  ;;  %v9301_v8 = vld [vmem:[%s14902_s22 + $0x8] sm:$0xff]  ;;  %s11846_s22 = smov [#allocation4]  }
 0xffa   :  { %v11778_v21 = vpop.eup %11777  ;;  %v9119_v38 = vmul.f32 %v11776_v23, %v9117_v44  ;;  %11235 = vmatprep.subr.bf16.mxu0 %v11843_v4  ;;  %v11236_v26 = vpack.c.bf16 %v9301_v8, %v9300_v33  ;;  %s9410_s1 = sshll.u32 %s11846_s22, 4  ;;  %s9411_s1 = int_to_ptr.vmem [resolvable:$true] %s9410_s1 }
 0xffb   :  { %v9120_v39 = vmul.f32 %v11778_v21, %v9118_v5  ;;  %s11791_s6 = scalar_lea.vmem %s9411_s1, 64  ;;  %p11796_p1 = scmp.lt.s32.totalorder %s9411_s1, %s9411_s1 }
 0xffc   :  { %v9127_v51 = vadd.f32 %v9125_v43, %v9119_v38  ;;  %p11792_p0 = scmp.ne.s32.totalorder %s9411_s1, %s11791_s6  ;;  %p11797_p2 = scmp.lt.s32.totalorder %s11791_s6, %s11791_s6 }
 0xffd   :  { %v9128_v19 = vadd.f32 %v9126_v53, %v9120_v39 }
 0xffe   :  { %v9131_v22 = vrot.slane %v9127_v51, 7  ;;  %9389 = vst.msk [vmem:[#allocation4 - $0x7] sm:$0x80] %vm9388_vm15, %v9127_v51  ;;  %p11798_p3 = por %p11797_p2, %p11796_p1 }
 0xfff   :  { %v9132_v59 = vrot.slane %v9128_v19, 6  ;;  %v9385_v9 = vrot.slane %v9128_v19, 7 }
0x1000   :  { %p11799_p4 = pnand %p11798_p3, %p11792_p0 }
0x1001   :  { %v9133_v0 = vsel %vm3788_vm4, %v9132_v59, %v9131_v22  ;;  %9391 = vst.msk [vmem:[#allocation4 + $0x1] sm:$0x1] %vm9390_vm0, %v9385_v9 }
0x1002   :  { %9746 = vmatmul.mubr.msk.f32.vlgmr.msra.gmra.mrb[84].mxu0 %vm3165_vm2, %v9133_v0  ;;  %10702 = vmatmul.mubr.msk.f32.vlgmr.msra.gmra.mrb[102].mxu1 %vm3165_vm2, %v9133_v0 }
0x1003   :  { %10712 = vmatprep.mubr.msk.f32.mxu0 %vm11845_vm14, %v11842_v50  ;;  %11237 = vmatpush3.bf16.msra.mxu0 %v11236_v26 }
0x1004   :  { %11238 = vmatprep.subr.bf16.mxu0 %v11843_v4 }
0x1007   :  { %11240 = vmatpush3.bf16.msra.mxu0 %v11239_v3 }
0x10c7   :  { %v9063_v50 = vpop.f32.mrb[100].mxu1 }
0x10c8   :  { %v10692_v58 = vpop.f32.mrb[101].mxu1  ;;  %v9291_v52 = vadd.f32 %v14737_v30, %v9063_v50 }
0x10d5   :  { %v9202_v35 = vpop.f32.mrb[84].mxu0  ;;  %v9273_v45 = vpop.f32.mrb[102].mxu1 }
0x10d6   :  { %v9203_v27 = vadd.f32 %v9202_v35, %v14390_v1  ;;  %v9204_v29 = vpop.f32.mrb[85].mxu0  ;;  %v10703_v6 = vpop.f32.mrb[103].mxu1  ;;  %v9274_v57 = vadd.f32 %v9273_v45, %v14407_v36 }
0x10d7   :  { %v9205_v49 = vadd.f32 %v9204_v29, %v14393_v20 }
0x10d8   :  { %v9748_v31 = vmul.f32 -1.442695, %v9203_v27 }
0x10d9   :  { %v9749_v18 = vmul.f32 -1.442695, %v9205_v49 }
0x10da   :  { %11779 = vpow2.f32 %v9748_v31 }
0x10db   :  { %11781 = vpow2.f32 %v9749_v18 }
0x10e4   :  { %v11780_v14 = vpop.eup %11779 }
0x10e5   :  { %v9282_v12 = vadd.f32 1.0, %v11780_v14  ;;  %v11782_v15 = vpop.eup %11781 }
0x10e6   :  { %v9288_v4 = vadd.f32 1.0, %v11782_v15 }
0x10e7   :  { %11783 = vrcp.f32 %v9282_v12 }
0x10e8   :  { %11785 = vrcp.f32 %v9288_v4 }
0x10f1   :  { %v11784_v7 = vpop.eup %11783 }
0x10f2   :  { %v9292_v16 = vmul.f32 %v11784_v7, %v9291_v52  ;;  %v11786_v10 = vpop.eup %11785 }
0x10f3   :  { %v9295_v61 = vsub.f32 1.0, %v11786_v10  ;;  %v9297_v62 = vmul.f32 %v11786_v10, %v14811_v56 }
0x10f4   :  { %v9293_v1 = vadd.f32 %v9292_v16, %v9274_v57 }
0x10f6   :  { %11787 = vtanh.f32 %v9293_v1 }
0x1100   :  { %v11788_v20 = vpop.eup %11787 }
0x1101   :  { %v9296_v47 = vmul.f32 %v11788_v20, %v9295_v61 }
0x1103   :  { %v9298_v2 = vadd.f32 %v9297_v62, %v9296_v47 }
0x1105   :  { %v9299_v60 = vmax.f32 %v9298_v2, 0.0  ;;  %9394 = vst.msk [vmem:[#allocation4 + $0x2] sm:$0x3] %vm9393_vm1, %v9298_v2 }
0x1107   :  { %10713 = vmatmul.mubr.msk.f32.vlgmr.msra.gmra.mrb[86].mxu0 %vm3165_vm2, %v9299_v60 }
0x1108   :  { %11802 = shalt.err (!%p11799_p4)
}
0x1109   :  { %s11803_s5 = scalar_lea.hbm %s14905_s25, 64 }
0x110a   :  { %p11804_p5 = scmp.ne.s32.totalorder %s14905_s25, %s11803_s5  ;;  %p11807_p6 = scmp.lt.u32.totalorder %s11803_s5, %s14905_s25 }
0x110c   :  { %p11809_p7 = pnand %p11807_p6, %p11804_p5 }
0x110e   :  { %11812 = shalt.err (!%p11809_p7)
}
0x110f   :  { %s11847_s12 = smov 2   ;;  %v9750_v36 = vld [vmem:[%s14903_s23] ss:$0 sm:$0xff]  ;;  %s11848_s30 = smov [#allocation2]  }
0x1110   :  { %9416 = dma.vmem_to_hbm [thread:$0]  %s9411_s1, 64, %s14905_s25, [#allocation5], %s11841_s11, %s11841_s11, %s11847_s12  }
0x1111   :  { %s9401_s3 = sshll.u32 %s11848_s30, 4  ;;  %s9402_s3 = int_to_ptr.vmem [resolvable:$true] %s9401_s3 }
0x1112   :  { %s11813_s17 = scalar_lea.vmem %s9402_s3, 32  ;;  %p11818_p9 = scmp.lt.s32.totalorder %s9402_s3, %s9402_s3 }
0x1113   :  { %p11814_p8 = scmp.ne.s32.totalorder %s9402_s3, %s11813_s17  ;;  %p11819_p10 = scmp.lt.s32.totalorder %s11813_s17, %s11813_s17 }
0x1115   :  { %p11820_p11 = por %p11819_p10, %p11818_p9 }
0x1117   :  { %p11821_p12 = pnand %p11820_p11, %p11814_p8 }
0x11da   :  { %v9380_v30 = vpop.f32.mrb[86].mxu0 }
0x11db   :  { %v9381_v25 = vadd.f32 %v9750_v36, %v9380_v30  ;;  %v10714_v41 = vpop.f32.mrb[87].mxu0 }
0x11dd   :  { %9384 = vst [vmem:[#allocation2] sm:$0x3] %v9381_v25 }
0x11de   :  { %11824 = shalt.err (!%p11821_p12)
}
0x11df   :  { %s11825_s11 = scalar_lea.hbm %s14904_s24, 32 }
0x11e0   :  { %p11826_p13 = scmp.ne.s32.totalorder %s14904_s24, %s11825_s11  ;;  %p11829_p0 = scmp.lt.u32.totalorder %s11825_s11, %s14904_s24 }
0x11e2   :  { %p11831_p1 = pnand %p11829_p0, %p11826_p13 }
0x11e4   :  { %11834 = shalt.err (!%p11831_p1)
}
0x11e5   :  { %9404 = dma.vmem_to_hbm [thread:$0]  %s9402_s3, 32, %s14904_s24, [#allocation3]  }
0x11e6   :  { %11835 = dma.done.wait [#allocation3], 32  }
0x11e7   :  { %11836 = vsyncadd [#allocation3], 4294967264 }
0x11e8   :  { %11837 = dma.done.wait [#allocation5], 64  }
0x11e9   :  { %11838 = vsyncadd [#allocation5], 4294967232 }
0x11ea   :  { %9423 = vsyncpa [#allocation3], 1 }
0x11eb   :  { %9424 = vsyncpa [#allocation5], 1 }

</bundles_post_ra>
